<compile_context>
chip_gen: v7x
topology: tpu7x:2x2x1
jax: 0.10.0
libtpu: 0.0.40
codegen_flags: <defaults>
</compile_context>

<pallas_src>
import functools

import jax
import jax.numpy as jnp
from jax import lax
from jax.experimental import pallas as pl
from jax.experimental.pallas import tpu as pltpu

C_MID = 8          # hidden channels
KSIZE = 3          # 3x3 convolutions
BN_EPS = 1e-5


def _round_up(x, m):
    return ((x + m - 1) // m) * m


def _rollr(a, d):
    """result[r, c] = a[(r + d) % R, c]  (sublane roll, XLU)."""
    return pltpu.roll(a, shift=(-d) % a.shape[0], axis=0) if d else a


def _rollc(a, d):
    """result[r, c] = a[r, (c + d) % C]  (lane roll, XLU)."""
    return pltpu.roll(a, shift=(-d) % a.shape[1], axis=1) if d else a


def _band_mask(band_h, w_slab, H, W, fw, lp):
    """True at interior pixels of every lane-packed image inside one band."""
    r = lax.broadcasted_iota(jnp.int32, (band_h, w_slab), 0)
    c = lax.broadcasted_iota(jnp.int32, (band_h, w_slab), 1)
    cm = c % fw
    return (r >= 1) & (r <= H) & (cm >= 1) & (cm <= W) & (c < lp * fw)


def _conv1(xr, w_ref, co):
    """3x3 conv (channel co, no bias) from the 3 row-rolled slabs xr."""
    z = None
    for kh in range(KSIZE):
        for kw in range(KSIZE):
            t = _rollc(xr[kh], kw - 1) * w_ref[co * 9 + kh * KSIZE + kw]
            z = t if z is None else z + t
    return z


# ---------------- phase A: bias-free conv1 + per-channel partial BN stats ----
def _stats_kernel(x_ref, w1_ref, out_ref, *, H, W, fw, lp, band_h, tb):
    w_slab = x_ref.shape[1]
    mask = _band_mask(band_h, w_slab, H, W, fw, lp)
    sums = [None] * C_MID
    sqs = [None] * C_MID
    for b in range(tb):                               # per-band strip loop
        xp = x_ref[b * band_h:(b + 1) * band_h, :]
        xr = [_rollr(xp, kh - 1) for kh in range(KSIZE)]
        for co in range(C_MID):
            z = _conv1(xr, w1_ref, co)                # bias-free on purpose
            zm = jnp.where(mask, z, 0.0)
            s = jnp.sum(zm, axis=0, keepdims=True)
            q = jnp.sum(zm * zm, axis=0, keepdims=True)
            sums[co] = s if sums[co] is None else sums[co] + s
            sqs[co] = q if sqs[co] is None else sqs[co] + q
    out_ref[...] = jnp.concatenate(sums + sqs, axis=0)   # one (16, W_slab) store


# ---------------- phase B: folded conv1+BN -> ReLU -> fused conv2 ------------
def _apply_kernel(x_ref, w1f_ref, b1f_ref, w2_ref, b2_ref, out_ref,
                  *, H, W, fw, lp, band_h, tb):
    w_slab = x_ref.shape[1]
    mask = _band_mask(band_h, w_slab, H, W, fw, lp)
    for b in range(tb):                               # per-band strip loop
        xp = x_ref[b * band_h:(b + 1) * band_h, :]
        xr = [_rollr(xp, kh - 1) for kh in range(KSIZE)]
        acc = jnp.full((band_h, w_slab), b2_ref[0], jnp.float32)
        for co in range(C_MID):
            z = _conv1(xr, w1f_ref, co)               # BN scale folded into w
            y = jnp.maximum(z + b1f_ref[co], 0.0)     # BN shift folded into b
            y = jnp.where(mask, y, 0.0)               # zero padded frame
            yr = [_rollr(y, kh - 1) for kh in range(KSIZE)]
            for kh in range(KSIZE):
                for kw in range(KSIZE):
                    acc = acc + _rollc(yr[kh], kw - 1) * w2_ref[co * 9 + kh * KSIZE + kw]
        out_ref[b * band_h:(b + 1) * band_h, :] = acc  # aligned lane-dense store


# ---------------- wrapper -----------------------------------------------------
def denoise_forward(x, params):
    """x: (B, 1, H, W) float32 NCHW -> (B, 1, H, W) float32 NCHW."""
    w1, b1, gamma, beta, w2, b2 = params
    B, C, H, W = x.shape
    assert C == 1

    fw = W + 2                                        # per-image frame width
    lp = max(1, 128 // fw) if fw <= 128 else 1        # images per lane group
    w_slab = _round_up(lp * fw, 128)
    band_h = _round_up(H + 2, 8)                      # per-band (image) rows
    n_bands = -(-B // lp)

    # Bands per grid step: block of a few hundred rows, capped for trace size;
    # keep >= 2 grid steps when possible so both v7x TensorCores get work.
    tb = max(1, min(n_bands, max(1, 512 // band_h), 8))
    if n_bands >= 2:
        tb = min(tb, -(-n_bands // 2))
    n_bands_pad = _round_up(n_bands, tb)
    grid_n = n_bands_pad // tb
    rows_total = n_bands_pad * band_h
    b_pad = n_bands_pad * lp

    # Pack batch: lane-pack lp images per band, bands stacked along sublanes.
    img = x[:, 0]
    img = jnp.pad(img, ((0, b_pad - B), (1, band_h - H - 1), (1, 1)))
    img = img.reshape(n_bands_pad, lp, band_h, fw).transpose(0, 2, 1, 3)
    img = img.reshape(n_bands_pad, band_h, lp * fw)
    img = jnp.pad(img, ((0, 0), (0, 0), (0, w_slab - lp * fw)))
    slab = img.reshape(rows_total, w_slab)

    w1s = w1.reshape(C_MID, KSIZE * KSIZE).astype(jnp.float32)
    w2s = w2[0].reshape(C_MID * KSIZE * KSIZE).astype(jnp.float32)

    smem = pl.BlockSpec(memory_space=pltpu.MemorySpace.SMEM)
    cparams = pltpu.CompilerParams(dimension_semantics=("parallel",),
                                   vmem_limit_bytes=32 * 1024 * 1024)
    consts = dict(H=H, W=W, fw=fw, lp=lp, band_h=band_h, tb=tb)

    # Phase A: per-step partial column sums / sums-of-squares of bias-free conv1.
    stats = pl.pallas_call(
        functools.partial(_stats_kernel, **consts),
        out_shape=jax.ShapeDtypeStruct((grid_n, 2 * C_MID, w_slab), jnp.float32),
        grid=(grid_n,),
        in_specs=[pl.BlockSpec((tb * band_h, w_slab), lambda g: (g, 0)), smem],
        out_specs=pl.BlockSpec((None, 2 * C_MID, w_slab), lambda g: (g, 0, 0)),
        compiler_params=cparams,
    )(slab, w1s.reshape(-1))

    # Fold BatchNorm (training-mode biased batch stats) into per-channel affine,
    # then fold the affine scale/shift into conv1 weights/bias for phase B.
    n = float(B * H * W)
    tot = jnp.sum(stats, axis=(0, 2))                 # (16,)
    mean0 = tot[:C_MID] / n                           # mean of bias-free conv1
    var = jnp.maximum(tot[C_MID:] / n - mean0 * mean0, 0.0)
    mean = mean0 + b1
    scale = gamma * lax.rsqrt(var + BN_EPS)
    shift = beta - mean * scale
    w1f = (w1s * scale[:, None]).reshape(-1)          # (72,)
    b1f = b1 * scale + shift                          # (8,)

    # Phase B: recompute conv1 (folded), ReLU, fused conv2.
    out_slab = pl.pallas_call(
        functools.partial(_apply_kernel, **consts),
        out_shape=jax.ShapeDtypeStruct((rows_total, w_slab), jnp.float32),
        grid=(grid_n,),
        in_specs=[pl.BlockSpec((tb * band_h, w_slab), lambda g: (g, 0)),
                  smem, smem, smem, smem],
        out_specs=pl.BlockSpec((tb * band_h, w_slab), lambda g: (g, 0)),
        compiler_params=cparams,
    )(slab, w1f, b1f, w2s, b2)

    # Unpack: bands -> images, trim borders / padding.
    o = out_slab.reshape(n_bands_pad, band_h, w_slab)[:, 1:H + 1, :lp * fw]
    o = o.reshape(n_bands_pad, H, lp, fw)[..., 1:W + 1]
    o = o.transpose(0, 2, 1, 3).reshape(b_pad, H, W)[:B]
    return o[:, None, :, :]


# ---------------- pure-JAX reference (verification) --------------------------
def _reference_forward(x, params):
    w1, b1, gamma, beta, w2, b2 = params
    dn = ("NCHW", "OIHW", "NCHW")
    y = lax.conv_general_dilated(x, w1, (1, 1), "SAME", dimension_numbers=dn,
                                 precision=lax.Precision.HIGHEST)
    y = y + b1[None, :, None, None]
    m = y.mean(axis=(0, 2, 3), keepdims=True)
    var = ((y - m) ** 2).mean(axis=(0, 2, 3), keepdims=True)
    y = gamma[None, :, None, None] * (y - m) * lax.rsqrt(var + BN_EPS) \
        + beta[None, :, None, None]
    y = jnp.maximum(y, 0.0)
    z = lax.conv_general_dilated(y, w2, (1, 1), "SAME", dimension_numbers=dn,
                                 precision=lax.Precision.HIGHEST)
    return z + b2[None, :, None, None]


def init_params(key):
    k1, k2, k3, k4, k5, k6 = jax.random.split(key, 6)
    w1 = 0.1 * jax.random.normal(k1, (C_MID, 1, KSIZE, KSIZE), jnp.float32)
    b1 = 0.1 * jax.random.normal(k2, (C_MID,), jnp.float32)
    gamma = 1.0 + 0.1 * jax.random.normal(k3, (C_MID,), jnp.float32)
    beta = 0.1 * jax.random.normal(k4, (C_MID,), jnp.float32)
    w2 = 0.1 * jax.random.normal(k5, (1, C_MID, KSIZE, KSIZE), jnp.float32)
    b2 = 0.1 * jax.random.normal(k6, (1,), jnp.float32)
    return (w1, b1, gamma, beta, w2, b2)


if __name__ == "__main__":
    key = jax.random.PRNGKey(0)
    kx, kp = jax.random.split(key)

    x = jax.random.normal(kx, (2, 1, 16, 16), jnp.float32)    # NCHW
    params = init_params(kp)

    out = jax.jit(denoise_forward)(x, params)
    out = jax.block_until_ready(out)

    ref = _reference_forward(x, params)
    assert out.shape == (2, 1, 16, 16)
    assert jnp.max(jnp.abs(out - ref)) < 1e-4

    print("KERNEL_OK")
</pallas_src>

<mosaic_0001>
module attributes {stable_mosaic.version = 11 : i64} {
  func.func @_stats_kernel(%arg0: i32, %arg1: memref<24x128xf32, #tpu.memory_space<vmem>>, %arg2: memref<72xf32, #tpu.memory_space<smem>>, %arg3: memref<1x16x128xf32, #tpu.memory_space<vmem>>) attributes {dimension_semantics = [#tpu.dimension_semantics<parallel>], iteration_bounds = array<i64: 1>, scalar_prefetch = 0 : i64, scratch_operands = 0 : i64, tpu.core_type = #tpu.core_type<tc>, window_params = [{transform_indices = @transform_0, window_bounds = array<i64: 24, 128>}, {transform_indices = @transform_1, window_bounds = array<i64: 72>}, {transform_indices = @transform_2, window_bounds = array<i64: 1, 16, 128>}]} {
    %0 = tpu.iota {dimensions = array<i32: 0>} : vector<24x128xi32>
    %1 = tpu.iota {dimensions = array<i32: 1>} : vector<24x128xi32>
    %c18_i32 = arith.constant 18 : i32
    %c0_i32 = arith.constant 0 : i32
    %2 = arith.cmpi eq, %c18_i32, %c0_i32 : i32
    %c1_i32 = arith.constant 1 : i32
    %3 = arith.select %2, %c1_i32, %c18_i32 : i32
    %4 = vector.broadcast %3 : i32 to vector<24x128xi32>
    %5 = arith.remsi %1, %4 : vector<24x128xi32>
    %c0_i32_0 = arith.constant 0 : i32
    %6 = vector.broadcast %c0_i32_0 : i32 to vector<24x128xi32>
    %7 = arith.cmpi ne, %5, %6 : vector<24x128xi32>
    %c0_i32_1 = arith.constant 0 : i32
    %8 = vector.broadcast %c0_i32_1 : i32 to vector<24x128xi32>
    %9 = arith.cmpi slt, %5, %8 : vector<24x128xi32>
    %c0_i32_2 = arith.constant 0 : i32
    %10 = arith.cmpi slt, %3, %c0_i32_2 : i32
    %11 = vector.broadcast %10 : i1 to vector<24x128xi1>
    %12 = vector.broadcast %11 : vector<24x128xi1> to vector<24x128xi1>
    %13 = arith.xori %9, %12 : vector<24x128xi1>
    %14 = arith.andi %13, %7 : vector<24x128xi1>
    %15 = vector.broadcast %3 : i32 to vector<24x128xi32>
    %16 = arith.addi %5, %15 : vector<24x128xi32>
    %17 = arith.select %14, %16, %5 : vector<24x128xi1>, vector<24x128xi32>
    %c1_i32_3 = arith.constant 1 : i32
    %18 = vector.broadcast %c1_i32_3 : i32 to vector<24x128xi32>
    %19 = arith.cmpi sge, %0, %18 : vector<24x128xi32>
    %c16_i32 = arith.constant 16 : i32
    %20 = vector.broadcast %c16_i32 : i32 to vector<24x128xi32>
    %21 = arith.cmpi sle, %0, %20 : vector<24x128xi32>
    %22 = arith.andi %19, %21 : vector<24x128xi1>
    %c1_i32_4 = arith.constant 1 : i32
    %23 = vector.broadcast %c1_i32_4 : i32 to vector<24x128xi32>
    %24 = arith.cmpi sge, %17, %23 : vector<24x128xi32>
    %25 = arith.andi %22, %24 : vector<24x128xi1>
    %c16_i32_5 = arith.constant 16 : i32
    %26 = vector.broadcast %c16_i32_5 : i32 to vector<24x128xi32>
    %27 = arith.cmpi sle, %17, %26 : vector<24x128xi32>
    %28 = arith.andi %25, %27 : vector<24x128xi1>
    %c126_i32 = arith.constant 126 : i32
    %29 = vector.broadcast %c126_i32 : i32 to vector<24x128xi32>
    %30 = arith.cmpi slt, %1, %29 : vector<24x128xi32>
    %31 = arith.andi %28, %30 : vector<24x128xi1>
    %c0 = arith.constant 0 : index
    %c0_6 = arith.constant 0 : index
    %32 = vector.load %arg1[%c0, %c0_6] : memref<24x128xf32, #tpu.memory_space<vmem>>, vector<24x128xf32>
    %c1_i32_7 = arith.constant 1 : i32
    %33 = tpu.dynamic_rotate %32 by %c1_i32_7 dim 0 : vector<24x128xf32>, i32 -> vector<24x128xf32>
    %c23_i32 = arith.constant 23 : i32
    %34 = tpu.dynamic_rotate %32 by %c23_i32 dim 0 : vector<24x128xf32>, i32 -> vector<24x128xf32>
    %c1_i32_8 = arith.constant 1 : i32
    %35 = tpu.dynamic_rotate %33 by %c1_i32_8 dim 1 : vector<24x128xf32>, i32 -> vector<24x128xf32>
    %c0_9 = arith.constant 0 : index
    %36 = memref.load %arg2[%c0_9] : memref<72xf32, #tpu.memory_space<smem>>
    %37 = vector.broadcast %36 : f32 to vector<24x128xf32>
    %38 = arith.mulf %35, %37 : vector<24x128xf32>
    %c1 = arith.constant 1 : index
    %39 = memref.load %arg2[%c1] : memref<72xf32, #tpu.memory_space<smem>>
    %40 = vector.broadcast %39 : f32 to vector<24x128xf32>
    %41 = arith.mulf %33, %40 : vector<24x128xf32>
    %42 = arith.addf %38, %41 : vector<24x128xf32>
    %c127_i32 = arith.constant 127 : i32
    %43 = tpu.dynamic_rotate %33 by %c127_i32 dim 1 : vector<24x128xf32>, i32 -> vector<24x128xf32>
    %c2 = arith.constant 2 : index
    %44 = memref.load %arg2[%c2] : memref<72xf32, #tpu.memory_space<smem>>
    %45 = vector.broadcast %44 : f32 to vector<24x128xf32>
    %46 = arith.mulf %43, %45 : vector<24x128xf32>
    %47 = arith.addf %42, %46 : vector<24x128xf32>
    %c1_i32_10 = arith.constant 1 : i32
    %48 = tpu.dynamic_rotate %32 by %c1_i32_10 dim 1 : vector<24x128xf32>, i32 -> vector<24x128xf32>
    %c3 = arith.constant 3 : index
    %49 = memref.load %arg2[%c3] : memref<72xf32, #tpu.memory_space<smem>>
    %50 = vector.broadcast %49 : f32 to vector<24x128xf32>
    %51 = arith.mulf %48, %50 : vector<24x128xf32>
    %52 = arith.addf %47, %51 : vector<24x128xf32>
    %c4 = arith.constant 4 : index
    %53 = memref.load %arg2[%c4] : memref<72xf32, #tpu.memory_space<smem>>
    %54 = vector.broadcast %53 : f32 to vector<24x128xf32>
    %55 = arith.mulf %32, %54 : vector<24x128xf32>
    %56 = arith.addf %52, %55 : vector<24x128xf32>
    %c127_i32_11 = arith.constant 127 : i32
    %57 = tpu.dynamic_rotate %32 by %c127_i32_11 dim 1 : vector<24x128xf32>, i32 -> vector<24x128xf32>
    %c5 = arith.constant 5 : index
    %58 = memref.load %arg2[%c5] : memref<72xf32, #tpu.memory_space<smem>>
    %59 = vector.broadcast %58 : f32 to vector<24x128xf32>
    %60 = arith.mulf %57, %59 : vector<24x128xf32>
    %61 = arith.addf %56, %60 : vector<24x128xf32>
    %c1_i32_12 = arith.constant 1 : i32
    %62 = tpu.dynamic_rotate %34 by %c1_i32_12 dim 1 : vector<24x128xf32>, i32 -> vector<24x128xf32>
    %c6 = arith.constant 6 : index
    %63 = memref.load %arg2[%c6] : memref<72xf32, #tpu.memory_space<smem>>
    %64 = vector.broadcast %63 : f32 to vector<24x128xf32>
    %65 = arith.mulf %62, %64 : vector<24x128xf32>
    %66 = arith.addf %61, %65 : vector<24x128xf32>
    %c7 = arith.constant 7 : index
    %67 = memref.load %arg2[%c7] : memref<72xf32, #tpu.memory_space<smem>>
    %68 = vector.broadcast %67 : f32 to vector<24x128xf32>
    %69 = arith.mulf %34, %68 : vector<24x128xf32>
    %70 = arith.addf %66, %69 : vector<24x128xf32>
    %c127_i32_13 = arith.constant 127 : i32
    %71 = tpu.dynamic_rotate %34 by %c127_i32_13 dim 1 : vector<24x128xf32>, i32 -> vector<24x128xf32>
    %c8 = arith.constant 8 : index
    %72 = memref.load %arg2[%c8] : memref<72xf32, #tpu.memory_space<smem>>
    %73 = vector.broadcast %72 : f32 to vector<24x128xf32>
    %74 = arith.mulf %71, %73 : vector<24x128xf32>
    %75 = arith.addf %70, %74 : vector<24x128xf32>
    %cst = arith.constant 0.000000e+00 : f32
    %76 = vector.broadcast %cst : f32 to vector<24x128xf32>
    %77 = arith.select %31, %75, %76 : vector<24x128xi1>, vector<24x128xf32>
    %cst_14 = arith.constant dense<0.000000e+00> : vector<128xf32>
    %78 = vector.multi_reduction <add>, %77, %cst_14 [0] : vector<24x128xf32> to vector<128xf32>
    %79 = vector.shape_cast %78 : vector<128xf32> to vector<1x128xf32>
    %80 = arith.mulf %77, %77 : vector<24x128xf32>
    %cst_15 = arith.constant dense<0.000000e+00> : vector<128xf32>
    %81 = vector.multi_reduction <add>, %80, %cst_15 [0] : vector<24x128xf32> to vector<128xf32>
    %82 = vector.shape_cast %81 : vector<128xf32> to vector<1x128xf32>
    %c1_i32_16 = arith.constant 1 : i32
    %83 = tpu.dynamic_rotate %33 by %c1_i32_16 dim 1 : vector<24x128xf32>, i32 -> vector<24x128xf32>
    %c9 = arith.constant 9 : index
    %84 = memref.load %arg2[%c9] : memref<72xf32, #tpu.memory_space<smem>>
    %85 = vector.broadcast %84 : f32 to vector<24x128xf32>
    %86 = arith.mulf %83, %85 : vector<24x128xf32>
    %c10 = arith.constant 10 : index
    %87 = memref.load %arg2[%c10] : memref<72xf32, #tpu.memory_space<smem>>
    %88 = vector.broadcast %87 : f32 to vector<24x128xf32>
    %89 = arith.mulf %33, %88 : vector<24x128xf32>
    %90 = arith.addf %86, %89 : vector<24x128xf32>
    %c127_i32_17 = arith.constant 127 : i32
    %91 = tpu.dynamic_rotate %33 by %c127_i32_17 dim 1 : vector<24x128xf32>, i32 -> vector<24x128xf32>
    %c11 = arith.constant 11 : index
    %92 = memref.load %arg2[%c11] : memref<72xf32, #tpu.memory_space<smem>>
    %93 = vector.broadcast %92 : f32 to vector<24x128xf32>
    %94 = arith.mulf %91, %93 : vector<24x128xf32>
    %95 = arith.addf %90, %94 : vector<24x128xf32>
    %c1_i32_18 = arith.constant 1 : i32
    %96 = tpu.dynamic_rotate %32 by %c1_i32_18 dim 1 : vector<24x128xf32>, i32 -> vector<24x128xf32>
    %c12 = arith.constant 12 : index
    %97 = memref.load %arg2[%c12] : memref<72xf32, #tpu.memory_space<smem>>
    %98 = vector.broadcast %97 : f32 to vector<24x128xf32>
    %99 = arith.mulf %96, %98 : vector<24x128xf32>
    %100 = arith.addf %95, %99 : vector<24x128xf32>
    %c13 = arith.constant 13 : index
    %101 = memref.load %arg2[%c13] : memref<72xf32, #tpu.memory_space<smem>>
    %102 = vector.broadcast %101 : f32 to vector<24x128xf32>
    %103 = arith.mulf %32, %102 : vector<24x128xf32>
    %104 = arith.addf %100, %103 : vector<24x128xf32>
    %c127_i32_19 = arith.constant 127 : i32
    %105 = tpu.dynamic_rotate %32 by %c127_i32_19 dim 1 : vector<24x128xf32>, i32 -> vector<24x128xf32>
    %c14 = arith.constant 14 : index
    %106 = memref.load %arg2[%c14] : memref<72xf32, #tpu.memory_space<smem>>
    %107 = vector.broadcast %106 : f32 to vector<24x128xf32>
    %108 = arith.mulf %105, %107 : vector<24x128xf32>
    %109 = arith.addf %104, %108 : vector<24x128xf32>
    %c1_i32_20 = arith.constant 1 : i32
    %110 = tpu.dynamic_rotate %34 by %c1_i32_20 dim 1 : vector<24x128xf32>, i32 -> vector<24x128xf32>
    %c15 = arith.constant 15 : index
    %111 = memref.load %arg2[%c15] : memref<72xf32, #tpu.memory_space<smem>>
    %112 = vector.broadcast %111 : f32 to vector<24x128xf32>
    %113 = arith.mulf %110, %112 : vector<24x128xf32>
    %114 = arith.addf %109, %113 : vector<24x128xf32>
    %c16 = arith.constant 16 : index
    %115 = memref.load %arg2[%c16] : memref<72xf32, #tpu.memory_space<smem>>
    %116 = vector.broadcast %115 : f32 to vector<24x128xf32>
    %117 = arith.mulf %34, %116 : vector<24x128xf32>
    %118 = arith.addf %114, %117 : vector<24x128xf32>
    %c127_i32_21 = arith.constant 127 : i32
    %119 = tpu.dynamic_rotate %34 by %c127_i32_21 dim 1 : vector<24x128xf32>, i32 -> vector<24x128xf32>
    %c17 = arith.constant 17 : index
    %120 = memref.load %arg2[%c17] : memref<72xf32, #tpu.memory_space<smem>>
    %121 = vector.broadcast %120 : f32 to vector<24x128xf32>
    %122 = arith.mulf %119, %121 : vector<24x128xf32>
    %123 = arith.addf %118, %122 : vector<24x128xf32>
    %cst_22 = arith.constant 0.000000e+00 : f32
    %124 = vector.broadcast %cst_22 : f32 to vector<24x128xf32>
    %125 = arith.select %31, %123, %124 : vector<24x128xi1>, vector<24x128xf32>
    %cst_23 = arith.constant dense<0.000000e+00> : vector<128xf32>
    %126 = vector.multi_reduction <add>, %125, %cst_23 [0] : vector<24x128xf32> to vector<128xf32>
    %127 = vector.shape_cast %126 : vector<128xf32> to vector<1x128xf32>
    %128 = arith.mulf %125, %125 : vector<24x128xf32>
    %cst_24 = arith.constant dense<0.000000e+00> : vector<128xf32>
    %129 = vector.multi_reduction <add>, %128, %cst_24 [0] : vector<24x128xf32> to vector<128xf32>
    %130 = vector.shape_cast %129 : vector<128xf32> to vector<1x128xf32>
    %c1_i32_25 = arith.constant 1 : i32
    %131 = tpu.dynamic_rotate %33 by %c1_i32_25 dim 1 : vector<24x128xf32>, i32 -> vector<24x128xf32>
    %c18 = arith.constant 18 : index
    %132 = memref.load %arg2[%c18] : memref<72xf32, #tpu.memory_space<smem>>
    %133 = vector.broadcast %132 : f32 to vector<24x128xf32>
    %134 = arith.mulf %131, %133 : vector<24x128xf32>
    %c19 = arith.constant 19 : index
    %135 = memref.load %arg2[%c19] : memref<72xf32, #tpu.memory_space<smem>>
    %136 = vector.broadcast %135 : f32 to vector<24x128xf32>
    %137 = arith.mulf %33, %136 : vector<24x128xf32>
    %138 = arith.addf %134, %137 : vector<24x128xf32>
    %c127_i32_26 = arith.constant 127 : i32
    %139 = tpu.dynamic_rotate %33 by %c127_i32_26 dim 1 : vector<24x128xf32>, i32 -> vector<24x128xf32>
    %c20 = arith.constant 20 : index
    %140 = memref.load %arg2[%c20] : memref<72xf32, #tpu.memory_space<smem>>
    %141 = vector.broadcast %140 : f32 to vector<24x128xf32>
    %142 = arith.mulf %139, %141 : vector<24x128xf32>
    %143 = arith.addf %138, %142 : vector<24x128xf32>
    %c1_i32_27 = arith.constant 1 : i32
    %144 = tpu.dynamic_rotate %32 by %c1_i32_27 dim 1 : vector<24x128xf32>, i32 -> vector<24x128xf32>
    %c21 = arith.constant 21 : index
    %145 = memref.load %arg2[%c21] : memref<72xf32, #tpu.memory_space<smem>>
    %146 = vector.broadcast %145 : f32 to vector<24x128xf32>
    %147 = arith.mulf %144, %146 : vector<24x128xf32>
    %148 = arith.addf %143, %147 : vector<24x128xf32>
    %c22 = arith.constant 22 : index
    %149 = memref.load %arg2[%c22] : memref<72xf32, #tpu.memory_space<smem>>
    %150 = vector.broadcast %149 : f32 to vector<24x128xf32>
    %151 = arith.mulf %32, %150 : vector<24x128xf32>
    %152 = arith.addf %148, %151 : vector<24x128xf32>
    %c127_i32_28 = arith.constant 127 : i32
    %153 = tpu.dynamic_rotate %32 by %c127_i32_28 dim 1 : vector<24x128xf32>, i32 -> vector<24x128xf32>
    %c23 = arith.constant 23 : index
    %154 = memref.load %arg2[%c23] : memref<72xf32, #tpu.memory_space<smem>>
    %155 = vector.broadcast %154 : f32 to vector<24x128xf32>
    %156 = arith.mulf %153, %155 : vector<24x128xf32>
    %157 = arith.addf %152, %156 : vector<24x128xf32>
    %c1_i32_29 = arith.constant 1 : i32
    %158 = tpu.dynamic_rotate %34 by %c1_i32_29 dim 1 : vector<24x128xf32>, i32 -> vector<24x128xf32>
    %c24 = arith.constant 24 : index
    %159 = memref.load %arg2[%c24] : memref<72xf32, #tpu.memory_space<smem>>
    %160 = vector.broadcast %159 : f32 to vector<24x128xf32>
    %161 = arith.mulf %158, %160 : vector<24x128xf32>
    %162 = arith.addf %157, %161 : vector<24x128xf32>
    %c25 = arith.constant 25 : index
    %163 = memref.load %arg2[%c25] : memref<72xf32, #tpu.memory_space<smem>>
    %164 = vector.broadcast %163 : f32 to vector<24x128xf32>
    %165 = arith.mulf %34, %164 : vector<24x128xf32>
    %166 = arith.addf %162, %165 : vector<24x128xf32>
    %c127_i32_30 = arith.constant 127 : i32
    %167 = tpu.dynamic_rotate %34 by %c127_i32_30 dim 1 : vector<24x128xf32>, i32 -> vector<24x128xf32>
    %c26 = arith.constant 26 : index
    %168 = memref.load %arg2[%c26] : memref<72xf32, #tpu.memory_space<smem>>
    %169 = vector.broadcast %168 : f32 to vector<24x128xf32>
    %170 = arith.mulf %167, %169 : vector<24x128xf32>
    %171 = arith.addf %166, %170 : vector<24x128xf32>
    %cst_31 = arith.constant 0.000000e+00 : f32
    %172 = vector.broadcast %cst_31 : f32 to vector<24x128xf32>
    %173 = arith.select %31, %171, %172 : vector<24x128xi1>, vector<24x128xf32>
    %cst_32 = arith.constant dense<0.000000e+00> : vector<128xf32>
    %174 = vector.multi_reduction <add>, %173, %cst_32 [0] : vector<24x128xf32> to vector<128xf32>
    %175 = vector.shape_cast %174 : vector<128xf32> to vector<1x128xf32>
    %176 = arith.mulf %173, %173 : vector<24x128xf32>
    %cst_33 = arith.constant dense<0.000000e+00> : vector<128xf32>
    %177 = vector.multi_reduction <add>, %176, %cst_33 [0] : vector<24x128xf32> to vector<128xf32>
    %178 = vector.shape_cast %177 : vector<128xf32> to vector<1x128xf32>
    %c1_i32_34 = arith.constant 1 : i32
    %179 = tpu.dynamic_rotate %33 by %c1_i32_34 dim 1 : vector<24x128xf32>, i32 -> vector<24x128xf32>
    %c27 = arith.constant 27 : index
    %180 = memref.load %arg2[%c27] : memref<72xf32, #tpu.memory_space<smem>>
    %181 = vector.broadcast %180 : f32 to vector<24x128xf32>
    %182 = arith.mulf %179, %181 : vector<24x128xf32>
    %c28 = arith.constant 28 : index
    %183 = memref.load %arg2[%c28] : memref<72xf32, #tpu.memory_space<smem>>
    %184 = vector.broadcast %183 : f32 to vector<24x128xf32>
    %185 = arith.mulf %33, %184 : vector<24x128xf32>
    %186 = arith.addf %182, %185 : vector<24x128xf32>
    %c127_i32_35 = arith.constant 127 : i32
    %187 = tpu.dynamic_rotate %33 by %c127_i32_35 dim 1 : vector<24x128xf32>, i32 -> vector<24x128xf32>
    %c29 = arith.constant 29 : index
    %188 = memref.load %arg2[%c29] : memref<72xf32, #tpu.memory_space<smem>>
    %189 = vector.broadcast %188 : f32 to vector<24x128xf32>
    %190 = arith.mulf %187, %189 : vector<24x128xf32>
    %191 = arith.addf %186, %190 : vector<24x128xf32>
    %c1_i32_36 = arith.constant 1 : i32
    %192 = tpu.dynamic_rotate %32 by %c1_i32_36 dim 1 : vector<24x128xf32>, i32 -> vector<24x128xf32>
    %c30 = arith.constant 30 : index
    %193 = memref.load %arg2[%c30] : memref<72xf32, #tpu.memory_space<smem>>
    %194 = vector.broadcast %193 : f32 to vector<24x128xf32>
    %195 = arith.mulf %192, %194 : vector<24x128xf32>
    %196 = arith.addf %191, %195 : vector<24x128xf32>
    %c31 = arith.constant 31 : index
    %197 = memref.load %arg2[%c31] : memref<72xf32, #tpu.memory_space<smem>>
    %198 = vector.broadcast %197 : f32 to vector<24x128xf32>
    %199 = arith.mulf %32, %198 : vector<24x128xf32>
    %200 = arith.addf %196, %199 : vector<24x128xf32>
    %c127_i32_37 = arith.constant 127 : i32
    %201 = tpu.dynamic_rotate %32 by %c127_i32_37 dim 1 : vector<24x128xf32>, i32 -> vector<24x128xf32>
    %c32 = arith.constant 32 : index
    %202 = memref.load %arg2[%c32] : memref<72xf32, #tpu.memory_space<smem>>
    %203 = vector.broadcast %202 : f32 to vector<24x128xf32>
    %204 = arith.mulf %201, %203 : vector<24x128xf32>
    %205 = arith.addf %200, %204 : vector<24x128xf32>
    %c1_i32_38 = arith.constant 1 : i32
    %206 = tpu.dynamic_rotate %34 by %c1_i32_38 dim 1 : vector<24x128xf32>, i32 -> vector<24x128xf32>
    %c33 = arith.constant 33 : index
    %207 = memref.load %arg2[%c33] : memref<72xf32, #tpu.memory_space<smem>>
    %208 = vector.broadcast %207 : f32 to vector<24x128xf32>
    %209 = arith.mulf %206, %208 : vector<24x128xf32>
    %210 = arith.addf %205, %209 : vector<24x128xf32>
    %c34 = arith.constant 34 : index
    %211 = memref.load %arg2[%c34] : memref<72xf32, #tpu.memory_space<smem>>
    %212 = vector.broadcast %211 : f32 to vector<24x128xf32>
    %213 = arith.mulf %34, %212 : vector<24x128xf32>
    %214 = arith.addf %210, %213 : vector<24x128xf32>
    %c127_i32_39 = arith.constant 127 : i32
    %215 = tpu.dynamic_rotate %34 by %c127_i32_39 dim 1 : vector<24x128xf32>, i32 -> vector<24x128xf32>
    %c35 = arith.constant 35 : index
    %216 = memref.load %arg2[%c35] : memref<72xf32, #tpu.memory_space<smem>>
    %217 = vector.broadcast %216 : f32 to vector<24x128xf32>
    %218 = arith.mulf %215, %217 : vector<24x128xf32>
    %219 = arith.addf %214, %218 : vector<24x128xf32>
    %cst_40 = arith.constant 0.000000e+00 : f32
    %220 = vector.broadcast %cst_40 : f32 to vector<24x128xf32>
    %221 = arith.select %31, %219, %220 : vector<24x128xi1>, vector<24x128xf32>
    %cst_41 = arith.constant dense<0.000000e+00> : vector<128xf32>
    %222 = vector.multi_reduction <add>, %221, %cst_41 [0] : vector<24x128xf32> to vector<128xf32>
    %223 = vector.shape_cast %222 : vector<128xf32> to vector<1x128xf32>
    %224 = arith.mulf %221, %221 : vector<24x128xf32>
    %cst_42 = arith.constant dense<0.000000e+00> : vector<128xf32>
    %225 = vector.multi_reduction <add>, %224, %cst_42 [0] : vector<24x128xf32> to vector<128xf32>
    %226 = vector.shape_cast %225 : vector<128xf32> to vector<1x128xf32>
    %c1_i32_43 = arith.constant 1 : i32
    %227 = tpu.dynamic_rotate %33 by %c1_i32_43 dim 1 : vector<24x128xf32>, i32 -> vector<24x128xf32>
    %c36 = arith.constant 36 : index
    %228 = memref.load %arg2[%c36] : memref<72xf32, #tpu.memory_space<smem>>
    %229 = vector.broadcast %228 : f32 to vector<24x128xf32>
    %230 = arith.mulf %227, %229 : vector<24x128xf32>
    %c37 = arith.constant 37 : index
    %231 = memref.load %arg2[%c37] : memref<72xf32, #tpu.memory_space<smem>>
    %232 = vector.broadcast %231 : f32 to vector<24x128xf32>
    %233 = arith.mulf %33, %232 : vector<24x128xf32>
    %234 = arith.addf %230, %233 : vector<24x128xf32>
    %c127_i32_44 = arith.constant 127 : i32
    %235 = tpu.dynamic_rotate %33 by %c127_i32_44 dim 1 : vector<24x128xf32>, i32 -> vector<24x128xf32>
    %c38 = arith.constant 38 : index
    %236 = memref.load %arg2[%c38] : memref<72xf32, #tpu.memory_space<smem>>
    %237 = vector.broadcast %236 : f32 to vector<24x128xf32>
    %238 = arith.mulf %235, %237 : vector<24x128xf32>
    %239 = arith.addf %234, %238 : vector<24x128xf32>
    %c1_i32_45 = arith.constant 1 : i32
    %240 = tpu.dynamic_rotate %32 by %c1_i32_45 dim 1 : vector<24x128xf32>, i32 -> vector<24x128xf32>
    %c39 = arith.constant 39 : index
    %241 = memref.load %arg2[%c39] : memref<72xf32, #tpu.memory_space<smem>>
    %242 = vector.broadcast %241 : f32 to vector<24x128xf32>
    %243 = arith.mulf %240, %242 : vector<24x128xf32>
    %244 = arith.addf %239, %243 : vector<24x128xf32>
    %c40 = arith.constant 40 : index
    %245 = memref.load %arg2[%c40] : memref<72xf32, #tpu.memory_space<smem>>
    %246 = vector.broadcast %245 : f32 to vector<24x128xf32>
    %247 = arith.mulf %32, %246 : vector<24x128xf32>
    %248 = arith.addf %244, %247 : vector<24x128xf32>
    %c127_i32_46 = arith.constant 127 : i32
    %249 = tpu.dynamic_rotate %32 by %c127_i32_46 dim 1 : vector<24x128xf32>, i32 -> vector<24x128xf32>
    %c41 = arith.constant 41 : index
    %250 = memref.load %arg2[%c41] : memref<72xf32, #tpu.memory_space<smem>>
    %251 = vector.broadcast %250 : f32 to vector<24x128xf32>
    %252 = arith.mulf %249, %251 : vector<24x128xf32>
    %253 = arith.addf %248, %252 : vector<24x128xf32>
    %c1_i32_47 = arith.constant 1 : i32
    %254 = tpu.dynamic_rotate %34 by %c1_i32_47 dim 1 : vector<24x128xf32>, i32 -> vector<24x128xf32>
    %c42 = arith.constant 42 : index
    %255 = memref.load %arg2[%c42] : memref<72xf32, #tpu.memory_space<smem>>
    %256 = vector.broadcast %255 : f32 to vector<24x128xf32>
    %257 = arith.mulf %254, %256 : vector<24x128xf32>
    %258 = arith.addf %253, %257 : vector<24x128xf32>
    %c43 = arith.constant 43 : index
    %259 = memref.load %arg2[%c43] : memref<72xf32, #tpu.memory_space<smem>>
    %260 = vector.broadcast %259 : f32 to vector<24x128xf32>
    %261 = arith.mulf %34, %260 : vector<24x128xf32>
    %262 = arith.addf %258, %261 : vector<24x128xf32>
    %c127_i32_48 = arith.constant 127 : i32
    %263 = tpu.dynamic_rotate %34 by %c127_i32_48 dim 1 : vector<24x128xf32>, i32 -> vector<24x128xf32>
    %c44 = arith.constant 44 : index
    %264 = memref.load %arg2[%c44] : memref<72xf32, #tpu.memory_space<smem>>
    %265 = vector.broadcast %264 : f32 to vector<24x128xf32>
    %266 = arith.mulf %263, %265 : vector<24x128xf32>
    %267 = arith.addf %262, %266 : vector<24x128xf32>
    %cst_49 = arith.constant 0.000000e+00 : f32
    %268 = vector.broadcast %cst_49 : f32 to vector<24x128xf32>
    %269 = arith.select %31, %267, %268 : vector<24x128xi1>, vector<24x128xf32>
    %cst_50 = arith.constant dense<0.000000e+00> : vector<128xf32>
    %270 = vector.multi_reduction <add>, %269, %cst_50 [0] : vector<24x128xf32> to vector<128xf32>
    %271 = vector.shape_cast %270 : vector<128xf32> to vector<1x128xf32>
    %272 = arith.mulf %269, %269 : vector<24x128xf32>
    %cst_51 = arith.constant dense<0.000000e+00> : vector<128xf32>
    %273 = vector.multi_reduction <add>, %272, %cst_51 [0] : vector<24x128xf32> to vector<128xf32>
    %274 = vector.shape_cast %273 : vector<128xf32> to vector<1x128xf32>
    %c1_i32_52 = arith.constant 1 : i32
    %275 = tpu.dynamic_rotate %33 by %c1_i32_52 dim 1 : vector<24x128xf32>, i32 -> vector<24x128xf32>
    %c45 = arith.constant 45 : index
    %276 = memref.load %arg2[%c45] : memref<72xf32, #tpu.memory_space<smem>>
    %277 = vector.broadcast %276 : f32 to vector<24x128xf32>
    %278 = arith.mulf %275, %277 : vector<24x128xf32>
    %c46 = arith.constant 46 : index
    %279 = memref.load %arg2[%c46] : memref<72xf32, #tpu.memory_space<smem>>
    %280 = vector.broadcast %279 : f32 to vector<24x128xf32>
    %281 = arith.mulf %33, %280 : vector<24x128xf32>
    %282 = arith.addf %278, %281 : vector<24x128xf32>
    %c127_i32_53 = arith.constant 127 : i32
    %283 = tpu.dynamic_rotate %33 by %c127_i32_53 dim 1 : vector<24x128xf32>, i32 -> vector<24x128xf32>
    %c47 = arith.constant 47 : index
    %284 = memref.load %arg2[%c47] : memref<72xf32, #tpu.memory_space<smem>>
    %285 = vector.broadcast %284 : f32 to vector<24x128xf32>
    %286 = arith.mulf %283, %285 : vector<24x128xf32>
    %287 = arith.addf %282, %286 : vector<24x128xf32>
    %c1_i32_54 = arith.constant 1 : i32
    %288 = tpu.dynamic_rotate %32 by %c1_i32_54 dim 1 : vector<24x128xf32>, i32 -> vector<24x128xf32>
    %c48 = arith.constant 48 : index
    %289 = memref.load %arg2[%c48] : memref<72xf32, #tpu.memory_space<smem>>
    %290 = vector.broadcast %289 : f32 to vector<24x128xf32>
    %291 = arith.mulf %288, %290 : vector<24x128xf32>
    %292 = arith.addf %287, %291 : vector<24x128xf32>
    %c49 = arith.constant 49 : index
    %293 = memref.load %arg2[%c49] : memref<72xf32, #tpu.memory_space<smem>>
    %294 = vector.broadcast %293 : f32 to vector<24x128xf32>
    %295 = arith.mulf %32, %294 : vector<24x128xf32>
    %296 = arith.addf %292, %295 : vector<24x128xf32>
    %c127_i32_55 = arith.constant 127 : i32
    %297 = tpu.dynamic_rotate %32 by %c127_i32_55 dim 1 : vector<24x128xf32>, i32 -> vector<24x128xf32>
    %c50 = arith.constant 50 : index
    %298 = memref.load %arg2[%c50] : memref<72xf32, #tpu.memory_space<smem>>
    %299 = vector.broadcast %298 : f32 to vector<24x128xf32>
    %300 = arith.mulf %297, %299 : vector<24x128xf32>
    %301 = arith.addf %296, %300 : vector<24x128xf32>
    %c1_i32_56 = arith.constant 1 : i32
    %302 = tpu.dynamic_rotate %34 by %c1_i32_56 dim 1 : vector<24x128xf32>, i32 -> vector<24x128xf32>
    %c51 = arith.constant 51 : index
    %303 = memref.load %arg2[%c51] : memref<72xf32, #tpu.memory_space<smem>>
    %304 = vector.broadcast %303 : f32 to vector<24x128xf32>
    %305 = arith.mulf %302, %304 : vector<24x128xf32>
    %306 = arith.addf %301, %305 : vector<24x128xf32>
    %c52 = arith.constant 52 : index
    %307 = memref.load %arg2[%c52] : memref<72xf32, #tpu.memory_space<smem>>
    %308 = vector.broadcast %307 : f32 to vector<24x128xf32>
    %309 = arith.mulf %34, %308 : vector<24x128xf32>
    %310 = arith.addf %306, %309 : vector<24x128xf32>
    %c127_i32_57 = arith.constant 127 : i32
    %311 = tpu.dynamic_rotate %34 by %c127_i32_57 dim 1 : vector<24x128xf32>, i32 -> vector<24x128xf32>
    %c53 = arith.constant 53 : index
    %312 = memref.load %arg2[%c53] : memref<72xf32, #tpu.memory_space<smem>>
    %313 = vector.broadcast %312 : f32 to vector<24x128xf32>
    %314 = arith.mulf %311, %313 : vector<24x128xf32>
    %315 = arith.addf %310, %314 : vector<24x128xf32>
    %cst_58 = arith.constant 0.000000e+00 : f32
    %316 = vector.broadcast %cst_58 : f32 to vector<24x128xf32>
    %317 = arith.select %31, %315, %316 : vector<24x128xi1>, vector<24x128xf32>
    %cst_59 = arith.constant dense<0.000000e+00> : vector<128xf32>
    %318 = vector.multi_reduction <add>, %317, %cst_59 [0] : vector<24x128xf32> to vector<128xf32>
    %319 = vector.shape_cast %318 : vector<128xf32> to vector<1x128xf32>
    %320 = arith.mulf %317, %317 : vector<24x128xf32>
    %cst_60 = arith.constant dense<0.000000e+00> : vector<128xf32>
    %321 = vector.multi_reduction <add>, %320, %cst_60 [0] : vector<24x128xf32> to vector<128xf32>
    %322 = vector.shape_cast %321 : vector<128xf32> to vector<1x128xf32>
    %c1_i32_61 = arith.constant 1 : i32
    %323 = tpu.dynamic_rotate %33 by %c1_i32_61 dim 1 : vector<24x128xf32>, i32 -> vector<24x128xf32>
    %c54 = arith.constant 54 : index
    %324 = memref.load %arg2[%c54] : memref<72xf32, #tpu.memory_space<smem>>
    %325 = vector.broadcast %324 : f32 to vector<24x128xf32>
    %326 = arith.mulf %323, %325 : vector<24x128xf32>
    %c55 = arith.constant 55 : index
    %327 = memref.load %arg2[%c55] : memref<72xf32, #tpu.memory_space<smem>>
    %328 = vector.broadcast %327 : f32 to vector<24x128xf32>
    %329 = arith.mulf %33, %328 : vector<24x128xf32>
    %330 = arith.addf %326, %329 : vector<24x128xf32>
    %c127_i32_62 = arith.constant 127 : i32
    %331 = tpu.dynamic_rotate %33 by %c127_i32_62 dim 1 : vector<24x128xf32>, i32 -> vector<24x128xf32>
    %c56 = arith.constant 56 : index
    %332 = memref.load %arg2[%c56] : memref<72xf32, #tpu.memory_space<smem>>
    %333 = vector.broadcast %332 : f32 to vector<24x128xf32>
    %334 = arith.mulf %331, %333 : vector<24x128xf32>
    %335 = arith.addf %330, %334 : vector<24x128xf32>
    %c1_i32_63 = arith.constant 1 : i32
    %336 = tpu.dynamic_rotate %32 by %c1_i32_63 dim 1 : vector<24x128xf32>, i32 -> vector<24x128xf32>
    %c57 = arith.constant 57 : index
    %337 = memref.load %arg2[%c57] : memref<72xf32, #tpu.memory_space<smem>>
    %338 = vector.broadcast %337 : f32 to vector<24x128xf32>
    %339 = arith.mulf %336, %338 : vector<24x128xf32>
    %340 = arith.addf %335, %339 : vector<24x128xf32>
    %c58 = arith.constant 58 : index
    %341 = memref.load %arg2[%c58] : memref<72xf32, #tpu.memory_space<smem>>
    %342 = vector.broadcast %341 : f32 to vector<24x128xf32>
    %343 = arith.mulf %32, %342 : vector<24x128xf32>
    %344 = arith.addf %340, %343 : vector<24x128xf32>
    %c127_i32_64 = arith.constant 127 : i32
    %345 = tpu.dynamic_rotate %32 by %c127_i32_64 dim 1 : vector<24x128xf32>, i32 -> vector<24x128xf32>
    %c59 = arith.constant 59 : index
    %346 = memref.load %arg2[%c59] : memref<72xf32, #tpu.memory_space<smem>>
    %347 = vector.broadcast %346 : f32 to vector<24x128xf32>
    %348 = arith.mulf %345, %347 : vector<24x128xf32>
    %349 = arith.addf %344, %348 : vector<24x128xf32>
    %c1_i32_65 = arith.constant 1 : i32
    %350 = tpu.dynamic_rotate %34 by %c1_i32_65 dim 1 : vector<24x128xf32>, i32 -> vector<24x128xf32>
    %c60 = arith.constant 60 : index
    %351 = memref.load %arg2[%c60] : memref<72xf32, #tpu.memory_space<smem>>
    %352 = vector.broadcast %351 : f32 to vector<24x128xf32>
    %353 = arith.mulf %350, %352 : vector<24x128xf32>
    %354 = arith.addf %349, %353 : vector<24x128xf32>
    %c61 = arith.constant 61 : index
    %355 = memref.load %arg2[%c61] : memref<72xf32, #tpu.memory_space<smem>>
    %356 = vector.broadcast %355 : f32 to vector<24x128xf32>
    %357 = arith.mulf %34, %356 : vector<24x128xf32>
    %358 = arith.addf %354, %357 : vector<24x128xf32>
    %c127_i32_66 = arith.constant 127 : i32
    %359 = tpu.dynamic_rotate %34 by %c127_i32_66 dim 1 : vector<24x128xf32>, i32 -> vector<24x128xf32>
    %c62 = arith.constant 62 : index
    %360 = memref.load %arg2[%c62] : memref<72xf32, #tpu.memory_space<smem>>
    %361 = vector.broadcast %360 : f32 to vector<24x128xf32>
    %362 = arith.mulf %359, %361 : vector<24x128xf32>
    %363 = arith.addf %358, %362 : vector<24x128xf32>
    %cst_67 = arith.constant 0.000000e+00 : f32
    %364 = vector.broadcast %cst_67 : f32 to vector<24x128xf32>
    %365 = arith.select %31, %363, %364 : vector<24x128xi1>, vector<24x128xf32>
    %cst_68 = arith.constant dense<0.000000e+00> : vector<128xf32>
    %366 = vector.multi_reduction <add>, %365, %cst_68 [0] : vector<24x128xf32> to vector<128xf32>
    %367 = vector.shape_cast %366 : vector<128xf32> to vector<1x128xf32>
    %368 = arith.mulf %365, %365 : vector<24x128xf32>
    %cst_69 = arith.constant dense<0.000000e+00> : vector<128xf32>
    %369 = vector.multi_reduction <add>, %368, %cst_69 [0] : vector<24x128xf32> to vector<128xf32>
    %370 = vector.shape_cast %369 : vector<128xf32> to vector<1x128xf32>
    %c1_i32_70 = arith.constant 1 : i32
    %371 = tpu.dynamic_rotate %33 by %c1_i32_70 dim 1 : vector<24x128xf32>, i32 -> vector<24x128xf32>
    %c63 = arith.constant 63 : index
    %372 = memref.load %arg2[%c63] : memref<72xf32, #tpu.memory_space<smem>>
    %373 = vector.broadcast %372 : f32 to vector<24x128xf32>
    %374 = arith.mulf %371, %373 : vector<24x128xf32>
    %c64 = arith.constant 64 : index
    %375 = memref.load %arg2[%c64] : memref<72xf32, #tpu.memory_space<smem>>
    %376 = vector.broadcast %375 : f32 to vector<24x128xf32>
    %377 = arith.mulf %33, %376 : vector<24x128xf32>
    %378 = arith.addf %374, %377 : vector<24x128xf32>
    %c127_i32_71 = arith.constant 127 : i32
    %379 = tpu.dynamic_rotate %33 by %c127_i32_71 dim 1 : vector<24x128xf32>, i32 -> vector<24x128xf32>
    %c65 = arith.constant 65 : index
    %380 = memref.load %arg2[%c65] : memref<72xf32, #tpu.memory_space<smem>>
    %381 = vector.broadcast %380 : f32 to vector<24x128xf32>
    %382 = arith.mulf %379, %381 : vector<24x128xf32>
    %383 = arith.addf %378, %382 : vector<24x128xf32>
    %c1_i32_72 = arith.constant 1 : i32
    %384 = tpu.dynamic_rotate %32 by %c1_i32_72 dim 1 : vector<24x128xf32>, i32 -> vector<24x128xf32>
    %c66 = arith.constant 66 : index
    %385 = memref.load %arg2[%c66] : memref<72xf32, #tpu.memory_space<smem>>
    %386 = vector.broadcast %385 : f32 to vector<24x128xf32>
    %387 = arith.mulf %384, %386 : vector<24x128xf32>
    %388 = arith.addf %383, %387 : vector<24x128xf32>
    %c67 = arith.constant 67 : index
    %389 = memref.load %arg2[%c67] : memref<72xf32, #tpu.memory_space<smem>>
    %390 = vector.broadcast %389 : f32 to vector<24x128xf32>
    %391 = arith.mulf %32, %390 : vector<24x128xf32>
    %392 = arith.addf %388, %391 : vector<24x128xf32>
    %c127_i32_73 = arith.constant 127 : i32
    %393 = tpu.dynamic_rotate %32 by %c127_i32_73 dim 1 : vector<24x128xf32>, i32 -> vector<24x128xf32>
    %c68 = arith.constant 68 : index
    %394 = memref.load %arg2[%c68] : memref<72xf32, #tpu.memory_space<smem>>
    %395 = vector.broadcast %394 : f32 to vector<24x128xf32>
    %396 = arith.mulf %393, %395 : vector<24x128xf32>
    %397 = arith.addf %392, %396 : vector<24x128xf32>
    %c1_i32_74 = arith.constant 1 : i32
    %398 = tpu.dynamic_rotate %34 by %c1_i32_74 dim 1 : vector<24x128xf32>, i32 -> vector<24x128xf32>
    %c69 = arith.constant 69 : index
    %399 = memref.load %arg2[%c69] : memref<72xf32, #tpu.memory_space<smem>>
    %400 = vector.broadcast %399 : f32 to vector<24x128xf32>
    %401 = arith.mulf %398, %400 : vector<24x128xf32>
    %402 = arith.addf %397, %401 : vector<24x128xf32>
    %c70 = arith.constant 70 : index
    %403 = memref.load %arg2[%c70] : memref<72xf32, #tpu.memory_space<smem>>
    %404 = vector.broadcast %403 : f32 to vector<24x128xf32>
    %405 = arith.mulf %34, %404 : vector<24x128xf32>
    %406 = arith.addf %402, %405 : vector<24x128xf32>
    %c127_i32_75 = arith.constant 127 : i32
    %407 = tpu.dynamic_rotate %34 by %c127_i32_75 dim 1 : vector<24x128xf32>, i32 -> vector<24x128xf32>
    %c71 = arith.constant 71 : index
    %408 = memref.load %arg2[%c71] : memref<72xf32, #tpu.memory_space<smem>>
    %409 = vector.broadcast %408 : f32 to vector<24x128xf32>
    %410 = arith.mulf %407, %409 : vector<24x128xf32>
    %411 = arith.addf %406, %410 : vector<24x128xf32>
    %cst_76 = arith.constant 0.000000e+00 : f32
    %412 = vector.broadcast %cst_76 : f32 to vector<24x128xf32>
    %413 = arith.select %31, %411, %412 : vector<24x128xi1>, vector<24x128xf32>
    %cst_77 = arith.constant dense<0.000000e+00> : vector<128xf32>
    %414 = vector.multi_reduction <add>, %413, %cst_77 [0] : vector<24x128xf32> to vector<128xf32>
    %415 = vector.shape_cast %414 : vector<128xf32> to vector<1x128xf32>
    %416 = arith.mulf %413, %413 : vector<24x128xf32>
    %cst_78 = arith.constant dense<0.000000e+00> : vector<128xf32>
    %417 = vector.multi_reduction <add>, %416, %cst_78 [0] : vector<24x128xf32> to vector<128xf32>
    %418 = vector.shape_cast %417 : vector<128xf32> to vector<1x128xf32>
    %419 = tpu.concatenate %79, %127, %175, %223, %271, %319, %367, %415, %82, %130, %178, %226, %274, %322, %370, %418 in 0 : vector<1x128xf32>, vector<1x128xf32>, vector<1x128xf32>, vector<1x128xf32>, vector<1x128xf32>, vector<1x128xf32>, vector<1x128xf32>, vector<1x128xf32>, vector<1x128xf32>, vector<1x128xf32>, vector<1x128xf32>, vector<1x128xf32>, vector<1x128xf32>, vector<1x128xf32>, vector<1x128xf32>, vector<1x128xf32> -> vector<16x128xf32>
    %c0_79 = arith.constant 0 : index
    %c0_80 = arith.constant 0 : index
    %c0_81 = arith.constant 0 : index
    %420 = vector.load %arg3[%c0_79, %c0_80, %c0_81] : memref<1x16x128xf32, #tpu.memory_space<vmem>>, vector<1x16x128xf32>
    %421 = vector.shape_cast %420 : vector<1x16x128xf32> to vector<16x128xf32>
    %422 = vector.shape_cast %419 : vector<16x128xf32> to vector<1x16x128xf32>
    tpu.vector_store %arg3[%c0_79, %c0_80, %c0_81], %422 {strides = array<i32>} : memref<1x16x128xf32, #tpu.memory_space<vmem>>, vector<1x16x128xf32>,
    return
  }
  func.func @transform_0(%arg0: i32) -> (i32, i32) {
    %c0_i32 = arith.constant 0 : i32
    %c0_i32_0 = arith.constant 0 : i32
    return %arg0, %c0_i32 : i32, i32
  }
  func.func @transform_1(%arg0: i32) -> i32 {
    %c0_i32 = arith.constant 0 : i32
    %c0_i32_0 = arith.constant 0 : i32
    return %c0_i32 : i32
  }
  func.func @transform_2(%arg0: i32) -> (i32, i32, i32) {
    %c0_i32 = arith.constant 0 : i32
    %c0_i32_0 = arith.constant 0 : i32
    %c0_i32_1 = arith.constant 0 : i32
    return %arg0, %c0_i32, %c0_i32_0 : i32, i32, i32
  }
}

module attributes {stable_mosaic.version = 11 : i64} {
  func.func @_apply_kernel(%arg0: i32, %arg1: memref<24x128xf32, #tpu.memory_space<vmem>>, %arg2: memref<72xf32, #tpu.memory_space<smem>>, %arg3: memref<8xf32, #tpu.memory_space<smem>>, %arg4: memref<72xf32, #tpu.memory_space<smem>>, %arg5: memref<1xf32, #tpu.memory_space<smem>>, %arg6: memref<24x128xf32, #tpu.memory_space<vmem>>) attributes {dimension_semantics = [#tpu.dimension_semantics<parallel>], iteration_bounds = array<i64: 1>, scalar_prefetch = 0 : i64, scratch_operands = 0 : i64, tpu.core_type = #tpu.core_type<tc>, window_params = [{transform_indices = @transform_0, window_bounds = array<i64: 24, 128>}, {transform_indices = @transform_1, window_bounds = array<i64: 72>}, {transform_indices = @transform_2, window_bounds = array<i64: 8>}, {transform_indices = @transform_3, window_bounds = array<i64: 72>}, {transform_indices = @transform_4, window_bounds = array<i64: 1>}, {transform_indices = @transform_5, window_bounds = array<i64: 24, 128>}]} {
    %0 = tpu.iota {dimensions = array<i32: 0>} : vector<24x128xi32>
    %1 = tpu.iota {dimensions = array<i32: 1>} : vector<24x128xi32>
    %c18_i32 = arith.constant 18 : i32
    %c0_i32 = arith.constant 0 : i32
    %2 = arith.cmpi eq, %c18_i32, %c0_i32 : i32
    %c1_i32 = arith.constant 1 : i32
    %3 = arith.select %2, %c1_i32, %c18_i32 : i32
    %4 = vector.broadcast %3 : i32 to vector<24x128xi32>
    %5 = arith.remsi %1, %4 : vector<24x128xi32>
    %c0_i32_0 = arith.constant 0 : i32
    %6 = vector.broadcast %c0_i32_0 : i32 to vector<24x128xi32>
    %7 = arith.cmpi ne, %5, %6 : vector<24x128xi32>
    %c0_i32_1 = arith.constant 0 : i32
    %8 = vector.broadcast %c0_i32_1 : i32 to vector<24x128xi32>
    %9 = arith.cmpi slt, %5, %8 : vector<24x128xi32>
    %c0_i32_2 = arith.constant 0 : i32
    %10 = arith.cmpi slt, %3, %c0_i32_2 : i32
    %11 = vector.broadcast %10 : i1 to vector<24x128xi1>
    %12 = vector.broadcast %11 : vector<24x128xi1> to vector<24x128xi1>
    %13 = arith.xori %9, %12 : vector<24x128xi1>
    %14 = arith.andi %13, %7 : vector<24x128xi1>
    %15 = vector.broadcast %3 : i32 to vector<24x128xi32>
    %16 = arith.addi %5, %15 : vector<24x128xi32>
    %17 = arith.select %14, %16, %5 : vector<24x128xi1>, vector<24x128xi32>
    %c1_i32_3 = arith.constant 1 : i32
    %18 = vector.broadcast %c1_i32_3 : i32 to vector<24x128xi32>
    %19 = arith.cmpi sge, %0, %18 : vector<24x128xi32>
    %c16_i32 = arith.constant 16 : i32
    %20 = vector.broadcast %c16_i32 : i32 to vector<24x128xi32>
    %21 = arith.cmpi sle, %0, %20 : vector<24x128xi32>
    %22 = arith.andi %19, %21 : vector<24x128xi1>
    %c1_i32_4 = arith.constant 1 : i32
    %23 = vector.broadcast %c1_i32_4 : i32 to vector<24x128xi32>
    %24 = arith.cmpi sge, %17, %23 : vector<24x128xi32>
    %25 = arith.andi %22, %24 : vector<24x128xi1>
    %c16_i32_5 = arith.constant 16 : i32
    %26 = vector.broadcast %c16_i32_5 : i32 to vector<24x128xi32>
    %27 = arith.cmpi sle, %17, %26 : vector<24x128xi32>
    %28 = arith.andi %25, %27 : vector<24x128xi1>
    %c126_i32 = arith.constant 126 : i32
    %29 = vector.broadcast %c126_i32 : i32 to vector<24x128xi32>
    %30 = arith.cmpi slt, %1, %29 : vector<24x128xi32>
    %31 = arith.andi %28, %30 : vector<24x128xi1>
    %c0 = arith.constant 0 : index
    %c0_6 = arith.constant 0 : index
    %32 = vector.load %arg1[%c0, %c0_6] : memref<24x128xf32, #tpu.memory_space<vmem>>, vector<24x128xf32>
    %c1_i32_7 = arith.constant 1 : i32
    %33 = tpu.dynamic_rotate %32 by %c1_i32_7 dim 0 : vector<24x128xf32>, i32 -> vector<24x128xf32>
    %c23_i32 = arith.constant 23 : i32
    %34 = tpu.dynamic_rotate %32 by %c23_i32 dim 0 : vector<24x128xf32>, i32 -> vector<24x128xf32>
    %c0_8 = arith.constant 0 : index
    %35 = memref.load %arg5[%c0_8] : memref<1xf32, #tpu.memory_space<smem>>
    %36 = vector.broadcast %35 : f32 to vector<24x128xf32>
    %c1_i32_9 = arith.constant 1 : i32
    %37 = tpu.dynamic_rotate %33 by %c1_i32_9 dim 1 : vector<24x128xf32>, i32 -> vector<24x128xf32>
    %c0_10 = arith.constant 0 : index
    %38 = memref.load %arg2[%c0_10] : memref<72xf32, #tpu.memory_space<smem>>
    %39 = vector.broadcast %38 : f32 to vector<24x128xf32>
    %40 = arith.mulf %37, %39 : vector<24x128xf32>
    %c1 = arith.constant 1 : index
    %41 = memref.load %arg2[%c1] : memref<72xf32, #tpu.memory_space<smem>>
    %42 = vector.broadcast %41 : f32 to vector<24x128xf32>
    %43 = arith.mulf %33, %42 : vector<24x128xf32>
    %44 = arith.addf %40, %43 : vector<24x128xf32>
    %c127_i32 = arith.constant 127 : i32
    %45 = tpu.dynamic_rotate %33 by %c127_i32 dim 1 : vector<24x128xf32>, i32 -> vector<24x128xf32>
    %c2 = arith.constant 2 : index
    %46 = memref.load %arg2[%c2] : memref<72xf32, #tpu.memory_space<smem>>
    %47 = vector.broadcast %46 : f32 to vector<24x128xf32>
    %48 = arith.mulf %45, %47 : vector<24x128xf32>
    %49 = arith.addf %44, %48 : vector<24x128xf32>
    %c1_i32_11 = arith.constant 1 : i32
    %50 = tpu.dynamic_rotate %32 by %c1_i32_11 dim 1 : vector<24x128xf32>, i32 -> vector<24x128xf32>
    %c3 = arith.constant 3 : index
    %51 = memref.load %arg2[%c3] : memref<72xf32, #tpu.memory_space<smem>>
    %52 = vector.broadcast %51 : f32 to vector<24x128xf32>
    %53 = arith.mulf %50, %52 : vector<24x128xf32>
    %54 = arith.addf %49, %53 : vector<24x128xf32>
    %c4 = arith.constant 4 : index
    %55 = memref.load %arg2[%c4] : memref<72xf32, #tpu.memory_space<smem>>
    %56 = vector.broadcast %55 : f32 to vector<24x128xf32>
    %57 = arith.mulf %32, %56 : vector<24x128xf32>
    %58 = arith.addf %54, %57 : vector<24x128xf32>
    %c127_i32_12 = arith.constant 127 : i32
    %59 = tpu.dynamic_rotate %32 by %c127_i32_12 dim 1 : vector<24x128xf32>, i32 -> vector<24x128xf32>
    %c5 = arith.constant 5 : index
    %60 = memref.load %arg2[%c5] : memref<72xf32, #tpu.memory_space<smem>>
    %61 = vector.broadcast %60 : f32 to vector<24x128xf32>
    %62 = arith.mulf %59, %61 : vector<24x128xf32>
    %63 = arith.addf %58, %62 : vector<24x128xf32>
    %c1_i32_13 = arith.constant 1 : i32
    %64 = tpu.dynamic_rotate %34 by %c1_i32_13 dim 1 : vector<24x128xf32>, i32 -> vector<24x128xf32>
    %c6 = arith.constant 6 : index
    %65 = memref.load %arg2[%c6] : memref<72xf32, #tpu.memory_space<smem>>
    %66 = vector.broadcast %65 : f32 to vector<24x128xf32>
    %67 = arith.mulf %64, %66 : vector<24x128xf32>
    %68 = arith.addf %63, %67 : vector<24x128xf32>
    %c7 = arith.constant 7 : index
    %69 = memref.load %arg2[%c7] : memref<72xf32, #tpu.memory_space<smem>>
    %70 = vector.broadcast %69 : f32 to vector<24x128xf32>
    %71 = arith.mulf %34, %70 : vector<24x128xf32>
    %72 = arith.addf %68, %71 : vector<24x128xf32>
    %c127_i32_14 = arith.constant 127 : i32
    %73 = tpu.dynamic_rotate %34 by %c127_i32_14 dim 1 : vector<24x128xf32>, i32 -> vector<24x128xf32>
    %c8 = arith.constant 8 : index
    %74 = memref.load %arg2[%c8] : memref<72xf32, #tpu.memory_space<smem>>
    %75 = vector.broadcast %74 : f32 to vector<24x128xf32>
    %76 = arith.mulf %73, %75 : vector<24x128xf32>
    %77 = arith.addf %72, %76 : vector<24x128xf32>
    %c0_15 = arith.constant 0 : index
    %78 = memref.load %arg3[%c0_15] : memref<8xf32, #tpu.memory_space<smem>>
    %79 = vector.broadcast %78 : f32 to vector<24x128xf32>
    %80 = arith.addf %77, %79 : vector<24x128xf32>
    %cst = arith.constant 0.000000e+00 : f32
    %81 = vector.broadcast %cst : f32 to vector<24x128xf32>
    %82 = arith.maximumf %80, %81 : vector<24x128xf32>
    %cst_16 = arith.constant 0.000000e+00 : f32
    %83 = vector.broadcast %cst_16 : f32 to vector<24x128xf32>
    %84 = arith.select %31, %82, %83 : vector<24x128xi1>, vector<24x128xf32>
    %c1_i32_17 = arith.constant 1 : i32
    %85 = tpu.dynamic_rotate %84 by %c1_i32_17 dim 0 : vector<24x128xf32>, i32 -> vector<24x128xf32>
    %c23_i32_18 = arith.constant 23 : i32
    %86 = tpu.dynamic_rotate %84 by %c23_i32_18 dim 0 : vector<24x128xf32>, i32 -> vector<24x128xf32>
    %c1_i32_19 = arith.constant 1 : i32
    %87 = tpu.dynamic_rotate %85 by %c1_i32_19 dim 1 : vector<24x128xf32>, i32 -> vector<24x128xf32>
    %c0_20 = arith.constant 0 : index
    %88 = memref.load %arg4[%c0_20] : memref<72xf32, #tpu.memory_space<smem>>
    %89 = vector.broadcast %88 : f32 to vector<24x128xf32>
    %90 = arith.mulf %87, %89 : vector<24x128xf32>
    %91 = arith.addf %36, %90 : vector<24x128xf32>
    %c1_21 = arith.constant 1 : index
    %92 = memref.load %arg4[%c1_21] : memref<72xf32, #tpu.memory_space<smem>>
    %93 = vector.broadcast %92 : f32 to vector<24x128xf32>
    %94 = arith.mulf %85, %93 : vector<24x128xf32>
    %95 = arith.addf %91, %94 : vector<24x128xf32>
    %c127_i32_22 = arith.constant 127 : i32
    %96 = tpu.dynamic_rotate %85 by %c127_i32_22 dim 1 : vector<24x128xf32>, i32 -> vector<24x128xf32>
    %c2_23 = arith.constant 2 : index
    %97 = memref.load %arg4[%c2_23] : memref<72xf32, #tpu.memory_space<smem>>
    %98 = vector.broadcast %97 : f32 to vector<24x128xf32>
    %99 = arith.mulf %96, %98 : vector<24x128xf32>
    %100 = arith.addf %95, %99 : vector<24x128xf32>
    %c1_i32_24 = arith.constant 1 : i32
    %101 = tpu.dynamic_rotate %84 by %c1_i32_24 dim 1 : vector<24x128xf32>, i32 -> vector<24x128xf32>
    %c3_25 = arith.constant 3 : index
    %102 = memref.load %arg4[%c3_25] : memref<72xf32, #tpu.memory_space<smem>>
    %103 = vector.broadcast %102 : f32 to vector<24x128xf32>
    %104 = arith.mulf %101, %103 : vector<24x128xf32>
    %105 = arith.addf %100, %104 : vector<24x128xf32>
    %c4_26 = arith.constant 4 : index
    %106 = memref.load %arg4[%c4_26] : memref<72xf32, #tpu.memory_space<smem>>
    %107 = vector.broadcast %106 : f32 to vector<24x128xf32>
    %108 = arith.mulf %84, %107 : vector<24x128xf32>
    %109 = arith.addf %105, %108 : vector<24x128xf32>
    %c127_i32_27 = arith.constant 127 : i32
    %110 = tpu.dynamic_rotate %84 by %c127_i32_27 dim 1 : vector<24x128xf32>, i32 -> vector<24x128xf32>
    %c5_28 = arith.constant 5 : index
    %111 = memref.load %arg4[%c5_28] : memref<72xf32, #tpu.memory_space<smem>>
    %112 = vector.broadcast %111 : f32 to vector<24x128xf32>
    %113 = arith.mulf %110, %112 : vector<24x128xf32>
    %114 = arith.addf %109, %113 : vector<24x128xf32>
    %c1_i32_29 = arith.constant 1 : i32
    %115 = tpu.dynamic_rotate %86 by %c1_i32_29 dim 1 : vector<24x128xf32>, i32 -> vector<24x128xf32>
    %c6_30 = arith.constant 6 : index
    %116 = memref.load %arg4[%c6_30] : memref<72xf32, #tpu.memory_space<smem>>
    %117 = vector.broadcast %116 : f32 to vector<24x128xf32>
    %118 = arith.mulf %115, %117 : vector<24x128xf32>
    %119 = arith.addf %114, %118 : vector<24x128xf32>
    %c7_31 = arith.constant 7 : index
    %120 = memref.load %arg4[%c7_31] : memref<72xf32, #tpu.memory_space<smem>>
    %121 = vector.broadcast %120 : f32 to vector<24x128xf32>
    %122 = arith.mulf %86, %121 : vector<24x128xf32>
    %123 = arith.addf %119, %122 : vector<24x128xf32>
    %c127_i32_32 = arith.constant 127 : i32
    %124 = tpu.dynamic_rotate %86 by %c127_i32_32 dim 1 : vector<24x128xf32>, i32 -> vector<24x128xf32>
    %c8_33 = arith.constant 8 : index
    %125 = memref.load %arg4[%c8_33] : memref<72xf32, #tpu.memory_space<smem>>
    %126 = vector.broadcast %125 : f32 to vector<24x128xf32>
    %127 = arith.mulf %124, %126 : vector<24x128xf32>
    %128 = arith.addf %123, %127 : vector<24x128xf32>
    %c1_i32_34 = arith.constant 1 : i32
    %129 = tpu.dynamic_rotate %33 by %c1_i32_34 dim 1 : vector<24x128xf32>, i32 -> vector<24x128xf32>
    %c9 = arith.constant 9 : index
    %130 = memref.load %arg2[%c9] : memref<72xf32, #tpu.memory_space<smem>>
    %131 = vector.broadcast %130 : f32 to vector<24x128xf32>
    %132 = arith.mulf %129, %131 : vector<24x128xf32>
    %c10 = arith.constant 10 : index
    %133 = memref.load %arg2[%c10] : memref<72xf32, #tpu.memory_space<smem>>
    %134 = vector.broadcast %133 : f32 to vector<24x128xf32>
    %135 = arith.mulf %33, %134 : vector<24x128xf32>
    %136 = arith.addf %132, %135 : vector<24x128xf32>
    %c127_i32_35 = arith.constant 127 : i32
    %137 = tpu.dynamic_rotate %33 by %c127_i32_35 dim 1 : vector<24x128xf32>, i32 -> vector<24x128xf32>
    %c11 = arith.constant 11 : index
    %138 = memref.load %arg2[%c11] : memref<72xf32, #tpu.memory_space<smem>>
    %139 = vector.broadcast %138 : f32 to vector<24x128xf32>
    %140 = arith.mulf %137, %139 : vector<24x128xf32>
    %141 = arith.addf %136, %140 : vector<24x128xf32>
    %c1_i32_36 = arith.constant 1 : i32
    %142 = tpu.dynamic_rotate %32 by %c1_i32_36 dim 1 : vector<24x128xf32>, i32 -> vector<24x128xf32>
    %c12 = arith.constant 12 : index
    %143 = memref.load %arg2[%c12] : memref<72xf32, #tpu.memory_space<smem>>
    %144 = vector.broadcast %143 : f32 to vector<24x128xf32>
    %145 = arith.mulf %142, %144 : vector<24x128xf32>
    %146 = arith.addf %141, %145 : vector<24x128xf32>
    %c13 = arith.constant 13 : index
    %147 = memref.load %arg2[%c13] : memref<72xf32, #tpu.memory_space<smem>>
    %148 = vector.broadcast %147 : f32 to vector<24x128xf32>
    %149 = arith.mulf %32, %148 : vector<24x128xf32>
    %150 = arith.addf %146, %149 : vector<24x128xf32>
    %c127_i32_37 = arith.constant 127 : i32
    %151 = tpu.dynamic_rotate %32 by %c127_i32_37 dim 1 : vector<24x128xf32>, i32 -> vector<24x128xf32>
    %c14 = arith.constant 14 : index
    %152 = memref.load %arg2[%c14] : memref<72xf32, #tpu.memory_space<smem>>
    %153 = vector.broadcast %152 : f32 to vector<24x128xf32>
    %154 = arith.mulf %151, %153 : vector<24x128xf32>
    %155 = arith.addf %150, %154 : vector<24x128xf32>
    %c1_i32_38 = arith.constant 1 : i32
    %156 = tpu.dynamic_rotate %34 by %c1_i32_38 dim 1 : vector<24x128xf32>, i32 -> vector<24x128xf32>
    %c15 = arith.constant 15 : index
    %157 = memref.load %arg2[%c15] : memref<72xf32, #tpu.memory_space<smem>>
    %158 = vector.broadcast %157 : f32 to vector<24x128xf32>
    %159 = arith.mulf %156, %158 : vector<24x128xf32>
    %160 = arith.addf %155, %159 : vector<24x128xf32>
    %c16 = arith.constant 16 : index
    %161 = memref.load %arg2[%c16] : memref<72xf32, #tpu.memory_space<smem>>
    %162 = vector.broadcast %161 : f32 to vector<24x128xf32>
    %163 = arith.mulf %34, %162 : vector<24x128xf32>
    %164 = arith.addf %160, %163 : vector<24x128xf32>
    %c127_i32_39 = arith.constant 127 : i32
    %165 = tpu.dynamic_rotate %34 by %c127_i32_39 dim 1 : vector<24x128xf32>, i32 -> vector<24x128xf32>
    %c17 = arith.constant 17 : index
    %166 = memref.load %arg2[%c17] : memref<72xf32, #tpu.memory_space<smem>>
    %167 = vector.broadcast %166 : f32 to vector<24x128xf32>
    %168 = arith.mulf %165, %167 : vector<24x128xf32>
    %169 = arith.addf %164, %168 : vector<24x128xf32>
    %c1_40 = arith.constant 1 : index
    %170 = memref.load %arg3[%c1_40] : memref<8xf32, #tpu.memory_space<smem>>
    %171 = vector.broadcast %170 : f32 to vector<24x128xf32>
    %172 = arith.addf %169, %171 : vector<24x128xf32>
    %cst_41 = arith.constant 0.000000e+00 : f32
    %173 = vector.broadcast %cst_41 : f32 to vector<24x128xf32>
    %174 = arith.maximumf %172, %173 : vector<24x128xf32>
    %cst_42 = arith.constant 0.000000e+00 : f32
    %175 = vector.broadcast %cst_42 : f32 to vector<24x128xf32>
    %176 = arith.select %31, %174, %175 : vector<24x128xi1>, vector<24x128xf32>
    %c1_i32_43 = arith.constant 1 : i32
    %177 = tpu.dynamic_rotate %176 by %c1_i32_43 dim 0 : vector<24x128xf32>, i32 -> vector<24x128xf32>
    %c23_i32_44 = arith.constant 23 : i32
    %178 = tpu.dynamic_rotate %176 by %c23_i32_44 dim 0 : vector<24x128xf32>, i32 -> vector<24x128xf32>
    %c1_i32_45 = arith.constant 1 : i32
    %179 = tpu.dynamic_rotate %177 by %c1_i32_45 dim 1 : vector<24x128xf32>, i32 -> vector<24x128xf32>
    %c9_46 = arith.constant 9 : index
    %180 = memref.load %arg4[%c9_46] : memref<72xf32, #tpu.memory_space<smem>>
    %181 = vector.broadcast %180 : f32 to vector<24x128xf32>
    %182 = arith.mulf %179, %181 : vector<24x128xf32>
    %183 = arith.addf %128, %182 : vector<24x128xf32>
    %c10_47 = arith.constant 10 : index
    %184 = memref.load %arg4[%c10_47] : memref<72xf32, #tpu.memory_space<smem>>
    %185 = vector.broadcast %184 : f32 to vector<24x128xf32>
    %186 = arith.mulf %177, %185 : vector<24x128xf32>
    %187 = arith.addf %183, %186 : vector<24x128xf32>
    %c127_i32_48 = arith.constant 127 : i32
    %188 = tpu.dynamic_rotate %177 by %c127_i32_48 dim 1 : vector<24x128xf32>, i32 -> vector<24x128xf32>
    %c11_49 = arith.constant 11 : index
    %189 = memref.load %arg4[%c11_49] : memref<72xf32, #tpu.memory_space<smem>>
    %190 = vector.broadcast %189 : f32 to vector<24x128xf32>
    %191 = arith.mulf %188, %190 : vector<24x128xf32>
    %192 = arith.addf %187, %191 : vector<24x128xf32>
    %c1_i32_50 = arith.constant 1 : i32
    %193 = tpu.dynamic_rotate %176 by %c1_i32_50 dim 1 : vector<24x128xf32>, i32 -> vector<24x128xf32>
    %c12_51 = arith.constant 12 : index
    %194 = memref.load %arg4[%c12_51] : memref<72xf32, #tpu.memory_space<smem>>
    %195 = vector.broadcast %194 : f32 to vector<24x128xf32>
    %196 = arith.mulf %193, %195 : vector<24x128xf32>
    %197 = arith.addf %192, %196 : vector<24x128xf32>
    %c13_52 = arith.constant 13 : index
    %198 = memref.load %arg4[%c13_52] : memref<72xf32, #tpu.memory_space<smem>>
    %199 = vector.broadcast %198 : f32 to vector<24x128xf32>
    %200 = arith.mulf %176, %199 : vector<24x128xf32>
    %201 = arith.addf %197, %200 : vector<24x128xf32>
    %c127_i32_53 = arith.constant 127 : i32
    %202 = tpu.dynamic_rotate %176 by %c127_i32_53 dim 1 : vector<24x128xf32>, i32 -> vector<24x128xf32>
    %c14_54 = arith.constant 14 : index
    %203 = memref.load %arg4[%c14_54] : memref<72xf32, #tpu.memory_space<smem>>
    %204 = vector.broadcast %203 : f32 to vector<24x128xf32>
    %205 = arith.mulf %202, %204 : vector<24x128xf32>
    %206 = arith.addf %201, %205 : vector<24x128xf32>
    %c1_i32_55 = arith.constant 1 : i32
    %207 = tpu.dynamic_rotate %178 by %c1_i32_55 dim 1 : vector<24x128xf32>, i32 -> vector<24x128xf32>
    %c15_56 = arith.constant 15 : index
    %208 = memref.load %arg4[%c15_56] : memref<72xf32, #tpu.memory_space<smem>>
    %209 = vector.broadcast %208 : f32 to vector<24x128xf32>
    %210 = arith.mulf %207, %209 : vector<24x128xf32>
    %211 = arith.addf %206, %210 : vector<24x128xf32>
    %c16_57 = arith.constant 16 : index
    %212 = memref.load %arg4[%c16_57] : memref<72xf32, #tpu.memory_space<smem>>
    %213 = vector.broadcast %212 : f32 to vector<24x128xf32>
    %214 = arith.mulf %178, %213 : vector<24x128xf32>
    %215 = arith.addf %211, %214 : vector<24x128xf32>
    %c127_i32_58 = arith.constant 127 : i32
    %216 = tpu.dynamic_rotate %178 by %c127_i32_58 dim 1 : vector<24x128xf32>, i32 -> vector<24x128xf32>
    %c17_59 = arith.constant 17 : index
    %217 = memref.load %arg4[%c17_59] : memref<72xf32, #tpu.memory_space<smem>>
    %218 = vector.broadcast %217 : f32 to vector<24x128xf32>
    %219 = arith.mulf %216, %218 : vector<24x128xf32>
    %220 = arith.addf %215, %219 : vector<24x128xf32>
    %c1_i32_60 = arith.constant 1 : i32
    %221 = tpu.dynamic_rotate %33 by %c1_i32_60 dim 1 : vector<24x128xf32>, i32 -> vector<24x128xf32>
    %c18 = arith.constant 18 : index
    %222 = memref.load %arg2[%c18] : memref<72xf32, #tpu.memory_space<smem>>
    %223 = vector.broadcast %222 : f32 to vector<24x128xf32>
    %224 = arith.mulf %221, %223 : vector<24x128xf32>
    %c19 = arith.constant 19 : index
    %225 = memref.load %arg2[%c19] : memref<72xf32, #tpu.memory_space<smem>>
    %226 = vector.broadcast %225 : f32 to vector<24x128xf32>
    %227 = arith.mulf %33, %226 : vector<24x128xf32>
    %228 = arith.addf %224, %227 : vector<24x128xf32>
    %c127_i32_61 = arith.constant 127 : i32
    %229 = tpu.dynamic_rotate %33 by %c127_i32_61 dim 1 : vector<24x128xf32>, i32 -> vector<24x128xf32>
    %c20 = arith.constant 20 : index
    %230 = memref.load %arg2[%c20] : memref<72xf32, #tpu.memory_space<smem>>
    %231 = vector.broadcast %230 : f32 to vector<24x128xf32>
    %232 = arith.mulf %229, %231 : vector<24x128xf32>
    %233 = arith.addf %228, %232 : vector<24x128xf32>
    %c1_i32_62 = arith.constant 1 : i32
    %234 = tpu.dynamic_rotate %32 by %c1_i32_62 dim 1 : vector<24x128xf32>, i32 -> vector<24x128xf32>
    %c21 = arith.constant 21 : index
    %235 = memref.load %arg2[%c21] : memref<72xf32, #tpu.memory_space<smem>>
    %236 = vector.broadcast %235 : f32 to vector<24x128xf32>
    %237 = arith.mulf %234, %236 : vector<24x128xf32>
    %238 = arith.addf %233, %237 : vector<24x128xf32>
    %c22 = arith.constant 22 : index
    %239 = memref.load %arg2[%c22] : memref<72xf32, #tpu.memory_space<smem>>
    %240 = vector.broadcast %239 : f32 to vector<24x128xf32>
    %241 = arith.mulf %32, %240 : vector<24x128xf32>
    %242 = arith.addf %238, %241 : vector<24x128xf32>
    %c127_i32_63 = arith.constant 127 : i32
    %243 = tpu.dynamic_rotate %32 by %c127_i32_63 dim 1 : vector<24x128xf32>, i32 -> vector<24x128xf32>
    %c23 = arith.constant 23 : index
    %244 = memref.load %arg2[%c23] : memref<72xf32, #tpu.memory_space<smem>>
    %245 = vector.broadcast %244 : f32 to vector<24x128xf32>
    %246 = arith.mulf %243, %245 : vector<24x128xf32>
    %247 = arith.addf %242, %246 : vector<24x128xf32>
    %c1_i32_64 = arith.constant 1 : i32
    %248 = tpu.dynamic_rotate %34 by %c1_i32_64 dim 1 : vector<24x128xf32>, i32 -> vector<24x128xf32>
    %c24 = arith.constant 24 : index
    %249 = memref.load %arg2[%c24] : memref<72xf32, #tpu.memory_space<smem>>
    %250 = vector.broadcast %249 : f32 to vector<24x128xf32>
    %251 = arith.mulf %248, %250 : vector<24x128xf32>
    %252 = arith.addf %247, %251 : vector<24x128xf32>
    %c25 = arith.constant 25 : index
    %253 = memref.load %arg2[%c25] : memref<72xf32, #tpu.memory_space<smem>>
    %254 = vector.broadcast %253 : f32 to vector<24x128xf32>
    %255 = arith.mulf %34, %254 : vector<24x128xf32>
    %256 = arith.addf %252, %255 : vector<24x128xf32>
    %c127_i32_65 = arith.constant 127 : i32
    %257 = tpu.dynamic_rotate %34 by %c127_i32_65 dim 1 : vector<24x128xf32>, i32 -> vector<24x128xf32>
    %c26 = arith.constant 26 : index
    %258 = memref.load %arg2[%c26] : memref<72xf32, #tpu.memory_space<smem>>
    %259 = vector.broadcast %258 : f32 to vector<24x128xf32>
    %260 = arith.mulf %257, %259 : vector<24x128xf32>
    %261 = arith.addf %256, %260 : vector<24x128xf32>
    %c2_66 = arith.constant 2 : index
    %262 = memref.load %arg3[%c2_66] : memref<8xf32, #tpu.memory_space<smem>>
    %263 = vector.broadcast %262 : f32 to vector<24x128xf32>
    %264 = arith.addf %261, %263 : vector<24x128xf32>
    %cst_67 = arith.constant 0.000000e+00 : f32
    %265 = vector.broadcast %cst_67 : f32 to vector<24x128xf32>
    %266 = arith.maximumf %264, %265 : vector<24x128xf32>
    %cst_68 = arith.constant 0.000000e+00 : f32
    %267 = vector.broadcast %cst_68 : f32 to vector<24x128xf32>
    %268 = arith.select %31, %266, %267 : vector<24x128xi1>, vector<24x128xf32>
    %c1_i32_69 = arith.constant 1 : i32
    %269 = tpu.dynamic_rotate %268 by %c1_i32_69 dim 0 : vector<24x128xf32>, i32 -> vector<24x128xf32>
    %c23_i32_70 = arith.constant 23 : i32
    %270 = tpu.dynamic_rotate %268 by %c23_i32_70 dim 0 : vector<24x128xf32>, i32 -> vector<24x128xf32>
    %c1_i32_71 = arith.constant 1 : i32
    %271 = tpu.dynamic_rotate %269 by %c1_i32_71 dim 1 : vector<24x128xf32>, i32 -> vector<24x128xf32>
    %c18_72 = arith.constant 18 : index
    %272 = memref.load %arg4[%c18_72] : memref<72xf32, #tpu.memory_space<smem>>
    %273 = vector.broadcast %272 : f32 to vector<24x128xf32>
    %274 = arith.mulf %271, %273 : vector<24x128xf32>
    %275 = arith.addf %220, %274 : vector<24x128xf32>
    %c19_73 = arith.constant 19 : index
    %276 = memref.load %arg4[%c19_73] : memref<72xf32, #tpu.memory_space<smem>>
    %277 = vector.broadcast %276 : f32 to vector<24x128xf32>
    %278 = arith.mulf %269, %277 : vector<24x128xf32>
    %279 = arith.addf %275, %278 : vector<24x128xf32>
    %c127_i32_74 = arith.constant 127 : i32
    %280 = tpu.dynamic_rotate %269 by %c127_i32_74 dim 1 : vector<24x128xf32>, i32 -> vector<24x128xf32>
    %c20_75 = arith.constant 20 : index
    %281 = memref.load %arg4[%c20_75] : memref<72xf32, #tpu.memory_space<smem>>
    %282 = vector.broadcast %281 : f32 to vector<24x128xf32>
    %283 = arith.mulf %280, %282 : vector<24x128xf32>
    %284 = arith.addf %279, %283 : vector<24x128xf32>
    %c1_i32_76 = arith.constant 1 : i32
    %285 = tpu.dynamic_rotate %268 by %c1_i32_76 dim 1 : vector<24x128xf32>, i32 -> vector<24x128xf32>
    %c21_77 = arith.constant 21 : index
    %286 = memref.load %arg4[%c21_77] : memref<72xf32, #tpu.memory_space<smem>>
    %287 = vector.broadcast %286 : f32 to vector<24x128xf32>
    %288 = arith.mulf %285, %287 : vector<24x128xf32>
    %289 = arith.addf %284, %288 : vector<24x128xf32>
    %c22_78 = arith.constant 22 : index
    %290 = memref.load %arg4[%c22_78] : memref<72xf32, #tpu.memory_space<smem>>
    %291 = vector.broadcast %290 : f32 to vector<24x128xf32>
    %292 = arith.mulf %268, %291 : vector<24x128xf32>
    %293 = arith.addf %289, %292 : vector<24x128xf32>
    %c127_i32_79 = arith.constant 127 : i32
    %294 = tpu.dynamic_rotate %268 by %c127_i32_79 dim 1 : vector<24x128xf32>, i32 -> vector<24x128xf32>
    %c23_80 = arith.constant 23 : index
    %295 = memref.load %arg4[%c23_80] : memref<72xf32, #tpu.memory_space<smem>>
    %296 = vector.broadcast %295 : f32 to vector<24x128xf32>
    %297 = arith.mulf %294, %296 : vector<24x128xf32>
    %298 = arith.addf %293, %297 : vector<24x128xf32>
    %c1_i32_81 = arith.constant 1 : i32
    %299 = tpu.dynamic_rotate %270 by %c1_i32_81 dim 1 : vector<24x128xf32>, i32 -> vector<24x128xf32>
    %c24_82 = arith.constant 24 : index
    %300 = memref.load %arg4[%c24_82] : memref<72xf32, #tpu.memory_space<smem>>
    %301 = vector.broadcast %300 : f32 to vector<24x128xf32>
    %302 = arith.mulf %299, %301 : vector<24x128xf32>
    %303 = arith.addf %298, %302 : vector<24x128xf32>
    %c25_83 = arith.constant 25 : index
    %304 = memref.load %arg4[%c25_83] : memref<72xf32, #tpu.memory_space<smem>>
    %305 = vector.broadcast %304 : f32 to vector<24x128xf32>
    %306 = arith.mulf %270, %305 : vector<24x128xf32>
    %307 = arith.addf %303, %306 : vector<24x128xf32>
    %c127_i32_84 = arith.constant 127 : i32
    %308 = tpu.dynamic_rotate %270 by %c127_i32_84 dim 1 : vector<24x128xf32>, i32 -> vector<24x128xf32>
    %c26_85 = arith.constant 26 : index
    %309 = memref.load %arg4[%c26_85] : memref<72xf32, #tpu.memory_space<smem>>
    %310 = vector.broadcast %309 : f32 to vector<24x128xf32>
    %311 = arith.mulf %308, %310 : vector<24x128xf32>
    %312 = arith.addf %307, %311 : vector<24x128xf32>
    %c1_i32_86 = arith.constant 1 : i32
    %313 = tpu.dynamic_rotate %33 by %c1_i32_86 dim 1 : vector<24x128xf32>, i32 -> vector<24x128xf32>
    %c27 = arith.constant 27 : index
    %314 = memref.load %arg2[%c27] : memref<72xf32, #tpu.memory_space<smem>>
    %315 = vector.broadcast %314 : f32 to vector<24x128xf32>
    %316 = arith.mulf %313, %315 : vector<24x128xf32>
    %c28 = arith.constant 28 : index
    %317 = memref.load %arg2[%c28] : memref<72xf32, #tpu.memory_space<smem>>
    %318 = vector.broadcast %317 : f32 to vector<24x128xf32>
    %319 = arith.mulf %33, %318 : vector<24x128xf32>
    %320 = arith.addf %316, %319 : vector<24x128xf32>
    %c127_i32_87 = arith.constant 127 : i32
    %321 = tpu.dynamic_rotate %33 by %c127_i32_87 dim 1 : vector<24x128xf32>, i32 -> vector<24x128xf32>
    %c29 = arith.constant 29 : index
    %322 = memref.load %arg2[%c29] : memref<72xf32, #tpu.memory_space<smem>>
    %323 = vector.broadcast %322 : f32 to vector<24x128xf32>
    %324 = arith.mulf %321, %323 : vector<24x128xf32>
    %325 = arith.addf %320, %324 : vector<24x128xf32>
    %c1_i32_88 = arith.constant 1 : i32
    %326 = tpu.dynamic_rotate %32 by %c1_i32_88 dim 1 : vector<24x128xf32>, i32 -> vector<24x128xf32>
    %c30 = arith.constant 30 : index
    %327 = memref.load %arg2[%c30] : memref<72xf32, #tpu.memory_space<smem>>
    %328 = vector.broadcast %327 : f32 to vector<24x128xf32>
    %329 = arith.mulf %326, %328 : vector<24x128xf32>
    %330 = arith.addf %325, %329 : vector<24x128xf32>
    %c31 = arith.constant 31 : index
    %331 = memref.load %arg2[%c31] : memref<72xf32, #tpu.memory_space<smem>>
    %332 = vector.broadcast %331 : f32 to vector<24x128xf32>
    %333 = arith.mulf %32, %332 : vector<24x128xf32>
    %334 = arith.addf %330, %333 : vector<24x128xf32>
    %c127_i32_89 = arith.constant 127 : i32
    %335 = tpu.dynamic_rotate %32 by %c127_i32_89 dim 1 : vector<24x128xf32>, i32 -> vector<24x128xf32>
    %c32 = arith.constant 32 : index
    %336 = memref.load %arg2[%c32] : memref<72xf32, #tpu.memory_space<smem>>
    %337 = vector.broadcast %336 : f32 to vector<24x128xf32>
    %338 = arith.mulf %335, %337 : vector<24x128xf32>
    %339 = arith.addf %334, %338 : vector<24x128xf32>
    %c1_i32_90 = arith.constant 1 : i32
    %340 = tpu.dynamic_rotate %34 by %c1_i32_90 dim 1 : vector<24x128xf32>, i32 -> vector<24x128xf32>
    %c33 = arith.constant 33 : index
    %341 = memref.load %arg2[%c33] : memref<72xf32, #tpu.memory_space<smem>>
    %342 = vector.broadcast %341 : f32 to vector<24x128xf32>
    %343 = arith.mulf %340, %342 : vector<24x128xf32>
    %344 = arith.addf %339, %343 : vector<24x128xf32>
    %c34 = arith.constant 34 : index
    %345 = memref.load %arg2[%c34] : memref<72xf32, #tpu.memory_space<smem>>
    %346 = vector.broadcast %345 : f32 to vector<24x128xf32>
    %347 = arith.mulf %34, %346 : vector<24x128xf32>
    %348 = arith.addf %344, %347 : vector<24x128xf32>
    %c127_i32_91 = arith.constant 127 : i32
    %349 = tpu.dynamic_rotate %34 by %c127_i32_91 dim 1 : vector<24x128xf32>, i32 -> vector<24x128xf32>
    %c35 = arith.constant 35 : index
    %350 = memref.load %arg2[%c35] : memref<72xf32, #tpu.memory_space<smem>>
    %351 = vector.broadcast %350 : f32 to vector<24x128xf32>
    %352 = arith.mulf %349, %351 : vector<24x128xf32>
    %353 = arith.addf %348, %352 : vector<24x128xf32>
    %c3_92 = arith.constant 3 : index
    %354 = memref.load %arg3[%c3_92] : memref<8xf32, #tpu.memory_space<smem>>
    %355 = vector.broadcast %354 : f32 to vector<24x128xf32>
    %356 = arith.addf %353, %355 : vector<24x128xf32>
    %cst_93 = arith.constant 0.000000e+00 : f32
    %357 = vector.broadcast %cst_93 : f32 to vector<24x128xf32>
    %358 = arith.maximumf %356, %357 : vector<24x128xf32>
    %cst_94 = arith.constant 0.000000e+00 : f32
    %359 = vector.broadcast %cst_94 : f32 to vector<24x128xf32>
    %360 = arith.select %31, %358, %359 : vector<24x128xi1>, vector<24x128xf32>
    %c1_i32_95 = arith.constant 1 : i32
    %361 = tpu.dynamic_rotate %360 by %c1_i32_95 dim 0 : vector<24x128xf32>, i32 -> vector<24x128xf32>
    %c23_i32_96 = arith.constant 23 : i32
    %362 = tpu.dynamic_rotate %360 by %c23_i32_96 dim 0 : vector<24x128xf32>, i32 -> vector<24x128xf32>
    %c1_i32_97 = arith.constant 1 : i32
    %363 = tpu.dynamic_rotate %361 by %c1_i32_97 dim 1 : vector<24x128xf32>, i32 -> vector<24x128xf32>
    %c27_98 = arith.constant 27 : index
    %364 = memref.load %arg4[%c27_98] : memref<72xf32, #tpu.memory_space<smem>>
    %365 = vector.broadcast %364 : f32 to vector<24x128xf32>
    %366 = arith.mulf %363, %365 : vector<24x128xf32>
    %367 = arith.addf %312, %366 : vector<24x128xf32>
    %c28_99 = arith.constant 28 : index
    %368 = memref.load %arg4[%c28_99] : memref<72xf32, #tpu.memory_space<smem>>
    %369 = vector.broadcast %368 : f32 to vector<24x128xf32>
    %370 = arith.mulf %361, %369 : vector<24x128xf32>
    %371 = arith.addf %367, %370 : vector<24x128xf32>
    %c127_i32_100 = arith.constant 127 : i32
    %372 = tpu.dynamic_rotate %361 by %c127_i32_100 dim 1 : vector<24x128xf32>, i32 -> vector<24x128xf32>
    %c29_101 = arith.constant 29 : index
    %373 = memref.load %arg4[%c29_101] : memref<72xf32, #tpu.memory_space<smem>>
    %374 = vector.broadcast %373 : f32 to vector<24x128xf32>
    %375 = arith.mulf %372, %374 : vector<24x128xf32>
    %376 = arith.addf %371, %375 : vector<24x128xf32>
    %c1_i32_102 = arith.constant 1 : i32
    %377 = tpu.dynamic_rotate %360 by %c1_i32_102 dim 1 : vector<24x128xf32>, i32 -> vector<24x128xf32>
    %c30_103 = arith.constant 30 : index
    %378 = memref.load %arg4[%c30_103] : memref<72xf32, #tpu.memory_space<smem>>
    %379 = vector.broadcast %378 : f32 to vector<24x128xf32>
    %380 = arith.mulf %377, %379 : vector<24x128xf32>
    %381 = arith.addf %376, %380 : vector<24x128xf32>
    %c31_104 = arith.constant 31 : index
    %382 = memref.load %arg4[%c31_104] : memref<72xf32, #tpu.memory_space<smem>>
    %383 = vector.broadcast %382 : f32 to vector<24x128xf32>
    %384 = arith.mulf %360, %383 : vector<24x128xf32>
    %385 = arith.addf %381, %384 : vector<24x128xf32>
    %c127_i32_105 = arith.constant 127 : i32
    %386 = tpu.dynamic_rotate %360 by %c127_i32_105 dim 1 : vector<24x128xf32>, i32 -> vector<24x128xf32>
    %c32_106 = arith.constant 32 : index
    %387 = memref.load %arg4[%c32_106] : memref<72xf32, #tpu.memory_space<smem>>
    %388 = vector.broadcast %387 : f32 to vector<24x128xf32>
    %389 = arith.mulf %386, %388 : vector<24x128xf32>
    %390 = arith.addf %385, %389 : vector<24x128xf32>
    %c1_i32_107 = arith.constant 1 : i32
    %391 = tpu.dynamic_rotate %362 by %c1_i32_107 dim 1 : vector<24x128xf32>, i32 -> vector<24x128xf32>
    %c33_108 = arith.constant 33 : index
    %392 = memref.load %arg4[%c33_108] : memref<72xf32, #tpu.memory_space<smem>>
    %393 = vector.broadcast %392 : f32 to vector<24x128xf32>
    %394 = arith.mulf %391, %393 : vector<24x128xf32>
    %395 = arith.addf %390, %394 : vector<24x128xf32>
    %c34_109 = arith.constant 34 : index
    %396 = memref.load %arg4[%c34_109] : memref<72xf32, #tpu.memory_space<smem>>
    %397 = vector.broadcast %396 : f32 to vector<24x128xf32>
    %398 = arith.mulf %362, %397 : vector<24x128xf32>
    %399 = arith.addf %395, %398 : vector<24x128xf32>
    %c127_i32_110 = arith.constant 127 : i32
    %400 = tpu.dynamic_rotate %362 by %c127_i32_110 dim 1 : vector<24x128xf32>, i32 -> vector<24x128xf32>
    %c35_111 = arith.constant 35 : index
    %401 = memref.load %arg4[%c35_111] : memref<72xf32, #tpu.memory_space<smem>>
    %402 = vector.broadcast %401 : f32 to vector<24x128xf32>
    %403 = arith.mulf %400, %402 : vector<24x128xf32>
    %404 = arith.addf %399, %403 : vector<24x128xf32>
    %c1_i32_112 = arith.constant 1 : i32
    %405 = tpu.dynamic_rotate %33 by %c1_i32_112 dim 1 : vector<24x128xf32>, i32 -> vector<24x128xf32>
    %c36 = arith.constant 36 : index
    %406 = memref.load %arg2[%c36] : memref<72xf32, #tpu.memory_space<smem>>
    %407 = vector.broadcast %406 : f32 to vector<24x128xf32>
    %408 = arith.mulf %405, %407 : vector<24x128xf32>
    %c37 = arith.constant 37 : index
    %409 = memref.load %arg2[%c37] : memref<72xf32, #tpu.memory_space<smem>>
    %410 = vector.broadcast %409 : f32 to vector<24x128xf32>
    %411 = arith.mulf %33, %410 : vector<24x128xf32>
    %412 = arith.addf %408, %411 : vector<24x128xf32>
    %c127_i32_113 = arith.constant 127 : i32
    %413 = tpu.dynamic_rotate %33 by %c127_i32_113 dim 1 : vector<24x128xf32>, i32 -> vector<24x128xf32>
    %c38 = arith.constant 38 : index
    %414 = memref.load %arg2[%c38] : memref<72xf32, #tpu.memory_space<smem>>
    %415 = vector.broadcast %414 : f32 to vector<24x128xf32>
    %416 = arith.mulf %413, %415 : vector<24x128xf32>
    %417 = arith.addf %412, %416 : vector<24x128xf32>
    %c1_i32_114 = arith.constant 1 : i32
    %418 = tpu.dynamic_rotate %32 by %c1_i32_114 dim 1 : vector<24x128xf32>, i32 -> vector<24x128xf32>
    %c39 = arith.constant 39 : index
    %419 = memref.load %arg2[%c39] : memref<72xf32, #tpu.memory_space<smem>>
    %420 = vector.broadcast %419 : f32 to vector<24x128xf32>
    %421 = arith.mulf %418, %420 : vector<24x128xf32>
    %422 = arith.addf %417, %421 : vector<24x128xf32>
    %c40 = arith.constant 40 : index
    %423 = memref.load %arg2[%c40] : memref<72xf32, #tpu.memory_space<smem>>
    %424 = vector.broadcast %423 : f32 to vector<24x128xf32>
    %425 = arith.mulf %32, %424 : vector<24x128xf32>
    %426 = arith.addf %422, %425 : vector<24x128xf32>
    %c127_i32_115 = arith.constant 127 : i32
    %427 = tpu.dynamic_rotate %32 by %c127_i32_115 dim 1 : vector<24x128xf32>, i32 -> vector<24x128xf32>
    %c41 = arith.constant 41 : index
    %428 = memref.load %arg2[%c41] : memref<72xf32, #tpu.memory_space<smem>>
    %429 = vector.broadcast %428 : f32 to vector<24x128xf32>
    %430 = arith.mulf %427, %429 : vector<24x128xf32>
    %431 = arith.addf %426, %430 : vector<24x128xf32>
    %c1_i32_116 = arith.constant 1 : i32
    %432 = tpu.dynamic_rotate %34 by %c1_i32_116 dim 1 : vector<24x128xf32>, i32 -> vector<24x128xf32>
    %c42 = arith.constant 42 : index
    %433 = memref.load %arg2[%c42] : memref<72xf32, #tpu.memory_space<smem>>
    %434 = vector.broadcast %433 : f32 to vector<24x128xf32>
    %435 = arith.mulf %432, %434 : vector<24x128xf32>
    %436 = arith.addf %431, %435 : vector<24x128xf32>
    %c43 = arith.constant 43 : index
    %437 = memref.load %arg2[%c43] : memref<72xf32, #tpu.memory_space<smem>>
    %438 = vector.broadcast %437 : f32 to vector<24x128xf32>
    %439 = arith.mulf %34, %438 : vector<24x128xf32>
    %440 = arith.addf %436, %439 : vector<24x128xf32>
    %c127_i32_117 = arith.constant 127 : i32
    %441 = tpu.dynamic_rotate %34 by %c127_i32_117 dim 1 : vector<24x128xf32>, i32 -> vector<24x128xf32>
    %c44 = arith.constant 44 : index
    %442 = memref.load %arg2[%c44] : memref<72xf32, #tpu.memory_space<smem>>
    %443 = vector.broadcast %442 : f32 to vector<24x128xf32>
    %444 = arith.mulf %441, %443 : vector<24x128xf32>
    %445 = arith.addf %440, %444 : vector<24x128xf32>
    %c4_118 = arith.constant 4 : index
    %446 = memref.load %arg3[%c4_118] : memref<8xf32, #tpu.memory_space<smem>>
    %447 = vector.broadcast %446 : f32 to vector<24x128xf32>
    %448 = arith.addf %445, %447 : vector<24x128xf32>
    %cst_119 = arith.constant 0.000000e+00 : f32
    %449 = vector.broadcast %cst_119 : f32 to vector<24x128xf32>
    %450 = arith.maximumf %448, %449 : vector<24x128xf32>
    %cst_120 = arith.constant 0.000000e+00 : f32
    %451 = vector.broadcast %cst_120 : f32 to vector<24x128xf32>
    %452 = arith.select %31, %450, %451 : vector<24x128xi1>, vector<24x128xf32>
    %c1_i32_121 = arith.constant 1 : i32
    %453 = tpu.dynamic_rotate %452 by %c1_i32_121 dim 0 : vector<24x128xf32>, i32 -> vector<24x128xf32>
    %c23_i32_122 = arith.constant 23 : i32
    %454 = tpu.dynamic_rotate %452 by %c23_i32_122 dim 0 : vector<24x128xf32>, i32 -> vector<24x128xf32>
    %c1_i32_123 = arith.constant 1 : i32
    %455 = tpu.dynamic_rotate %453 by %c1_i32_123 dim 1 : vector<24x128xf32>, i32 -> vector<24x128xf32>
    %c36_124 = arith.constant 36 : index
    %456 = memref.load %arg4[%c36_124] : memref<72xf32, #tpu.memory_space<smem>>
    %457 = vector.broadcast %456 : f32 to vector<24x128xf32>
    %458 = arith.mulf %455, %457 : vector<24x128xf32>
    %459 = arith.addf %404, %458 : vector<24x128xf32>
    %c37_125 = arith.constant 37 : index
    %460 = memref.load %arg4[%c37_125] : memref<72xf32, #tpu.memory_space<smem>>
    %461 = vector.broadcast %460 : f32 to vector<24x128xf32>
    %462 = arith.mulf %453, %461 : vector<24x128xf32>
    %463 = arith.addf %459, %462 : vector<24x128xf32>
    %c127_i32_126 = arith.constant 127 : i32
    %464 = tpu.dynamic_rotate %453 by %c127_i32_126 dim 1 : vector<24x128xf32>, i32 -> vector<24x128xf32>
    %c38_127 = arith.constant 38 : index
    %465 = memref.load %arg4[%c38_127] : memref<72xf32, #tpu.memory_space<smem>>
    %466 = vector.broadcast %465 : f32 to vector<24x128xf32>
    %467 = arith.mulf %464, %466 : vector<24x128xf32>
    %468 = arith.addf %463, %467 : vector<24x128xf32>
    %c1_i32_128 = arith.constant 1 : i32
    %469 = tpu.dynamic_rotate %452 by %c1_i32_128 dim 1 : vector<24x128xf32>, i32 -> vector<24x128xf32>
    %c39_129 = arith.constant 39 : index
    %470 = memref.load %arg4[%c39_129] : memref<72xf32, #tpu.memory_space<smem>>
    %471 = vector.broadcast %470 : f32 to vector<24x128xf32>
    %472 = arith.mulf %469, %471 : vector<24x128xf32>
    %473 = arith.addf %468, %472 : vector<24x128xf32>
    %c40_130 = arith.constant 40 : index
    %474 = memref.load %arg4[%c40_130] : memref<72xf32, #tpu.memory_space<smem>>
    %475 = vector.broadcast %474 : f32 to vector<24x128xf32>
    %476 = arith.mulf %452, %475 : vector<24x128xf32>
    %477 = arith.addf %473, %476 : vector<24x128xf32>
    %c127_i32_131 = arith.constant 127 : i32
    %478 = tpu.dynamic_rotate %452 by %c127_i32_131 dim 1 : vector<24x128xf32>, i32 -> vector<24x128xf32>
    %c41_132 = arith.constant 41 : index
    %479 = memref.load %arg4[%c41_132] : memref<72xf32, #tpu.memory_space<smem>>
    %480 = vector.broadcast %479 : f32 to vector<24x128xf32>
    %481 = arith.mulf %478, %480 : vector<24x128xf32>
    %482 = arith.addf %477, %481 : vector<24x128xf32>
    %c1_i32_133 = arith.constant 1 : i32
    %483 = tpu.dynamic_rotate %454 by %c1_i32_133 dim 1 : vector<24x128xf32>, i32 -> vector<24x128xf32>
    %c42_134 = arith.constant 42 : index
    %484 = memref.load %arg4[%c42_134] : memref<72xf32, #tpu.memory_space<smem>>
    %485 = vector.broadcast %484 : f32 to vector<24x128xf32>
    %486 = arith.mulf %483, %485 : vector<24x128xf32>
    %487 = arith.addf %482, %486 : vector<24x128xf32>
    %c43_135 = arith.constant 43 : index
    %488 = memref.load %arg4[%c43_135] : memref<72xf32, #tpu.memory_space<smem>>
    %489 = vector.broadcast %488 : f32 to vector<24x128xf32>
    %490 = arith.mulf %454, %489 : vector<24x128xf32>
    %491 = arith.addf %487, %490 : vector<24x128xf32>
    %c127_i32_136 = arith.constant 127 : i32
    %492 = tpu.dynamic_rotate %454 by %c127_i32_136 dim 1 : vector<24x128xf32>, i32 -> vector<24x128xf32>
    %c44_137 = arith.constant 44 : index
    %493 = memref.load %arg4[%c44_137] : memref<72xf32, #tpu.memory_space<smem>>
    %494 = vector.broadcast %493 : f32 to vector<24x128xf32>
    %495 = arith.mulf %492, %494 : vector<24x128xf32>
    %496 = arith.addf %491, %495 : vector<24x128xf32>
    %c1_i32_138 = arith.constant 1 : i32
    %497 = tpu.dynamic_rotate %33 by %c1_i32_138 dim 1 : vector<24x128xf32>, i32 -> vector<24x128xf32>
    %c45 = arith.constant 45 : index
    %498 = memref.load %arg2[%c45] : memref<72xf32, #tpu.memory_space<smem>>
    %499 = vector.broadcast %498 : f32 to vector<24x128xf32>
    %500 = arith.mulf %497, %499 : vector<24x128xf32>
    %c46 = arith.constant 46 : index
    %501 = memref.load %arg2[%c46] : memref<72xf32, #tpu.memory_space<smem>>
    %502 = vector.broadcast %501 : f32 to vector<24x128xf32>
    %503 = arith.mulf %33, %502 : vector<24x128xf32>
    %504 = arith.addf %500, %503 : vector<24x128xf32>
    %c127_i32_139 = arith.constant 127 : i32
    %505 = tpu.dynamic_rotate %33 by %c127_i32_139 dim 1 : vector<24x128xf32>, i32 -> vector<24x128xf32>
    %c47 = arith.constant 47 : index
    %506 = memref.load %arg2[%c47] : memref<72xf32, #tpu.memory_space<smem>>
    %507 = vector.broadcast %506 : f32 to vector<24x128xf32>
    %508 = arith.mulf %505, %507 : vector<24x128xf32>
    %509 = arith.addf %504, %508 : vector<24x128xf32>
    %c1_i32_140 = arith.constant 1 : i32
    %510 = tpu.dynamic_rotate %32 by %c1_i32_140 dim 1 : vector<24x128xf32>, i32 -> vector<24x128xf32>
    %c48 = arith.constant 48 : index
    %511 = memref.load %arg2[%c48] : memref<72xf32, #tpu.memory_space<smem>>
    %512 = vector.broadcast %511 : f32 to vector<24x128xf32>
    %513 = arith.mulf %510, %512 : vector<24x128xf32>
    %514 = arith.addf %509, %513 : vector<24x128xf32>
    %c49 = arith.constant 49 : index
    %515 = memref.load %arg2[%c49] : memref<72xf32, #tpu.memory_space<smem>>
    %516 = vector.broadcast %515 : f32 to vector<24x128xf32>
    %517 = arith.mulf %32, %516 : vector<24x128xf32>
    %518 = arith.addf %514, %517 : vector<24x128xf32>
    %c127_i32_141 = arith.constant 127 : i32
    %519 = tpu.dynamic_rotate %32 by %c127_i32_141 dim 1 : vector<24x128xf32>, i32 -> vector<24x128xf32>
    %c50 = arith.constant 50 : index
    %520 = memref.load %arg2[%c50] : memref<72xf32, #tpu.memory_space<smem>>
    %521 = vector.broadcast %520 : f32 to vector<24x128xf32>
    %522 = arith.mulf %519, %521 : vector<24x128xf32>
    %523 = arith.addf %518, %522 : vector<24x128xf32>
    %c1_i32_142 = arith.constant 1 : i32
    %524 = tpu.dynamic_rotate %34 by %c1_i32_142 dim 1 : vector<24x128xf32>, i32 -> vector<24x128xf32>
    %c51 = arith.constant 51 : index
    %525 = memref.load %arg2[%c51] : memref<72xf32, #tpu.memory_space<smem>>
    %526 = vector.broadcast %525 : f32 to vector<24x128xf32>
    %527 = arith.mulf %524, %526 : vector<24x128xf32>
    %528 = arith.addf %523, %527 : vector<24x128xf32>
    %c52 = arith.constant 52 : index
    %529 = memref.load %arg2[%c52] : memref<72xf32, #tpu.memory_space<smem>>
    %530 = vector.broadcast %529 : f32 to vector<24x128xf32>
    %531 = arith.mulf %34, %530 : vector<24x128xf32>
    %532 = arith.addf %528, %531 : vector<24x128xf32>
    %c127_i32_143 = arith.constant 127 : i32
    %533 = tpu.dynamic_rotate %34 by %c127_i32_143 dim 1 : vector<24x128xf32>, i32 -> vector<24x128xf32>
    %c53 = arith.constant 53 : index
    %534 = memref.load %arg2[%c53] : memref<72xf32, #tpu.memory_space<smem>>
    %535 = vector.broadcast %534 : f32 to vector<24x128xf32>
    %536 = arith.mulf %533, %535 : vector<24x128xf32>
    %537 = arith.addf %532, %536 : vector<24x128xf32>
    %c5_144 = arith.constant 5 : index
    %538 = memref.load %arg3[%c5_144] : memref<8xf32, #tpu.memory_space<smem>>
    %539 = vector.broadcast %538 : f32 to vector<24x128xf32>
    %540 = arith.addf %537, %539 : vector<24x128xf32>
    %cst_145 = arith.constant 0.000000e+00 : f32
    %541 = vector.broadcast %cst_145 : f32 to vector<24x128xf32>
    %542 = arith.maximumf %540, %541 : vector<24x128xf32>
    %cst_146 = arith.constant 0.000000e+00 : f32
    %543 = vector.broadcast %cst_146 : f32 to vector<24x128xf32>
    %544 = arith.select %31, %542, %543 : vector<24x128xi1>, vector<24x128xf32>
    %c1_i32_147 = arith.constant 1 : i32
    %545 = tpu.dynamic_rotate %544 by %c1_i32_147 dim 0 : vector<24x128xf32>, i32 -> vector<24x128xf32>
    %c23_i32_148 = arith.constant 23 : i32
    %546 = tpu.dynamic_rotate %544 by %c23_i32_148 dim 0 : vector<24x128xf32>, i32 -> vector<24x128xf32>
    %c1_i32_149 = arith.constant 1 : i32
    %547 = tpu.dynamic_rotate %545 by %c1_i32_149 dim 1 : vector<24x128xf32>, i32 -> vector<24x128xf32>
    %c45_150 = arith.constant 45 : index
    %548 = memref.load %arg4[%c45_150] : memref<72xf32, #tpu.memory_space<smem>>
    %549 = vector.broadcast %548 : f32 to vector<24x128xf32>
    %550 = arith.mulf %547, %549 : vector<24x128xf32>
    %551 = arith.addf %496, %550 : vector<24x128xf32>
    %c46_151 = arith.constant 46 : index
    %552 = memref.load %arg4[%c46_151] : memref<72xf32, #tpu.memory_space<smem>>
    %553 = vector.broadcast %552 : f32 to vector<24x128xf32>
    %554 = arith.mulf %545, %553 : vector<24x128xf32>
    %555 = arith.addf %551, %554 : vector<24x128xf32>
    %c127_i32_152 = arith.constant 127 : i32
    %556 = tpu.dynamic_rotate %545 by %c127_i32_152 dim 1 : vector<24x128xf32>, i32 -> vector<24x128xf32>
    %c47_153 = arith.constant 47 : index
    %557 = memref.load %arg4[%c47_153] : memref<72xf32, #tpu.memory_space<smem>>
    %558 = vector.broadcast %557 : f32 to vector<24x128xf32>
    %559 = arith.mulf %556, %558 : vector<24x128xf32>
    %560 = arith.addf %555, %559 : vector<24x128xf32>
    %c1_i32_154 = arith.constant 1 : i32
    %561 = tpu.dynamic_rotate %544 by %c1_i32_154 dim 1 : vector<24x128xf32>, i32 -> vector<24x128xf32>
    %c48_155 = arith.constant 48 : index
    %562 = memref.load %arg4[%c48_155] : memref<72xf32, #tpu.memory_space<smem>>
    %563 = vector.broadcast %562 : f32 to vector<24x128xf32>
    %564 = arith.mulf %561, %563 : vector<24x128xf32>
    %565 = arith.addf %560, %564 : vector<24x128xf32>
    %c49_156 = arith.constant 49 : index
    %566 = memref.load %arg4[%c49_156] : memref<72xf32, #tpu.memory_space<smem>>
    %567 = vector.broadcast %566 : f32 to vector<24x128xf32>
    %568 = arith.mulf %544, %567 : vector<24x128xf32>
    %569 = arith.addf %565, %568 : vector<24x128xf32>
    %c127_i32_157 = arith.constant 127 : i32
    %570 = tpu.dynamic_rotate %544 by %c127_i32_157 dim 1 : vector<24x128xf32>, i32 -> vector<24x128xf32>
    %c50_158 = arith.constant 50 : index
    %571 = memref.load %arg4[%c50_158] : memref<72xf32, #tpu.memory_space<smem>>
    %572 = vector.broadcast %571 : f32 to vector<24x128xf32>
    %573 = arith.mulf %570, %572 : vector<24x128xf32>
    %574 = arith.addf %569, %573 : vector<24x128xf32>
    %c1_i32_159 = arith.constant 1 : i32
    %575 = tpu.dynamic_rotate %546 by %c1_i32_159 dim 1 : vector<24x128xf32>, i32 -> vector<24x128xf32>
    %c51_160 = arith.constant 51 : index
    %576 = memref.load %arg4[%c51_160] : memref<72xf32, #tpu.memory_space<smem>>
    %577 = vector.broadcast %576 : f32 to vector<24x128xf32>
    %578 = arith.mulf %575, %577 : vector<24x128xf32>
    %579 = arith.addf %574, %578 : vector<24x128xf32>
    %c52_161 = arith.constant 52 : index
    %580 = memref.load %arg4[%c52_161] : memref<72xf32, #tpu.memory_space<smem>>
    %581 = vector.broadcast %580 : f32 to vector<24x128xf32>
    %582 = arith.mulf %546, %581 : vector<24x128xf32>
    %583 = arith.addf %579, %582 : vector<24x128xf32>
    %c127_i32_162 = arith.constant 127 : i32
    %584 = tpu.dynamic_rotate %546 by %c127_i32_162 dim 1 : vector<24x128xf32>, i32 -> vector<24x128xf32>
    %c53_163 = arith.constant 53 : index
    %585 = memref.load %arg4[%c53_163] : memref<72xf32, #tpu.memory_space<smem>>
    %586 = vector.broadcast %585 : f32 to vector<24x128xf32>
    %587 = arith.mulf %584, %586 : vector<24x128xf32>
    %588 = arith.addf %583, %587 : vector<24x128xf32>
    %c1_i32_164 = arith.constant 1 : i32
    %589 = tpu.dynamic_rotate %33 by %c1_i32_164 dim 1 : vector<24x128xf32>, i32 -> vector<24x128xf32>
    %c54 = arith.constant 54 : index
    %590 = memref.load %arg2[%c54] : memref<72xf32, #tpu.memory_space<smem>>
    %591 = vector.broadcast %590 : f32 to vector<24x128xf32>
    %592 = arith.mulf %589, %591 : vector<24x128xf32>
    %c55 = arith.constant 55 : index
    %593 = memref.load %arg2[%c55] : memref<72xf32, #tpu.memory_space<smem>>
    %594 = vector.broadcast %593 : f32 to vector<24x128xf32>
    %595 = arith.mulf %33, %594 : vector<24x128xf32>
    %596 = arith.addf %592, %595 : vector<24x128xf32>
    %c127_i32_165 = arith.constant 127 : i32
    %597 = tpu.dynamic_rotate %33 by %c127_i32_165 dim 1 : vector<24x128xf32>, i32 -> vector<24x128xf32>
    %c56 = arith.constant 56 : index
    %598 = memref.load %arg2[%c56] : memref<72xf32, #tpu.memory_space<smem>>
    %599 = vector.broadcast %598 : f32 to vector<24x128xf32>
    %600 = arith.mulf %597, %599 : vector<24x128xf32>
    %601 = arith.addf %596, %600 : vector<24x128xf32>
    %c1_i32_166 = arith.constant 1 : i32
    %602 = tpu.dynamic_rotate %32 by %c1_i32_166 dim 1 : vector<24x128xf32>, i32 -> vector<24x128xf32>
    %c57 = arith.constant 57 : index
    %603 = memref.load %arg2[%c57] : memref<72xf32, #tpu.memory_space<smem>>
    %604 = vector.broadcast %603 : f32 to vector<24x128xf32>
    %605 = arith.mulf %602, %604 : vector<24x128xf32>
    %606 = arith.addf %601, %605 : vector<24x128xf32>
    %c58 = arith.constant 58 : index
    %607 = memref.load %arg2[%c58] : memref<72xf32, #tpu.memory_space<smem>>
    %608 = vector.broadcast %607 : f32 to vector<24x128xf32>
    %609 = arith.mulf %32, %608 : vector<24x128xf32>
    %610 = arith.addf %606, %609 : vector<24x128xf32>
    %c127_i32_167 = arith.constant 127 : i32
    %611 = tpu.dynamic_rotate %32 by %c127_i32_167 dim 1 : vector<24x128xf32>, i32 -> vector<24x128xf32>
    %c59 = arith.constant 59 : index
    %612 = memref.load %arg2[%c59] : memref<72xf32, #tpu.memory_space<smem>>
    %613 = vector.broadcast %612 : f32 to vector<24x128xf32>
    %614 = arith.mulf %611, %613 : vector<24x128xf32>
    %615 = arith.addf %610, %614 : vector<24x128xf32>
    %c1_i32_168 = arith.constant 1 : i32
    %616 = tpu.dynamic_rotate %34 by %c1_i32_168 dim 1 : vector<24x128xf32>, i32 -> vector<24x128xf32>
    %c60 = arith.constant 60 : index
    %617 = memref.load %arg2[%c60] : memref<72xf32, #tpu.memory_space<smem>>
    %618 = vector.broadcast %617 : f32 to vector<24x128xf32>
    %619 = arith.mulf %616, %618 : vector<24x128xf32>
    %620 = arith.addf %615, %619 : vector<24x128xf32>
    %c61 = arith.constant 61 : index
    %621 = memref.load %arg2[%c61] : memref<72xf32, #tpu.memory_space<smem>>
    %622 = vector.broadcast %621 : f32 to vector<24x128xf32>
    %623 = arith.mulf %34, %622 : vector<24x128xf32>
    %624 = arith.addf %620, %623 : vector<24x128xf32>
    %c127_i32_169 = arith.constant 127 : i32
    %625 = tpu.dynamic_rotate %34 by %c127_i32_169 dim 1 : vector<24x128xf32>, i32 -> vector<24x128xf32>
    %c62 = arith.constant 62 : index
    %626 = memref.load %arg2[%c62] : memref<72xf32, #tpu.memory_space<smem>>
    %627 = vector.broadcast %626 : f32 to vector<24x128xf32>
    %628 = arith.mulf %625, %627 : vector<24x128xf32>
    %629 = arith.addf %624, %628 : vector<24x128xf32>
    %c6_170 = arith.constant 6 : index
    %630 = memref.load %arg3[%c6_170] : memref<8xf32, #tpu.memory_space<smem>>
    %631 = vector.broadcast %630 : f32 to vector<24x128xf32>
    %632 = arith.addf %629, %631 : vector<24x128xf32>
    %cst_171 = arith.constant 0.000000e+00 : f32
    %633 = vector.broadcast %cst_171 : f32 to vector<24x128xf32>
    %634 = arith.maximumf %632, %633 : vector<24x128xf32>
    %cst_172 = arith.constant 0.000000e+00 : f32
    %635 = vector.broadcast %cst_172 : f32 to vector<24x128xf32>
    %636 = arith.select %31, %634, %635 : vector<24x128xi1>, vector<24x128xf32>
    %c1_i32_173 = arith.constant 1 : i32
    %637 = tpu.dynamic_rotate %636 by %c1_i32_173 dim 0 : vector<24x128xf32>, i32 -> vector<24x128xf32>
    %c23_i32_174 = arith.constant 23 : i32
    %638 = tpu.dynamic_rotate %636 by %c23_i32_174 dim 0 : vector<24x128xf32>, i32 -> vector<24x128xf32>
    %c1_i32_175 = arith.constant 1 : i32
    %639 = tpu.dynamic_rotate %637 by %c1_i32_175 dim 1 : vector<24x128xf32>, i32 -> vector<24x128xf32>
    %c54_176 = arith.constant 54 : index
    %640 = memref.load %arg4[%c54_176] : memref<72xf32, #tpu.memory_space<smem>>
    %641 = vector.broadcast %640 : f32 to vector<24x128xf32>
    %642 = arith.mulf %639, %641 : vector<24x128xf32>
    %643 = arith.addf %588, %642 : vector<24x128xf32>
    %c55_177 = arith.constant 55 : index
    %644 = memref.load %arg4[%c55_177] : memref<72xf32, #tpu.memory_space<smem>>
    %645 = vector.broadcast %644 : f32 to vector<24x128xf32>
    %646 = arith.mulf %637, %645 : vector<24x128xf32>
    %647 = arith.addf %643, %646 : vector<24x128xf32>
    %c127_i32_178 = arith.constant 127 : i32
    %648 = tpu.dynamic_rotate %637 by %c127_i32_178 dim 1 : vector<24x128xf32>, i32 -> vector<24x128xf32>
    %c56_179 = arith.constant 56 : index
    %649 = memref.load %arg4[%c56_179] : memref<72xf32, #tpu.memory_space<smem>>
    %650 = vector.broadcast %649 : f32 to vector<24x128xf32>
    %651 = arith.mulf %648, %650 : vector<24x128xf32>
    %652 = arith.addf %647, %651 : vector<24x128xf32>
    %c1_i32_180 = arith.constant 1 : i32
    %653 = tpu.dynamic_rotate %636 by %c1_i32_180 dim 1 : vector<24x128xf32>, i32 -> vector<24x128xf32>
    %c57_181 = arith.constant 57 : index
    %654 = memref.load %arg4[%c57_181] : memref<72xf32, #tpu.memory_space<smem>>
    %655 = vector.broadcast %654 : f32 to vector<24x128xf32>
    %656 = arith.mulf %653, %655 : vector<24x128xf32>
    %657 = arith.addf %652, %656 : vector<24x128xf32>
    %c58_182 = arith.constant 58 : index
    %658 = memref.load %arg4[%c58_182] : memref<72xf32, #tpu.memory_space<smem>>
    %659 = vector.broadcast %658 : f32 to vector<24x128xf32>
    %660 = arith.mulf %636, %659 : vector<24x128xf32>
    %661 = arith.addf %657, %660 : vector<24x128xf32>
    %c127_i32_183 = arith.constant 127 : i32
    %662 = tpu.dynamic_rotate %636 by %c127_i32_183 dim 1 : vector<24x128xf32>, i32 -> vector<24x128xf32>
    %c59_184 = arith.constant 59 : index
    %663 = memref.load %arg4[%c59_184] : memref<72xf32, #tpu.memory_space<smem>>
    %664 = vector.broadcast %663 : f32 to vector<24x128xf32>
    %665 = arith.mulf %662, %664 : vector<24x128xf32>
    %666 = arith.addf %661, %665 : vector<24x128xf32>
    %c1_i32_185 = arith.constant 1 : i32
    %667 = tpu.dynamic_rotate %638 by %c1_i32_185 dim 1 : vector<24x128xf32>, i32 -> vector<24x128xf32>
    %c60_186 = arith.constant 60 : index
    %668 = memref.load %arg4[%c60_186] : memref<72xf32, #tpu.memory_space<smem>>
    %669 = vector.broadcast %668 : f32 to vector<24x128xf32>
    %670 = arith.mulf %667, %669 : vector<24x128xf32>
    %671 = arith.addf %666, %670 : vector<24x128xf32>
    %c61_187 = arith.constant 61 : index
    %672 = memref.load %arg4[%c61_187] : memref<72xf32, #tpu.memory_space<smem>>
    %673 = vector.broadcast %672 : f32 to vector<24x128xf32>
    %674 = arith.mulf %638, %673 : vector<24x128xf32>
    %675 = arith.addf %671, %674 : vector<24x128xf32>
    %c127_i32_188 = arith.constant 127 : i32
    %676 = tpu.dynamic_rotate %638 by %c127_i32_188 dim 1 : vector<24x128xf32>, i32 -> vector<24x128xf32>
    %c62_189 = arith.constant 62 : index
    %677 = memref.load %arg4[%c62_189] : memref<72xf32, #tpu.memory_space<smem>>
    %678 = vector.broadcast %677 : f32 to vector<24x128xf32>
    %679 = arith.mulf %676, %678 : vector<24x128xf32>
    %680 = arith.addf %675, %679 : vector<24x128xf32>
    %c1_i32_190 = arith.constant 1 : i32
    %681 = tpu.dynamic_rotate %33 by %c1_i32_190 dim 1 : vector<24x128xf32>, i32 -> vector<24x128xf32>
    %c63 = arith.constant 63 : index
    %682 = memref.load %arg2[%c63] : memref<72xf32, #tpu.memory_space<smem>>
    %683 = vector.broadcast %682 : f32 to vector<24x128xf32>
    %684 = arith.mulf %681, %683 : vector<24x128xf32>
    %c64 = arith.constant 64 : index
    %685 = memref.load %arg2[%c64] : memref<72xf32, #tpu.memory_space<smem>>
    %686 = vector.broadcast %685 : f32 to vector<24x128xf32>
    %687 = arith.mulf %33, %686 : vector<24x128xf32>
    %688 = arith.addf %684, %687 : vector<24x128xf32>
    %c127_i32_191 = arith.constant 127 : i32
    %689 = tpu.dynamic_rotate %33 by %c127_i32_191 dim 1 : vector<24x128xf32>, i32 -> vector<24x128xf32>
    %c65 = arith.constant 65 : index
    %690 = memref.load %arg2[%c65] : memref<72xf32, #tpu.memory_space<smem>>
    %691 = vector.broadcast %690 : f32 to vector<24x128xf32>
    %692 = arith.mulf %689, %691 : vector<24x128xf32>
    %693 = arith.addf %688, %692 : vector<24x128xf32>
    %c1_i32_192 = arith.constant 1 : i32
    %694 = tpu.dynamic_rotate %32 by %c1_i32_192 dim 1 : vector<24x128xf32>, i32 -> vector<24x128xf32>
    %c66 = arith.constant 66 : index
    %695 = memref.load %arg2[%c66] : memref<72xf32, #tpu.memory_space<smem>>
    %696 = vector.broadcast %695 : f32 to vector<24x128xf32>
    %697 = arith.mulf %694, %696 : vector<24x128xf32>
    %698 = arith.addf %693, %697 : vector<24x128xf32>
    %c67 = arith.constant 67 : index
    %699 = memref.load %arg2[%c67] : memref<72xf32, #tpu.memory_space<smem>>
    %700 = vector.broadcast %699 : f32 to vector<24x128xf32>
    %701 = arith.mulf %32, %700 : vector<24x128xf32>
    %702 = arith.addf %698, %701 : vector<24x128xf32>
    %c127_i32_193 = arith.constant 127 : i32
    %703 = tpu.dynamic_rotate %32 by %c127_i32_193 dim 1 : vector<24x128xf32>, i32 -> vector<24x128xf32>
    %c68 = arith.constant 68 : index
    %704 = memref.load %arg2[%c68] : memref<72xf32, #tpu.memory_space<smem>>
    %705 = vector.broadcast %704 : f32 to vector<24x128xf32>
    %706 = arith.mulf %703, %705 : vector<24x128xf32>
    %707 = arith.addf %702, %706 : vector<24x128xf32>
    %c1_i32_194 = arith.constant 1 : i32
    %708 = tpu.dynamic_rotate %34 by %c1_i32_194 dim 1 : vector<24x128xf32>, i32 -> vector<24x128xf32>
    %c69 = arith.constant 69 : index
    %709 = memref.load %arg2[%c69] : memref<72xf32, #tpu.memory_space<smem>>
    %710 = vector.broadcast %709 : f32 to vector<24x128xf32>
    %711 = arith.mulf %708, %710 : vector<24x128xf32>
    %712 = arith.addf %707, %711 : vector<24x128xf32>
    %c70 = arith.constant 70 : index
    %713 = memref.load %arg2[%c70] : memref<72xf32, #tpu.memory_space<smem>>
    %714 = vector.broadcast %713 : f32 to vector<24x128xf32>
    %715 = arith.mulf %34, %714 : vector<24x128xf32>
    %716 = arith.addf %712, %715 : vector<24x128xf32>
    %c127_i32_195 = arith.constant 127 : i32
    %717 = tpu.dynamic_rotate %34 by %c127_i32_195 dim 1 : vector<24x128xf32>, i32 -> vector<24x128xf32>
    %c71 = arith.constant 71 : index
    %718 = memref.load %arg2[%c71] : memref<72xf32, #tpu.memory_space<smem>>
    %719 = vector.broadcast %718 : f32 to vector<24x128xf32>
    %720 = arith.mulf %717, %719 : vector<24x128xf32>
    %721 = arith.addf %716, %720 : vector<24x128xf32>
    %c7_196 = arith.constant 7 : index
    %722 = memref.load %arg3[%c7_196] : memref<8xf32, #tpu.memory_space<smem>>
    %723 = vector.broadcast %722 : f32 to vector<24x128xf32>
    %724 = arith.addf %721, %723 : vector<24x128xf32>
    %cst_197 = arith.constant 0.000000e+00 : f32
    %725 = vector.broadcast %cst_197 : f32 to vector<24x128xf32>
    %726 = arith.maximumf %724, %725 : vector<24x128xf32>
    %cst_198 = arith.constant 0.000000e+00 : f32
    %727 = vector.broadcast %cst_198 : f32 to vector<24x128xf32>
    %728 = arith.select %31, %726, %727 : vector<24x128xi1>, vector<24x128xf32>
    %c1_i32_199 = arith.constant 1 : i32
    %729 = tpu.dynamic_rotate %728 by %c1_i32_199 dim 0 : vector<24x128xf32>, i32 -> vector<24x128xf32>
    %c23_i32_200 = arith.constant 23 : i32
    %730 = tpu.dynamic_rotate %728 by %c23_i32_200 dim 0 : vector<24x128xf32>, i32 -> vector<24x128xf32>
    %c1_i32_201 = arith.constant 1 : i32
    %731 = tpu.dynamic_rotate %729 by %c1_i32_201 dim 1 : vector<24x128xf32>, i32 -> vector<24x128xf32>
    %c63_202 = arith.constant 63 : index
    %732 = memref.load %arg4[%c63_202] : memref<72xf32, #tpu.memory_space<smem>>
    %733 = vector.broadcast %732 : f32 to vector<24x128xf32>
    %734 = arith.mulf %731, %733 : vector<24x128xf32>
    %735 = arith.addf %680, %734 : vector<24x128xf32>
    %c64_203 = arith.constant 64 : index
    %736 = memref.load %arg4[%c64_203] : memref<72xf32, #tpu.memory_space<smem>>
    %737 = vector.broadcast %736 : f32 to vector<24x128xf32>
    %738 = arith.mulf %729, %737 : vector<24x128xf32>
    %739 = arith.addf %735, %738 : vector<24x128xf32>
    %c127_i32_204 = arith.constant 127 : i32
    %740 = tpu.dynamic_rotate %729 by %c127_i32_204 dim 1 : vector<24x128xf32>, i32 -> vector<24x128xf32>
    %c65_205 = arith.constant 65 : index
    %741 = memref.load %arg4[%c65_205] : memref<72xf32, #tpu.memory_space<smem>>
    %742 = vector.broadcast %741 : f32 to vector<24x128xf32>
    %743 = arith.mulf %740, %742 : vector<24x128xf32>
    %744 = arith.addf %739, %743 : vector<24x128xf32>
    %c1_i32_206 = arith.constant 1 : i32
    %745 = tpu.dynamic_rotate %728 by %c1_i32_206 dim 1 : vector<24x128xf32>, i32 -> vector<24x128xf32>
    %c66_207 = arith.constant 66 : index
    %746 = memref.load %arg4[%c66_207] : memref<72xf32, #tpu.memory_space<smem>>
    %747 = vector.broadcast %746 : f32 to vector<24x128xf32>
    %748 = arith.mulf %745, %747 : vector<24x128xf32>
    %749 = arith.addf %744, %748 : vector<24x128xf32>
    %c67_208 = arith.constant 67 : index
    %750 = memref.load %arg4[%c67_208] : memref<72xf32, #tpu.memory_space<smem>>
    %751 = vector.broadcast %750 : f32 to vector<24x128xf32>
    %752 = arith.mulf %728, %751 : vector<24x128xf32>
    %753 = arith.addf %749, %752 : vector<24x128xf32>
    %c127_i32_209 = arith.constant 127 : i32
    %754 = tpu.dynamic_rotate %728 by %c127_i32_209 dim 1 : vector<24x128xf32>, i32 -> vector<24x128xf32>
    %c68_210 = arith.constant 68 : index
    %755 = memref.load %arg4[%c68_210] : memref<72xf32, #tpu.memory_space<smem>>
    %756 = vector.broadcast %755 : f32 to vector<24x128xf32>
    %757 = arith.mulf %754, %756 : vector<24x128xf32>
    %758 = arith.addf %753, %757 : vector<24x128xf32>
    %c1_i32_211 = arith.constant 1 : i32
    %759 = tpu.dynamic_rotate %730 by %c1_i32_211 dim 1 : vector<24x128xf32>, i32 -> vector<24x128xf32>
    %c69_212 = arith.constant 69 : index
    %760 = memref.load %arg4[%c69_212] : memref<72xf32, #tpu.memory_space<smem>>
    %761 = vector.broadcast %760 : f32 to vector<24x128xf32>
    %762 = arith.mulf %759, %761 : vector<24x128xf32>
    %763 = arith.addf %758, %762 : vector<24x128xf32>
    %c70_213 = arith.constant 70 : index
    %764 = memref.load %arg4[%c70_213] : memref<72xf32, #tpu.memory_space<smem>>
    %765 = vector.broadcast %764 : f32 to vector<24x128xf32>
    %766 = arith.mulf %730, %765 : vector<24x128xf32>
    %767 = arith.addf %763, %766 : vector<24x128xf32>
    %c127_i32_214 = arith.constant 127 : i32
    %768 = tpu.dynamic_rotate %730 by %c127_i32_214 dim 1 : vector<24x128xf32>, i32 -> vector<24x128xf32>
    %c71_215 = arith.constant 71 : index
    %769 = memref.load %arg4[%c71_215] : memref<72xf32, #tpu.memory_space<smem>>
    %770 = vector.broadcast %769 : f32 to vector<24x128xf32>
    %771 = arith.mulf %768, %770 : vector<24x128xf32>
    %772 = arith.addf %767, %771 : vector<24x128xf32>
    %c0_216 = arith.constant 0 : index
    %c0_217 = arith.constant 0 : index
    %773 = vector.load %arg6[%c0_216, %c0_217] : memref<24x128xf32, #tpu.memory_space<vmem>>, vector<24x128xf32>
    tpu.vector_store %arg6[%c0_216, %c0_217], %772 {strides = array<i32>} : memref<24x128xf32, #tpu.memory_space<vmem>>, vector<24x128xf32>,
    return
  }
  func.func @transform_0(%arg0: i32) -> (i32, i32) {
    %c0_i32 = arith.constant 0 : i32
    %c0_i32_0 = arith.constant 0 : i32
    return %arg0, %c0_i32 : i32, i32
  }
  func.func @transform_1(%arg0: i32) -> i32 {
    %c0_i32 = arith.constant 0 : i32
    %c0_i32_0 = arith.constant 0 : i32
    return %c0_i32 : i32
  }
  func.func @transform_2(%arg0: i32) -> i32 {
    %c0_i32 = arith.constant 0 : i32
    %c0_i32_0 = arith.constant 0 : i32
    return %c0_i32 : i32
  }
  func.func @transform_3(%arg0: i32) -> i32 {
    %c0_i32 = arith.constant 0 : i32
    %c0_i32_0 = arith.constant 0 : i32
    return %c0_i32 : i32
  }
  func.func @transform_4(%arg0: i32) -> i32 {
    %c0_i32 = arith.constant 0 : i32
    %c0_i32_0 = arith.constant 0 : i32
    return %c0_i32 : i32
  }
  func.func @transform_5(%arg0: i32) -> (i32, i32) {
    %c0_i32 = arith.constant 0 : i32
    %c0_i32_0 = arith.constant 0 : i32
    return %arg0, %c0_i32 : i32, i32
  }
}

</mosaic_0001>

<bundles_post_ra>
// kernel: mul.0
= control target key start
LH: loop header
LB: loop body
LE: loop exit
PB: predicated region body
PF: predicated region fallthrough
CT: control target
= control target key end

     0   :  { %s34_s0 = inlined_call_operand.vmem [shape: f32[72], index: 0, kind: input, shape index: {}]   ;;  %s35_s1 = inlined_call_operand.vmem [shape: f32[72], index: 1, kind: input, shape index: {}]   ;;  %s36_s2 = inlined_call_operand.vmem [shape: f32[72], index: 2, kind: output, shape index: {}]  }
   0x1   :  { %v3_v0 = vld [vmem:[%s34_s0] sm:$0x1] }
   0x2   :  { %v4_v1 = vld [vmem:[%s35_s1] sm:$0x1] }
   0x3   :  { %v7_v2 = vmul.f32 %v4_v1, %v3_v0 }
   0x5   :  { %9 = vst [vmem:[%s36_s2] sm:$0x1] %v7_v2 }

// kernel: squeeze.3
= control target key start
LH: loop header
LB: loop body
LE: loop exit
PB: predicated region body
PF: predicated region fallthrough
CT: control target
= control target key end

     0   :  { %s224_s22 = smov 63   ;;  %s225_s23 = smov 66   ;;  %vm41_vm0 = vcmask 23552   ;;  %vm47_vm1 = vcmask 589352   ;;  %vm53_vm2 = vcmask 564752   ;;  %vm59_vm3 = vcmask 540152   ;;  %s283_s0 = inlined_call_operand.vmem [shape: f32[1,8,3,3], index: 0, kind: input, shape index: {}]   ;;  %s284_s1 = inlined_call_operand.vmem [shape: f32[72], index: 1, kind: output, shape index: {}]  }
   0x1   :  { %v193_v0 = vld [vmem:[%s283_s0 + $0x1c] sm:$0xf]  ;;  %v194_v1 = vld [vmem:[%s283_s0 + $0x18] sm:$0xf]  ;;  %v195_v2 = vld [vmem:[%s283_s0 + $0x14] sm:$0xf] }
   0x2   :  { %8 = vst [vmem:[#allocation1 + $0x38] sm:$0xf] %v193_v0  ;;  %13 = vst [vmem:[#allocation1 + $0x30] sm:$0xf] %v194_v1  ;;  %v196_v3 = vld [vmem:[%s283_s0 + $0x10] sm:$0xf] }
   0x3   :  { %18 = vst [vmem:[#allocation1 + $0x28] sm:$0xf] %v195_v2  ;;  %23 = vst [vmem:[#allocation1 + $0x20] sm:$0xf] %v196_v3  ;;  %v197_v4 = vld [vmem:[%s283_s0 + $0xc] sm:$0xf] }
   0x4   :  { %v198_v5 = vld [vmem:[%s283_s0 + $0x8] sm:$0xf]  ;;  %28 = vst [vmem:[#allocation1 + $0x18] sm:$0xf] %v197_v4  ;;  %v199_v6 = vld [vmem:[%s283_s0 + $0x4] sm:$0xf] }
   0x5   :  { %33 = vst [vmem:[#allocation1 + $0x10] sm:$0xf] %v198_v5  ;;  %v38_v7 = vld [vmem:[%s283_s0] sm:$0xf]  ;;  %37 = vst [vmem:[#allocation1 + $0x8] sm:$0xf] %v199_v6 }
   0x6   :  { %39 = vst [vmem:[#allocation1] sm:$0xf] %v38_v7  ;;  %s223_s0 = smov 69   ;;  %s226_s24 = smov 60   ;;  %vm65_vm4 = vcmask 515552   ;;  %vm71_vm5 = vcmask 490952  }
   0x7   :  { %s227_s25 = smov 57   ;;  %s228_s26 = smov 54   ;;  %vm77_vm6 = vcmask 466352   ;;  %vm83_vm7 = vcmask 441752   ;;  %vm89_vm8 = vcmask 417152   ;;  %vm95_vm9 = vcmask 392552  }
   0x8   :  { %s229_s27 = smov 51   ;;  %s230_s28 = smov 48   ;;  %vm101_vm10 = vcmask 367952   ;;  %vm107_vm11 = vcmask 343352   ;;  %vm113_vm12 = vcmask 318752   ;;  %vm119_vm13 = vcmask 294152  }
   0x9   :  { %v44_v8 = vld [vmem:[#allocation1 + $0x3a] sm:$0x1]   ;;  %v56_v9 = vld [vmem:[#allocation1 + $0x38] sm:$0x1]   ;;  %v50_v10 = vld [vmem:[#allocation1 + $0x39] sm:$0x1]  }
   0xa   :  { %45 = vrot.lane.b32.xlu0 %v44_v8, %s223_s0  ;;  %57 = vrot.lane.b32.xlu1 %v56_v9, %s224_s22  ;;  %v62_v11 = vld [vmem:[#allocation1 + $0x32] sm:$0x1]   ;;  %v68_v12 = vld [vmem:[#allocation1 + $0x31] sm:$0x1]   ;;  %v74_v13 = vld [vmem:[#allocation1 + $0x30] sm:$0x1]  }
   0xb   :  { %v80_v15 = vld [vmem:[#allocation1 + $0x2a] sm:$0x1]   ;;  %v86_v16 = vld [vmem:[#allocation1 + $0x29] sm:$0x1]   ;;  %v92_v17 = vld [vmem:[#allocation1 + $0x28] sm:$0x1]  }
   0xc   :  { %v98_v18 = vld [vmem:[#allocation1 + $0x22] sm:$0x1]   ;;  %s231_s29 = smov 45   ;;  %s232_s30 = smov 42   ;;  %v104_v19 = vld [vmem:[#allocation1 + $0x21] sm:$0x1]  }
   0xd   :  { %v40_v14 = vld [vmem:[#allocation1] sm:$0x1]   ;;  %s233_s2 = smov 39   ;;  %s234_s3 = smov 36   ;;  %v116_v21 = vld [vmem:[#allocation1 + $0x1a] sm:$0x1]  }
   0xe   :  { %51 = vrot.lane.b32.xlu0 %v50_v10, %s225_s23  ;;  %63 = vrot.lane.b32.xlu1 %v62_v11, %s226_s24  ;;  %42 = vst.msk [vmem:[#allocation0] sm:$0x1] %vm41_vm0, %v40_v14   ;;  %v110_v20 = vld [vmem:[#allocation1 + $0x20] sm:$0x1]   ;;  %v122_v22 = vld [vmem:[#allocation1 + $0x19] sm:$0x1]  }
   0xf   :  { %s235_s4 = smov 33   ;;  %s236_s5 = smov 30   ;;  %v128_v23 = vld [vmem:[#allocation1 + $0x18] sm:$0x1]   ;;  %v134_v24 = vld [vmem:[#allocation1 + $0x12] sm:$0x1]  }
  0x10   :  { %s237_s6 = smov 27   ;;  %s238_s7 = smov 24   ;;  %v140_v25 = vld [vmem:[#allocation1 + $0x11] sm:$0x1]   ;;  %v146_v26 = vld [vmem:[#allocation1 + $0x10] sm:$0x1]  }
  0x11   :  { %s239_s8 = smov 21   ;;  %s240_s9 = smov 18   ;;  %v152_v27 = vld [vmem:[#allocation1 + $0xa] sm:$0x1]   ;;  %v158_v28 = vld [vmem:[#allocation1 + $0x9] sm:$0x1]  }
  0x12   :  { %69 = vrot.lane.b32.xlu0 %v68_v12, %s227_s25  ;;  %75 = vrot.lane.b32.xlu1 %v74_v13, %s228_s26  ;;  %s241_s10 = smov 15   ;;  %s242_s11 = smov 12   ;;  %v164_v29 = vld [vmem:[#allocation1 + $0x8] sm:$0x1]   ;;  %v170_v30 = vld [vmem:[#allocation1 + $0x2] sm:$0x1]  }
  0x13   :  { %s243_s12 = smov 9   ;;  %s244_s13 = smov 6   ;;  %v176_v31 = vld [vmem:[#allocation1 + $0x1] sm:$0x1]   ;;  %vm125_vm14 = vcmask 269552   ;;  %vm131_vm15 = vcmask 244952  }
  0x14   :  { %s245_s14 = smov 3   ;;  %vm137_vm0 = vcmask 220352  }
  0x16   :  { %81 = vrot.lane.b32.xlu0 %v80_v15, %s229_s27  ;;  %87 = vrot.lane.b32.xlu1 %v86_v16, %s230_s28 }
  0x1a   :  { %93 = vrot.lane.b32.xlu0 %v92_v17, %s231_s29  ;;  %99 = vrot.lane.b32.xlu1 %v98_v18, %s232_s30 }
  0x1e   :  { %105 = vrot.lane.b32.xlu0 %v104_v19, %s233_s2  ;;  %111 = vrot.lane.b32.xlu1 %v110_v20, %s234_s3 }
  0x22   :  { %117 = vrot.lane.b32.xlu0 %v116_v21, %s235_s4  ;;  %123 = vrot.lane.b32.xlu1 %v122_v22, %s236_s5 }
  0x26   :  { %129 = vrot.lane.b32.xlu0 %v128_v23, %s237_s6  ;;  %135 = vrot.lane.b32.xlu1 %v134_v24, %s238_s7 }
  0x2a   :  { %141 = vrot.lane.b32.xlu0 %v140_v25, %s239_s8  ;;  %147 = vrot.lane.b32.xlu1 %v146_v26, %s240_s9 }
  0x2e   :  { %153 = vrot.lane.b32.xlu0 %v152_v27, %s241_s10  ;;  %159 = vrot.lane.b32.xlu1 %v158_v28, %s242_s11 }
  0x32   :  { %165 = vrot.lane.b32.xlu0 %v164_v29, %s243_s12  ;;  %171 = vrot.lane.b32.xlu1 %v170_v30, %s244_s13 }
  0x36   :  { %177 = vrot.lane.b32.xlu0 %v176_v31, %s245_s14 }
  0x7c   :  { %v46_v32 = vpop.permute.xlu0 %45   ;;  %v58_v33 = vpop.permute.xlu1 %57  }
  0x7d   :  { %48 = vst.msk [vmem:[#allocation0] sm:$0x1] %vm47_vm1, %v46_v32   ;;  %vm143_vm1 = vcmask 195752  }
  0x80   :  { %v52_v34 = vpop.permute.xlu0 %51   ;;  %v64_v35 = vpop.permute.xlu1 %63  }
  0x81   :  { %54 = vst.msk [vmem:[#allocation0] sm:$0x1] %vm53_vm2, %v52_v34   ;;  %vm149_vm2 = vcmask 171152  }
  0x82   :  { %60 = vst.msk [vmem:[#allocation0] sm:$0x1] %vm59_vm3, %v58_v33   ;;  %vm155_vm3 = vcmask 146552  }
  0x83   :  { %66 = vst.msk [vmem:[#allocation0] sm:$0x1] %vm65_vm4, %v64_v35   ;;  %vm161_vm4 = vcmask 121952  }
  0x84   :  { %v70_v36 = vpop.permute.xlu0 %69   ;;  %v76_v37 = vpop.permute.xlu1 %75  }
  0x85   :  { %72 = vst.msk [vmem:[#allocation0] sm:$0x1] %vm71_vm5, %v70_v36   ;;  %vm167_vm5 = vcmask 97352  }
  0x86   :  { %78 = vst.msk [vmem:[#allocation0] sm:$0x1] %vm77_vm6, %v76_v37   ;;  %vm173_vm6 = vcmask 72752  }
  0x88   :  { %v82_v38 = vpop.permute.xlu0 %81   ;;  %v88_v39 = vpop.permute.xlu1 %87  }
  0x89   :  { %84 = vst.msk [vmem:[#allocation0] sm:$0x1] %vm83_vm7, %v82_v38   ;;  %vm179_vm7 = vcmask 48152  }
  0x8a   :  { %90 = vst.msk [vmem:[#allocation0] sm:$0x1] %vm89_vm8, %v88_v39  }
  0x8c   :  { %v94_v40 = vpop.permute.xlu0 %93   ;;  %v100_v41 = vpop.permute.xlu1 %99  }
  0x8d   :  { %96 = vst.msk [vmem:[#allocation0] sm:$0x1] %vm95_vm9, %v94_v40  }
  0x8e   :  { %102 = vst.msk [vmem:[#allocation0] sm:$0x1] %vm101_vm10, %v100_v41  }
  0x90   :  { %v106_v42 = vpop.permute.xlu0 %105   ;;  %v112_v43 = vpop.permute.xlu1 %111  }
  0x91   :  { %108 = vst.msk [vmem:[#allocation0] sm:$0x1] %vm107_vm11, %v106_v42  }
  0x92   :  { %114 = vst.msk [vmem:[#allocation0] sm:$0x1] %vm113_vm12, %v112_v43  }
  0x94   :  { %v118_v44 = vpop.permute.xlu0 %117   ;;  %v124_v45 = vpop.permute.xlu1 %123  }
  0x95   :  { %120 = vst.msk [vmem:[#allocation0] sm:$0x1] %vm119_vm13, %v118_v44  }
  0x96   :  { %126 = vst.msk [vmem:[#allocation0] sm:$0x1] %vm125_vm14, %v124_v45  }
  0x98   :  { %v130_v46 = vpop.permute.xlu0 %129   ;;  %v136_v47 = vpop.permute.xlu1 %135  }
  0x99   :  { %132 = vst.msk [vmem:[#allocation0] sm:$0x1] %vm131_vm15, %v130_v46  }
  0x9a   :  { %138 = vst.msk [vmem:[#allocation0] sm:$0x1] %vm137_vm0, %v136_v47  }
  0x9c   :  { %v142_v48 = vpop.permute.xlu0 %141   ;;  %v148_v49 = vpop.permute.xlu1 %147  }
  0x9d   :  { %144 = vst.msk [vmem:[#allocation0] sm:$0x1] %vm143_vm1, %v142_v48  }
  0x9e   :  { %150 = vst.msk [vmem:[#allocation0] sm:$0x1] %vm149_vm2, %v148_v49  }
  0xa0   :  { %v154_v50 = vpop.permute.xlu0 %153   ;;  %v160_v51 = vpop.permute.xlu1 %159  }
  0xa1   :  { %156 = vst.msk [vmem:[#allocation0] sm:$0x1] %vm155_vm3, %v154_v50  }
  0xa2   :  { %162 = vst.msk [vmem:[#allocation0] sm:$0x1] %vm161_vm4, %v160_v51  }
  0xa4   :  { %v166_v52 = vpop.permute.xlu0 %165   ;;  %v172_v53 = vpop.permute.xlu1 %171  }
  0xa5   :  { %168 = vst.msk [vmem:[#allocation0] sm:$0x1] %vm167_vm5, %v166_v52  }
  0xa6   :  { %174 = vst.msk [vmem:[#allocation0] sm:$0x1] %vm173_vm6, %v172_v53  }
  0xa8   :  { %v178_v54 = vpop.permute.xlu0 %177  }
  0xa9   :  { %180 = vst.msk [vmem:[#allocation0] sm:$0x1] %vm179_vm7, %v178_v54  }
  0xb0   :  { %v184_v55 = vld [vmem:[#allocation0] sm:$0x1] }
  0xb1   :  { %186 = vst [vmem:[%s284_s1] sm:$0x1] %v184_v55 }

// kernel: denoise_forward.2
= control target key start
LH: loop header
LB: loop body
LE: loop exit
PB: predicated region body
PF: predicated region fallthrough
CT: control target
= control target key end

     0   :  { %7 = vsyncpa [#allocation3], 0  ;;  %s2134_s0 = inlined_call_operand.vmem [shape: f32[24,128], index: 0, kind: input, shape index: {}]   ;;  %s2135_s1 = inlined_call_operand.vmem [shape: f32[72], index: 1, kind: input, shape index: {}]   ;;  %s2136_s2 = inlined_call_operand.vmem [shape: f32[1,16,128], index: 2, kind: output, shape index: {}]  }
   0x1   :  { %s16_s11 = sshll.u32 %s2135_s1, 4  ;;  %s17_s11 = int_to_ptr.vmem [resolvable:$true] %s16_s11 }
   0x2   :  { %s952_s12 = scalar_lea.vmem %s17_s11, 16  ;;  %p957_p1 = scmp.lt.s32.totalorder %s17_s11, %s17_s11 }
   0x3   :  { %p953_p0 = scmp.ne.s32.totalorder %s17_s11, %s952_s12  ;;  %p958_p2 = scmp.lt.s32.totalorder %s952_s12, %s952_s12 }
   0x5   :  { %p959_p3 = por %p958_p2, %p957_p1 }
   0x7   :  { %p960_p4 = pnand %p959_p3, %p953_p0 }
   0x9   :  { %963 = shalt.err (!%p960_p4)
}
   0xa   :  { %s966_s13 = smov [#allocation2]  }
   0xb   :  { %19 = dma.vmem_to_smem %s17_s11, 16, %s966_s13, [#allocation3]  }
   0xc   :  { %964 = dma.done.wait [#allocation3], 16  }
   0xd   :  { %965 = vsyncadd [#allocation3], 4294967280 }
   0xe   :  { %23 = sfence }
   0xf   :  { %v24_v0 = vlaneseq  ;;  %v990_v1 = vld [vmem:[%s2134_s0] sm:$0xff]  ;;  %v995_v2 = vld [vmem:[%s2134_s0 + $0x10] sm:$0xff]  ;;  %v1000_v3 = vld [vmem:[%s2134_s0 + $0x8] sm:$0xff]  ;;  %s967_s19 = smov 1   ;;  %s968_s0 = smov 127  }
  0x10   :  { %v70_v4 = vrot.slane %v990_v1, 7  ;;  %v72_v5 = vrot.slane %v995_v2, 7  ;;  %v71_v6 = vrot.slane %v1000_v3, 7  ;;  %v77_v11 = vrot.slane %v990_v1, 1  ;;  %s90_s20 = sld [smem:[#allocation2]]  ;;  %s876_s21 = sld [smem:[#allocation2 + $0x1]] }
  0x11   :  { %v1005_v7 = vshrl.u32 %v24_v0, 7  ;;  %v78_v12 = vrot.slane %v1000_v3, 1  ;;  %v79_v13 = vrot.slane %v995_v2, 1  ;;  %v1042_v17 = vand.u32 127, %v24_v0  ;;  %s884_s22 = sld [smem:[#allocation2 + $0x9]]  ;;  %s885_s23 = sld [smem:[#allocation2 + $0xa]] }
  0x12   :  { %s893_s24 = sld [smem:[#allocation2 + $0x12]]  ;;  %s894_s25 = sld [smem:[#allocation2 + $0x13]] }
  0x13   :  { %vm73_vm0 = vcmp.lt.s32.totalorder %v1005_v7, 1  ;;  %vm80_vm1 = vcmp.lt.s32.totalorder %v1005_v7, 7  ;;  %2171 = vst [vmem:[#allocation5_spill] sm:$0xff] %v1042_v17  ;;  %v1045_v18 = vmul.u32.u64.low 3817748708, %v1042_v17  ;;  %v1046_v19 = vmul.u32.u64.high 3817748708, %v1042_v17, %v1045_v18  ;;  %s1048_s26 = sld [smem:[#allocation2 + $0x1b]] }
  0x14   :  { %v1008_v8 = vsel %vm73_vm0, %v72_v5, %v70_v4  ;;  %v1010_v9 = vsel %vm73_vm0, %v71_v6, %v72_v5  ;;  %v1014_v10 = vsel %vm73_vm0, %v70_v4, %v71_v6  ;;  %v1030_v14 = vsel %vm80_vm1, %v77_v11, %v78_v12  ;;  %s1050_s27 = sld [smem:[#allocation2 + $0x1c]]  ;;  %s1054_s29 = sld [smem:[#allocation2 + $0x25]] }
  0x15   :  { %84 = vrot.lane.b32.xlu0 %v1008_v8, %s967_s19  ;;  %88 = vrot.lane.b32.xlu1 %v1010_v9, %s967_s19  ;;  %v1032_v15 = vsel %vm80_vm1, %v78_v12, %v79_v13  ;;  %v1036_v16 = vsel %vm80_vm1, %v79_v13, %v77_v11  ;;  %s1052_s28 = sld [smem:[#allocation2 + $0x24]]  ;;  %s1056_s30 = sld [smem:[#allocation2 + $0x2d]]  ;;  %v36_v20 = vshrl.u32 %v1046_v19, 4  ;;  %vm46_vm6 = vcmp.ge.s32.totalorder %v1005_v7, 1 }
  0x16   :  { %s1058_s3 = sld [smem:[#allocation2 + $0x2e]]  ;;  %s1063_s5 = sld [smem:[#allocation2 + $0x37]]  ;;  %v96_v21 = vstv %s876_s21  ;;  %v1083_v24 = vstv %s90_s20 }
  0x17   :  { %s1060_s4 = sld [smem:[#allocation2 + $0x36]]  ;;  %s1065_s6 = sld [smem:[#allocation2 + $0x3f]]  ;;  %v37_v22 = vmul.u32 18, %v36_v20  ;;  %v217_v23 = vstv %s885_s23  ;;  %v1085_v25 = vstv %s884_s22  ;;  %v1094_v28 = vmul.f32 %v96_v21, %v1008_v8 }
  0x18   :  { %s1067_s7 = sld [smem:[#allocation2 + $0x40]]  ;;  %s1069_s8 = sld [smem:[#allocation2 + $0x2]]  ;;  %v1091_v26 = vstv %s893_s24  ;;  %v308_v27 = vstv %s894_s25  ;;  %v1097_v29 = vmul.f32 %v96_v21, %v1010_v9  ;;  %v1108_v32 = vmul.f32 %v217_v23, %v1008_v8 }
  0x19   :  { %86 = vrot.lane.b32.xlu0 %v1014_v10, %s967_s19  ;;  %103 = vrot.lane.b32.xlu1 %v1008_v8, %s968_s0  ;;  %s1071_s9 = sld [smem:[#allocation2 + $0xb]]  ;;  %s1073_s10 = sld [smem:[#allocation2 + $0x14]]  ;;  %v1104_v30 = vstv %s1048_s26  ;;  %v1111_v33 = vmul.f32 %v217_v23, %v1010_v9  ;;  %v1118_v34 = vsub.s32 %v1042_v17, %v37_v22  ;;  %v1122_v36 = vmul.f32 %v96_v21, %v1014_v10 }
  0x1a   :  { %s1075_s11 = sld [smem:[#allocation2 + $0x1d]]  ;;  %s1077_s12 = sld [smem:[#allocation2 + $0x26]]  ;;  %v399_v31 = vstv %s1050_s27  ;;  %v490_v35 = vstv %s1054_s29  ;;  %v1125_v37 = vmul.f32 %v217_v23, %v1014_v10  ;;  %v1137_v41 = vmul.f32 %v308_v27, %v1008_v8 }
  0x1b   :  { %s1079_s13 = sld [smem:[#allocation2 + $0x2f]]  ;;  %s1081_s14 = sld [smem:[#allocation2 + $0x38]]  ;;  %v1132_v38 = vstv %s1052_s28  ;;  %v1144_v42 = vstv %s1056_s30  ;;  %v1148_v44 = vmul.f32 %v399_v31, %v1008_v8  ;;  %v1151_v45 = vmul.f32 %v308_v27, %v1010_v9 }
  0x1c   :  { %s1087_s15 = sld [smem:[#allocation2 + $0x41]]  ;;  %s1089_s1 = sld [smem:[#allocation2 + $0x3]]  ;;  %v581_v39 = vstv %s1058_s3  ;;  %v672_v40 = vstv %s1063_s5  ;;  %v1164_v48 = vmul.f32 %v490_v35, %v1008_v8  ;;  %v1167_v49 = vmul.f32 %v399_v31, %v1010_v9 }
  0x1d   :  { %105 = vrot.lane.b32.xlu0 %v1014_v10, %s968_s0  ;;  %107 = vrot.lane.b32.xlu1 %v1010_v9, %s968_s0  ;;  %s1099_s16 = sld [smem:[#allocation2 + $0xc]]  ;;  %s1101_s17 = sld [smem:[#allocation2 + $0x15]]  ;;  %v1158_v46 = vstv %s1060_s4  ;;  %v1161_v47 = vstv %s1065_s6  ;;  %v1174_v50 = vmul.f32 %v581_v39, %v1008_v8  ;;  %v1177_v51 = vmul.f32 %v672_v40, %v1008_v8 }
  0x1e   :  { %s1113_s18 = sld [smem:[#allocation2 + $0x1e]]  ;;  %s1129_s20 = sld [smem:[#allocation2 + $0x39]]  ;;  %v763_v43 = vstv %s1067_s7  ;;  %v1180_v52 = vmul.f32 %v490_v35, %v1010_v9  ;;  %v1183_v53 = vmul.f32 %v581_v39, %v1010_v9  ;;  %v1193_v55 = vmul.f32 %v672_v40, %v1010_v9 }
  0x1f   :  { %s1139_s21 = sld [smem:[#allocation2 + $0x4]]  ;;  %s1141_s22 = sld [smem:[#allocation2 + $0xd]]  ;;  %v1190_v54 = vmul.f32 %v763_v43, %v1008_v8  ;;  %v1196_v56 = vmul.f32 %v763_v43, %v1010_v9  ;;  %v1199_v57 = vmul.f32 %v308_v27, %v1014_v10  ;;  %v1206_v58 = vmul.f32 %v399_v31, %v1014_v10 }
  0x20   :  { %s1153_s23 = sld [smem:[#allocation2 + $0x42]]  ;;  %s1155_s24 = sld [smem:[#allocation2 + $0x16]]  ;;  %v1209_v59 = vmul.f32 %v490_v35, %v1014_v10  ;;  %v1212_v60 = vmul.f32 %v581_v39, %v1014_v10  ;;  %v1215_v61 = vmul.f32 %v672_v40, %v1014_v10  ;;  %v1222_v62 = vmul.f32 %v763_v43, %v1014_v10 }
  0x21   :  { %117 = vrot.lane.b32.xlu0 %v990_v1, %s967_s19  ;;  %119 = vrot.lane.b32.xlu1 %v1000_v3, %s967_s19  ;;  %s1169_s25 = sld [smem:[#allocation2 + $0x1f]]  ;;  %s1171_s26 = sld [smem:[#allocation2 + $0x28]]  ;;  %v1225_v63 = vstv %s1069_s8  ;;  %v1228_v0 = vstv %s1071_s9  ;;  %vm41_vm2 = vcmp.ne.s32.totalorder %v1118_v34, 0  ;;  %vm42_vm3 = vcmp.lt.s32.totalorder %v1118_v34, 0 }
  0x22   :  { %s1185_s27 = sld [smem:[#allocation2 + $0x5]]  ;;  %s1187_s28 = sld [smem:[#allocation2 + $0xe]]  ;;  %v1231_v4 = vstv %s1073_s10  ;;  %v1238_v5 = vstv %s1075_s11  ;;  %v1241_v6 = vstv %s1077_s12  ;;  %v1244_v8 = vstv %s1079_s13  ;;  %vm43_vm4 = vmand %vm42_vm3, %vm41_vm2 }
  0x23   :  { %s1201_s29 = sld [smem:[#allocation2 + $0x17]]  ;;  %s1203_s30 = sld [smem:[#allocation2 + $0x31]]  ;;  %v1247_v9 = vstv %s1081_s14  ;;  %v1252_v10 = vstv %s1087_s15  ;;  %v1255_v11 = vstv %s1089_s1  ;;  %v1262_v18 = vstv %s1099_s16 }
  0x24   :  { %s1217_s3 = sld [smem:[#allocation2 + $0x3a]]  ;;  %s1219_s4 = sld [smem:[#allocation2 + $0x43]]  ;;  %2172 = vst [vmem:[#allocation6_spill] sm:$0xff] %v1255_v11  ;;  %2173 = vst [vmem:[#allocation7_spill] sm:$0xff] %v1262_v18  ;;  %v1265_v19 = vstv %s1101_s17  ;;  %v1268_v20 = vstv %s1113_s18  ;;  %v1286_v35 = vstv %s1129_s20  ;;  %vm848_vm2 = vcmask 1040384  }
  0x25   :  { %121 = vrot.lane.b32.xlu0 %v995_v2, %s967_s19  ;;  %139 = vrot.lane.b32.xlu1 %v990_v1, %s968_s0  ;;  %s1233_s5 = sld [smem:[#allocation2 + $0x20]]  ;;  %s1235_s6 = sld [smem:[#allocation2 + $0x29]]  ;;  %v132_v12 = vstv %s1139_s21  ;;  %v241_v13 = vstv %s1141_s22  ;;  %2174 = vst [vmem:[#allocation8_spill] sm:$0xff] %v1265_v19  ;;  %2175 = vst [vmem:[#allocation9_spill] sm:$0xff] %v1268_v20  ;;  %vm850_vm3 = vcmask 1041408  }
  0x26   :  { %s1249_s7 = sld [smem:[#allocation2 + $0x32]]  ;;  %s1259_s8 = sld [smem:[#allocation2 + $0x3b]]  ;;  %v332_v21 = vstv %s1155_s24  ;;  %2178 = vst [vmem:[#allocation12_spill] sm:$0xff] %v1286_v35  ;;  %v1289_v39 = vstv %s1153_s23  ;;  %v1292_v40 = vmul.f32 %v132_v12, %v990_v1  ;;  %v1295_v43 = vmul.f32 %v241_v13, %v990_v1 }
  0x27   :  { %s1271_s9 = sld [smem:[#allocation2 + $0x44]]  ;;  %v423_v27 = vstv %s1169_s25  ;;  %v514_v31 = vstv %s1171_s26  ;;  %s1281_s10 = sld [smem:[#allocation2 + $0x6]]  ;;  %2179 = vst [vmem:[#allocation13_spill] sm:$0xff] %v1289_v39  ;;  %v1308_v35 = vmul.f32 %v332_v21, %v990_v1  ;;  %v1337_v19 = vmul.f32 %v132_v12, %v1000_v3 }
  0x28   :  { %s1283_s11 = sld [smem:[#allocation2 + $0xf]]  ;;  %2180 = vst [vmem:[#allocation14_spill] sm:$0xff] %v1292_v40  ;;  %2181 = vst [vmem:[#allocation15_spill] sm:$0xff] %v1295_v43  ;;  %s1297_s12 = sld [smem:[#allocation2 + $0x18]]  ;;  %v1302_v17 = vstv %s1185_s27  ;;  %v1316_v43 = vmul.f32 %v423_v27, %v990_v1  ;;  %v1319_v40 = vmul.f32 %v514_v31, %v990_v1  ;;  %v1350_v18 = vmul.f32 %v241_v13, %v1000_v3 }
  0x29   :  { %141 = vrot.lane.b32.xlu0 %v1000_v3, %s968_s0  ;;  %143 = vrot.lane.b32.xlu1 %v995_v2, %s968_s0  ;;  %s1299_s13 = sld [smem:[#allocation2 + $0x21]]  ;;  %2182 = vst [vmem:[#allocation16_spill] sm:$0xff] %v1302_v17  ;;  %2184 = vst [vmem:[#allocation18_spill] sm:$0xff] %v1308_v35  ;;  %v605_v39 = vstv %s1203_s30  ;;  %s1311_s14 = sld [smem:[#allocation2 + $0x7]] }
  0x2a   :  { %s1313_s15 = sld [smem:[#allocation2 + $0x10]]  ;;  %2185 = vst [vmem:[#allocation19_spill] sm:$0xff] %v1316_v43  ;;  %2186 = vst [vmem:[#allocation20_spill] sm:$0xff] %v1319_v40  ;;  %v787_v20 = vstv %s1219_s4  ;;  %s1323_s1 = sld [smem:[#allocation2 + $0x19]]  ;;  %v1344_v40 = vmul.f32 %v605_v39, %v990_v1 }
  0x2b   :  { %s1325_s16 = sld [smem:[#allocation2 + $0x22]]  ;;  %v1331_v17 = vstv %s1233_s5  ;;  %v1334_v35 = vstv %s1235_s6  ;;  %2190 = vst [vmem:[#allocation24_spill] sm:$0xff] %v1337_v19  ;;  %s1339_s17 = sld [smem:[#allocation2 + $0x2b]]  ;;  %2193 = vst [vmem:[#allocation27_spill] sm:$0xff] %v1350_v18  ;;  %v1375_v18 = vmul.f32 %v514_v31, %v1000_v3 }
  0x2c   :  { %2188 = vst [vmem:[#allocation22_spill] sm:$0xff] %v1331_v17  ;;  %2189 = vst [vmem:[#allocation23_spill] sm:$0xff] %v1334_v35  ;;  %s1341_s18 = sld [smem:[#allocation2 + $0x34]]  ;;  %v1347_v43 = vstv %s1249_s7  ;;  %v1363_v35 = vstv %s1259_s8  ;;  %v1366_v17 = vmul.f32 %v787_v20, %v990_v1  ;;  %s1383_s20 = sld [smem:[#allocation2 + $0x2a]] }
  0x2d   :  { %153 = vrot.lane.b32.xlu0 %v1030_v14, %s967_s19  ;;  %155 = vrot.lane.b32.xlu1 %v1032_v15, %s967_s19  ;;  %2191 = vst [vmem:[#allocation25_spill] sm:$0xff] %v1344_v40  ;;  %2192 = vst [vmem:[#allocation26_spill] sm:$0xff] %v1347_v43  ;;  %v1369_v43 = vmul.f32 %v423_v27, %v1000_v3  ;;  %v1372_v40 = vstv %s1271_s9  ;;  %s1385_s21 = sld [smem:[#allocation2 + $0x33]]  ;;  %s1399_s22 = sld [smem:[#allocation2 + $0x3c]] }
  0x2e   :  { %2195 = vst [vmem:[#allocation29_spill] sm:$0xff] %v1363_v35  ;;  %2197 = vst [vmem:[#allocation31_spill] sm:$0xff] %v1372_v40  ;;  %s1401_s23 = sld [smem:[#allocation2 + $0x45]]  ;;  %s1415_s24 = sld [smem:[#allocation2 + $0x8]] }
  0x2f   :  { %2196 = vst [vmem:[#allocation30_spill] sm:$0xff] %v1369_v43  ;;  %2198 = vst [vmem:[#allocation32_spill] sm:$0xff] %v1375_v18  ;;  %v1391_v43 = vmul.f32 %v132_v12, %v995_v2  ;;  %v1394_v18 = vmul.f32 %v241_v13, %v995_v2  ;;  %v1407_v12 = vmul.f32 %v514_v31, %v995_v2  ;;  %s1417_s25 = sld [smem:[#allocation2 + $0x11]]  ;;  %v1427_v31 = vstv %s1283_s11  ;;  %s1429_s26 = sld [smem:[#allocation2 + $0x1a]] }
  0x30   :  { %v1410_v13 = vmul.f32 %v605_v39, %v995_v2  ;;  %2211 = vst [vmem:[#allocation45_spill] sm:$0xff] %v1427_v31  ;;  %s1437_s27 = sld [smem:[#allocation2 + $0x23]]  ;;  %s1447_s30 = sld [smem:[#allocation2 + $0x3e]]  ;;  %v1453_v31 = vstv %s1299_s13 }
  0x31   :  { %157 = vrot.lane.b32.xlu0 %v1036_v16, %s967_s19  ;;  %175 = vrot.lane.b32.xlu1 %v1030_v14, %s968_s0  ;;  %s1115_s19 = sld [smem:[#allocation2 + $0x27]]  ;;  %2202 = vst [vmem:[#allocation36_spill] sm:$0xff] %v1391_v43  ;;  %2203 = vst [vmem:[#allocation37_spill] sm:$0xff] %v1394_v18 }
  0x32   :  { %2206 = vst [vmem:[#allocation40_spill] sm:$0xff] %v1407_v12  ;;  %2207 = vst [vmem:[#allocation41_spill] sm:$0xff] %v1410_v13  ;;  %v447_v13 = vstv %s1325_s16 }
  0x33   :  { %2214 = vst [vmem:[#allocation48_spill] sm:$0xff] %v1453_v31  ;;  %v1464_v43 = vmul.f32 %v447_v13, %v1030_v14 }
  0x35   :  { %177 = vrot.lane.b32.xlu0 %v1032_v15, %s968_s0  ;;  %179 = vrot.lane.b32.xlu1 %v1036_v16, %s968_s0  ;;  %s1127_s0 = sld [smem:[#allocation2 + $0x30]]  ;;  %2217 = vst [vmem:[#allocation51_spill] sm:$0xff] %v1464_v43  ;;  %v1484_v43 = vstv %s1399_s22  ;;  %v1505_v35 = vstv %s1417_s25 }
  0x36   :  { %2222 = vst [vmem:[#allocation56_spill] sm:$0xff] %v1484_v43 }
  0x37   :  { %v1274_v22 = vstv %s1115_s19  ;;  %s1355_s19 = sld [smem:[#allocation2 + $0x3d]] }
  0x38   :  { %2176 = vst [vmem:[#allocation10_spill] sm:$0xff] %v1274_v22  ;;  %v696_v22 = vstv %s1217_s3  ;;  %s946_s3 = sld [smem:[#allocation2 + $0x47]] }
  0x39   :  { %v1360_v19 = vmul.f32 %v696_v22, %v990_v1  ;;  %v1381_v11 = vmul.f32 %v696_v22, %v1000_v3  ;;  %v1388_v1 = vmul.f32 %v787_v20, %v1000_v3 }
  0x3b   :  { %v1277_v23 = vstv %s1127_s0  ;;  %s1357_s0 = sld [smem:[#allocation2 + $0x46]]  ;;  %2200 = vst [vmem:[#allocation34_spill] sm:$0xff] %v1381_v11  ;;  %2201 = vst [vmem:[#allocation35_spill] sm:$0xff] %v1388_v1  ;;  %v1397_v11 = vmul.f32 %v332_v21, %v995_v2  ;;  %v44_v1 = vadd.s32 18, %v1118_v34 }
  0x3c   :  { %2177 = vst [vmem:[#allocation11_spill] sm:$0xff] %v1277_v23  ;;  %v1305_v23 = vstv %s1187_s28  ;;  %s1439_s28 = sld [smem:[#allocation2 + $0x2c]] }
  0x3d   :  { %2183 = vst [vmem:[#allocation17_spill] sm:$0xff] %v1305_v23  ;;  %v1328_v23 = vstv %s1201_s29  ;;  %2204 = vst [vmem:[#allocation38_spill] sm:$0xff] %v1397_v11  ;;  %v1420_v11 = vmul.f32 %v787_v20, %v995_v2  ;;  %v629_v20 = vstv %s1341_s18  ;;  %s1445_s29 = sld [smem:[#allocation2 + $0x35]]  ;;  %v1508_v43 = vsel %vm43_vm4, %v44_v1, %v1118_v34 }
  0x3e   :  { %2187 = vst [vmem:[#allocation21_spill] sm:$0xff] %v1328_v23  ;;  %v1353_v23 = vmul.f32 %v332_v21, %v1000_v3  ;;  %v1413_v21 = vmul.f32 %v696_v22, %v995_v2  ;;  %v1433_v22 = vstv %s1297_s12  ;;  %vm55_vm5 = vcmp.ge.s32.totalorder %v1508_v43, 1 }
  0x3f   :  { %2209 = vst [vmem:[#allocation43_spill] sm:$0xff] %v1420_v11  ;;  %2212 = vst [vmem:[#allocation46_spill] sm:$0xff] %v1433_v22  ;;  %vm59_vm7 = vcmp.le.s32.totalorder %v1508_v43, 16  ;;  %vm852_vm4 = vcmask 1042432  }
  0x40   :  { %2194 = vst [vmem:[#allocation28_spill] sm:$0xff] %v1353_v23  ;;  %v1378_v23 = vmul.f32 %v605_v39, %v1000_v3  ;;  %v1404_v3 = vmul.f32 %v423_v27, %v995_v2  ;;  %2208 = vst [vmem:[#allocation42_spill] sm:$0xff] %v1413_v21  ;;  %v1423_v27 = vstv %s1281_s10  ;;  %v265_v39 = vstv %s1313_s15 }
  0x41   :  { %2210 = vst [vmem:[#allocation44_spill] sm:$0xff] %v1423_v27  ;;  %v356_v21 = vstv %s1323_s1  ;;  %v538_v2 = vstv %s1339_s17  ;;  %v720_v27 = vstv %s1355_s19  ;;  %v811_v11 = vstv %s1357_s0  ;;  %vm1835_vm9 = vmand %vm46_vm6, %vm55_vm5 }
  0x42   :  { %2199 = vst [vmem:[#allocation33_spill] sm:$0xff] %v1378_v23  ;;  %2205 = vst [vmem:[#allocation39_spill] sm:$0xff] %v1404_v3  ;;  %v168_v3 = vstv %s1311_s14  ;;  %v1458_v12 = vmul.f32 %v265_v39, %v1030_v14  ;;  %v1461_v18 = vmul.f32 %v356_v21, %v1030_v14  ;;  %v1471_v31 = vmul.f32 %v538_v2, %v1030_v14 }
  0x43   :  { %v1450_v22 = vmul.f32 %v168_v3, %v1030_v14  ;;  %v1474_v23 = vstv %s1385_s21  ;;  %v1502_v40 = vmul.f32 %v265_v39, %v1032_v15  ;;  %v1532_v34 = vstv %s1445_s29  ;;  %vm60_vm10 = vmand %vm1835_vm9, %vm59_vm7 }
  0x44   :  { %2215 = vst [vmem:[#allocation49_spill] sm:$0xff] %v1458_v12  ;;  %2216 = vst [vmem:[#allocation50_spill] sm:$0xff] %v1461_v18  ;;  %v1477_v12 = vmul.f32 %v629_v20, %v1030_v14  ;;  %v1487_v18 = vmul.f32 %v720_v27, %v1030_v14  ;;  %v1535_v1 = vmul.f32 %v720_v27, %v1032_v15  ;;  %vm856_vm6 = vcmask 1044480  }
  0x45   :  { %2213 = vst [vmem:[#allocation47_spill] sm:$0xff] %v1450_v22  ;;  %v1468_v22 = vstv %s1383_s20  ;;  %2219 = vst [vmem:[#allocation53_spill] sm:$0xff] %v1471_v31  ;;  %v1493_v31 = vmul.f32 %v811_v11, %v1030_v14  ;;  %v1517_v14 = vmul.f32 %v447_v13, %v1032_v15 }
  0x46   :  { %2218 = vst [vmem:[#allocation52_spill] sm:$0xff] %v1468_v22  ;;  %2220 = vst [vmem:[#allocation54_spill] sm:$0xff] %v1474_v23  ;;  %v1490_v22 = vstv %s1401_s23  ;;  %v1499_v23 = vstv %s1415_s24 }
  0x47   :  { %2221 = vst [vmem:[#allocation55_spill] sm:$0xff] %v1477_v12  ;;  %2223 = vst [vmem:[#allocation57_spill] sm:$0xff] %v1487_v18  ;;  %v1496_v12 = vmul.f32 %v168_v3, %v1032_v15  ;;  %v1511_v18 = vmul.f32 %v356_v21, %v1032_v15 }
  0x48   :  { %2224 = vst [vmem:[#allocation58_spill] sm:$0xff] %v1490_v22  ;;  %2225 = vst [vmem:[#allocation59_spill] sm:$0xff] %v1493_v31  ;;  %v1514_v22 = vstv %s1429_s26  ;;  %v1520_v31 = vstv %s1437_s27 }
  0x49   :  { %2226 = vst [vmem:[#allocation60_spill] sm:$0xff] %v1496_v12  ;;  %2227 = vst [vmem:[#allocation61_spill] sm:$0xff] %v1499_v23  ;;  %v1523_v12 = vmul.f32 %v538_v2, %v1032_v15  ;;  %v1526_v23 = vstv %s1439_s28 }
  0x4a   :  { %2228 = vst [vmem:[#allocation62_spill] sm:$0xff] %v1502_v40  ;;  %2229 = vst [vmem:[#allocation63_spill] sm:$0xff] %v1511_v18  ;;  %v1529_v40 = vmul.f32 %v629_v20, %v1032_v15  ;;  %v1538_v18 = vstv %s1447_s30 }
  0x4b   :  { %2230 = vst [vmem:[#allocation64_spill] sm:$0xff] %v1514_v22  ;;  %2231 = vst [vmem:[#allocation65_spill] sm:$0xff] %v1517_v14  ;;  %v1541_v22 = vmul.f32 %v811_v11, %v1032_v15  ;;  %v1543_v14 = vstv %s946_s3  ;;  %v1561_v15 = vmul.f32 %v629_v20, %v1036_v16  ;;  %v1576_v20 = vadd.s32 16, %v1005_v7 }
  0x4c   :  { %2232 = vst [vmem:[#allocation66_spill] sm:$0xff] %v1520_v31  ;;  %2233 = vst [vmem:[#allocation67_spill] sm:$0xff] %v1523_v12  ;;  %v1546_v31 = vmul.f32 %v168_v3, %v1036_v16  ;;  %v1549_v12 = vmul.f32 %v265_v39, %v1036_v16 }
  0x4d   :  { %2234 = vst [vmem:[#allocation68_spill] sm:$0xff] %v1526_v23  ;;  %2235 = vst [vmem:[#allocation69_spill] sm:$0xff] %v1529_v40  ;;  %v1552_v40 = vmul.f32 %v356_v21, %v1036_v16  ;;  %v1555_v23 = vmul.f32 %v447_v13, %v1036_v16 }
  0x4e   :  { %2236 = vst [vmem:[#allocation70_spill] sm:$0xff] %v1532_v34  ;;  %2237 = vst [vmem:[#allocation71_spill] sm:$0xff] %v1535_v1  ;;  %v1558_v1 = vmul.f32 %v538_v2, %v1036_v16  ;;  %v1573_v2 = vmul.f32 %v811_v11, %v1036_v16 }
  0x4f   :  { %2238 = vst [vmem:[#allocation72_spill] sm:$0xff] %v1538_v18  ;;  %2239 = vst [vmem:[#allocation73_spill] sm:$0xff] %v1541_v22  ;;  %v1564_v22 = vmul.f32 %v720_v27, %v1036_v16 }
  0x50   :  { %2240 = vst [vmem:[#allocation74_spill] sm:$0xff] %v1543_v14  ;;  %2241 = vst [vmem:[#allocation75_spill] sm:$0xff] %v1546_v31 }
  0x51   :  { %2242 = vst [vmem:[#allocation76_spill] sm:$0xff] %v1549_v12  ;;  %2243 = vst [vmem:[#allocation77_spill] sm:$0xff] %v1552_v40 }
  0x52   :  { %2244 = vst [vmem:[#allocation78_spill] sm:$0xff] %v1555_v23  ;;  %2245 = vst [vmem:[#allocation79_spill] sm:$0xff] %v1558_v1 }
  0x53   :  { %2246 = vst [vmem:[#allocation80_spill] sm:$0xff] %v1561_v15  ;;  %2247 = vst [vmem:[#allocation81_spill] sm:$0xff] %v1564_v22 }
  0x54   :  { %2248 = vst [vmem:[#allocation82_spill] sm:$0xff] %v1573_v2  ;;  %2249 = vst [vmem:[#allocation83_spill] sm:$0xff] %v1576_v20 }
  0x55   :  { %vm61_vm11 = vmand %vm55_vm5, %vm59_vm7 }
  0x87   :  { %v85_v34 = vpop.permute.xlu0 %84  ;;  %v89_v11 = vpop.permute.xlu1 %88 }
  0x88   :  { %v92_v3 = vmul.f32 %v1083_v24, %v85_v34  ;;  %v213_v39 = vmul.f32 %v1085_v25, %v85_v34  ;;  %v304_v21 = vmul.f32 %v1091_v26, %v85_v34  ;;  %v395_v40 = vmul.f32 %v1104_v30, %v85_v34 }
  0x89   :  { %v486_v13 = vmul.f32 %v1132_v38, %v85_v34  ;;  %v577_v23 = vmul.f32 %v1144_v42, %v85_v34  ;;  %v668_v15 = vmul.f32 %v1158_v46, %v85_v34  ;;  %v759_v1 = vmul.f32 %v1161_v47, %v85_v34 }
  0x8a   :  { %v100_v27 = vadd.f32 %v1094_v28, %v92_v3  ;;  %v221_v22 = vadd.f32 %v1108_v32, %v213_v39  ;;  %v312_v12 = vadd.f32 %v1137_v41, %v304_v21  ;;  %v403_v31 = vadd.f32 %v1148_v44, %v395_v40 }
  0x8b   :  { %v494_v14 = vadd.f32 %v1164_v48, %v486_v13  ;;  %v585_v16 = vadd.f32 %v1174_v50, %v577_v23  ;;  %v94_v2 = vmul.f32 %v1083_v24, %v89_v11  ;;  %v215_v18 = vmul.f32 %v1085_v25, %v89_v11  ;;  %v87_v48 = vpop.permute.xlu0 %86 }
  0x8c   :  { %v306_v28 = vmul.f32 %v1091_v26, %v89_v11  ;;  %v397_v32 = vmul.f32 %v1104_v30, %v89_v11  ;;  %v488_v3 = vmul.f32 %v1132_v38, %v89_v11  ;;  %v579_v34 = vmul.f32 %v1144_v42, %v89_v11 }
  0x8d   :  { %v670_v41 = vmul.f32 %v1158_v46, %v89_v11  ;;  %v761_v44 = vmul.f32 %v1161_v47, %v89_v11  ;;  %v676_v50 = vadd.f32 %v1177_v51, %v668_v15  ;;  %v767_v23 = vadd.f32 %v1190_v54, %v759_v1 }
  0x8e   :  { %v1597_v40 = vadd.f32 %v1097_v29, %v94_v2  ;;  %v1600_v39 = vadd.f32 %v1111_v33, %v215_v18  ;;  %v1603_v21 = vadd.f32 %v1151_v45, %v306_v28  ;;  %v1606_v13 = vadd.f32 %v1167_v49, %v397_v32 }
  0x8f   :  { %v1609_v20 = vadd.f32 %v1180_v52, %v488_v3  ;;  %v1612_v11 = vadd.f32 %v1183_v53, %v579_v34  ;;  %v93_v51 = vmul.f32 %v1083_v24, %v87_v48  ;;  %v214_v29 = vmul.f32 %v1085_v25, %v87_v48  ;;  %v104_v53 = vpop.permute.xlu1 %103  ;;  %v106_v2 = vpop.permute.xlu0 %105 }
  0x90   :  { %v305_v54 = vmul.f32 %v1091_v26, %v87_v48  ;;  %v396_v33 = vmul.f32 %v1104_v30, %v87_v48  ;;  %v1619_v45 = vadd.f32 %v1193_v55, %v670_v41  ;;  %v1622_v49 = vadd.f32 %v1196_v56, %v761_v44 }
  0x91   :  { %v487_v52 = vmul.f32 %v1132_v38, %v87_v48  ;;  %v578_v18 = vmul.f32 %v1144_v42, %v87_v48  ;;  %v101_v1 = vadd.f32 %v1122_v36, %v93_v51  ;;  %v222_v24 = vadd.f32 %v1125_v37, %v214_v29 }
  0x92   :  { %v669_v25 = vmul.f32 %v1158_v46, %v87_v48  ;;  %v760_v26 = vmul.f32 %v1161_v47, %v87_v48  ;;  %v313_v30 = vadd.f32 %v1199_v57, %v305_v54  ;;  %v404_v55 = vadd.f32 %v1206_v58, %v396_v33 }
  0x93   :  { %v495_v56 = vadd.f32 %v1209_v59, %v487_v52  ;;  %v586_v15 = vadd.f32 %v1212_v60, %v578_v18  ;;  %v111_v38 = vmul.f32 %v1225_v63, %v104_v53  ;;  %v226_v42 = vmul.f32 %v1228_v0, %v104_v53 }
  0x94   :  { %v317_v36 = vmul.f32 %v1231_v4, %v104_v53  ;;  %v408_v37 = vmul.f32 %v1238_v5, %v104_v53  ;;  %v499_v46 = vmul.f32 %v1241_v6, %v104_v53  ;;  %v590_v47 = vmul.f32 %v1244_v8, %v104_v53 }
  0x95   :  { %v681_v57 = vmul.f32 %v1247_v9, %v104_v53  ;;  %v772_v58 = vmul.f32 %v1252_v10, %v104_v53  ;;  %v677_v59 = vadd.f32 %v1215_v61, %v669_v25  ;;  %v768_v60 = vadd.f32 %v1222_v62, %v760_v26 }
  0x96   :  { %v114_v28 = vadd.f32 %v111_v38, %v100_v27  ;;  %v229_v32 = vadd.f32 %v226_v42, %v221_v22  ;;  %v320_v3 = vadd.f32 %v317_v36, %v312_v12  ;;  %v411_v34 = vadd.f32 %v408_v37, %v403_v31  ;;  %v108_v27 = vpop.permute.xlu1 %107 }
  0x97   :  { %v502_v41 = vadd.f32 %v499_v46, %v494_v14  ;;  %v593_v44 = vadd.f32 %v590_v47, %v585_v16  ;;  %v112_v48 = vmul.f32 %v1225_v63, %v106_v2  ;;  %v227_v51 = vmul.f32 %v1228_v0, %v106_v2 }
  0x98   :  { %v318_v29 = vmul.f32 %v1231_v4, %v106_v2  ;;  %v409_v54 = vmul.f32 %v1238_v5, %v106_v2  ;;  %v684_v33 = vadd.f32 %v681_v57, %v676_v50  ;;  %v775_v52 = vadd.f32 %v772_v58, %v767_v23  ;;  %v2253_v57 = vld [vmem:[#allocation9_spill] sm:$0xff] }
  0x99   :  { %v500_v61 = vmul.f32 %v1241_v6, %v106_v2  ;;  %v591_v62 = vmul.f32 %v1244_v8, %v106_v2  ;;  %v115_v22 = vadd.f32 %v112_v48, %v101_v1  ;;  %v230_v12 = vadd.f32 %v227_v51, %v222_v24 }
  0x9a   :  { %v682_v31 = vmul.f32 %v1247_v9, %v106_v2  ;;  %v773_v14 = vmul.f32 %v1252_v10, %v106_v2  ;;  %v321_v16 = vadd.f32 %v318_v29, %v313_v30  ;;  %v412_v18 = vadd.f32 %v409_v54, %v404_v55  ;;  %v118_v30 = vpop.permute.xlu0 %117  ;;  %v2254_v2 = vld [vmem:[#allocation10_spill] sm:$0xff]  ;;  %v2257_v29 = vld [vmem:[#allocation13_spill] sm:$0xff] }
  0x9b   :  { %v503_v53 = vadd.f32 %v500_v61, %v495_v56  ;;  %v594_v25 = vadd.f32 %v591_v62, %v586_v15  ;;  %v113_v26 = vmul.f32 %v1225_v63, %v108_v27  ;;  %v228_v50 = vmul.f32 %v1228_v0, %v108_v27 }
  0x9c   :  { %v319_v23 = vmul.f32 %v1231_v4, %v108_v27  ;;  %v410_v38 = vmul.f32 %v1238_v5, %v108_v27  ;;  %v501_v42 = vmul.f32 %v1241_v6, %v108_v27  ;;  %v592_v1 = vmul.f32 %v1244_v8, %v108_v27  ;;  %v2250_v8 = vld [vmem:[#allocation6_spill] sm:$0xff] }
  0x9d   :  { %v683_v24 = vmul.f32 %v1247_v9, %v108_v27  ;;  %v774_v36 = vmul.f32 %v1252_v10, %v108_v27  ;;  %v685_v55 = vadd.f32 %v682_v31, %v677_v59  ;;  %v776_v56 = vadd.f32 %v773_v14, %v768_v60  ;;  %v2251_v9 = vld [vmem:[#allocation7_spill] sm:$0xff]  ;;  %v2252_v10 = vld [vmem:[#allocation8_spill] sm:$0xff]  ;;  %v120_v60 = vpop.permute.xlu1 %119 }
  0x9e   :  { %v116_v15 = vadd.f32 %v113_v26, %v1597_v40  ;;  %v231_v63 = vadd.f32 %v228_v50, %v1600_v39  ;;  %v322_v0 = vadd.f32 %v319_v23, %v1603_v21  ;;  %v413_v4 = vadd.f32 %v410_v38, %v1606_v13  ;;  %v2255_v59 = vld [vmem:[#allocation11_spill] sm:$0xff] }
  0x9f   :  { %v504_v5 = vadd.f32 %v501_v42, %v1609_v20  ;;  %v595_v6 = vadd.f32 %v592_v1, %v1612_v11  ;;  %v125_v37 = vmul.f32 %v2250_v8, %v118_v30  ;;  %v234_v46 = vmul.f32 %v2251_v9, %v118_v30  ;;  %v2256_v11 = vld [vmem:[#allocation12_spill] sm:$0xff] }
  0xa0   :  { %v325_v47 = vmul.f32 %v2252_v10, %v118_v30  ;;  %v416_v58 = vmul.f32 %v2253_v57, %v118_v30  ;;  %v686_v40 = vadd.f32 %v683_v24, %v1619_v45  ;;  %v777_v39 = vadd.f32 %v774_v36, %v1622_v49 }
  0xa1   :  { %v507_v21 = vmul.f32 %v2254_v2, %v118_v30  ;;  %v598_v13 = vmul.f32 %v2255_v59, %v118_v30  ;;  %v128_v20 = vadd.f32 %v125_v37, %v114_v28  ;;  %v237_v48 = vadd.f32 %v234_v46, %v229_v32 }
  0xa2   :  { %v689_v51 = vmul.f32 %v2256_v11, %v118_v30  ;;  %v780_v54 = vmul.f32 %v2257_v29, %v118_v30  ;;  %v328_v61 = vadd.f32 %v325_v47, %v320_v3  ;;  %v419_v62 = vadd.f32 %v416_v58, %v411_v34  ;;  %v122_v3 = vpop.permute.xlu0 %121 }
  0xa3   :  { %v510_v27 = vadd.f32 %v507_v21, %v502_v41  ;;  %v601_v31 = vadd.f32 %v598_v13, %v593_v44  ;;  %v126_v14 = vmul.f32 %v2250_v8, %v120_v60  ;;  %v235_v45 = vmul.f32 %v2251_v9, %v120_v60 }
  0xa4   :  { %v326_v49 = vmul.f32 %v2252_v10, %v120_v60  ;;  %v417_v26 = vmul.f32 %v2253_v57, %v120_v60  ;;  %v508_v50 = vmul.f32 %v2254_v2, %v120_v60  ;;  %v599_v28 = vmul.f32 %v2255_v59, %v120_v60 }
  0xa5   :  { %v690_v32 = vmul.f32 %v2256_v11, %v120_v60  ;;  %v781_v23 = vmul.f32 %v2257_v29, %v120_v60  ;;  %v692_v34 = vadd.f32 %v689_v51, %v684_v33  ;;  %v783_v41 = vadd.f32 %v780_v54, %v775_v52  ;;  %v2262_v60 = vld [vmem:[#allocation20_spill] sm:$0xff]  ;;  %v2263_v51 = vld [vmem:[#allocation25_spill] sm:$0xff] }
  0xa6   :  { %v129_v44 = vadd.f32 %v126_v14, %v115_v22  ;;  %v238_v38 = vadd.f32 %v235_v45, %v230_v12  ;;  %v329_v42 = vadd.f32 %v326_v49, %v321_v16  ;;  %v420_v1 = vadd.f32 %v417_v26, %v412_v18  ;;  %v2265_v54 = vld [vmem:[#allocation17_spill] sm:$0xff]  ;;  %v2267_v49 = vld [vmem:[#allocation22_spill] sm:$0xff] }
  0xa7   :  { %v511_v24 = vadd.f32 %v508_v50, %v503_v53  ;;  %v602_v36 = vadd.f32 %v599_v28, %v594_v25  ;;  %v127_v30 = vmul.f32 %v2250_v8, %v122_v3  ;;  %v236_v37 = vmul.f32 %v2251_v9, %v122_v3  ;;  %v140_v9 = vpop.permute.xlu1 %139  ;;  %v2266_v45 = vld [vmem:[#allocation21_spill] sm:$0xff]  ;;  %v2268_v50 = vld [vmem:[#allocation23_spill] sm:$0xff]  ;;  %v2269_v28 = vld [vmem:[#allocation26_spill] sm:$0xff] }
  0xa8   :  { %v327_v46 = vmul.f32 %v2252_v10, %v122_v3  ;;  %v418_v47 = vmul.f32 %v2253_v57, %v122_v3  ;;  %v693_v58 = vadd.f32 %v690_v32, %v685_v55  ;;  %v784_v21 = vadd.f32 %v781_v23, %v776_v56  ;;  %v2258_v55 = vld [vmem:[#allocation14_spill] sm:$0xff]  ;;  %v2259_v10 = vld [vmem:[#allocation15_spill] sm:$0xff]  ;;  %v142_v32 = vpop.permute.xlu0 %141 }
  0xa9   :  { %v509_v13 = vmul.f32 %v2254_v2, %v122_v3  ;;  %v600_v33 = vmul.f32 %v2255_v59, %v122_v3  ;;  %v130_v52 = vadd.f32 %v127_v30, %v116_v15  ;;  %v239_v22 = vadd.f32 %v236_v37, %v231_v63  ;;  %v2260_v2 = vld [vmem:[#allocation18_spill] sm:$0xff]  ;;  %v2261_v15 = vld [vmem:[#allocation19_spill] sm:$0xff] }
  0xaa   :  { %v691_v12 = vmul.f32 %v2256_v11, %v122_v3  ;;  %v782_v16 = vmul.f32 %v2257_v29, %v122_v3  ;;  %v330_v18 = vadd.f32 %v327_v46, %v322_v0  ;;  %v1692_v53 = vadd.f32 %v418_v47, %v413_v4  ;;  %v2271_v3 = vld [vmem:[#allocation31_spill] sm:$0xff] }
  0xab   :  { %v1694_v25 = vadd.f32 %v509_v13, %v504_v5  ;;  %v1696_v8 = vadd.f32 %v600_v33, %v595_v6  ;;  %v136_v56 = vadd.f32 %v2258_v55, %v128_v20  ;;  %v245_v57 = vadd.f32 %v2259_v10, %v237_v48  ;;  %v2264_v5 = vld [vmem:[#allocation16_spill] sm:$0xff]  ;;  %v2273_v13 = vld [vmem:[#allocation27_spill] sm:$0xff] }
  0xac   :  { %v336_v59 = vadd.f32 %v2260_v2, %v328_v61  ;;  %v427_v63 = vadd.f32 %v2261_v15, %v419_v62  ;;  %v518_v11 = vadd.f32 %v2262_v60, %v510_v27  ;;  %v609_v29 = vadd.f32 %v2263_v51, %v601_v31  ;;  %v2276_v15 = vld [vmem:[#allocation32_spill] sm:$0xff]  ;;  %v144_v60 = vpop.permute.xlu1 %143 }
  0xad   :  { %v700_v0 = vadd.f32 %v1360_v19, %v692_v34  ;;  %v791_v4 = vadd.f32 %v1366_v17, %v783_v41  ;;  %v147_v6 = vmul.f32 %v2264_v5, %v140_v9  ;;  %v250_v14 = vmul.f32 %v2265_v54, %v140_v9  ;;  %v2270_v17 = vld [vmem:[#allocation29_spill] sm:$0xff] }
  0xae   :  { %v341_v20 = vmul.f32 %v2266_v45, %v140_v9  ;;  %v432_v48 = vmul.f32 %v2267_v49, %v140_v9  ;;  %v694_v26 = vadd.f32 %v691_v12, %v686_v40  ;;  %v785_v61 = vadd.f32 %v782_v16, %v777_v39  ;;  %v2272_v39 = vld [vmem:[#allocation24_spill] sm:$0xff] }
  0xaf   :  { %v523_v62 = vmul.f32 %v2268_v50, %v140_v9  ;;  %v614_v27 = vmul.f32 %v2269_v28, %v140_v9  ;;  %v1712_v31 = vadd.f32 %v147_v6, %v136_v56  ;;  %v1714_v19 = vadd.f32 %v250_v14, %v245_v57  ;;  %v2274_v16 = vld [vmem:[#allocation28_spill] sm:$0xff]  ;;  %v2275_v56 = vld [vmem:[#allocation30_spill] sm:$0xff]  ;;  %v2279_v14 = vld [vmem:[#allocation35_spill] sm:$0xff] }
  0xb0   :  { %v705_v23 = vmul.f32 %v2270_v17, %v140_v9  ;;  %v796_v34 = vmul.f32 %v2271_v3, %v140_v9  ;;  %v1718_v41 = vadd.f32 %v341_v20, %v336_v59  ;;  %v1720_v30 = vadd.f32 %v432_v48, %v427_v63  ;;  %v2278_v6 = vld [vmem:[#allocation34_spill] sm:$0xff] }
  0xb1   :  { %v1722_v37 = vadd.f32 %v523_v62, %v518_v11  ;;  %v1724_v40 = vadd.f32 %v614_v27, %v609_v29  ;;  %v137_v46 = vadd.f32 %v2272_v39, %v129_v44  ;;  %v148_v47 = vmul.f32 %v2264_v5, %v142_v32  ;;  %v2280_v62 = vld [vmem:[#allocation36_spill] sm:$0xff] }
  0xb2   :  { %v246_v33 = vadd.f32 %v2273_v13, %v238_v38  ;;  %v251_v12 = vmul.f32 %v2265_v54, %v142_v32  ;;  %v337_v55 = vadd.f32 %v2274_v16, %v329_v42  ;;  %v342_v9 = vmul.f32 %v2266_v45, %v142_v32  ;;  %v2277_v42 = vld [vmem:[#allocation33_spill] sm:$0xff] }
  0xb3   :  { %v428_v10 = vadd.f32 %v2275_v56, %v420_v1  ;;  %v433_v57 = vmul.f32 %v2267_v49, %v142_v32  ;;  %v1734_v2 = vadd.f32 %v705_v23, %v700_v0  ;;  %v1736_v59 = vadd.f32 %v796_v34, %v791_v4 }
  0xb4   :  { %v519_v44 = vadd.f32 %v2276_v15, %v511_v24  ;;  %v524_v63 = vmul.f32 %v2268_v50, %v142_v32  ;;  %v1740_v38 = vadd.f32 %v148_v47, %v137_v46  ;;  %v1742_v11 = vadd.f32 %v251_v12, %v246_v33  ;;  %v2282_v47 = vld [vmem:[#allocation38_spill] sm:$0xff]  ;;  %v154_v33 = vpop.permute.xlu0 %153 }
  0xb5   :  { %v610_v51 = vadd.f32 %v2277_v42, %v602_v36  ;;  %v615_v29 = vmul.f32 %v2269_v28, %v142_v32  ;;  %v1746_v1 = vadd.f32 %v342_v9, %v337_v55  ;;  %v701_v0 = vadd.f32 %v2278_v6, %v693_v58  ;;  %v2281_v36 = vld [vmem:[#allocation37_spill] sm:$0xff]  ;;  %v2288_v42 = vld [vmem:[#allocation44_spill] sm:$0xff] }
  0xb6   :  { %v706_v4 = vmul.f32 %v2270_v17, %v142_v32  ;;  %v792_v20 = vadd.f32 %v2279_v14, %v784_v21  ;;  %v1751_v24 = vadd.f32 %v433_v57, %v428_v10  ;;  %v797_v48 = vmul.f32 %v2271_v3, %v142_v32  ;;  %v2285_v9 = vld [vmem:[#allocation41_spill] sm:$0xff]  ;;  %v2286_v10 = vld [vmem:[#allocation42_spill] sm:$0xff]  ;;  %v2292_v14 = vld [vmem:[#allocation52_spill] sm:$0xff] }
  0xb7   :  { %v138_v27 = vadd.f32 %v2280_v62, %v130_v52  ;;  %v149_v23 = vmul.f32 %v2264_v5, %v144_v60  ;;  %v1756_v34 = vadd.f32 %v524_v63, %v519_v44  ;;  %v247_v39 = vadd.f32 %v2281_v36, %v239_v22  ;;  %v2283_v5 = vld [vmem:[#allocation39_spill] sm:$0xff]  ;;  %v156_v36 = vpop.permute.xlu1 %155 }
  0xb8   :  { %v252_v46 = vmul.f32 %v2265_v54, %v144_v60  ;;  %v338_v58 = vadd.f32 %v2282_v47, %v330_v18  ;;  %v1763_v21 = vadd.f32 %v615_v29, %v610_v51  ;;  %v1765_v13 = vadd.f32 %v706_v4, %v701_v0  ;;  %v2284_v18 = vld [vmem:[#allocation40_spill] sm:$0xff]  ;;  %v2289_v51 = vld [vmem:[#allocation45_spill] sm:$0xff] }
  0xb9   :  { %v343_v52 = vmul.f32 %v2266_v45, %v144_v60  ;;  %v429_v32 = vadd.f32 %v2283_v5, %v1692_v53  ;;  %v1770_v12 = vadd.f32 %v797_v48, %v792_v20  ;;  %v434_v22 = vmul.f32 %v2267_v49, %v144_v60  ;;  %v2291_v0 = vld [vmem:[#allocation48_spill] sm:$0xff]  ;;  %v2293_v48 = vld [vmem:[#allocation5_spill] sm:$0xff] }
  0xba   :  { %v520_v54 = vadd.f32 %v2284_v18, %v1694_v25  ;;  %v525_v16 = vmul.f32 %v2268_v50, %v144_v60  ;;  %v1776_v55 = vadd.f32 %v149_v23, %v138_v27  ;;  %v611_v56 = vadd.f32 %v2285_v9, %v1696_v8  ;;  %v2287_v25 = vld [vmem:[#allocation43_spill] sm:$0xff]  ;;  %v2294_v27 = vld [vmem:[#allocation54_spill] sm:$0xff] }
  0xbb   :  { %v616_v45 = vmul.f32 %v2269_v28, %v144_v60  ;;  %v702_v57 = vadd.f32 %v2286_v10, %v694_v26  ;;  %v1783_v53 = vadd.f32 %v252_v46, %v247_v39  ;;  %v1785_v15 = vadd.f32 %v343_v52, %v338_v58  ;;  %v2290_v26 = vld [vmem:[#allocation46_spill] sm:$0xff]  ;;  %v1805_v39 = vpop.permute.xlu0 %157  ;;  %v2295_v52 = vld [vmem:[#allocation56_spill] sm:$0xff]  ;;  %v2300_v9 = vld [vmem:[#allocation51_spill] sm:$0xff] }
  0xbc   :  { %v1787_v49 = vadd.f32 %v434_v22, %v429_v32  ;;  %v793_v44 = vadd.f32 %v2287_v25, %v785_v61  ;;  %v1790_v50 = vadd.f32 %v525_v16, %v520_v54  ;;  %v707_v63 = vmul.f32 %v2270_v17, %v144_v60  ;;  %v2296_v32 = vld [vmem:[#allocation47_spill] sm:$0xff]  ;;  %v2299_v54 = vld [vmem:[#allocation50_spill] sm:$0xff] }
  0xbd   :  { %v161_v8 = vmul.f32 %v2288_v42, %v154_v33  ;;  %v258_v28 = vmul.f32 %v2289_v51, %v154_v33  ;;  %v1795_v29 = vadd.f32 %v616_v45, %v611_v56  ;;  %v349_v6 = vmul.f32 %v2290_v26, %v154_v33  ;;  %v2303_v25 = vld [vmem:[#allocation55_spill] sm:$0xff] }
  0xbe   :  { %v440_v4 = vmul.f32 %v2291_v0, %v154_v33  ;;  %v531_v20 = vmul.f32 %v2292_v14, %v154_v33  ;;  %vm63_vm8 = vcmp.lt.s32.totalorder %v2293_v48, 126  ;;  %v798_v61 = vmul.f32 %v2271_v3, %v144_v60  ;;  %v2297_v3 = vld [vmem:[#allocation49_spill] sm:$0xff] }
  0xbf   :  { %v164_v62 = vadd.f32 %v161_v8, %v1712_v31  ;;  %v261_v17 = vadd.f32 %v258_v28, %v1714_v19  ;;  %v622_v23 = vmul.f32 %v2294_v27, %v154_v33  ;;  %v352_v46 = vadd.f32 %v349_v6, %v1718_v41  ;;  %v2298_v19 = vld [vmem:[#allocation58_spill] sm:$0xff]  ;;  %v2301_v41 = vld [vmem:[#allocation53_spill] sm:$0xff]  ;;  %vm1903_vm12 = vmand %vm60_vm10, %vm63_vm8 }
  0xc0   :  { %v443_v47 = vadd.f32 %v440_v4, %v1720_v30  ;;  %v534_v58 = vadd.f32 %v531_v20, %v1722_v37  ;;  %v713_v5 = vmul.f32 %v2295_v52, %v154_v33  ;;  %v804_v18 = vmul.f32 %v2298_v19, %v154_v33  ;;  %v2306_v28 = vld [vmem:[#allocation57_spill] sm:$0xff]  ;;  %vm1920_vm13 = vmand %vm61_vm11, %vm63_vm8 }
  0xc1   :  { %v172_v22 = vadd.f32 %v2296_v32, %v164_v62  ;;  %v269_v60 = vadd.f32 %v2297_v3, %v261_v17  ;;  %v625_v31 = vadd.f32 %v622_v23, %v1724_v40  ;;  %v360_v16 = vadd.f32 %v2299_v54, %v352_v46  ;;  %v1855_v62 = vpop.permute.xlu0 %177 }
  0xc2   :  { %v1817_v56 = vadd.f32 %v2300_v9, %v443_v47  ;;  %v1820_v45 = vadd.f32 %v2301_v41, %v534_v58  ;;  %v716_v30 = vadd.f32 %v713_v5, %v1734_v2  ;;  %v1823_v37 = vadd.f32 %v707_v63, %v702_v57  ;;  %v2307_v63 = vld [vmem:[#allocation59_spill] sm:$0xff]  ;;  %v2308_v5 = vld [vmem:[#allocation61_spill] sm:$0xff]  ;;  %v2312_v9 = vld [vmem:[#allocation60_spill] sm:$0xff] }
  0xc3   :  { %v1825_v10 = vadd.f32 %v798_v61, %v793_v44  ;;  %v1828_v8 = vadd.f32 %v2303_v25, %v625_v31  ;;  %v807_v40 = vadd.f32 %v804_v18, %v1736_v59  ;;  %v162_v2 = vmul.f32 %v2288_v42, %v156_v36  ;;  %v1853_v61 = vpop.permute.xlu1 %175  ;;  %v2311_v18 = vld [vmem:[#allocation64_spill] sm:$0xff] }
  0xc4   :  { %v1840_v6 = vadd.f32 %v2306_v28, %v716_v30  ;;  %v259_v57 = vmul.f32 %v2289_v51, %v156_v36  ;;  %v350_v44 = vmul.f32 %v2290_v26, %v156_v36  ;;  %v441_v59 = vmul.f32 %v2291_v0, %v156_v36  ;;  %v2313_v30 = vld [vmem:[#allocation62_spill] sm:$0xff] }
  0xc5   :  { %2302 = vst [vmem:[#allocation6_spill] sm:$0xff] %v1825_v10  ;;  %v1846_v4 = vadd.f32 %v2307_v63, %v807_v40  ;;  %v532_v7 = vmul.f32 %v2292_v14, %v156_v36  ;;  %v1851_v20 = vmul.f32 %v2294_v27, %v156_v36  ;;  %v1858_v17 = vmul.f32 %v2295_v52, %v156_v36 }
  0xc6   :  { %v1861_v23 = vmul.f32 %v2298_v19, %v156_v36  ;;  %v1865_v46 = vmul.f32 %v2288_v42, %v1805_v39  ;;  %v1869_v47 = vmul.f32 %v2289_v51, %v1805_v39  ;;  %v1877_v58 = vmul.f32 %v2290_v26, %v1805_v39 }
  0xc7   :  { %v1881_v36 = vmul.f32 %v2291_v0, %v1805_v39  ;;  %v1885_v42 = vmul.f32 %v2292_v14, %v1805_v39  ;;  %v1889_v51 = vmul.f32 %v2294_v27, %v1805_v39  ;;  %v165_v26 = vadd.f32 %v162_v2, %v1740_v38  ;;  %v2316_v2 = vld [vmem:[#allocation63_spill] sm:$0xff] }
  0xc8   :  { %v183_v32 = vmul.f32 %v2308_v5, %v1853_v61  ;;  %v184_v0 = vmul.f32 %v2308_v5, %v1855_v62  ;;  %v262_v14 = vadd.f32 %v259_v57, %v1742_v11  ;;  %v274_v3 = vmul.f32 %v1505_v35, %v1853_v61 }
  0xc9   :  { %v275_v38 = vmul.f32 %v1505_v35, %v1855_v62  ;;  %v353_v31 = vadd.f32 %v350_v44, %v1746_v1  ;;  %v365_v54 = vmul.f32 %v2311_v18, %v1853_v61  ;;  %v173_v41 = vadd.f32 %v2312_v9, %v165_v26 }
  0xca   :  { %v186_v11 = vadd.f32 %v183_v32, %v172_v22  ;;  %v270_v25 = vadd.f32 %v2313_v30, %v262_v14  ;;  %v366_v40 = vmul.f32 %v2311_v18, %v1855_v62  ;;  %v277_v28 = vadd.f32 %v274_v3, %v269_v60  ;;  %v2317_v32 = vld [vmem:[#allocation66_spill] sm:$0xff]  ;;  %v2318_v3 = vld [vmem:[#allocation83_spill] sm:$0xff] }
  0xcb   :  { %v361_v1 = vadd.f32 %v2316_v2, %v353_v31  ;;  %v368_v57 = vadd.f32 %v365_v54, %v360_v16  ;;  %v444_v44 = vadd.f32 %v441_v59, %v1751_v24  ;;  %v187_v63 = vadd.f32 %v184_v0, %v173_v41 }
  0xcc   :  { %v189_v22 = vsel %vm1903_vm12, %v186_v11, 0.0  ;;  %v278_v26 = vadd.f32 %v275_v38, %v270_v25  ;;  %v456_v14 = vmul.f32 %v2317_v32, %v1853_v61  ;;  %v280_v30 = vsel %vm1903_vm12, %v277_v28, 0.0  ;;  %v2319_v25 = vld [vmem:[#allocation65_spill] sm:$0xff] }
  0xcd   :  { %v200_v9 = vmul.f32 %v189_v22, %v189_v22  ;;  %v369_v10 = vadd.f32 %v366_v40, %v361_v1  ;;  %v371_v60 = vsel %vm1903_vm12, %v368_v57, 0.0  ;;  %v190_v16 = vsel %vm1920_vm13, %v187_v63, 0.0 }
  0xce   :  { %v281_v24 = vsel %vm1920_vm13, %v278_v26, 0.0  ;;  %v291_v59 = vmul.f32 %v280_v30, %v280_v30  ;;  %v382_v0 = vmul.f32 %v371_v60, %v371_v60  ;;  %vm51_vm14 = vcmp.le.s32.totalorder %v2318_v3, 16 }
  0xcf   :  { %v1939_v38 = vadd.f32 %v190_v16, %v189_v22  ;;  %v201_v31 = vmul.f32 %v190_v16, %v190_v16  ;;  %v1941_v54 = vadd.f32 %v281_v24, %v280_v30  ;;  %v292_v41 = vmul.f32 %v281_v24, %v281_v24  ;;  %vm58_vm15 = vmand %vm51_vm14, %vm55_vm5 }
  0xd0   :  { %v372_v11 = vsel %vm1920_vm13, %v369_v10, 0.0  ;;  %v452_v40 = vadd.f32 %v2319_v25, %v444_v44  ;;  %v457_v28 = vmul.f32 %v2317_v32, %v1855_v62  ;;  %v459_v2 = vadd.f32 %v456_v14, %v1817_v56  ;;  %v2320_v44 = vld [vmem:[#allocation68_spill] sm:$0xff]  ;;  %vm62_vm0 = vmand %vm58_vm15, %vm59_vm7 }
  0xd1   :  { %v1949_v1 = vadd.f32 %v201_v31, %v200_v9  ;;  %v1951_v57 = vadd.f32 %v292_v41, %v291_v59  ;;  %v1953_v63 = vadd.f32 %v372_v11, %v371_v60  ;;  %v383_v22 = vmul.f32 %v372_v11, %v372_v11  ;;  %v2321_v60 = vld [vmem:[#allocation67_spill] sm:$0xff]  ;;  %v2323_v11 = vld [vmem:[#allocation69_spill] sm:$0xff]  ;;  %vm2037_vm1 = vmand %vm62_vm0, %vm63_vm8 }
  0xd2   :  { %v460_v26 = vadd.f32 %v457_v28, %v452_v40  ;;  %v462_v30 = vsel %vm1903_vm12, %v459_v2, 0.0  ;;  %v535_v10 = vadd.f32 %v532_v7, %v1756_v34  ;;  %v547_v16 = vmul.f32 %v2320_v44, %v1853_v61  ;;  %v2322_v34 = vld [vmem:[#allocation70_spill] sm:$0xff] }
  0xd3   :  { %v1960_v24 = vadd.f32 %v383_v22, %v382_v0  ;;  %v473_v25 = vmul.f32 %v462_v30, %v462_v30  ;;  %v548_v56 = vmul.f32 %v2320_v44, %v1855_v62  ;;  %v626_v14 = vadd.f32 %v1851_v20, %v1763_v21 }
  0xd4   :  { %v463_v9 = vsel %vm1920_vm13, %v460_v26, 0.0  ;;  %v543_v59 = vadd.f32 %v2321_v60, %v535_v10  ;;  %v550_v31 = vadd.f32 %v547_v16, %v1820_v45  ;;  %v638_v7 = vmul.f32 %v2322_v34, %v1853_v61  ;;  %v2324_v10 = vld [vmem:[#allocation72_spill] sm:$0xff] }
  0xd5   :  { %v1972_v41 = vadd.f32 %v463_v9, %v462_v30  ;;  %v474_v0 = vmul.f32 %v463_v9, %v463_v9  ;;  %v634_v40 = vadd.f32 %v2323_v11, %v626_v14  ;;  %v639_v28 = vmul.f32 %v2322_v34, %v1855_v62  ;;  %v2325_v9 = vld [vmem:[#allocation71_spill] sm:$0xff] }
  0xd6   :  { %v551_v2 = vadd.f32 %v548_v56, %v543_v59  ;;  %v553_v21 = vsel %vm1903_vm12, %v550_v31, 0.0  ;;  %v641_v20 = vadd.f32 %v638_v7, %v1828_v8  ;;  %v717_v45 = vadd.f32 %v1858_v17, %v1765_v13 }
  0xd7   :  { %v1982_v22 = vadd.f32 %v474_v0, %v473_v25  ;;  %v564_v26 = vmul.f32 %v553_v21, %v553_v21  ;;  %v642_v30 = vadd.f32 %v639_v28, %v634_v40  ;;  %v729_v16 = vmul.f32 %v2324_v10, %v1853_v61 }
  0xd8   :  { %v554_v14 = vsel %vm1920_vm13, %v551_v2, 0.0  ;;  %v644_v56 = vsel %vm1903_vm12, %v641_v20, 0.0  ;;  %v725_v60 = vadd.f32 %v2325_v9, %v717_v45  ;;  %v730_v8 = vmul.f32 %v2324_v10, %v1855_v62  ;;  %v2326_v2 = vld [vmem:[#allocation74_spill] sm:$0xff]  ;;  %v2012_v45 = vpop.permute.xlu1 %179 }
  0xd9   :  { %v1993_v59 = vadd.f32 %v554_v14, %v553_v21  ;;  %v565_v13 = vmul.f32 %v554_v14, %v554_v14  ;;  %v645_v17 = vsel %vm1920_vm13, %v642_v30, 0.0  ;;  %v655_v25 = vmul.f32 %v644_v56, %v644_v56 }
  0xda   :  { %v2001_v31 = vadd.f32 %v645_v17, %v644_v56  ;;  %v656_v7 = vmul.f32 %v645_v17, %v645_v17  ;;  %v732_v0 = vadd.f32 %v729_v16, %v1840_v6  ;;  %v733_v11 = vadd.f32 %v730_v8, %v725_v60  ;;  %v2328_v56 = vld [vmem:[#allocation75_spill] sm:$0xff] }
  0xdb   :  { %v2004_v40 = vadd.f32 %v565_v13, %v564_v26  ;;  %v808_v28 = vadd.f32 %v1861_v23, %v1770_v12  ;;  %v820_v21 = vmul.f32 %v2326_v2, %v1853_v61  ;;  %v821_v20 = vmul.f32 %v2326_v2, %v1855_v62  ;;  %v2327_v26 = vld [vmem:[#allocation73_spill] sm:$0xff] }
  0xdc   :  { %v2014_v3 = vadd.f32 %v656_v7, %v655_v25  ;;  %v735_v30 = vsel %vm1903_vm12, %v732_v0, 0.0  ;;  %v736_v6 = vsel %vm1920_vm13, %v733_v11, 0.0  ;;  %v166_v12 = vadd.f32 %v1865_v46, %v1776_v55  ;;  %v2332_v0 = vld [vmem:[#allocation77_spill] sm:$0xff] }
  0xdd   :  { %v2024_v61 = vadd.f32 %v736_v6, %v735_v30  ;;  %v746_v23 = vmul.f32 %v735_v30, %v735_v30  ;;  %v747_v62 = vmul.f32 %v736_v6, %v736_v6  ;;  %v816_v16 = vadd.f32 %v2327_v26, %v808_v28  ;;  %v2333_v30 = vld [vmem:[#allocation78_spill] sm:$0xff] }
  0xde   :  { %v823_v14 = vadd.f32 %v820_v21, %v1846_v4  ;;  %v174_v9 = vadd.f32 %v2328_v56, %v166_v12  ;;  %v185_v60 = vmul.f32 %v2308_v5, %v2012_v45  ;;  %v263_v43 = vadd.f32 %v1869_v47, %v1783_v53  ;;  %v2331_v53 = vld [vmem:[#allocation76_spill] sm:$0xff]  ;;  %v2334_v56 = vld [vmem:[#allocation79_spill] sm:$0xff] }
  0xdf   :  { %v2033_v8 = vadd.f32 %v747_v62, %v746_v23  ;;  %v824_v13 = vadd.f32 %v821_v20, %v816_v16  ;;  %v276_v4 = vmul.f32 %v1505_v35, %v2012_v45  ;;  %v354_v46 = vadd.f32 %v1877_v58, %v1785_v15 }
  0xe0   :  { %v826_v5 = vsel %vm1903_vm12, %v823_v14, 0.0  ;;  %v188_v17 = vadd.f32 %v185_v60, %v174_v9  ;;  %v271_v47 = vadd.f32 %v2331_v53, %v263_v43  ;;  %v367_v25 = vmul.f32 %v2311_v18, %v2012_v45 }
  0xe1   :  { %v827_v48 = vsel %vm1920_vm13, %v824_v13, 0.0  ;;  %v837_v7 = vmul.f32 %v826_v5, %v826_v5  ;;  %v362_v11 = vadd.f32 %v2332_v0, %v354_v46  ;;  %v445_v35 = vadd.f32 %v1881_v36, %v1787_v49 }
  0xe2   :  { %v2055_v28 = vadd.f32 %v827_v48, %v826_v5  ;;  %v838_v15 = vmul.f32 %v827_v48, %v827_v48  ;;  %v191_v58 = vsel %vm2037_vm1, %v188_v17, 0.0  ;;  %v279_v27 = vadd.f32 %v276_v4, %v271_v47 }
  0xe3   :  { %v193_v21 = vadd.f32 %v1939_v38, %v191_v58  ;;  %v202_v20 = vmul.f32 %v191_v58, %v191_v58  ;;  %v370_v18 = vadd.f32 %v367_v25, %v362_v11  ;;  %v453_v33 = vadd.f32 %v2333_v30, %v445_v35 }
  0xe4   :  { %v2061_v6 = vadd.f32 %v838_v15, %v837_v7  ;;  %v282_v12 = vsel %vm2037_vm1, %v279_v27, 0.0  ;;  %v458_v49 = vmul.f32 %v2317_v32, %v2012_v45  ;;  %v536_v36 = vadd.f32 %v1885_v42, %v1790_v50 }
  0xe5   :  { %v194_v23 = vrot.slane %v193_v21, 4  ;;  %v204_v62 = vadd.f32 %v1949_v1, %v202_v20  ;;  %v284_v38 = vadd.f32 %v1941_v54, %v282_v12  ;;  %v293_v26 = vmul.f32 %v282_v12, %v282_v12 }
  0xe6   :  { %v373_v16 = vsel %vm2037_vm1, %v370_v18, 0.0  ;;  %v461_v14 = vadd.f32 %v458_v49, %v453_v33  ;;  %v544_v9 = vadd.f32 %v2334_v56, %v536_v36  ;;  %v549_v60 = vmul.f32 %v2320_v44, %v2012_v45 }
  0xe7   :  { %v195_v43 = vadd.f32 %v194_v23, %v193_v21  ;;  %v205_v32 = vrot.slane %v204_v62, 4  ;;  %v285_v13 = vrot.slane %v284_v38, 4  ;;  %v295_v50 = vadd.f32 %v1951_v57, %v293_v26 }
  0xe8   :  { %v375_v42 = vadd.f32 %v1953_v63, %v373_v16  ;;  %v384_v1 = vmul.f32 %v373_v16, %v373_v16  ;;  %v464_v54 = vsel %vm2037_vm1, %v461_v14, 0.0  ;;  %v552_v4 = vadd.f32 %v549_v60, %v544_v9 }
  0xe9   :  { %v196_v46 = vrot.slane %v195_v43, 2  ;;  %v206_v5 = vadd.f32 %v205_v32, %v204_v62  ;;  %v286_v17 = vadd.f32 %v285_v13, %v284_v38  ;;  %v296_v53 = vrot.slane %v295_v50, 4 }
  0xea   :  { %v376_v47 = vrot.slane %v375_v42, 4  ;;  %v386_v25 = vadd.f32 %v1960_v24, %v384_v1  ;;  %v466_v44 = vadd.f32 %v1972_v41, %v464_v54  ;;  %v475_v48 = vmul.f32 %v464_v54, %v464_v54 }
  0xeb   :  { %v197_v7 = vadd.f32 %v196_v46, %v195_v43  ;;  %v207_v0 = vrot.slane %v206_v5, 2  ;;  %v287_v57 = vrot.slane %v286_v17, 2  ;;  %v297_v11 = vadd.f32 %v296_v53, %v295_v50 }
  0xec   :  { %v377_v63 = vadd.f32 %v376_v47, %v375_v42  ;;  %v387_v35 = vrot.slane %v386_v25, 4  ;;  %v467_v15 = vrot.slane %v466_v44, 4  ;;  %v477_v58 = vadd.f32 %v1982_v22, %v475_v48 }
  0xed   :  { %v198_v27 = vrot.slane %v197_v7, 1  ;;  %v208_v21 = vadd.f32 %v207_v0, %v206_v5  ;;  %v288_v20 = vadd.f32 %v287_v57, %v286_v17  ;;  %v298_v18 = vrot.slane %v297_v11, 2 }
  0xee   :  { %v378_v30 = vrot.slane %v377_v63, 2  ;;  %v388_v33 = vadd.f32 %v387_v35, %v386_v25  ;;  %v468_v24 = vadd.f32 %v467_v15, %v466_v44  ;;  %v478_v12 = vrot.slane %v477_v58, 4 }
  0xef   :  { %v715_v41 = vmul.f32 %v2295_v52, %v1805_v39  ;;  %v209_v49 = vrot.slane %v208_v21, 1  ;;  %v289_v36 = vrot.slane %v288_v20, 1  ;;  %v299_v23 = vadd.f32 %v298_v18, %v297_v11  ;;  %v2336_v11 = vld [vmem:[#allocation81_spill] sm:$0xff] }
  0xf0   :  { %v379_v62 = vadd.f32 %v378_v30, %v377_v63  ;;  %v389_v38 = vrot.slane %v388_v33, 2  ;;  %v469_v26 = vrot.slane %v468_v24, 2  ;;  %v479_v22 = vadd.f32 %v478_v12, %v477_v58  ;;  %v2337_v63 = vld [vmem:[#allocation6_spill] sm:$0xff] }
  0xf1   :  { %v806_v16 = vmul.f32 %v2298_v19, %v1805_v39  ;;  %v199_v14 = vadd.f32 %v198_v27, %v197_v7  ;;  %v300_v56 = vrot.slane %v299_v23, 1  ;;  %v555_v9 = vsel %vm2037_vm1, %v552_v4, 0.0  ;;  %v2335_v4 = vld [vmem:[#allocation80_spill] sm:$0xff] }
  0xf2   :  { %v380_v60 = vrot.slane %v379_v62, 1  ;;  %v390_v43 = vadd.f32 %v389_v38, %v388_v33  ;;  %v470_v32 = vadd.f32 %v469_v26, %v468_v24  ;;  %v480_v52 = vrot.slane %v479_v22, 2 }
  0xf3   :  { %v210_v13 = vadd.f32 %v209_v49, %v208_v21  ;;  %v557_v50 = vadd.f32 %v1993_v59, %v555_v9  ;;  %v566_v42 = vmul.f32 %v555_v9, %v555_v9  ;;  %v627_v1 = vadd.f32 %v1889_v51, %v1795_v29 }
  0xf4   :  { %v290_v54 = vadd.f32 %v289_v36, %v288_v20  ;;  %v301_v46 = vadd.f32 %v300_v56, %v299_v23  ;;  %v391_v39 = vrot.slane %v390_v43, 1  ;;  %v471_v19 = vrot.slane %v470_v32, 1 }
  0xf5   :  { %v558_v5 = vrot.slane %v557_v50, 4  ;;  %v568_v17 = vadd.f32 %v2004_v40, %v566_v42  ;;  %v635_v53 = vadd.f32 %v2335_v4, %v627_v1  ;;  %v640_v47 = vmul.f32 %v2322_v34, %v2012_v45 }
  0xf6   :  { %vm854_vm5 = vcmask 1043456   ;;  %v381_v25 = vadd.f32 %v380_v60, %v379_v62  ;;  %v392_v44 = vadd.f32 %v391_v39, %v390_v43  ;;  %v481_v59 = vadd.f32 %v480_v52, %v479_v22 }
  0xf7   :  { %v718_v48 = vadd.f32 %v715_v41, %v1823_v37  ;;  %v559_v7 = vadd.f32 %v558_v5, %v557_v50  ;;  %v569_v29 = vrot.slane %v568_v17, 4  ;;  %v643_v51 = vadd.f32 %v640_v47, %v635_v53 }
  0xf8   :  { %v731_v0 = vmul.f32 %v2324_v10, %v2012_v45  ;;  %v472_v57 = vadd.f32 %v471_v19, %v470_v32  ;;  %v809_v35 = vadd.f32 %v806_v16, %v2337_v63  ;;  %v822_v34 = vmul.f32 %v2326_v2, %v2012_v45  ;;  %v2338_v10 = vld [vmem:[#allocation82_spill] sm:$0xff] }
  0xf9   :  { %v726_v40 = vadd.f32 %v2336_v11, %v718_v48  ;;  %v560_v15 = vrot.slane %v559_v7, 2  ;;  %v570_v58 = vadd.f32 %v569_v29, %v568_v17  ;;  %v646_v27 = vsel %vm2037_vm1, %v643_v51, 0.0 }
  0xfa   :  { %v849_v37 = vsel %vm848_vm2, %v199_v14, %v290_v54  ;;  %v648_v21 = vadd.f32 %v2001_v31, %v646_v27  ;;  %v657_v20 = vmul.f32 %v646_v27, %v646_v27  ;;  %v817_v30 = vadd.f32 %v2338_v10, %v809_v35 }
  0xfb   :  { %v734_v18 = vadd.f32 %v731_v0, %v726_v40  ;;  %v561_v33 = vadd.f32 %v560_v15, %v559_v7  ;;  %v571_v24 = vrot.slane %v570_v58, 2  ;;  %v851_v12 = vsel %vm850_vm3, %v849_v37, %v381_v25 }
  0xfc   :  { %v862_v41 = vsel %vm848_vm2, %v210_v13, %v301_v46  ;;  %v649_v2 = vrot.slane %v648_v21, 4  ;;  %v659_v45 = vadd.f32 %v2014_v3, %v657_v20  ;;  %v825_v36 = vadd.f32 %v822_v34, %v817_v30 }
  0xfd   :  { %v737_v49 = vsel %vm2037_vm1, %v734_v18, 0.0  ;;  %v562_v23 = vrot.slane %v561_v33, 1  ;;  %v572_v31 = vadd.f32 %v571_v24, %v570_v58  ;;  %v853_v14 = vsel %vm852_vm4, %v851_v12, %v472_v57 }
  0xfe   :  { %v739_v62 = vadd.f32 %v2024_v61, %v737_v49  ;;  %v748_v38 = vmul.f32 %v737_v49, %v737_v49  ;;  %v650_v26 = vadd.f32 %v649_v2, %v648_v21  ;;  %v660_v22 = vrot.slane %v659_v45, 4 }
  0xff   :  { %v828_v16 = vsel %vm2037_vm1, %v825_v36, 0.0  ;;  %v482_v56 = vrot.slane %v481_v59, 1  ;;  %v563_v9 = vadd.f32 %v562_v23, %v561_v33  ;;  %v573_v50 = vrot.slane %v572_v31, 1 }
 0x100   :  { %v740_v3 = vrot.slane %v739_v62, 4  ;;  %v750_v60 = vadd.f32 %v2033_v8, %v748_v38  ;;  %v651_v43 = vrot.slane %v650_v26, 2  ;;  %v661_v32 = vadd.f32 %v660_v22, %v659_v45 }
 0x101   :  { %v830_v52 = vadd.f32 %v2055_v28, %v828_v16  ;;  %v839_v13 = vmul.f32 %v828_v16, %v828_v16  ;;  %v855_v1 = vsel %vm854_vm5, %v853_v14, %v563_v9  ;;  %v483_v19 = vadd.f32 %v482_v56, %v481_v59 }
 0x102   :  { %v741_v61 = vadd.f32 %v740_v3, %v739_v62  ;;  %v751_v42 = vrot.slane %v750_v60, 4  ;;  %v652_v54 = vadd.f32 %v651_v43, %v650_v26  ;;  %v662_v55 = vrot.slane %v661_v32, 2 }
 0x103   :  { %v831_v46 = vrot.slane %v830_v52, 4  ;;  %v841_v39 = vadd.f32 %v2061_v6, %v839_v13  ;;  %v863_v8 = vsel %vm850_vm3, %v862_v41, %v392_v44  ;;  %v574_v25 = vadd.f32 %v573_v50, %v572_v31 }
 0x104   :  { %v742_v5 = vrot.slane %v741_v61, 2  ;;  %v752_v17 = vadd.f32 %v751_v42, %v750_v60  ;;  %v653_v4 = vrot.slane %v652_v54, 1  ;;  %v663_v53 = vadd.f32 %v662_v55, %v661_v32 }
 0x105   :  { %v832_v47 = vadd.f32 %v831_v46, %v830_v52  ;;  %v842_v28 = vrot.slane %v841_v39, 4  ;;  %v864_v29 = vsel %vm852_vm4, %v863_v8, %v483_v19  ;;  %vm858_vm7 = vcmask 1045504  }
 0x106   :  { %v743_v48 = vadd.f32 %v742_v5, %v741_v61  ;;  %v753_v7 = vrot.slane %v752_v17, 2  ;;  %v654_v51 = vadd.f32 %v653_v4, %v652_v54  ;;  %v664_v0 = vrot.slane %v663_v53, 1 }
 0x107   :  { %v833_v57 = vrot.slane %v832_v47, 2  ;;  %v843_v11 = vadd.f32 %v842_v28, %v841_v39  ;;  %v865_v40 = vsel %vm854_vm5, %v864_v29, %v574_v25  ;;  %vm860_vm8 = vcmask 1046528  }
 0x108   :  { %v744_v6 = vrot.slane %v743_v48, 1  ;;  %v754_v59 = vadd.f32 %v753_v7, %v752_v17  ;;  %v665_v63 = vadd.f32 %v664_v0, %v663_v53  ;;  %v857_v34 = vsel %vm856_vm6, %v855_v1, %v654_v51 }
 0x109   :  { %v834_v44 = vadd.f32 %v833_v57, %v832_v47  ;;  %v844_v35 = vrot.slane %v843_v11, 2 }
 0x10a   :  { %v745_v15 = vadd.f32 %v744_v6, %v743_v48  ;;  %v755_v58 = vrot.slane %v754_v59, 1  ;;  %v866_v21 = vsel %vm856_vm6, %v865_v40, %v665_v63 }
 0x10b   :  { %v835_v27 = vrot.slane %v834_v44, 1  ;;  %v845_v37 = vadd.f32 %v844_v35, %v843_v11 }
 0x10c   :  { %v756_v20 = vadd.f32 %v755_v58, %v754_v59  ;;  %v859_v18 = vsel %vm858_vm7, %v857_v34, %v745_v15 }
 0x10d   :  { %v836_v10 = vadd.f32 %v835_v27, %v834_v44  ;;  %v846_v30 = vrot.slane %v845_v37, 1 }
 0x10e   :  { %v867_v33 = vsel %vm858_vm7, %v866_v21, %v756_v20 }
 0x10f   :  { %v847_v24 = vadd.f32 %v846_v30, %v845_v37  ;;  %v861_v12 = vsel %vm860_vm8, %v859_v18, %v836_v10 }
 0x110   :  { %869 = vst [vmem:[%s2136_s2] sm:$0xff] %v861_v12 }
 0x111   :  { %v868_v41 = vsel %vm860_vm8, %v867_v33, %v847_v24 }
 0x112   :  { %870 = vst [vmem:[%s2136_s2 + $0x8] sm:$0xff] %v868_v41 }
 0x113   :  { %875 = vsyncpa [#allocation3], 1 }

// kernel: denoise_forward.3
= control target key start
LH: loop header
LB: loop body
LE: loop exit
PB: predicated region body
PF: predicated region fallthrough
CT: control target
= control target key end

     0   :  { %11 = vsyncpa [#allocation4], 0  ;;  %s3978_s0 = inlined_call_operand.vmem [shape: f32[24,128], index: 0, kind: input, shape index: {}]   ;;  %s3979_s1 = inlined_call_operand.vmem [shape: f32[72], index: 1, kind: input, shape index: {}]   ;;  %s3980_s2 = inlined_call_operand.vmem [shape: f32[8], index: 2, kind: input, shape index: {}]   ;;  %s3981_s3 = inlined_call_operand.vmem [shape: f32[72], index: 3, kind: input, shape index: {}]   ;;  %s3982_s4 = inlined_call_operand.<no memory space> [shape: f32[1], index: 4, kind: input, shape index: {}]   ;;  %s3983_s5 = inlined_call_operand.vmem [shape: f32[24,128], index: 5, kind: output, shape index: {}]  }
   0x1   :  { %12 = vsyncpa [#allocation6], 0  ;;  %s31_s20 = sshll.u32 %s3980_s2, 4  ;;  %s21_s23 = sshll.u32 %s3979_s1, 4  ;;  %s32_s20 = int_to_ptr.vmem [resolvable:$true] %s31_s20  ;;  %s22_s23 = int_to_ptr.vmem [resolvable:$true] %s21_s23 }
   0x2   :  { %s1923_s24 = scalar_lea.vmem %s32_s20, 16  ;;  %p1928_p1 = scmp.lt.s32.totalorder %s32_s20, %s32_s20 }
   0x3   :  { %p1924_p0 = scmp.ne.s32.totalorder %s32_s20, %s1923_s24  ;;  %p1929_p2 = scmp.lt.s32.totalorder %s1923_s24, %s1923_s24 }
   0x5   :  { %p1930_p3 = por %p1929_p2, %p1928_p1 }
   0x7   :  { %p1931_p4 = pnand %p1930_p3, %p1924_p0 }
   0x9   :  { %1934 = shalt.err (!%p1931_p4)
}
   0xa   :  { %s1963_s25 = smov [#allocation5]   ;;  %s1935_s26 = scalar_lea.vmem %s22_s23, 16 }
   0xb   :  { %34 = dma.vmem_to_smem %s32_s20, 16, %s1963_s25, [#allocation6]  }
   0xc   :  { %p1936_p5 = scmp.ne.s32.totalorder %s22_s23, %s1935_s26  ;;  %p1940_p6 = scmp.lt.s32.totalorder %s22_s23, %s22_s23 }
   0xd   :  { %p1941_p7 = scmp.lt.s32.totalorder %s1935_s26, %s1935_s26 }
   0xf   :  { %p1942_p8 = por %p1941_p7, %p1940_p6 }
  0x11   :  { %p1943_p9 = pnand %p1942_p8, %p1936_p5 }
  0x13   :  { %1946 = shalt.err (!%p1943_p9)
}
  0x14   :  { %s1964_s2 = smov [#allocation3]   ;;  %s41_s28 = sshll.u32 %s3981_s3, 4  ;;  %s42_s28 = int_to_ptr.vmem [resolvable:$true] %s41_s28 }
  0x15   :  { %24 = dma.vmem_to_smem %s22_s23, 16, %s1964_s2, [#allocation4]  }
  0x16   :  { %s1947_s29 = scalar_lea.vmem %s42_s28, 16  ;;  %p1952_p11 = scmp.lt.s32.totalorder %s42_s28, %s42_s28 }
  0x17   :  { %p1948_p10 = scmp.ne.s32.totalorder %s42_s28, %s1947_s29  ;;  %p1953_p12 = scmp.lt.s32.totalorder %s1947_s29, %s1947_s29 }
  0x19   :  { %p1954_p13 = por %p1953_p12, %p1952_p11 }
  0x1b   :  { %p1955_p0 = pnand %p1954_p13, %p1948_p10 }
  0x1d   :  { %1958 = shalt.err (!%p1955_p0)
}
  0x1e   :  { %s1965_s30 = smov [#allocation7]  }
  0x1f   :  { %44 = dma.vmem_to_smem %s42_s28, 16, %s1965_s30, [#allocation6]  }
  0x20   :  { %1959 = dma.done.wait [#allocation4], 16  }
  0x21   :  { %1960 = vsyncadd [#allocation4], 4294967280 }
  0x22   :  { %1961 = dma.done.wait [#allocation6], 32  }
  0x23   :  { %1962 = vsyncadd [#allocation6], 4294967264 }
  0x24   :  { %56 = sfence }
  0x25   :  { %v57_v0 = vlaneseq  ;;  %v2010_v1 = vld [vmem:[%s3978_s0] sm:$0xff]  ;;  %v2015_v2 = vld [vmem:[%s3978_s0 + $0x10] sm:$0xff]  ;;  %v2020_v3 = vld [vmem:[%s3978_s0 + $0x8] sm:$0xff]  ;;  %s1966_s11 = smov 1   ;;  %s1967_s12 = smov 127   ;;  %v4112_v25 = vmov 0 }
  0x26   :  { %4101 = vst [vmem:[#allocation10_spill] sm:$0xff] %v2010_v1  ;;  %4102 = vst [vmem:[#allocation11_spill] sm:$0xff] %v2015_v2  ;;  %v103_v4 = vrot.slane %v2010_v1, 7  ;;  %v105_v5 = vrot.slane %v2015_v2, 7  ;;  %v104_v6 = vrot.slane %v2020_v3, 7  ;;  %v110_v14 = vrot.slane %v2010_v1, 1 }
  0x27   :  { %4103 = vst [vmem:[#allocation12_spill] sm:$0xff] %v2020_v3  ;;  %v2025_v7 = vshrl.u32 %v57_v0, 7  ;;  %v2056_v11 = vand.u32 127, %v57_v0  ;;  %v111_v15 = vrot.slane %v2020_v3, 1  ;;  %v112_v16 = vrot.slane %v2015_v2, 1  ;;  %s1764_s13 = sld [smem:[#allocation3 + $0x1]] }
  0x28   :  { %v4115_v27 = vmov 0  ;;  %s125_s14 = sld [smem:[#allocation3]]  ;;  %s1781_s15 = sld [smem:[#allocation3 + $0xa]] }
  0x29   :  { %4104 = vst [vmem:[#allocation13_spill] sm:$0xff] %v2025_v7  ;;  %vm106_vm0 = vcmp.lt.s32.totalorder %v2025_v7, 1  ;;  %4108 = vst [vmem:[#allocation17_spill] sm:$0xff] %v2056_v11  ;;  %v2059_v12 = vmul.u32.u64.low 3817748708, %v2056_v11  ;;  %v2060_v13 = vmul.u32.u64.high 3817748708, %v2056_v11, %v2059_v12  ;;  %vm113_vm1 = vcmp.lt.s32.totalorder %v2025_v7, 7 }
  0x2a   :  { %v2030_v8 = vsel %vm106_vm0, %v105_v5, %v103_v4  ;;  %v2034_v9 = vsel %vm106_vm0, %v104_v6, %v105_v5  ;;  %v2042_v10 = vsel %vm106_vm0, %v103_v4, %v104_v6  ;;  %v2077_v18 = vsel %vm113_vm1, %v110_v14, %v111_v15  ;;  %s1780_s16 = sld [smem:[#allocation3 + $0x9]]  ;;  %s1800_s17 = sld [smem:[#allocation3 + $0x13]] }
  0x2b   :  { %4105 = vst [vmem:[#allocation14_spill] sm:$0xff] %v2030_v8  ;;  %4106 = vst [vmem:[#allocation15_spill] sm:$0xff] %v2034_v9  ;;  %119 = vrot.lane.b32.xlu0 %v2030_v8, %s1966_s11  ;;  %123 = vrot.lane.b32.xlu1 %v2034_v9, %s1966_s11  ;;  %v69_v17 = vshrl.u32 %v2060_v13, 4  ;;  %v2081_v19 = vsel %vm113_vm1, %v111_v15, %v112_v16  ;;  %v2090_v22 = vsel %vm113_vm1, %v112_v16, %v110_v14  ;;  %s1799_s18 = sld [smem:[#allocation3 + $0x12]]  ;;  %s1767_s20 = sld [smem:[#allocation3 + $0x4]] }
  0x2c   :  { %4107 = vst [vmem:[#allocation16_spill] sm:$0xff] %v2042_v10  ;;  %4109 = vst [vmem:[#allocation18_spill] sm:$0xff] %v2077_v18  ;;  %vm79_vm5 = vcmp.ge.s32.totalorder %v2025_v7, 1  ;;  %vm96_vm8 = vcmp.lt.s32.totalorder %v2056_v11, 126  ;;  %v60_v26 = vadd.s32 16, %v2025_v7  ;;  %s1765_s19 = sld [smem:[#allocation3 + $0x2]] }
  0x2d   :  { %4110 = vst [vmem:[#allocation19_spill] sm:$0xff] %v2081_v19  ;;  %v70_v20 = vmul.u32 18, %v69_v17  ;;  %4111 = vst [vmem:[#allocation20_spill] sm:$0xff] %v2090_v22  ;;  %s2139_s21 = sld [smem:[#allocation3 + $0xb]]  ;;  %s1770_s22 = sld [smem:[#allocation3 + $0x7]]  ;;  %v131_v36 = vstv %s1764_s13 }
  0x2e   :  { %vm84_vm12 = vcmp.le.s32.totalorder %v60_v26, 16  ;;  %s2141_s23 = sld [smem:[#allocation3 + $0xd]]  ;;  %s2147_s24 = sld [smem:[#allocation3 + $0x3]]  ;;  %v361_v37 = vstv %s1781_s15  ;;  %v2171_v41 = vstv %s125_s14  ;;  %v2178_v44 = vmul.f32 %v131_v36, %v2030_v8 }
  0x2f   :  { %121 = vrot.lane.b32.xlu0 %v2042_v10, %s1966_s11  ;;  %138 = vrot.lane.b32.xlu1 %v2030_v8, %s1967_s12  ;;  %v71_v21 = vsub.s32 %v2056_v11, %v70_v20  ;;  %s2149_s25 = sld [smem:[#allocation3 + $0x5]]  ;;  %s2151_s26 = sld [smem:[#allocation3 + $0x6]]  ;;  %v2185_v47 = vmul.f32 %v131_v36, %v2042_v10  ;;  %v2188_v48 = vmul.f32 %v361_v37, %v2030_v8 }
  0x30   :  { %s2153_s2 = sld [smem:[#allocation3 + $0xc]]  ;;  %s2155_s1 = sld [smem:[#allocation3 + $0x8]]  ;;  %v561_v40 = vstv %s1800_s17  ;;  %v2173_v42 = vstv %s1780_s16  ;;  %v2195_v50 = vmul.f32 %v131_v36, %v2034_v9  ;;  %v2218_v57 = vmul.f32 %v361_v37, %v2042_v10 }
  0x31   :  { %vm74_vm2 = vcmp.ne.s32.totalorder %v71_v21, 0  ;;  %vm75_vm3 = vcmp.lt.s32.totalorder %v71_v21, 0  ;;  %v77_v23 = vadd.s32 18, %v71_v21  ;;  %s2157_s27 = sld [smem:[#allocation3 + $0x14]]  ;;  %s2159_s28 = sld [smem:[#allocation3 + $0xe]]  ;;  %v2175_v43 = vstv %s1799_s18 }
  0x32   :  { %vm76_vm4 = vmand %vm75_vm3, %vm74_vm2  ;;  %s2161_s29 = sld [smem:[#allocation3 + $0x16]]  ;;  %s2167_s30 = sld [smem:[#allocation5]]  ;;  %v2182_v45 = vstv %s1765_s19  ;;  %v167_v46 = vstv %s1767_s20  ;;  %v2201_v52 = vmul.f32 %v561_v40, %v2030_v8  ;;  %v2221_v58 = vmul.f32 %v361_v37, %v2034_v9 }
  0x33   :  { %140 = vrot.lane.b32.xlu0 %v2042_v10, %s1967_s12  ;;  %142 = vrot.lane.b32.xlu1 %v2034_v9, %s1967_s12  ;;  %v2093_v24 = vsel %vm76_vm4, %v77_v23, %v71_v21  ;;  %s2169_s6 = sld [smem:[#allocation3 + $0x10]]  ;;  %s2180_s7 = sld [smem:[#allocation3 + $0x15]]  ;;  %v203_v49 = vstv %s1770_s22  ;;  %v2213_v56 = vstv %s2139_s21  ;;  %v2224_v59 = vmul.f32 %v167_v46, %v2010_v1 }
  0x34   :  { %vm88_vm6 = vcmp.ge.s32.totalorder %v2093_v24, 1  ;;  %vm92_vm7 = vcmp.le.s32.totalorder %v2093_v24, 16  ;;  %s2190_s3 = sld [smem:[#allocation3 + $0xf]]  ;;  %s2192_s8 = sld [smem:[#allocation3 + $0x19]]  ;;  %v385_v51 = vstv %s2141_s23  ;;  %v2210_v55 = vstv %s2147_s24 }
  0x35   :  { %vm89_vm9 = vmand %vm79_vm5, %vm88_vm6  ;;  %s2198_s9 = sld [smem:[#allocation3 + $0x11]]  ;;  %s2203_s10 = sld [smem:[#allocation3 + $0x17]]  ;;  %v2227_v60 = vstv %s2149_s25  ;;  %v2230_v61 = vstv %s2151_s26  ;;  %v2233_v62 = vmul.f32 %v167_v46, %v2020_v3  ;;  %v2238_v63 = vmul.f32 %v203_v49, %v2077_v18 }
  0x36   :  { %vm93_vm10 = vmand %vm89_vm9, %vm92_vm7  ;;  %s2215_s13 = sld [smem:[#allocation5 + $0x1]]  ;;  %s2235_s14 = sld [smem:[#allocation3 + $0x18]]  ;;  %v2241_v0 = vmul.f32 %v167_v46, %v2015_v2  ;;  %v2244_v4 = vstv %s2153_s2  ;;  %v2247_v5 = vmul.f32 %v385_v51, %v2010_v1  ;;  %v2252_v6 = vstv %s2155_s1 }
  0x37   :  { %152 = vrot.lane.b32.xlu0 %v2010_v1, %s1966_s11  ;;  %154 = vrot.lane.b32.xlu1 %v2020_v3, %s1966_s11  ;;  %vm2108_vm11 = vmand %vm93_vm10, %vm96_vm8  ;;  %s2249_s15 = sld [smem:[#allocation3 + $0x1a]]  ;;  %v2255_v12 = vmul.f32 %v385_v51, %v2020_v3  ;;  %v2258_v13 = vstv %s2157_s27  ;;  %v2269_v20 = vstv %s2159_s28  ;;  %v2273_v23 = vmul.f32 %v561_v40, %v2042_v10  ;;  %s1818_s17 = sld [smem:[#allocation3 + $0x1b]] }
  0x38   :  { %v4113_v25 = vsel %vm2108_vm11, 4294967295, %v4112_v25  ;;  %vm91_vm13 = vmand %vm84_vm12, %vm88_vm6  ;;  %4122 = vst [vmem:[#allocation27_spill] sm:$0xff] %v2258_v13  ;;  %v585_v14 = vstv %s2161_s29  ;;  %v2266_v17 = vstv %s2167_s30  ;;  %v2276_v26 = vmul.f32 %v203_v49, %v2081_v19  ;;  %s2452_s16 = sld [smem:[#allocation5 + $0x2]]  ;;  %s1819_s18 = sld [smem:[#allocation3 + $0x1c]] }
  0x39   :  { %4114 = vst [vmem:[#allocation21_spill] sm:$0xff] %v4113_v25  ;;  %vm95_vm14 = vmand %vm91_vm13, %vm92_vm7  ;;  %v409_v21 = vstv %s2169_s6  ;;  %v2279_v36 = vmul.f32 %v203_v49, %v2090_v22  ;;  %v2282_v37 = vmul.f32 %v385_v51, %v2015_v2  ;;  %v2285_v46 = vmul.f32 %v561_v40, %v2034_v9  ;;  %s1820_s19 = sld [smem:[#allocation3 + $0x1d]]  ;;  %s1821_s20 = sld [smem:[#allocation3 + $0x1e]] }
  0x3a   :  { %vm2123_vm15 = vmand %vm95_vm14, %vm96_vm8  ;;  %4125 = vst [vmem:[#allocation30_spill] sm:$0xff] %v2273_v23  ;;  %v2288_v8 = vstv %s2190_s3  ;;  %v2291_v7 = vstv %s2180_s7  ;;  %v2294_v10 = vmul.f32 %v585_v14, %v2010_v1  ;;  %v2297_v23 = vstv %s2192_s8  ;;  %s1822_s21 = sld [smem:[#allocation3 + $0x1f]]  ;;  %s1823_s22 = sld [smem:[#allocation3 + $0x20]] }
  0x3b   :  { %156 = vrot.lane.b32.xlu0 %v2015_v2, %s1966_s11  ;;  %174 = vrot.lane.b32.xlu1 %v2010_v1, %s1967_s12  ;;  %v4116_v27 = vsel %vm2123_vm15, 4294967295, %v4115_v27  ;;  %4126 = vst [vmem:[#allocation31_spill] sm:$0xff] %v2282_v37  ;;  %4127 = vst [vmem:[#allocation32_spill] sm:$0xff] %v2285_v46  ;;  %v2303_v49 = vstv %s2198_s9  ;;  %v2306_v51 = vmul.f32 %v409_v21, %v2081_v19  ;;  %v2309_v40 = vstv %s2203_s10  ;;  %s1824_s23 = sld [smem:[#allocation3 + $0x21]]  ;;  %s1825_s24 = sld [smem:[#allocation3 + $0x22]] }
  0x3c   :  { %4117 = vst [vmem:[#allocation22_spill] sm:$0xff] %v4116_v27  ;;  %4128 = vst [vmem:[#allocation33_spill] sm:$0xff] %v2291_v7  ;;  %v2300_v27 = vmul.f32 %v409_v21, %v2077_v18  ;;  %v2316_v1 = vstv %s2215_s13  ;;  %v2322_v25 = vmul.f32 %v585_v14, %v2020_v3  ;;  %v2336_v37 = vmul.f32 %v585_v14, %v2015_v2  ;;  %s1826_s25 = sld [smem:[#allocation3 + $0x23]]  ;;  %s1837_s2 = sld [smem:[#allocation3 + $0x24]] }
  0x3d   :  { %4129 = vst [vmem:[#allocation34_spill] sm:$0xff] %v2294_v10  ;;  %4130 = vst [vmem:[#allocation35_spill] sm:$0xff] %v2297_v23  ;;  %v2319_v10 = vmul.f32 %v409_v21, %v2090_v22  ;;  %s1827_s26 = sld [smem:[#allocation5 + $0x3]]  ;;  %s1838_s1 = sld [smem:[#allocation3 + $0x25]] }
  0x3e   :  { %4131 = vst [vmem:[#allocation36_spill] sm:$0xff] %v2300_v27  ;;  %4132 = vst [vmem:[#allocation37_spill] sm:$0xff] %v2306_v51  ;;  %v2329_v51 = vstv %s2235_s14  ;;  %s1839_s27 = sld [smem:[#allocation3 + $0x26]]  ;;  %s1840_s28 = sld [smem:[#allocation3 + $0x27]] }
  0x3f   :  { %176 = vrot.lane.b32.xlu0 %v2020_v3, %s1967_s12  ;;  %178 = vrot.lane.b32.xlu1 %v2015_v2, %s1967_s12  ;;  %4133 = vst [vmem:[#allocation38_spill] sm:$0xff] %v2309_v40  ;;  %4134 = vst [vmem:[#allocation39_spill] sm:$0xff] %v2316_v1  ;;  %v2333_v40 = vmul.f32 %v2297_v23, %v2077_v18  ;;  %s2770_s29 = sld [smem:[#allocation3 + $0x28]]  ;;  %s2783_s30 = sld [smem:[#allocation3 + $0x29]] }
  0x40   :  { %4135 = vst [vmem:[#allocation40_spill] sm:$0xff] %v2319_v10  ;;  %4136 = vst [vmem:[#allocation41_spill] sm:$0xff] %v2322_v25  ;;  %v2347_v25 = vstv %s2249_s15  ;;  %s2791_s6 = sld [smem:[#allocation3 + $0x2d]]  ;;  %s2793_s7 = sld [smem:[#allocation3 + $0x2e]] }
  0x41   :  { %4138 = vst [vmem:[#allocation43_spill] sm:$0xff] %v2329_v51  ;;  %4139 = vst [vmem:[#allocation44_spill] sm:$0xff] %v2333_v40  ;;  %s2804_s3 = sld [smem:[#allocation3 + $0x2a]]  ;;  %s2806_s8 = sld [smem:[#allocation3 + $0x37]] }
  0x42   :  { %4140 = vst [vmem:[#allocation45_spill] sm:$0xff] %v2336_v37  ;;  %4141 = vst [vmem:[#allocation46_spill] sm:$0xff] %v2347_v25  ;;  %s2812_s9 = sld [smem:[#allocation3 + $0x36]]  ;;  %s2814_s10 = sld [smem:[#allocation3 + $0x3f]] }
  0x43   :  { %188 = vrot.lane.b32.xlu0 %v2077_v18, %s1966_s11  ;;  %190 = vrot.lane.b32.xlu1 %v2081_v19, %s1966_s11  ;;  %vm2438_vm2 = vmand %vm88_vm6, %vm92_vm7  ;;  %s2821_s13 = sld [smem:[#allocation3 + $0x40]]  ;;  %s2970_s14 = sld [smem:[#allocation5 + $0x4]] }
  0x44   :  { %vm2458_vm3 = vmand %vm2438_vm2, %vm96_vm8  ;;  %s2973_s15 = sld [smem:[#allocation3 + $0x34]] }
  0x47   :  { %192 = vrot.lane.b32.xlu0 %v2090_v22, %s1966_s11  ;;  %210 = vrot.lane.b32.xlu1 %v2077_v18, %s1967_s12 }
  0x4b   :  { %212 = vrot.lane.b32.xlu0 %v2081_v19, %s1967_s12  ;;  %214 = vrot.lane.b32.xlu1 %v2090_v22, %s1967_s12 }
  0x9d   :  { %v2127_v28 = vpop.permute.xlu0 %119  ;;  %v2129_v29 = vpop.permute.xlu1 %123 }
  0x9e   :  { %4118 = vst [vmem:[#allocation23_spill] sm:$0xff] %v2127_v28  ;;  %4119 = vst [vmem:[#allocation24_spill] sm:$0xff] %v2129_v29  ;;  %v127_v9 = vmul.f32 %v2171_v41, %v2127_v28  ;;  %v357_v21 = vmul.f32 %v2173_v42, %v2127_v28  ;;  %v2342_v3 = vmul.f32 %v2175_v43, %v2127_v28 }
  0x9f   :  { %v129_v22 = vmul.f32 %v2171_v41, %v2129_v29  ;;  %v359_v10 = vmul.f32 %v2173_v42, %v2129_v29  ;;  %v2353_v18 = vmul.f32 %v2175_v43, %v2129_v29 }
  0xa0   :  { %v135_v28 = vadd.f32 %v2178_v44, %v127_v9 }
  0xa1   :  { %v2131_v30 = vpop.permute.xlu0 %121  ;;  %v2133_v31 = vpop.permute.xlu1 %138  ;;  %4142 = vst [vmem:[#allocation47_spill] sm:$0xff] %v2353_v18 }
  0xa2   :  { %4120 = vst [vmem:[#allocation25_spill] sm:$0xff] %v2131_v30  ;;  %v128_v7 = vmul.f32 %v2171_v41, %v2131_v30  ;;  %v358_v14 = vmul.f32 %v2173_v42, %v2131_v30  ;;  %v2359_v2 = vmul.f32 %v2175_v43, %v2131_v30  ;;  %v146_v41 = vmul.f32 %v2182_v45, %v2133_v31 }
  0xa4   :  { %4143 = vst [vmem:[#allocation48_spill] sm:$0xff] %v2359_v2  ;;  %v136_v18 = vadd.f32 %v2185_v47, %v128_v7  ;;  %v149_v44 = vadd.f32 %v146_v41, %v135_v28  ;;  %v137_v7 = vadd.f32 %v2195_v50, %v129_v22  ;;  %v365_v22 = vadd.f32 %v2188_v48, %v357_v21 }
  0xa5   :  { %v2135_v32 = vpop.permute.xlu0 %140  ;;  %v2137_v33 = vpop.permute.xlu1 %142 }
  0xa6   :  { %v147_v43 = vmul.f32 %v2182_v45, %v2135_v32  ;;  %v148_v47 = vmul.f32 %v2182_v45, %v2137_v33  ;;  %v370_v45 = vmul.f32 %v2213_v56, %v2133_v31 }
  0xa8   :  { %v150_v51 = vadd.f32 %v147_v43, %v136_v18  ;;  %v151_v18 = vadd.f32 %v148_v47, %v137_v7  ;;  %v373_v43 = vadd.f32 %v370_v45, %v365_v22  ;;  %v372_v45 = vmul.f32 %v2213_v56, %v2137_v33 }
  0xa9   :  { %v2143_v34 = vpop.permute.xlu0 %152  ;;  %v2145_v35 = vpop.permute.xlu1 %154 }
  0xaa   :  { %4121 = vst [vmem:[#allocation26_spill] sm:$0xff] %v2145_v35  ;;  %v160_v37 = vmul.f32 %v2210_v55, %v2143_v34  ;;  %v161_v9 = vmul.f32 %v2210_v55, %v2145_v35 }
  0xac   :  { %v163_v41 = vadd.f32 %v160_v37, %v149_v44  ;;  %v164_v27 = vadd.f32 %v161_v9, %v150_v51  ;;  %v378_v37 = vmul.f32 %v2244_v4, %v2143_v34  ;;  %v366_v9 = vadd.f32 %v2218_v57, %v358_v14 }
  0xad   :  { %v2163_v38 = vpop.permute.xlu0 %156  ;;  %v2165_v39 = vpop.permute.xlu1 %174 }
  0xae   :  { %v182_v40 = vmul.f32 %v2227_v60, %v2165_v39  ;;  %v162_v28 = vmul.f32 %v2210_v55, %v2163_v38  ;;  %v171_v50 = vadd.f32 %v2224_v59, %v163_v41  ;;  %v371_v59 = vmul.f32 %v2213_v56, %v2135_v32  ;;  %v4164_v56 = vld [vmem:[#allocation34_spill] sm:$0xff] }
  0xaf   :  { %v381_v47 = vadd.f32 %v378_v37, %v373_v43  ;;  %v4148_v43 = vld [vmem:[#allocation36_spill] sm:$0xff] }
  0xb0   :  { %v165_v51 = vadd.f32 %v162_v28, %v151_v18  ;;  %v185_v21 = vadd.f32 %v182_v40, %v171_v50  ;;  %v374_v28 = vadd.f32 %v371_v59, %v366_v9 }
  0xb1   :  { %v2205_v53 = vpop.permute.xlu0 %176  ;;  %v2207_v54 = vpop.permute.xlu1 %178  ;;  %v389_v18 = vadd.f32 %v2247_v5, %v381_v47 }
  0xb2   :  { %v183_v23 = vmul.f32 %v2227_v60, %v2205_v53  ;;  %v184_v11 = vmul.f32 %v2227_v60, %v2207_v54  ;;  %v394_v60 = vmul.f32 %v2269_v20, %v2165_v39  ;;  %v173_v7 = vadd.f32 %v2241_v0, %v165_v51 }
  0xb3   :  { %v395_v40 = vmul.f32 %v2269_v20, %v2205_v53 }
  0xb4   :  { %v187_v41 = vadd.f32 %v184_v11, %v173_v7 }
  0xb5   :  { %v2261_v15 = vpop.permute.xlu0 %188  ;;  %v2263_v16 = vpop.permute.xlu1 %190 }
  0xb6   :  { %4123 = vst [vmem:[#allocation28_spill] sm:$0xff] %v2261_v15  ;;  %4124 = vst [vmem:[#allocation29_spill] sm:$0xff] %v2263_v16  ;;  %v196_v42 = vmul.f32 %v2230_v61, %v2261_v15  ;;  %v197_v25 = vmul.f32 %v2230_v61, %v2263_v16  ;;  %v402_v48 = vmul.f32 %v2288_v8, %v2261_v15 }
  0xb7   :  { %v403_v57 = vmul.f32 %v2288_v8, %v2263_v16 }
  0xb9   :  { %v2313_v46 = vpop.permute.xlu0 %192  ;;  %v2326_v19 = vpop.permute.xlu1 %210 }
  0xba   :  { %4137 = vst [vmem:[#allocation42_spill] sm:$0xff] %v2326_v19  ;;  %v218_v30 = vmul.f32 %v2252_v6, %v2326_v19  ;;  %v198_v13 = vmul.f32 %v2230_v61, %v2313_v46  ;;  %v172_v61 = vadd.f32 %v2233_v62, %v164_v27  ;;  %v418_v27 = vmul.f32 %v2303_v49, %v2326_v19 }
  0xbb   :  { %v199_v62 = vadd.f32 %v196_v42, %v185_v21  ;;  %v380_v42 = vmul.f32 %v2244_v4, %v2163_v38 }
  0xbc   :  { %v186_v44 = vadd.f32 %v183_v23, %v172_v61  ;;  %v367_v23 = vadd.f32 %v2221_v58, %v359_v10  ;;  %v201_v37 = vadd.f32 %v198_v13, %v187_v41  ;;  %v397_v61 = vadd.f32 %v394_v60, %v389_v18 }
  0xbd   :  { %v2368_v29 = vpop.permute.xlu0 %212  ;;  %v2383_v2 = vpop.permute.xlu1 %214  ;;  %v207_v0 = vadd.f32 %v2238_v63, %v199_v62  ;;  %v396_v58 = vmul.f32 %v2269_v20, %v2207_v54  ;;  %v565_v20 = vadd.f32 %v2201_v52, %v2342_v3  ;;  %v4153_v52 = vld [vmem:[#allocation31_spill] sm:$0xff] }
  0xbe   :  { %4144 = vst [vmem:[#allocation49_spill] sm:$0xff] %v2368_v29  ;;  %4145 = vst [vmem:[#allocation50_spill] sm:$0xff] %v2383_v2  ;;  %v219_v1 = vmul.f32 %v2252_v6, %v2368_v29  ;;  %v220_v55 = vmul.f32 %v2252_v6, %v2383_v2  ;;  %v379_v6 = vmul.f32 %v2244_v4, %v2145_v35 }
  0xbf   :  { %v200_v14 = vadd.f32 %v197_v25, %v186_v44  ;;  %v419_v11 = vmul.f32 %v2303_v49, %v2368_v29  ;;  %v221_v25 = vadd.f32 %v218_v30, %v207_v0  ;;  %v375_v10 = vadd.f32 %v372_v45, %v367_v23  ;;  %v4158_v23 = vld [vmem:[#allocation38_spill] sm:$0xff] }
  0xc0   :  { %v382_v22 = vadd.f32 %v379_v6, %v374_v28  ;;  %v209_v4 = vadd.f32 %v2279_v36, %v201_v37  ;;  %v405_v13 = vadd.f32 %v402_v48, %v397_v61  ;;  %v404_v30 = vmul.f32 %v2288_v8, %v2313_v46  ;;  %v4161_v61 = vld [vmem:[#allocation43_spill] sm:$0xff] }
  0xc1   :  { %v208_v50 = vadd.f32 %v2276_v26, %v200_v14  ;;  %v383_v60 = vadd.f32 %v380_v42, %v375_v10  ;;  %v4157_v14 = vld [vmem:[#allocation37_spill] sm:$0xff]  ;;  %v420_v37 = vmul.f32 %v2303_v49, %v2383_v2 }
  0xc2   :  { %v390_v5 = vadd.f32 %v2255_v12, %v382_v22  ;;  %v226_v12 = vadd.f32 %v2266_v17, %v221_v25  ;;  %v223_v51 = vadd.f32 %v220_v55, %v209_v4  ;;  %v413_v21 = vadd.f32 %v4148_v43, %v405_v13  ;;  %v4154_v55 = vld [vmem:[#allocation33_spill] sm:$0xff]  ;;  %v4165_v4 = vld [vmem:[#allocation48_spill] sm:$0xff]  ;;  %v4166_v13 = vld [vmem:[#allocation30_spill] sm:$0xff] }
  0xc3   :  { %v222_v63 = vadd.f32 %v219_v1, %v208_v50  ;;  %v4149_v1 = vld [vmem:[#allocation27_spill] sm:$0xff]  ;;  %v391_v59 = vadd.f32 %v4153_v52, %v383_v60  ;;  %v578_v6 = vmul.f32 %v4154_v55, %v2143_v34  ;;  %v602_v25 = vmul.f32 %v4161_v61, %v2261_v15 }
  0xc4   :  { %v398_v26 = vadd.f32 %v395_v40, %v390_v5  ;;  %v570_v9 = vmul.f32 %v4149_v1, %v2133_v31  ;;  %v229_v36 = vmax.f32 %v226_v12, 0.0  ;;  %v228_v7 = vadd.f32 %v2266_v17, %v223_v51 }
  0xc5   :  { %v227_v24 = vadd.f32 %v2266_v17, %v222_v63  ;;  %v421_v47 = vadd.f32 %v418_v27, %v413_v21  ;;  %v399_v18 = vadd.f32 %v396_v58, %v391_v59  ;;  %v4160_v27 = vld [vmem:[#allocation39_spill] sm:$0xff]  ;;  %v566_v12 = vadd.f32 %v4166_v13, %v4165_v4 }
  0xc6   :  { %v406_v3 = vadd.f32 %v403_v57, %v398_v26  ;;  %v573_v62 = vadd.f32 %v570_v9, %v565_v20  ;;  %v2468_v40 = vsel %vm2108_vm11, %v229_v36, 0.0  ;;  %v594_v57 = vmul.f32 %v4158_v23, %v2165_v39  ;;  %v4169_v21 = vld [vmem:[#allocation19_spill] sm:$0xff] }
  0xc7   :  { %v230_v44 = vmax.f32 %v227_v24, 0.0  ;;  %4156 = vst [vmem:[#allocation36_spill] sm:$0xff] %v2468_v40  ;;  %283 = vrot.lane.b32.xlu0 %v2468_v40, %s1966_s11  ;;  %v231_v17 = vmax.f32 %v228_v7, 0.0  ;;  %v426_v22 = vadd.f32 %v4160_v27, %v421_v47  ;;  %v407_v50 = vadd.f32 %v404_v30, %v399_v18  ;;  %v4168_v24 = vld [vmem:[#allocation46_spill] sm:$0xff]  ;;  %v4170_v9 = vld [vmem:[#allocation35_spill] sm:$0xff]  ;;  %v4173_v7 = vld [vmem:[#allocation32_spill] sm:$0xff] }
  0xc8   :  { %v414_v41 = vadd.f32 %v4157_v14, %v406_v3  ;;  %v581_v45 = vadd.f32 %v578_v6, %v573_v62  ;;  %v571_v49 = vmul.f32 %v4149_v1, %v2135_v32  ;;  %v579_v60 = vmul.f32 %v4154_v55, %v2145_v35 }
  0xc9   :  { %v2477_v0 = vsel %vm2458_vm3, %v230_v44, 0.0  ;;  %v2488_v10 = vsel %vm2123_vm15, %v231_v17, 0.0  ;;  %v429_v58 = vmax.f32 %v426_v22, 0.0  ;;  %v618_v51 = vmul.f32 %v4168_v24, %v2326_v19  ;;  %v4172_v44 = vld [vmem:[#allocation47_spill] sm:$0xff] }
  0xca   :  { %4159 = vst [vmem:[#allocation27_spill] sm:$0xff] %v2477_v0  ;;  %285 = vrot.lane.b32.xlu1 %v2477_v0, %s1966_s11  ;;  %v422_v42 = vadd.f32 %v419_v11, %v414_v41  ;;  %4163 = vst [vmem:[#allocation17_spill] sm:$0xff] %v2488_v10  ;;  %v589_v63 = vadd.f32 %v4164_v56, %v581_v45  ;;  %v4167_v11 = vld [vmem:[#allocation40_spill] sm:$0xff]  ;;  %v2504_v43 = vstv %s2452_s16  ;;  %v236_v13 = vrot.slane %v2477_v0, 7  ;;  %s2834_s16 = sld [smem:[#allocation3 + $0x2b]] }
  0xcb   :  { %v415_v30 = vadd.f32 %v4167_v11, %v407_v50  ;;  %287 = vrot.lane.b32.xlu0 %v2488_v10, %s1966_s11  ;;  %v611_v36 = vmul.f32 %v4170_v9, %v4169_v21  ;;  %v2512_v48 = vsel %vm2108_vm11, %v429_v58, 0.0  ;;  %v574_v59 = vadd.f32 %v571_v49, %v566_v12  ;;  %v4176_v50 = vld [vmem:[#allocation41_spill] sm:$0xff] }
  0xcc   :  { %v427_v26 = vadd.f32 %v4160_v27, %v422_v42  ;;  %v597_v20 = vadd.f32 %v594_v57, %v589_v63  ;;  %4171 = vst [vmem:[#allocation31_spill] sm:$0xff] %v2512_v48  ;;  %v567_v47 = vadd.f32 %v4173_v7, %v4172_v44  ;;  %v572_v62 = vmul.f32 %v4149_v1, %v2137_v33  ;;  %v4175_v1 = vld [vmem:[#allocation44_spill] sm:$0xff] }
  0xcd   :  { %v423_v52 = vadd.f32 %v420_v37, %v415_v30  ;;  %v580_v14 = vmul.f32 %v4154_v55, %v2163_v38  ;;  %v582_v18 = vadd.f32 %v579_v60, %v574_v59  ;;  %v595_v57 = vmul.f32 %v4158_v23, %v2205_v53  ;;  %v4180_v60 = vld [vmem:[#allocation45_spill] sm:$0xff]  ;;  %v4184_v7 = vld [vmem:[#allocation20_spill] sm:$0xff] }
  0xce   :  { %305 = vrot.lane.b32.xlu1 %v2468_v40, %s1967_s12  ;;  %v430_v3 = vmax.f32 %v427_v26, 0.0  ;;  %v605_v6 = vadd.f32 %v602_v25, %v597_v20  ;;  %v603_v17 = vmul.f32 %v4161_v61, %v2263_v16  ;;  %v575_v42 = vadd.f32 %v572_v62, %v567_v47 }
  0xcf   :  { %v428_v41 = vadd.f32 %v4160_v27, %v423_v52  ;;  %307 = vrot.lane.b32.xlu0 %v2477_v0, %s1967_s12  ;;  %v596_v55 = vmul.f32 %v4158_v23, %v2207_v54  ;;  %v590_v37 = vadd.f32 %v4176_v50, %v582_v18  ;;  %v235_v25 = vrot.slane %v2468_v40, 7 }
  0xd0   :  { %v2529_v22 = vsel %vm2458_vm3, %v430_v3, 0.0  ;;  %v613_v45 = vadd.f32 %v4175_v1, %v605_v6  ;;  %v237_v58 = vrot.slane %v2488_v10, 7  ;;  %v583_v63 = vadd.f32 %v580_v14, %v575_v42 }
  0xd1   :  { %4174 = vst [vmem:[#allocation33_spill] sm:$0xff] %v2529_v22  ;;  %v431_v27 = vmax.f32 %v428_v41, 0.0  ;;  %v604_v4 = vmul.f32 %v4161_v61, %v2313_v46  ;;  %v598_v12 = vadd.f32 %v595_v57, %v590_v37  ;;  %v241_v11 = vrot.slane %v2468_v40, 1 }
  0xd2   :  { %309 = vrot.lane.b32.xlu1 %v2488_v10, %s1967_s12  ;;  %v621_v56 = vadd.f32 %v618_v51, %v613_v45  ;;  %v2544_v23 = vsel %vm106_vm0, %v237_v58, %v235_v25  ;;  %v242_v30 = vrot.slane %v2477_v0, 1  ;;  %v591_v20 = vadd.f32 %v4180_v60, %v583_v63 }
  0xd3   :  { %4178 = vst [vmem:[#allocation21_spill] sm:$0xff] %v2544_v23  ;;  %483 = vrot.lane.b32.xlu0 %v2512_v48, %s1966_s11  ;;  %v2552_v49 = vsel %vm2123_vm15, %v431_v27, 0.0  ;;  %v2558_v51 = vsel %vm106_vm0, %v235_v25, %v236_v13  ;;  %v606_v3 = vadd.f32 %v603_v17, %v598_v12  ;;  %v619_v52 = vmul.f32 %v4168_v24, %v2368_v29 }
  0xd4   :  { %4179 = vst [vmem:[#allocation37_spill] sm:$0xff] %v2552_v49  ;;  %v626_v61 = vadd.f32 %v2504_v43, %v621_v56  ;;  %4181 = vst [vmem:[#allocation38_spill] sm:$0xff] %v2558_v51  ;;  %v2566_v59 = vsel %vm106_vm0, %v236_v13, %v237_v58  ;;  %v2570_v6 = vsel %vm113_vm1, %v241_v11, %v242_v30  ;;  %v243_v14 = vrot.slane %v2488_v10, 1  ;;  %v4208_v10 = vld [vmem:[#allocation11_spill] sm:$0xff] }
  0xd5   :  { %4182 = vst [vmem:[#allocation39_spill] sm:$0xff] %v2566_v59  ;;  %4183 = vst [vmem:[#allocation43_spill] sm:$0xff] %v2570_v6  ;;  %v599_v44 = vadd.f32 %v596_v55, %v591_v20  ;;  %v612_v47 = vmul.f32 %v4170_v9, %v4184_v7  ;;  %v614_v62 = vadd.f32 %v611_v36, %v606_v3  ;;  %v435_v41 = vrot.slane %v2512_v48, 7 }
  0xd6   :  { %485 = vrot.lane.b32.xlu1 %v2529_v22, %s1966_s11  ;;  %v437_v18 = vrot.slane %v2552_v49, 7  ;;  %v629_v57 = vmax.f32 %v626_v61, 0.0  ;;  %v620_v1 = vmul.f32 %v4168_v24, %v2383_v2  ;;  %v436_v45 = vrot.slane %v2529_v22, 7 }
  0xd7   :  { %487 = vrot.lane.b32.xlu0 %v2552_v49, %s1966_s11  ;;  %v607_v17 = vadd.f32 %v604_v4, %v599_v44  ;;  %v622_v9 = vadd.f32 %v619_v52, %v614_v62  ;;  %v2586_v36 = vsel %vm113_vm1, %v242_v30, %v243_v14  ;;  %v2590_v42 = vsel %vm113_vm1, %v243_v14, %v241_v11 }
  0xd8   :  { %4185 = vst [vmem:[#allocation22_spill] sm:$0xff] %v2586_v36  ;;  %4186 = vst [vmem:[#allocation34_spill] sm:$0xff] %v2590_v42  ;;  %v2594_v55 = vsel %vm106_vm0, %v437_v18, %v435_v41  ;;  %v441_v24 = vrot.slane %v2512_v48, 1  ;;  %v2600_v37 = vsel %vm106_vm0, %v435_v41, %v436_v45  ;;  %v2604_v25 = vsel %vm106_vm0, %v436_v45, %v437_v18 }
  0xd9   :  { %4187 = vst [vmem:[#allocation48_spill] sm:$0xff] %v2594_v55  ;;  %v615_v27 = vadd.f32 %v612_v47, %v607_v17  ;;  %v627_v50 = vadd.f32 %v2504_v43, %v622_v9  ;;  %4188 = vst [vmem:[#allocation30_spill] sm:$0xff] %v2600_v37  ;;  %v442_v58 = vrot.slane %v2529_v22, 1  ;;  %v2611_v56 = vsel %vm2108_vm11, %v629_v57, 0.0 }
  0xda   :  { %505 = vrot.lane.b32.xlu1 %v2512_v48, %s1967_s12  ;;  %4189 = vst [vmem:[#allocation40_spill] sm:$0xff] %v2604_v25  ;;  %4190 = vst [vmem:[#allocation46_spill] sm:$0xff] %v2611_v56  ;;  %v443_v4 = vrot.slane %v2552_v49, 1  ;;  %v635_v20 = vrot.slane %v2611_v56, 7  ;;  %v641_v52 = vrot.slane %v2611_v56, 1  ;;  %v756_v9 = vstv %s1818_s17  ;;  %s3005_s17 = sld [smem:[#allocation7 + $0x4]] }
  0xdb   :  { %507 = vrot.lane.b32.xlu0 %v2529_v22, %s1967_s12  ;;  %v623_v63 = vadd.f32 %v620_v1, %v615_v27  ;;  %v630_v13 = vmax.f32 %v627_v50, 0.0  ;;  %v2618_v12 = vsel %vm113_vm1, %v441_v24, %v442_v58  ;;  %v761_v27 = vstv %s1819_s18  ;;  %s3007_s18 = sld [smem:[#allocation3 + $0x43]] }
  0xdc   :  { %4191 = vst [vmem:[#allocation35_spill] sm:$0xff] %v2618_v12  ;;  %v2623_v30 = vsel %vm113_vm1, %v442_v58, %v443_v4  ;;  %v2627_v61 = vsel %vm113_vm1, %v443_v4, %v441_v24  ;;  %v4202_v24 = vld [vmem:[#allocation24_spill] sm:$0xff]  ;;  %v4203_v58 = vld [vmem:[#allocation15_spill] sm:$0xff]  ;;  %v769_v4 = vstv %s1820_s19  ;;  %s2848_s19 = sld [smem:[#allocation3 + $0x2f]] }
  0xdd   :  { %v628_v11 = vadd.f32 %v2504_v43, %v623_v63  ;;  %4192 = vst [vmem:[#allocation47_spill] sm:$0xff] %v2623_v30  ;;  %4193 = vst [vmem:[#allocation32_spill] sm:$0xff] %v2627_v61  ;;  %v2631_v60 = vsel %vm2458_vm3, %v630_v13, 0.0  ;;  %v759_v50 = vmul.f32 %v756_v9, %v4202_v24  ;;  %v764_v63 = vmul.f32 %v761_v27, %v4203_v58  ;;  %v4204_v13 = vld [vmem:[#allocation23_spill] sm:$0xff] }
  0xde   :  { %509 = vrot.lane.b32.xlu1 %v2552_v49, %s1967_s12  ;;  %4194 = vst [vmem:[#allocation44_spill] sm:$0xff] %v2631_v60  ;;  %v636_v43 = vrot.slane %v2631_v60, 7  ;;  %v642_v44 = vrot.slane %v2631_v60, 1 }
  0xdf   :  { %683 = vrot.lane.b32.xlu0 %v2611_v56, %s1966_s11  ;;  %v631_v3 = vmax.f32 %v628_v11, 0.0  ;;  %v757_v11 = vmul.f32 %v756_v9, %v4204_v13 }
  0xe0   :  { %v2647_v62 = vsel %vm106_vm0, %v635_v20, %v636_v43  ;;  %v2651_v14 = vsel %vm113_vm1, %v641_v52, %v642_v44 }
  0xe1   :  { %v2643_v47 = vsel %vm2123_vm15, %v631_v3, 0.0  ;;  %4196 = vst [vmem:[#allocation13_spill] sm:$0xff] %v2647_v62  ;;  %4197 = vst [vmem:[#allocation45_spill] sm:$0xff] %v2651_v14 }
  0xe2   :  { %685 = vrot.lane.b32.xlu1 %v2631_v60, %s1966_s11  ;;  %4195 = vst [vmem:[#allocation41_spill] sm:$0xff] %v2643_v47  ;;  %v637_v41 = vrot.slane %v2643_v47, 7  ;;  %v643_v18 = vrot.slane %v2643_v47, 1 }
  0xe3   :  { %687 = vrot.lane.b32.xlu0 %v2643_v47, %s1966_s11 }
  0xe4   :  { %v2661_v57 = vsel %vm106_vm0, %v637_v41, %v635_v20  ;;  %v2665_v17 = vsel %vm106_vm0, %v636_v43, %v637_v41  ;;  %v2669_v1 = vsel %vm113_vm1, %v642_v44, %v643_v18  ;;  %v2673_v45 = vsel %vm113_vm1, %v643_v18, %v641_v52  ;;  %v4205_v20 = vld [vmem:[#allocation14_spill] sm:$0xff] }
  0xe5   :  { %4198 = vst [vmem:[#allocation51_spill] sm:$0xff] %v2661_v57  ;;  %4199 = vst [vmem:[#allocation52_spill] sm:$0xff] %v2665_v17  ;;  %v762_v3 = vmul.f32 %v761_v27, %v4205_v20  ;;  %v772_v43 = vmul.f32 %v769_v4, %v2137_v33  ;;  %v777_v52 = vstv %s1821_s20  ;;  %v767_v44 = vadd.f32 %v764_v63, %v759_v50  ;;  %s2850_s20 = sld [smem:[#allocation3 + $0x38]] }
  0xe6   :  { %705 = vrot.lane.b32.xlu1 %v2611_v56, %s1967_s12  ;;  %4200 = vst [vmem:[#allocation53_spill] sm:$0xff] %v2669_v1  ;;  %4201 = vst [vmem:[#allocation54_spill] sm:$0xff] %v2673_v45  ;;  %v770_v41 = vmul.f32 %v769_v4, %v2133_v31  ;;  %v780_v18 = vmul.f32 %v777_v52, %v2163_v38  ;;  %v4207_v56 = vld [vmem:[#allocation16_spill] sm:$0xff]  ;;  %v785_v50 = vstv %s1822_s21  ;;  %s2859_s21 = sld [smem:[#allocation3 + $0x41]] }
  0xe7   :  { %707 = vrot.lane.b32.xlu0 %v2631_v60, %s1967_s12  ;;  %v763_v49 = vmul.f32 %v761_v27, %v4207_v56  ;;  %v765_v22 = vadd.f32 %v762_v3, %v757_v11  ;;  %v775_v48 = vadd.f32 %v772_v43, %v767_v44  ;;  %v779_v27 = vmul.f32 %v777_v52, %v2145_v35  ;;  %v4209_v3 = vld [vmem:[#allocation10_spill] sm:$0xff] }
  0xe8   :  { %v786_v43 = vmul.f32 %v785_v50, %v4209_v3 }
  0xe9   :  { %v773_v63 = vadd.f32 %v770_v41, %v765_v22 }
  0xea   :  { %709 = vrot.lane.b32.xlu1 %v2643_v47, %s1967_s12  ;;  %v4206_v47 = vld [vmem:[#allocation25_spill] sm:$0xff] }
  0xeb   :  { %247 = vrot.lane.b32.xlu0 %v2544_v23, %s1966_s11  ;;  %v758_v60 = vmul.f32 %v756_v9, %v4206_v47  ;;  %v788_v9 = vmul.f32 %v785_v50, %v4208_v10  ;;  %v801_v10 = vstv %s1824_s23  ;;  %s2864_s23 = sld [smem:[#allocation3 + $0x39]] }
  0xed   :  { %v766_v0 = vadd.f32 %v763_v49, %v758_v60  ;;  %v4210_v49 = vld [vmem:[#allocation12_spill] sm:$0xff] }
  0xee   :  { %249 = vrot.lane.b32.xlu1 %v2558_v51, %s1966_s11  ;;  %v787_v60 = vmul.f32 %v785_v50, %v4210_v49  ;;  %v803_v50 = vmul.f32 %v801_v10, %v2263_v16 }
  0xef   :  { %251 = vrot.lane.b32.xlu0 %v2566_v59, %s1966_s11 }
  0xf2   :  { %269 = vrot.lane.b32.xlu1 %v2544_v23, %s1967_s12 }
  0xf3   :  { %271 = vrot.lane.b32.xlu0 %v2558_v51, %s1967_s12 }
  0xf6   :  { %273 = vrot.lane.b32.xlu1 %v2566_v59, %s1967_s12 }
  0xf7   :  { %319 = vrot.lane.b32.xlu0 %v2570_v6, %s1966_s11 }
  0xfa   :  { %321 = vrot.lane.b32.xlu1 %v2586_v36, %s1966_s11 }
  0xfb   :  { %323 = vrot.lane.b32.xlu0 %v2590_v42, %s1966_s11 }
  0xfe   :  { %341 = vrot.lane.b32.xlu1 %v2570_v6, %s1967_s12 }
  0xff   :  { %343 = vrot.lane.b32.xlu0 %v2586_v36, %s1967_s12  ;;  %v771_v36 = vmul.f32 %v769_v4, %v2135_v32  ;;  %v793_v4 = vstv %s1823_s22  ;;  %s2861_s22 = sld [smem:[#allocation3 + $0x30]] }
 0x100   :  { %v796_v22 = vmul.f32 %v793_v4, %v2207_v54 }
 0x101   :  { %v774_v44 = vadd.f32 %v771_v36, %v766_v0  ;;  %v804_v0 = vmul.f32 %v801_v10, %v2313_v46  ;;  %v795_v36 = vmul.f32 %v793_v4, %v2205_v53 }
 0x102   :  { %345 = vrot.lane.b32.xlu1 %v2590_v42, %s1967_s12  ;;  %v778_v42 = vmul.f32 %v777_v52, %v2143_v34 }
 0x103   :  { %447 = vrot.lane.b32.xlu0 %v2594_v55, %s1966_s11  ;;  %v782_v41 = vadd.f32 %v779_v27, %v774_v44 }
 0x104   :  { %v781_v11 = vadd.f32 %v778_v42, %v773_v63  ;;  %v794_v42 = vmul.f32 %v793_v4, %v2165_v39  ;;  %v809_v63 = vstv %s1825_s24  ;;  %v4211_v4 = vld [vmem:[#allocation18_spill] sm:$0xff]  ;;  %s2871_s24 = sld [smem:[#allocation3 + $0x2c]] }
 0x106   :  { %449 = vrot.lane.b32.xlu1 %v2600_v37, %s1966_s11  ;;  %v789_v52 = vadd.f32 %v786_v43, %v781_v11  ;;  %v812_v11 = vmul.f32 %v809_v63, %v4184_v7 }
 0x107   :  { %451 = vrot.lane.b32.xlu0 %v2604_v25, %s1966_s11 }
 0x108   :  { %v797_v27 = vadd.f32 %v794_v42, %v789_v52 }
 0x10a   :  { %469 = vrot.lane.b32.xlu1 %v2594_v55, %s1967_s12  ;;  %v783_v55 = vadd.f32 %v780_v18, %v775_v48 }
 0x10b   :  { %471 = vrot.lane.b32.xlu0 %v2600_v37, %s1967_s12  ;;  %v1009_v37 = vstv %s2834_s16  ;;  %s2981_s16 = sld [smem:[#allocation7 + $0x19]] }
 0x10c   :  { %v791_v48 = vadd.f32 %v788_v9, %v783_v55  ;;  %v802_v55 = vmul.f32 %v801_v10, %v2261_v15  ;;  %v790_v9 = vadd.f32 %v787_v60, %v782_v41  ;;  %v811_v41 = vmul.f32 %v809_v63, %v4169_v21 }
 0x10e   :  { %473 = vrot.lane.b32.xlu1 %v2604_v25, %s1967_s12  ;;  %v799_v18 = vadd.f32 %v796_v22, %v791_v48  ;;  %v798_v43 = vadd.f32 %v795_v36, %v790_v9  ;;  %v805_v44 = vadd.f32 %v802_v55, %v797_v27  ;;  %v810_v22 = vmul.f32 %v809_v63, %v4211_v4 }
 0x10f   :  { %519 = vrot.lane.b32.xlu0 %v2618_v12, %s1966_s11  ;;  %v817_v48 = vstv %s1826_s25  ;;  %v825_v9 = vstv %s1827_s26  ;;  %s3211_s25 = sld [smem:[#allocation7]]  ;;  %s3260_s26 = sld [smem:[#allocation7 + $0x2]] }
 0x110   :  { %v807_v3 = vadd.f32 %v804_v0, %v799_v18  ;;  %v806_v49 = vadd.f32 %v803_v50, %v798_v43  ;;  %v820_v60 = vmul.f32 %v817_v48, %v2383_v2  ;;  %v819_v42 = vmul.f32 %v817_v48, %v2368_v29 }
 0x111   :  { %v813_v52 = vadd.f32 %v810_v22, %v805_v44  ;;  %v818_v0 = vmul.f32 %v817_v48, %v2326_v19  ;;  %v956_v43 = vstv %s1837_s2  ;;  %v961_v44 = vstv %s1838_s1  ;;  %s2880_s2 = sld [smem:[#allocation3 + $0x42]] }
 0x112   :  { %521 = vrot.lane.b32.xlu1 %v2623_v30, %s1966_s11  ;;  %v815_v10 = vadd.f32 %v812_v11, %v807_v3  ;;  %v814_v36 = vadd.f32 %v811_v41, %v806_v49  ;;  %v959_v48 = vmul.f32 %v956_v43, %v4202_v24  ;;  %v964_v49 = vmul.f32 %v961_v44, %v4203_v58  ;;  %s2882_s1 = sld [smem:[#allocation3 + $0x32]] }
 0x113   :  { %523 = vrot.lane.b32.xlu0 %v2627_v61, %s1966_s11  ;;  %v821_v63 = vadd.f32 %v818_v0, %v813_v52 }
 0x114   :  { %v823_v18 = vadd.f32 %v820_v60, %v815_v10  ;;  %v822_v55 = vadd.f32 %v819_v42, %v814_v36  ;;  %v969_v10 = vstv %s1839_s27  ;;  %v957_v60 = vmul.f32 %v956_v43, %v4204_v13  ;;  %s2902_s27 = sld [smem:[#allocation3 + $0x31]] }
 0x115   :  { %v826_v3 = vadd.f32 %v825_v9, %v821_v63  ;;  %v962_v42 = vmul.f32 %v961_v44, %v4205_v20  ;;  %v972_v52 = vmul.f32 %v969_v10, %v2137_v33  ;;  %v977_v36 = vstv %s1840_s28  ;;  %s2908_s28 = sld [smem:[#allocation3 + $0x44]] }
 0x116   :  { %541 = vrot.lane.b32.xlu1 %v2618_v12, %s1967_s12  ;;  %v828_v50 = vadd.f32 %v825_v9, %v823_v18  ;;  %v827_v27 = vadd.f32 %v825_v9, %v822_v55  ;;  %v967_v55 = vadd.f32 %v964_v49, %v959_v48  ;;  %v970_v63 = vmul.f32 %v969_v10, %v2133_v31 }
 0x117   :  { %543 = vrot.lane.b32.xlu0 %v2623_v30, %s1967_s12  ;;  %v829_v41 = vmax.f32 %v826_v3, 0.0  ;;  %v980_v9 = vmul.f32 %v977_v36, %v2163_v38  ;;  %v963_v3 = vmul.f32 %v961_v44, %v4207_v56  ;;  %v978_v49 = vmul.f32 %v977_v36, %v2143_v34 }
 0x118   :  { %v831_v11 = vmax.f32 %v828_v50, 0.0  ;;  %v830_v22 = vmax.f32 %v827_v27, 0.0  ;;  %v958_v27 = vmul.f32 %v956_v43, %v4206_v47  ;;  %v975_v48 = vadd.f32 %v972_v52, %v967_v55  ;;  %v2826_v55 = vld [vmem:[%s3978_s0 + $0x10] sm:$0xff] }
 0x119   :  { %v2799_v50 = vsel %vm2108_vm11, %v829_v41, 0.0  ;;  %v971_v43 = vmul.f32 %v969_v10, %v2135_v32 }
 0x11a   :  { %545 = vrot.lane.b32.xlu1 %v2627_v61, %s1967_s12  ;;  %v2781_v0 = vsel %vm2123_vm15, %v831_v11, 0.0  ;;  %v2789_v18 = vsel %vm2458_vm3, %v830_v22, 0.0  ;;  %4214 = vst [vmem:[#allocation23_spill] sm:$0xff] %v2799_v50  ;;  %v965_v22 = vadd.f32 %v962_v42, %v957_v60  ;;  %v835_v44 = vrot.slane %v2799_v50, 7 }
 0x11b   :  { %647 = vrot.lane.b32.xlu0 %v2661_v57, %s1966_s11  ;;  %4212 = vst [vmem:[#allocation24_spill] sm:$0xff] %v2781_v0  ;;  %4213 = vst [vmem:[#allocation15_spill] sm:$0xff] %v2789_v18  ;;  %v837_v11 = vrot.slane %v2781_v0, 7  ;;  %v836_v41 = vrot.slane %v2789_v18, 7  ;;  %v985_v60 = vstv %s2770_s29  ;;  %v983_v52 = vadd.f32 %v980_v9, %v975_v48  ;;  %s2910_s29 = sld [smem:[#allocation3 + $0x33]] }
 0x11c   :  { %v973_v42 = vadd.f32 %v970_v63, %v965_v22  ;;  %v966_v10 = vadd.f32 %v963_v3, %v958_v27  ;;  %v2845_v27 = vld [vmem:[%s3978_s0] sm:$0xff]  ;;  %v993_v22 = vstv %s2783_s30  ;;  %v2856_v48 = vstv %s2791_s6  ;;  %s2918_s30 = sld [smem:[#allocation3 + $0x3c]]  ;;  %s2920_s6 = sld [smem:[#allocation3 + $0x45]] }
 0x11d   :  { %v2840_v9 = vsel %vm106_vm0, %v835_v44, %v836_v41 }
 0x11e   :  { %649 = vrot.lane.b32.xlu1 %v2647_v62, %s1966_s11  ;;  %v981_v63 = vadd.f32 %v978_v49, %v973_v42  ;;  %4216 = vst [vmem:[#allocation25_spill] sm:$0xff] %v2840_v9  ;;  %v974_v3 = vadd.f32 %v971_v43, %v966_v10  ;;  %v1161_v49 = vstv %s2793_s7  ;;  %v2868_v10 = vsel %vm106_vm0, %v836_v41, %v837_v11  ;;  %s2929_s7 = sld [smem:[#allocation7 + $0x1]] }
 0x11f   :  { %651 = vrot.lane.b32.xlu0 %v2665_v17, %s1966_s11  ;;  %4217 = vst [vmem:[#allocation16_spill] sm:$0xff] %v2868_v10  ;;  %v2895_v61 = vmul.f32 %v1161_v49, %v4205_v20 }
 0x121   :  { %v3016_v51 = vstv %s2910_s29  ;;  %s3371_s29 = sld [smem:[#allocation7 + $0x9]] }
 0x122   :  { %669 = vrot.lane.b32.xlu1 %v2661_v57, %s1967_s12 }
 0x123   :  { %671 = vrot.lane.b32.xlu0 %v2647_v62, %s1967_s12  ;;  %v2876_v62 = vld [vmem:[%s3978_s0 + $0x8] sm:$0xff]  ;;  %s2897_s0 = sld [smem:[#allocation3 + $0x3b]] }
 0x124   :  { %v987_v57 = vmul.f32 %v2876_v62, %v985_v60 }
 0x126   :  { %673 = vrot.lane.b32.xlu1 %v2665_v17, %s1967_s12  ;;  %v1001_v17 = vstv %s2804_s3  ;;  %s2931_s3 = sld [smem:[#allocation7 + $0x7]] }
 0x127   :  { %719 = vrot.lane.b32.xlu0 %v2651_v14, %s1966_s11  ;;  %v1004_v41 = vmul.f32 %v1001_v17, %v2313_v46  ;;  %v1002_v25 = vmul.f32 %v1001_v17, %v2261_v15  ;;  %v1003_v6 = vmul.f32 %v1001_v17, %v2263_v16  ;;  %v2943_v17 = vmul.f32 %v1161_v49, %v4207_v56 }
 0x128   :  { %v1025_v16 = vstv %s2970_s14  ;;  %v1209_v15 = vstv %s2973_s15  ;;  %s3549_s14 = sld [smem:[#allocation7 + $0x15]]  ;;  %s3573_s15 = sld [smem:[#allocation7 + $0x17]] }
 0x12a   :  { %721 = vrot.lane.b32.xlu1 %v2669_v1, %s1966_s11 }
 0x12b   :  { %723 = vrot.lane.b32.xlu0 %v2673_v45, %s1966_s11 }
 0x12e   :  { %741 = vrot.lane.b32.xlu1 %v2651_v14, %s1967_s12  ;;  %v2832_v14 = vsel %vm106_vm0, %v837_v11, %v835_v44  ;;  %v996_v44 = vmul.f32 %v993_v22, %v2207_v54 }
 0x12f   :  { %743 = vrot.lane.b32.xlu0 %v2669_v1, %s1967_s12  ;;  %v988_v1 = vmul.f32 %v2826_v55, %v985_v60  ;;  %4215 = vst [vmem:[#allocation14_spill] sm:$0xff] %v2832_v14 }
 0x131   :  { %v991_v42 = vadd.f32 %v988_v1, %v983_v52  ;;  %v1361_v1 = vstv %s2806_s8  ;;  %v2889_v52 = vstv %s2812_s9  ;;  %s2945_s8 = sld [smem:[#allocation7 + $0xa]]  ;;  %s2947_s9 = sld [smem:[#allocation7 + $0x10]] }
 0x132   :  { %745 = vrot.lane.b32.xlu1 %v2673_v45, %s1967_s12  ;;  %v979_v45 = vmul.f32 %v977_v36, %v2145_v35  ;;  %v986_v36 = vmul.f32 %v2845_v27, %v985_v60  ;;  %v995_v60 = vmul.f32 %v993_v22, %v2205_v53  ;;  %v2927_v59 = vmul.f32 %v1361_v1, %v4203_v58 }
 0x133   :  { %847 = vrot.lane.b32.xlu0 %v2832_v14, %s1966_s11  ;;  %v999_v12 = vadd.f32 %v996_v44, %v991_v42 }
 0x134   :  { %v982_v43 = vadd.f32 %v979_v45, %v974_v3  ;;  %v994_v45 = vmul.f32 %v993_v22, %v2165_v39  ;;  %v989_v11 = vadd.f32 %v986_v36, %v981_v63  ;;  %v2892_v3 = vstv %s2814_s10  ;;  %s2957_s10 = sld [smem:[#allocation7 + $0x13]] }
 0x135   :  { %v1561_v63 = vstv %s2821_s13  ;;  %v2906_v36 = vmul.f32 %v1161_v49, %v4203_v58  ;;  %v2916_v22 = vmul.f32 %v1361_v1, %v4205_v20  ;;  %v1007_v42 = vadd.f32 %v1004_v41, %v999_v12  ;;  %s2962_s13 = sld [smem:[#allocation3 + $0x3a]] }
 0x136   :  { %849 = vrot.lane.b32.xlu1 %v2840_v9, %s1966_s11  ;;  %v990_v40 = vadd.f32 %v987_v57, %v982_v43  ;;  %v997_v44 = vadd.f32 %v994_v45, %v989_v11  ;;  %v2940_v57 = vmul.f32 %v1561_v63, %v4203_v58  ;;  %v2955_v43 = vmul.f32 %v1561_v63, %v4207_v56 }
 0x137   :  { %851 = vrot.lane.b32.xlu0 %v2868_v10, %s1966_s11  ;;  %v1010_v45 = vmul.f32 %v1009_v37, %v4211_v4  ;;  %v2965_v11 = vstv %s2848_s19  ;;  %v1011_v41 = vmul.f32 %v1009_v37, %v4169_v21  ;;  %s3020_s19 = sld [smem:[#allocation3 + $0x35]] }
 0x138   :  { %v998_v12 = vadd.f32 %v995_v60, %v990_v40  ;;  %v1005_v49 = vadd.f32 %v1002_v25, %v997_v44  ;;  %v2976_v25 = vstv %s2850_s20  ;;  %v2979_v60 = vstv %s2859_s21  ;;  %s3022_s20 = sld [smem:[#allocation3 + $0x3d]] }
 0x139   :  { %v2912_v30 = vpop.permute.xlu0 %283  ;;  %s3035_s21 = sld [smem:[#allocation5 + $0x5]] }
 0x13a   :  { %869 = vrot.lane.b32.xlu1 %v2832_v14, %s1967_s12  ;;  %4218 = vst [vmem:[#allocation11_spill] sm:$0xff] %v2912_v30  ;;  %v1012_v30 = vmul.f32 %v1009_v37, %v4184_v7  ;;  %v2990_v37 = vstv %s2864_s23  ;;  %v3058_v23 = vstv %s2957_s10  ;;  %s3067_s23 = sld [smem:[#allocation7 + $0x16]] }
 0x13b   :  { %871 = vrot.lane.b32.xlu0 %v2840_v9, %s1967_s12  ;;  %v2997_v9 = vstv %s2880_s2  ;;  %4234 = vst [vmem:[#allocation68_spill] sm:$0xff] %v3058_v23  ;;  %v841_v23 = vrot.slane %v2799_v50, 1  ;;  %s3270_s2 = sld [smem:[#allocation7 + $0x3]]  ;;  %s3526_s10 = sld [smem:[#allocation5 + $0x6]] }
 0x13c   :  { %v2922_v14 = vpop.permute.xlu1 %285  ;;  %4222 = vst [vmem:[#allocation56_spill] sm:$0xff] %v2997_v9 }
 0x13d   :  { %4219 = vst [vmem:[#allocation10_spill] sm:$0xff] %v2922_v14  ;;  %v2937_v14 = vmul.f32 %v1561_v63, %v4205_v20  ;;  %v2952_v20 = vmul.f32 %v1361_v1, %v4207_v56  ;;  %v2959_v58 = vpop.permute.xlu0 %287  ;;  %v1017_v1 = vstv %s2871_s24  ;;  %v1006_v56 = vadd.f32 %v1003_v6, %v998_v12  ;;  %s3078_s24 = sld [smem:[#allocation3 + $0x3e]] }
 0x13e   :  { %873 = vrot.lane.b32.xlu1 %v2868_v10, %s1967_s12  ;;  %4220 = vst [vmem:[#allocation12_spill] sm:$0xff] %v2959_v58  ;;  %v1015_v63 = vadd.f32 %v1012_v30, %v1007_v42  ;;  %v1020_v44 = vmul.f32 %v1017_v1, %v2383_v2  ;;  %v2987_v6 = vstv %s2861_s22  ;;  %v1019_v12 = vmul.f32 %v1017_v1, %v2368_v29  ;;  %s3065_s22 = sld [smem:[#allocation7 + $0xd]] }
 0x13f   :  { %883 = vrot.lane.b32.xlu0 %v2799_v50, %s1966_s11  ;;  %v1185_v10 = vstv %s2902_s27  ;;  %v1013_v42 = vadd.f32 %v1010_v45, %v1005_v49  ;;  %v1018_v58 = vmul.f32 %v1017_v1, %v2326_v19  ;;  %v3010_v2 = vstv %s2897_s0  ;;  %s3767_s0 = sld [smem:[#allocation7 + $0x23]]  ;;  %s1847_s27 = sld [smem:[#allocation7 + $0x24]] }
 0x140   :  { %v2967_v40 = vpop.permute.xlu1 %305  ;;  %4224 = vst [vmem:[#allocation58_spill] sm:$0xff] %v3010_v2  ;;  %v3013_v29 = vstv %s2908_s28  ;;  %v3025_v49 = vstv %s2918_s30  ;;  %v3028_v45 = vstv %s2920_s6  ;;  %v1023_v1 = vadd.f32 %v1020_v44, %v1015_v63  ;;  %s3314_s28 = sld [smem:[#allocation7 + $0x6]]  ;;  %s3398_s30 = sld [smem:[#allocation7 + $0xb]] }
 0x141   :  { %4221 = vst [vmem:[#allocation55_spill] sm:$0xff] %v2967_v40  ;;  %v3000_v40 = vstv %s2882_s1  ;;  %v3002_v30 = vpop.permute.xlu0 %307  ;;  %4225 = vst [vmem:[#allocation59_spill] sm:$0xff] %v3013_v29  ;;  %v3033_v29 = vmul.f32 %v2845_v27, %v1185_v10  ;;  %v3049_v63 = vstv %s2945_s8  ;;  %v3052_v44 = vstv %s2947_s9  ;;  %s3277_s1 = sld [smem:[#allocation7 + $0x5]]  ;;  %s3406_s6 = sld [smem:[#allocation7 + $0xc]] }
 0x142   :  { %885 = vrot.lane.b32.xlu1 %v2789_v18, %s1966_s11  ;;  %4223 = vst [vmem:[#allocation57_spill] sm:$0xff] %v3002_v30  ;;  %v1014_v30 = vadd.f32 %v1011_v41, %v1006_v56  ;;  %4227 = vst [vmem:[#allocation61_spill] sm:$0xff] %v3025_v49  ;;  %v3038_v56 = vstv %s2929_s7  ;;  %v3041_v41 = vstv %s2931_s3  ;;  %v3046_v49 = vmul.f32 %v2826_v55, %v1185_v10  ;;  %s3430_s7 = sld [smem:[#allocation7 + $0xe]]  ;;  %s3458_s3 = sld [smem:[#allocation7 + $0xf]] }
 0x143   :  { %4228 = vst [vmem:[#allocation62_spill] sm:$0xff] %v3028_v45  ;;  %887 = vrot.lane.b32.xlu0 %v2781_v0, %s1966_s11  ;;  %4229 = vst [vmem:[#allocation63_spill] sm:$0xff] %v3038_v56  ;;  %v1385_v19 = vstv %s2962_s13  ;;  %s3503_s8 = sld [smem:[#allocation7 + $0x11]]  ;;  %s3517_s9 = sld [smem:[#allocation7 + $0x12]] }
 0x144   :  { %v3018_v9 = vpop.permute.xlu1 %309  ;;  %4230 = vst [vmem:[#allocation64_spill] sm:$0xff] %v3041_v41  ;;  %v1022_v45 = vadd.f32 %v1019_v12, %v1014_v30  ;;  %4231 = vst [vmem:[#allocation65_spill] sm:$0xff] %v3049_v63  ;;  %v842_v41 = vrot.slane %v2789_v18, 1  ;;  %v3070_v12 = vstv %s2981_s16  ;;  %v1028_v30 = vadd.f32 %v1025_v16, %v1023_v1  ;;  %s3540_s13 = sld [smem:[#allocation7 + $0x14]]  ;;  %s3584_s16 = sld [smem:[#allocation7 + $0x18]] }
 0x145   :  { %4226 = vst [vmem:[#allocation60_spill] sm:$0xff] %v3018_v9  ;;  %4232 = vst [vmem:[#allocation66_spill] sm:$0xff] %v3052_v44  ;;  %v3054_v2 = vpop.permute.xlu0 %483  ;;  %v1021_v9 = vadd.f32 %v1018_v58, %v1013_v42  ;;  %v843_v58 = vrot.slane %v2781_v0, 1  ;;  %v3076_v42 = vmul.f32 %v2876_v62, %v1185_v10  ;;  %v3092_v10 = vstv %s3005_s17  ;;  %s3605_s17 = sld [smem:[#allocation7 + $0x1a]] }
 0x146   :  { %905 = vrot.lane.b32.xlu1 %v2799_v50, %s1967_s12  ;;  %4233 = vst [vmem:[#allocation67_spill] sm:$0xff] %v3054_v2  ;;  %4236 = vst [vmem:[#allocation70_spill] sm:$0xff] %v3070_v12  ;;  %v3084_v12 = vmul.f32 %v2845_v27, %v1385_v19  ;;  %v3095_v44 = vmul.f32 %v1209_v15, %v4211_v4  ;;  %v1585_v63 = vstv %s3007_s18  ;;  %v3105_v50 = vstv %s3020_s19  ;;  %s3644_s18 = sld [smem:[#allocation7 + $0x1b]]  ;;  %s3652_s19 = sld [smem:[#allocation7 + $0x1c]] }
 0x147   :  { %907 = vrot.lane.b32.xlu0 %v2789_v18, %s1967_s12  ;;  %v3087_v18 = vmul.f32 %v2826_v55, %v1385_v19  ;;  %v1026_v2 = vadd.f32 %v1025_v16, %v1021_v9  ;;  %4240 = vst [vmem:[#allocation74_spill] sm:$0xff] %v3092_v10  ;;  %v1031_v9 = vmax.f32 %v1028_v30, 0.0  ;;  %v3131_v10 = vmul.f32 %v2845_v27, %v1585_v63 }
 0x148   :  { %v3060_v56 = vpop.permute.xlu1 %485  ;;  %4237 = vst [vmem:[#allocation71_spill] sm:$0xff] %v3084_v12  ;;  %4241 = vst [vmem:[#allocation75_spill] sm:$0xff] %v3095_v44  ;;  %v3108_v12 = vstv %s3022_s20  ;;  %v1159_v30 = vmul.f32 %v2856_v48, %v4202_v24  ;;  %v1157_v27 = vmul.f32 %v2856_v48, %v4204_v13  ;;  %s3665_s20 = sld [smem:[#allocation3 + $0x46]] }
 0x149   :  { %4235 = vst [vmem:[#allocation69_spill] sm:$0xff] %v3060_v56  ;;  %v1027_v56 = vadd.f32 %v1025_v16, %v1022_v45  ;;  %4238 = vst [vmem:[#allocation72_spill] sm:$0xff] %v3087_v18  ;;  %v3089_v1 = vpop.permute.xlu0 %487  ;;  %v3111_v18 = vmul.f32 %v2876_v62, %v1385_v19  ;;  %v3117_v16 = vsel %vm113_vm1, %v842_v41, %v843_v58 }
 0x14a   :  { %909 = vrot.lane.b32.xlu1 %v2781_v0, %s1967_s12  ;;  %4239 = vst [vmem:[#allocation73_spill] sm:$0xff] %v3089_v1  ;;  %v3100_v0 = vsel %vm113_vm1, %v841_v23, %v842_v41  ;;  %4245 = vst [vmem:[#allocation79_spill] sm:$0xff] %v3117_v16  ;;  %v3120_v1 = vmul.f32 %v1209_v15, %v4184_v7  ;;  %v3134_v41 = vmul.f32 %v2826_v55, %v1585_v63 }
 0x14b   :  { %4242 = vst [vmem:[#allocation76_spill] sm:$0xff] %v3100_v0  ;;  %4244 = vst [vmem:[#allocation78_spill] sm:$0xff] %v3111_v18  ;;  %919 = vrot.lane.b32.xlu0 %v3100_v0, %s1966_s11  ;;  %v1030_v19 = vmax.f32 %v1027_v56, 0.0  ;;  %v3128_v18 = vmul.f32 %v1209_v15, %v4169_v21  ;;  %v3142_v44 = vmul.f32 %v3108_v12, %v4211_v4 }
 0x14c   :  { %v3102_v45 = vpop.permute.xlu1 %505  ;;  %4247 = vst [vmem:[#allocation81_spill] sm:$0xff] %v3131_v10  ;;  %4248 = vst [vmem:[#allocation82_spill] sm:$0xff] %v3134_v41  ;;  %v3145_v15 = vmul.f32 %v2876_v62, %v1585_v63  ;;  %v3151_v55 = vsel %vm113_vm1, %v843_v58, %v841_v23  ;;  %v3156_v10 = vstv %s3065_s22  ;;  %v3159_v41 = vstv %s3067_s23  ;;  %s3689_s22 = sld [smem:[#allocation3 + $0x47]]  ;;  %s3709_s23 = sld [smem:[#allocation7 + $0x1e]] }
 0x14d   :  { %4243 = vst [vmem:[#allocation77_spill] sm:$0xff] %v3102_v45  ;;  %v3123_v45 = vstv %s3035_s21  ;;  %v3138_v7 = vpop.permute.xlu0 %507  ;;  %4250 = vst [vmem:[#allocation84_spill] sm:$0xff] %v3142_v44  ;;  %v1172_v62 = vmul.f32 %v2965_v11, %v2137_v33  ;;  %v3169_v63 = vsel %vm2123_vm15, %v1031_v9, 0.0  ;;  %v3172_v23 = vstv %s3078_s24  ;;  %s3677_s21 = sld [smem:[#allocation7 + $0x1d]]  ;;  %s3718_s24 = sld [smem:[#allocation7 + $0x1f]] }
 0x14e   :  { %4246 = vst [vmem:[#allocation80_spill] sm:$0xff] %v3123_v45  ;;  %921 = vrot.lane.b32.xlu1 %v3117_v16, %s1966_s11  ;;  %4249 = vst [vmem:[#allocation83_spill] sm:$0xff] %v3138_v7  ;;  %v1029_v45 = vmax.f32 %v1026_v2, 0.0  ;;  %v1357_v2 = vmul.f32 %v2889_v52, %v4204_v13  ;;  %v1557_v58 = vmul.f32 %v2892_v3, %v4204_v13 }
 0x14f   :  { %4251 = vst [vmem:[#allocation85_spill] sm:$0xff] %v3145_v15  ;;  %4252 = vst [vmem:[#allocation86_spill] sm:$0xff] %v3151_v55  ;;  %923 = vrot.lane.b32.xlu0 %v3151_v55, %s1966_s11  ;;  %v1359_v4 = vmul.f32 %v2889_v52, %v4202_v24  ;;  %v1170_v15 = vmul.f32 %v2965_v11, %v2133_v31  ;;  %v1167_v9 = vadd.f32 %v2906_v36, %v1159_v30 }
 0x150   :  { %v3153_v56 = vpop.permute.xlu1 %509  ;;  %4254 = vst [vmem:[#allocation88_spill] sm:$0xff] %v3159_v41  ;;  %4255 = vst [vmem:[#allocation89_spill] sm:$0xff] %v3169_v63  ;;  %v3184_v41 = vsel %vm2458_vm3, %v1030_v19, 0.0  ;;  %v1559_v44 = vmul.f32 %v2892_v3, %v4202_v24  ;;  %v1180_v13 = vmul.f32 %v2987_v6, %v2163_v38  ;;  %v1158_v19 = vmul.f32 %v2856_v48, %v4206_v47 }
 0x151   :  { %4253 = vst [vmem:[#allocation87_spill] sm:$0xff] %v3153_v56  ;;  %4256 = vst [vmem:[#allocation90_spill] sm:$0xff] %v3172_v23  ;;  %v3191_v23 = vpop.permute.xlu0 %683  ;;  %v3195_v56 = vsel %vm2108_vm11, %v1029_v45, 0.0  ;;  %v1178_v36 = vmul.f32 %v2987_v6, %v2143_v34  ;;  %v1037_v24 = vrot.slane %v3169_v63, 7  ;;  %v1365_v21 = vadd.f32 %v2916_v22, %v1357_v2 }
 0x152   :  { %941 = vrot.lane.b32.xlu1 %v3100_v0, %s1967_s12  ;;  %4257 = vst [vmem:[#allocation91_spill] sm:$0xff] %v3191_v23  ;;  %4258 = vst [vmem:[#allocation92_spill] sm:$0xff] %v3195_v56  ;;  %v1165_v0 = vadd.f32 %v2895_v61, %v1157_v27  ;;  %v1358_v23 = vmul.f32 %v2889_v52, %v4206_v47  ;;  %v1175_v7 = vadd.f32 %v1172_v62, %v1167_v9 }
 0x153   :  { %943 = vrot.lane.b32.xlu0 %v3117_v16, %s1967_s12  ;;  %v1036_v61 = vrot.slane %v3184_v41, 7  ;;  %v1558_v48 = vmul.f32 %v2892_v3, %v4206_v47  ;;  %v1171_v27 = vmul.f32 %v2965_v11, %v2135_v32  ;;  %v1035_v52 = vrot.slane %v3195_v56, 7 }
 0x154   :  { %v3202_v30 = vpop.permute.xlu1 %685  ;;  %v1173_v45 = vadd.f32 %v1170_v15, %v1165_v0  ;;  %v3221_v22 = vadd.f32 %v2937_v14, %v1557_v58  ;;  %v1367_v2 = vadd.f32 %v2927_v59, %v1359_v4  ;;  %v3225_v62 = vadd.f32 %v2940_v57, %v1559_v44 }
 0x155   :  { %4259 = vst [vmem:[#allocation93_spill] sm:$0xff] %v3202_v30  ;;  %v1183_v9 = vadd.f32 %v1180_v13, %v1175_v7  ;;  %v3227_v16 = vpop.permute.xlu0 %687  ;;  %v1166_v47 = vadd.f32 %v2943_v17, %v1158_v19  ;;  %v1179_v3 = vmul.f32 %v2987_v6, %v2145_v35  ;;  %v3234_v11 = vsel %vm106_vm0, %v1037_v24, %v1035_v52  ;;  %v4285_v30 = vld [vmem:[#allocation74_spill] sm:$0xff] }
 0x156   :  { %945 = vrot.lane.b32.xlu1 %v3151_v55, %s1967_s12  ;;  %4260 = vst [vmem:[#allocation94_spill] sm:$0xff] %v3225_v62  ;;  %4261 = vst [vmem:[#allocation95_spill] sm:$0xff] %v3227_v16  ;;  %v1181_v0 = vadd.f32 %v1178_v36, %v1173_v45  ;;  %v1366_v59 = vadd.f32 %v2952_v20, %v1358_v23  ;;  %v1370_v4 = vmul.f32 %v2976_v25, %v2133_v31 }
 0x157   :  { %4262 = vst [vmem:[#allocation96_spill] sm:$0xff] %v3234_v11  ;;  %v1371_v7 = vmul.f32 %v2976_v25, %v2135_v32  ;;  %1047 = vrot.lane.b32.xlu0 %v3234_v11, %s1966_s11  ;;  %v3247_v57 = vsel %vm106_vm0, %v1035_v52, %v1036_v61  ;;  %v3250_v17 = vadd.f32 %v2955_v43, %v1558_v48 }
 0x158   :  { %v3236_v14 = vpop.permute.xlu1 %705  ;;  %4264 = vst [vmem:[#allocation98_spill] sm:$0xff] %v3247_v57  ;;  %v3254_v6 = vmul.f32 %v2979_v60, %v2133_v31  ;;  %v1174_v20 = vadd.f32 %v1171_v27, %v1166_v47  ;;  %v1372_v44 = vmul.f32 %v2976_v25, %v2137_v33  ;;  %v3264_v15 = vmul.f32 %v2979_v60, %v2135_v32 }
 0x159   :  { %4263 = vst [vmem:[#allocation97_spill] sm:$0xff] %v3236_v14  ;;  %4265 = vst [vmem:[#allocation99_spill] sm:$0xff] %v3250_v17  ;;  %v1378_v43 = vmul.f32 %v2990_v37, %v2143_v34  ;;  %v1196_v31 = vmul.f32 %v3000_v40, %v2207_v54  ;;  %v3272_v23 = vpop.permute.xlu0 %707  ;;  %v1191_v25 = vadd.f32 %v3046_v49, %v1183_v9  ;;  %v254_v27 = vstv %s3211_s25  ;;  %s3721_s25 = sld [smem:[#allocation5 + $0x7]] }
 0x15a   :  { %1049 = vrot.lane.b32.xlu1 %v3247_v57, %s1966_s11  ;;  %4266 = vst [vmem:[#allocation100_spill] sm:$0xff] %v3264_v15  ;;  %4267 = vst [vmem:[#allocation101_spill] sm:$0xff] %v3272_v23  ;;  %v1182_v58 = vadd.f32 %v1179_v3, %v1174_v20  ;;  %v1194_v13 = vmul.f32 %v3000_v40, %v2165_v39  ;;  %v3281_v32 = vsel %vm106_vm0, %v1036_v61, %v1037_v24  ;;  %v4273_v20 = vld [vmem:[#allocation21_spill] sm:$0xff]  ;;  %v4290_v15 = vld [vmem:[#allocation55_spill] sm:$0xff] }
 0x15b   :  { %4268 = vst [vmem:[#allocation102_spill] sm:$0xff] %v3281_v32  ;;  %v1189_v36 = vadd.f32 %v3033_v29, %v1181_v0  ;;  %v1373_v48 = vadd.f32 %v1370_v4, %v1365_v21  ;;  %v3286_v45 = vadd.f32 %v1371_v7, %v1366_v59  ;;  %v1204_v49 = vmul.f32 %v3016_v51, %v2313_v46  ;;  %v4271_v29 = vld [vmem:[#allocation28_spill] sm:$0xff] }
 0x15c   :  { %v3283_v19 = vpop.permute.xlu1 %709  ;;  %1051 = vrot.lane.b32.xlu0 %v3281_v32, %s1966_s11  ;;  %v3293_v52 = vadd.f32 %v1372_v44, %v1367_v2  ;;  %v3297_v24 = vmul.f32 %v2979_v60, %v2137_v33  ;;  %v1195_v61 = vmul.f32 %v3000_v40, %v2205_v53  ;;  %v1202_v21 = vmul.f32 %v3016_v51, %v4271_v29  ;;  %v4272_v2 = vld [vmem:[#allocation29_spill] sm:$0xff]  ;;  %v4274_v44 = vld [vmem:[#allocation63_spill] sm:$0xff] }
 0x15d   :  { %4269 = vst [vmem:[#allocation103_spill] sm:$0xff] %v3283_v19  ;;  %v3305_v9 = vadd.f32 %v1378_v43, %v1373_v48  ;;  %v3309_v47 = vmul.f32 %v2990_v37, %v2145_v35  ;;  %v118_v33 = vstv %s3982_s4  ;;  %v248_v60 = vpop.permute.xlu0 %247  ;;  %v1199_v40 = vadd.f32 %v1196_v31, %v1191_v25  ;;  %v4275_v48 = vld [vmem:[#allocation38_spill] sm:$0xff]  ;;  %s3356_s4 = sld [smem:[#allocation7 + $0x8]] }
 0x15e   :  { %4270 = vst [vmem:[#allocation104_spill] sm:$0xff] %v3297_v24  ;;  %1069 = vrot.lane.b32.xlu1 %v3234_v11, %s1967_s12  ;;  %v1203_v0 = vmul.f32 %v3016_v51, %v4272_v2  ;;  %v255_v3 = vmul.f32 %v254_v27, %v248_v60  ;;  %v1197_v4 = vadd.f32 %v1194_v13, %v1189_v36  ;;  %v276_v51 = vstv %s3260_s26  ;;  %v4277_v60 = vld [vmem:[#allocation43_spill] sm:$0xff]  ;;  %s3729_s26 = sld [smem:[#allocation7 + $0x20]] }
 0x15f   :  { %v1190_v7 = vadd.f32 %v3076_v42, %v1182_v58  ;;  %v263_v43 = vmul.f32 %v4274_v44, %v4273_v20  ;;  %v264_v11 = vmul.f32 %v4274_v44, %v4275_v48  ;;  %v1207_v25 = vadd.f32 %v1204_v49, %v1199_v40  ;;  %v4276_v42 = vld [vmem:[#allocation39_spill] sm:$0xff]  ;;  %v4278_v20 = vld [vmem:[#allocation64_spill] sm:$0xff]  ;;  %v4279_v40 = vld [vmem:[#allocation42_spill] sm:$0xff] }
 0x160   :  { %v250_v59 = vpop.permute.xlu1 %249  ;;  %1071 = vrot.lane.b32.xlu0 %v3247_v57, %s1967_s12  ;;  %v258_v55 = vadd.f32 %v255_v3, %v118_v33  ;;  %v1205_v13 = vadd.f32 %v1202_v21, %v1197_v4  ;;  %v265_v58 = vmul.f32 %v4274_v44, %v4276_v42  ;;  %v3332_v19 = vmul.f32 %v4278_v20, %v4277_v60  ;;  %v4282_v60 = vld [vmem:[#allocation49_spill] sm:$0xff] }
 0x161   :  { %v256_v31 = vmul.f32 %v254_v27, %v250_v59  ;;  %v1198_v36 = vadd.f32 %v1195_v61, %v1190_v7  ;;  %v290_v48 = vstv %s3270_s2  ;;  %v252_v14 = vpop.permute.xlu0 %251  ;;  %v312_v57 = vstv %s3277_s1  ;;  %v4280_v7 = vld [vmem:[#allocation50_spill] sm:$0xff]  ;;  %s3745_s2 = sld [smem:[#allocation7 + $0x21]]  ;;  %s3752_s1 = sld [smem:[#allocation7 + $0x22]] }
 0x162   :  { %1073 = vrot.lane.b32.xlu1 %v3281_v32, %s1967_s12  ;;  %v257_v59 = vmul.f32 %v254_v27, %v252_v14  ;;  %v1218_v3 = vmul.f32 %v3105_v50, %v4279_v40  ;;  %v266_v21 = vadd.f32 %v263_v43, %v258_v55  ;;  %v1215_v4 = vadd.f32 %v3120_v1, %v1207_v25  ;;  %v4281_v14 = vld [vmem:[#allocation75_spill] sm:$0xff] }
 0x163   :  { %v259_v23 = vadd.f32 %v256_v31, %v118_v33  ;;  %v1206_v32 = vadd.f32 %v1203_v0, %v1198_v36  ;;  %v1220_v44 = vmul.f32 %v3105_v50, %v4280_v7  ;;  %v1213_v27 = vadd.f32 %v4281_v14, %v1205_v13  ;;  %v4283_v55 = vld [vmem:[#allocation11_spill] sm:$0xff] }
 0x164   :  { %v270_v49 = vpop.permute.xlu1 %269  ;;  %1083 = vrot.lane.b32.xlu0 %v3195_v56, %s1966_s11  ;;  %v260_v42 = vadd.f32 %v257_v59, %v118_v33  ;;  %v1219_v0 = vmul.f32 %v3105_v50, %v4282_v60  ;;  %v291_v43 = vmul.f32 %v290_v48, %v4283_v55  ;;  %v326_v25 = vstv %s3314_s28  ;;  %v4287_v33 = vld [vmem:[#allocation17_spill] sm:$0xff]  ;;  %v4288_v55 = vld [vmem:[#allocation10_spill] sm:$0xff]  ;;  %s1848_s28 = sld [smem:[#allocation7 + $0x25]] }
 0x165   :  { %v277_v61 = vmul.f32 %v276_v51, %v270_v49  ;;  %v267_v31 = vadd.f32 %v264_v11, %v259_v23  ;;  %v272_v16 = vpop.permute.xlu0 %271  ;;  %v4284_v49 = vld [vmem:[#allocation36_spill] sm:$0xff]  ;;  %v4286_v11 = vld [vmem:[#allocation27_spill] sm:$0xff]  ;;  %v301_v59 = vmul.f32 %v4285_v30, %v4287_v33  ;;  %v1214_v50 = vadd.f32 %v3128_v18, %v1206_v32 }
 0x166   :  { %1085 = vrot.lane.b32.xlu1 %v3184_v41, %s1966_s11  ;;  %v299_v1 = vmul.f32 %v4285_v30, %v4284_v49  ;;  %v278_v35 = vmul.f32 %v276_v51, %v272_v16  ;;  %v300_v23 = vmul.f32 %v4285_v30, %v4286_v11  ;;  %v268_v13 = vadd.f32 %v265_v58, %v260_v42  ;;  %v4289_v30 = vld [vmem:[#allocation12_spill] sm:$0xff] }
 0x167   :  { %v280_v36 = vadd.f32 %v277_v61, %v266_v21  ;;  %v1223_v61 = vadd.f32 %v1220_v44, %v1215_v4  ;;  %v292_v16 = vmul.f32 %v290_v48, %v4288_v55  ;;  %v1221_v11 = vadd.f32 %v1218_v3, %v1213_v27  ;;  %v4292_v3 = vld [vmem:[#allocation57_spill] sm:$0xff] }
 0x168   :  { %v274_v24 = vpop.permute.xlu1 %273  ;;  %1087 = vrot.lane.b32.xlu0 %v3169_v63, %s1966_s11  ;;  %v281_v49 = vadd.f32 %v278_v35, %v267_v31  ;;  %v1222_v62 = vadd.f32 %v1219_v0, %v1214_v50  ;;  %v293_v33 = vmul.f32 %v290_v48, %v4289_v30  ;;  %v313_v17 = vmul.f32 %v312_v57, %v4290_v15  ;;  %v4291_v15 = vld [vmem:[#allocation80_spill] sm:$0xff] }
 0x169   :  { %v294_v14 = vadd.f32 %v291_v43, %v280_v36  ;;  %v279_v21 = vmul.f32 %v276_v51, %v274_v24  ;;  %v320_v58 = vpop.permute.xlu0 %319  ;;  %v1041_v24 = vrot.slane %v3195_v56, 1  ;;  %v1042_v51 = vrot.slane %v3184_v41, 1  ;;  %v4293_v50 = vld [vmem:[#allocation60_spill] sm:$0xff] }
 0x16a   :  { %1105 = vrot.lane.b32.xlu1 %v3195_v56, %s1967_s12  ;;  %v295_v42 = vadd.f32 %v292_v16, %v281_v49  ;;  %v1043_v35 = vrot.slane %v3169_v63, 1  ;;  %v327_v31 = vmul.f32 %v326_v25, %v320_v58  ;;  %v1228_v48 = vadd.f32 %v4291_v15, %v1223_v61 }
 0x16b   :  { %v282_v18 = vadd.f32 %v279_v21, %v268_v13  ;;  %v302_v32 = vadd.f32 %v299_v1, %v294_v14  ;;  %v314_v27 = vmul.f32 %v312_v57, %v4292_v3  ;;  %v1227_v1 = vadd.f32 %v4291_v15, %v1222_v62 }
 0x16c   :  { %v322_v43 = vpop.permute.xlu1 %321  ;;  %1107 = vrot.lane.b32.xlu0 %v3184_v41, %s1967_s12  ;;  %v303_v0 = vadd.f32 %v300_v23, %v295_v42  ;;  %v1226_v55 = vadd.f32 %v4291_v15, %v1221_v11  ;;  %v3382_v61 = vsel %vm113_vm1, %v1041_v24, %v1042_v51  ;;  %v348_v49 = vstv %s3356_s4  ;;  %s1849_s4 = sld [smem:[#allocation7 + $0x26]] }
 0x16d   :  { %v296_v4 = vadd.f32 %v293_v33, %v282_v18  ;;  %v316_v44 = vadd.f32 %v313_v17, %v302_v32  ;;  %v328_v36 = vmul.f32 %v326_v25, %v322_v43  ;;  %v315_v17 = vmul.f32 %v312_v57, %v4293_v50  ;;  %v324_v14 = vpop.permute.xlu0 %323  ;;  %4294 = vst [vmem:[#allocation28_spill] sm:$0xff] %v3382_v61  ;;  %v4296_v18 = vld [vmem:[#allocation22_spill] sm:$0xff] }
 0x16e   :  { %1109 = vrot.lane.b32.xlu1 %v3169_v63, %s1967_s12  ;;  %v317_v16 = vadd.f32 %v314_v27, %v303_v0  ;;  %v3387_v30 = vsel %vm113_vm1, %v1042_v51, %v1043_v35  ;;  %v329_v57 = vmul.f32 %v326_v25, %v324_v14  ;;  %v1380_v11 = vmul.f32 %v2990_v37, %v2163_v38  ;;  %v4297_v25 = vld [vmem:[#allocation56_spill] sm:$0xff]  ;;  %v4298_v43 = vld [vmem:[#allocation34_spill] sm:$0xff]  ;;  %v4313_v63 = vld [vmem:[#allocation37_spill] sm:$0xff] }
 0x16f   :  { %v330_v13 = vadd.f32 %v327_v31, %v316_v44  ;;  %v304_v21 = vadd.f32 %v301_v59, %v296_v4  ;;  %4295 = vst [vmem:[#allocation29_spill] sm:$0xff] %v3387_v30  ;;  %v1231_v59 = vmax.f32 %v1228_v48, 0.0  ;;  %v336_v32 = vmul.f32 %v4278_v20, %v4296_v18 }
 0x170   :  { %v342_v23 = vpop.permute.xlu1 %341  ;;  %1119 = vrot.lane.b32.xlu0 %v3382_v61, %s1966_s11  ;;  %v331_v58 = vadd.f32 %v328_v36, %v317_v16  ;;  %v3402_v42 = vmul.f32 %v4297_v25, %v2143_v34  ;;  %v337_v51 = vmul.f32 %v4278_v20, %v4298_v43  ;;  %v1229_v44 = vmax.f32 %v1226_v55, 0.0 }
 0x171   :  { %v338_v62 = vadd.f32 %v3332_v19, %v330_v13  ;;  %v318_v33 = vadd.f32 %v315_v17, %v304_v21  ;;  %v1230_v19 = vmax.f32 %v1227_v1, 0.0  ;;  %v344_v4 = vpop.permute.xlu0 %343  ;;  %v3410_v31 = vadd.f32 %v3309_v47, %v3286_v45  ;;  %v4300_v47 = vld [vmem:[#allocation58_spill] sm:$0xff] }
 0x172   :  { %1121 = vrot.lane.b32.xlu1 %v3387_v30, %s1966_s11  ;;  %v339_v15 = vadd.f32 %v336_v32, %v331_v58  ;;  %v349_v48 = vmul.f32 %v348_v49, %v342_v23  ;;  %v3414_v3 = vsel %vm113_vm1, %v1043_v35, %v1041_v24  ;;  %v350_v0 = vmul.f32 %v348_v49, %v344_v4  ;;  %v4302_v58 = vld [vmem:[#allocation48_spill] sm:$0xff] }
 0x173   :  { %v332_v37 = vadd.f32 %v329_v57, %v318_v33  ;;  %4299 = vst [vmem:[#allocation21_spill] sm:$0xff] %v3414_v3  ;;  %v454_v20 = vstv %s3371_s29  ;;  %v3421_v36 = vsel %vm2123_vm15, %v1231_v59, 0.0  ;;  %v1383_v45 = vadd.f32 %v1380_v11, %v3293_v52  ;;  %v4301_v52 = vld [vmem:[#allocation61_spill] sm:$0xff]  ;;  %s1850_s29 = sld [smem:[#allocation7 + $0x27]] }
 0x174   :  { %v346_v34 = vpop.permute.xlu1 %345  ;;  %1123 = vrot.lane.b32.xlu0 %v3414_v3, %s1966_s11  ;;  %v1394_v1 = vmul.f32 %v4300_v47, %v2165_v39  ;;  %v3428_v24 = vmul.f32 %v4300_v47, %v2205_v53  ;;  %v3436_v35 = vsel %vm2458_vm3, %v1230_v19, 0.0  ;;  %v1396_v50 = vmul.f32 %v4300_v47, %v2207_v54 }
 0x175   :  { %v340_v27 = vadd.f32 %v337_v51, %v332_v37  ;;  %v3442_v17 = vmul.f32 %v4301_v52, %v4271_v29  ;;  %v3446_v13 = vmul.f32 %v4301_v52, %v4272_v2  ;;  %v448_v14 = vpop.permute.xlu0 %447  ;;  %v3450_v21 = vsel %vm2108_vm11, %v1229_v44, 0.0  ;;  %v4304_v37 = vld [vmem:[#allocation30_spill] sm:$0xff]  ;;  %v4305_v44 = vld [vmem:[#allocation40_spill] sm:$0xff] }
 0x176   :  { %1141 = vrot.lane.b32.xlu1 %v3382_v61, %s1967_s12  ;;  %v352_v55 = vadd.f32 %v349_v48, %v338_v62  ;;  %v351_v16 = vmul.f32 %v348_v49, %v346_v34  ;;  %v455_v23 = vmul.f32 %v454_v20, %v448_v14  ;;  %v1237_v57 = vrot.slane %v3421_v36, 7  ;;  %v4303_v62 = vld [vmem:[#allocation65_spill] sm:$0xff] }
 0x177   :  { %v1404_v59 = vmul.f32 %v4301_v52, %v2313_v46  ;;  %v353_v11 = vadd.f32 %v350_v0, %v339_v15  ;;  %v1236_v32 = vrot.slane %v3436_v35, 7  ;;  %v463_v49 = vmul.f32 %v4303_v62, %v4302_v58  ;;  %v4312_v61 = vld [vmem:[#allocation33_spill] sm:$0xff] }
 0x178   :  { %v450_v33 = vpop.permute.xlu1 %449  ;;  %1143 = vrot.lane.b32.xlu0 %v3387_v30, %s1967_s12  ;;  %v458_v19 = vadd.f32 %v455_v23, %v352_v55  ;;  %v1235_v43 = vrot.slane %v3450_v21, 7  ;;  %v476_v51 = vstv %s3398_s30  ;;  %v464_v4 = vmul.f32 %v4303_v62, %v4304_v37  ;;  %s1851_s30 = sld [smem:[#allocation7 + $0x28]] }
 0x179   :  { %v456_v18 = vmul.f32 %v454_v20, %v450_v33  ;;  %v465_v15 = vmul.f32 %v4303_v62, %v4305_v44  ;;  %v490_v48 = vstv %s3406_s6  ;;  %v452_v0 = vpop.permute.xlu0 %451  ;;  %v354_v47 = vadd.f32 %v351_v16, %v340_v27  ;;  %v4307_v27 = vld [vmem:[#allocation35_spill] sm:$0xff]  ;;  %v4308_v16 = vld [vmem:[#allocation66_spill] sm:$0xff]  ;;  %s1852_s6 = sld [smem:[#allocation7 + $0x29]] }
 0x17a   :  { %1145 = vrot.lane.b32.xlu1 %v3414_v3, %s1967_s12  ;;  %v466_v52 = vadd.f32 %v463_v49, %v458_v19  ;;  %v457_v14 = vmul.f32 %v454_v20, %v452_v0  ;;  %v3473_v55 = vsel %vm106_vm0, %v1237_v57, %v1235_v43  ;;  %v3479_v37 = vsel %vm106_vm0, %v1235_v43, %v1236_v32  ;;  %v4309_v19 = vld [vmem:[#allocation72_spill] sm:$0xff]  ;;  %v4310_v44 = vld [vmem:[#allocation67_spill] sm:$0xff] }
 0x17b   :  { %v459_v34 = vadd.f32 %v456_v18, %v353_v11  ;;  %v4306_v11 = vld [vmem:[#allocation71_spill] sm:$0xff]  ;;  %v535_v20 = vmul.f32 %v4308_v16, %v4307_v27  ;;  %v512_v62 = vstv %s3430_s7  ;;  %s1854_s7 = sld [smem:[#allocation7 + $0x2b]] }
 0x17c   :  { %v470_v23 = vpop.permute.xlu1 %469  ;;  %1247 = vrot.lane.b32.xlu0 %v3473_v55, %s1966_s11  ;;  %v1389_v18 = vadd.f32 %v4306_v11, %v3305_v9  ;;  %v460_v49 = vadd.f32 %v457_v14, %v354_v47  ;;  %v4311_v43 = vld [vmem:[#allocation31_spill] sm:$0xff]  ;;  %v500_v9 = vmul.f32 %v3156_v10, %v4312_v61  ;;  %v3496_v47 = vsel %vm106_vm0, %v1236_v32, %v1237_v57  ;;  %v4314_v61 = vld [vmem:[#allocation69_spill] sm:$0xff]  ;;  %v4315_v32 = vld [vmem:[#allocation78_spill] sm:$0xff] }
 0x17d   :  { %v467_v33 = vadd.f32 %v464_v4, %v459_v34  ;;  %v477_v58 = vmul.f32 %v476_v51, %v470_v23  ;;  %v1391_v4 = vadd.f32 %v4309_v19, %v1383_v45  ;;  %v491_v34 = vmul.f32 %v490_v48, %v4310_v44  ;;  %v472_v23 = vpop.permute.xlu0 %471 }
 0x17e   :  { %1249 = vrot.lane.b32.xlu1 %v3479_v37, %s1966_s11  ;;  %v499_v3 = vmul.f32 %v3156_v10, %v4311_v43  ;;  %v468_v11 = vadd.f32 %v465_v15, %v460_v49  ;;  %v478_v27 = vmul.f32 %v476_v51, %v472_v23  ;;  %v501_v45 = vmul.f32 %v3156_v10, %v4313_v63  ;;  %v4316_v10 = vld [vmem:[#allocation73_spill] sm:$0xff] }
 0x17f   :  { %v480_v0 = vadd.f32 %v477_v58, %v466_v52  ;;  %v526_v58 = vstv %s3458_s3  ;;  %v1397_v44 = vadd.f32 %v1394_v1, %v1389_v18  ;;  %v492_v15 = vmul.f32 %v490_v48, %v4314_v61  ;;  %s1866_s3 = sld [smem:[#allocation7 + $0x2d]] }
 0x180   :  { %v474_v14 = vpop.permute.xlu1 %473  ;;  %1251 = vrot.lane.b32.xlu0 %v3496_v47, %s1966_s11  ;;  %v481_v49 = vadd.f32 %v478_v27, %v467_v33  ;;  %v1399_v57 = vadd.f32 %v1396_v50, %v1391_v4  ;;  %v1390_v23 = vadd.f32 %v4315_v32, %v3410_v31  ;;  %v493_v63 = vmul.f32 %v490_v48, %v4316_v10  ;;  %v4318_v33 = vld [vmem:[#allocation20_spill] sm:$0xff] }
 0x181   :  { %v494_v19 = vadd.f32 %v491_v34, %v480_v0  ;;  %v479_v52 = vmul.f32 %v476_v51, %v474_v14  ;;  %v4317_v34 = vld [vmem:[#allocation77_spill] sm:$0xff]  ;;  %v520_v14 = vpop.permute.xlu0 %519  ;;  %v1405_v1 = vadd.f32 %v3442_v17, %v1397_v44  ;;  %v1412_v27 = vmul.f32 %v3108_v12, %v4318_v33  ;;  %v4320_v17 = vld [vmem:[#allocation19_spill] sm:$0xff] }
 0x182   :  { %1269 = vrot.lane.b32.xlu1 %v3473_v55, %s1967_s12  ;;  %v513_v0 = vmul.f32 %v512_v62, %v4317_v34  ;;  %v495_v56 = vadd.f32 %v492_v15, %v481_v49  ;;  %v1407_v18 = vadd.f32 %v1404_v59, %v1399_v57  ;;  %v527_v4 = vmul.f32 %v526_v58, %v520_v14  ;;  %v4325_v14 = vld [vmem:[#allocation32_spill] sm:$0xff] }
 0x183   :  { %v482_v43 = vadd.f32 %v479_v52, %v468_v11  ;;  %v502_v51 = vadd.f32 %v499_v3, %v494_v19  ;;  %v1398_v31 = vadd.f32 %v3428_v24, %v1390_v23  ;;  %v4319_v3 = vld [vmem:[#allocation83_spill] sm:$0xff]  ;;  %v1411_v59 = vmul.f32 %v3108_v12, %v4320_v17 }
 0x184   :  { %v522_v30 = vpop.permute.xlu1 %521  ;;  %1271 = vrot.lane.b32.xlu0 %v3479_v37, %s1967_s12  ;;  %v514_v48 = vmul.f32 %v512_v62, %v4319_v3  ;;  %v503_v11 = vadd.f32 %v500_v9, %v495_v56  ;;  %v4321_v52 = vld [vmem:[#allocation87_spill] sm:$0xff]  ;;  %v1415_v56 = vadd.f32 %v1412_v27, %v1407_v18  ;;  %v537_v18 = vmul.f32 %v4308_v16, %v4325_v14 }
 0x185   :  { %v496_v61 = vadd.f32 %v493_v63, %v482_v43  ;;  %v516_v50 = vadd.f32 %v513_v0, %v502_v51  ;;  %v528_v19 = vmul.f32 %v526_v58, %v522_v30  ;;  %v515_v44 = vmul.f32 %v512_v62, %v4321_v52  ;;  %v524_v49 = vpop.permute.xlu0 %523  ;;  %v4322_v30 = vld [vmem:[#allocation90_spill] sm:$0xff]  ;;  %v4324_v43 = vld [vmem:[#allocation84_spill] sm:$0xff] }
 0x186   :  { %1273 = vrot.lane.b32.xlu1 %v3496_v47, %s1967_s12  ;;  %v1406_v24 = vadd.f32 %v3446_v13, %v1398_v31  ;;  %v517_v32 = vadd.f32 %v514_v48, %v503_v11  ;;  %v1420_v9 = vmul.f32 %v4322_v30, %v4280_v7  ;;  %v1419_v10 = vmul.f32 %v4322_v30, %v4282_v60  ;;  %v4327_v31 = vld [vmem:[#allocation100_spill] sm:$0xff] }
 0x187   :  { %v530_v15 = vadd.f32 %v527_v4, %v516_v50  ;;  %v504_v57 = vadd.f32 %v501_v45, %v496_v61  ;;  %v529_v34 = vmul.f32 %v526_v58, %v524_v49  ;;  %v548_v62 = vstv %s3503_s8  ;;  %v4323_v45 = vld [vmem:[#allocation47_spill] sm:$0xff]  ;;  %s1867_s8 = sld [smem:[#allocation7 + $0x2e]] }
 0x188   :  { %v542_v23 = vpop.permute.xlu1 %541  ;;  %1283 = vrot.lane.b32.xlu0 %v3450_v21, %s1966_s11  ;;  %v536_v0 = vmul.f32 %v4308_v16, %v4323_v45  ;;  %v531_v13 = vadd.f32 %v528_v19, %v517_v32  ;;  %v1413_v51 = vadd.f32 %v4324_v43, %v1405_v1  ;;  %v1573_v58 = vadd.f32 %v3254_v6, %v3221_v22  ;;  %v4326_v4 = vld [vmem:[#allocation99_spill] sm:$0xff]  ;;  %v4328_v16 = vld [vmem:[#allocation94_spill] sm:$0xff] }
 0x189   :  { %v538_v12 = vadd.f32 %v535_v20, %v530_v15  ;;  %v518_v63 = vadd.f32 %v515_v44, %v504_v57  ;;  %v1418_v20 = vmul.f32 %v4322_v30, %v4279_v40  ;;  %v544_v61 = vpop.permute.xlu0 %543  ;;  %v1414_v50 = vadd.f32 %v1411_v59, %v1406_v24  ;;  %v4329_v15 = vld [vmem:[#allocation104_spill] sm:$0xff]  ;;  %v4330_v57 = vld [vmem:[#allocation26_spill] sm:$0xff] }
 0x18a   :  { %1285 = vrot.lane.b32.xlu1 %v3436_v35, %s1966_s11  ;;  %v3553_v3 = vadd.f32 %v4327_v31, %v4326_v4  ;;  %v539_v1 = vadd.f32 %v536_v0, %v531_v13  ;;  %v549_v48 = vmul.f32 %v548_v62, %v542_v23  ;;  %v1423_v19 = vadd.f32 %v1420_v9, %v1415_v56  ;;  %v4331_v56 = vld [vmem:[#allocation51_spill] sm:$0xff]  ;;  %v4332_v30 = vld [vmem:[#allocation68_spill] sm:$0xff] }
 0x18b   :  { %v532_v27 = vadd.f32 %v529_v34, %v518_v63  ;;  %v550_v44 = vmul.f32 %v548_v62, %v544_v61  ;;  %v654_v22 = vstv %s3517_s9  ;;  %v1422_v6 = vadd.f32 %v1419_v10, %v1414_v50  ;;  %s1868_s9 = sld [smem:[#allocation7 + $0x2f]] }
 0x18c   :  { %v546_v11 = vpop.permute.xlu1 %545  ;;  %1287 = vrot.lane.b32.xlu0 %v3421_v36, %s1966_s11  ;;  %v1575_v49 = vadd.f32 %v4329_v15, %v4328_v16  ;;  %v3561_v59 = vadd.f32 %v3402_v42, %v1573_v58  ;;  %v3565_v24 = vmul.f32 %v4297_v25, %v4330_v57  ;;  %v1421_v32 = vadd.f32 %v1418_v20, %v1413_v51  ;;  %v4334_v57 = vld [vmem:[#allocation52_spill] sm:$0xff] }
 0x18d   :  { %v540_v52 = vadd.f32 %v537_v18, %v532_v27  ;;  %v1580_v23 = vmul.f32 %v4297_v25, %v2163_v38  ;;  %v663_v9 = vmul.f32 %v4332_v30, %v4331_v56  ;;  %v648_v10 = vpop.permute.xlu0 %647  ;;  %v1243_v42 = vrot.slane %v3421_v36, 1  ;;  %v4333_v27 = vld [vmem:[#allocation13_spill] sm:$0xff]  ;;  %v4335_v56 = vld [vmem:[#allocation91_spill] sm:$0xff] }
 0x18e   :  { %1305 = vrot.lane.b32.xlu1 %v3450_v21, %s1967_s12  ;;  %v1425_v63 = vstv %s3526_s10  ;;  %v552_v34 = vadd.f32 %v549_v48, %v538_v12  ;;  %v551_v45 = vmul.f32 %v548_v62, %v546_v11  ;;  %v655_v0 = vmul.f32 %v654_v22, %v648_v10  ;;  %s1869_s10 = sld [smem:[#allocation7 + $0x30]] }
 0x18f   :  { %v1242_v43 = vrot.slane %v3436_v35, 1  ;;  %v553_v51 = vadd.f32 %v550_v44, %v539_v1  ;;  %v1428_v25 = vadd.f32 %v1425_v63, %v1423_v19  ;;  %v1427_v20 = vadd.f32 %v1425_v63, %v1422_v6 }
 0x190   :  { %v650_v13 = vpop.permute.xlu1 %649  ;;  %1307 = vrot.lane.b32.xlu0 %v3436_v35, %s1967_s12  ;;  %v658_v58 = vadd.f32 %v655_v0, %v552_v34  ;;  %v1241_v14 = vrot.slane %v3450_v21, 1  ;;  %v676_v12 = vstv %s3540_s13  ;;  %v1426_v62 = vadd.f32 %v1425_v63, %v1421_v32  ;;  %v4337_v0 = vld [vmem:[#allocation88_spill] sm:$0xff]  ;;  %s1870_s13 = sld [smem:[#allocation7 + $0x31]] }
 0x191   :  { %v656_v38 = vmul.f32 %v654_v22, %v650_v13  ;;  %v3586_v18 = vadd.f32 %v1580_v23, %v1575_v49  ;;  %v664_v61 = vmul.f32 %v4332_v30, %v4333_v27  ;;  %v690_v50 = vstv %s3549_s14  ;;  %v652_v31 = vpop.permute.xlu0 %651  ;;  %s1871_s14 = sld [smem:[#allocation7 + $0x32]] }
 0x192   :  { %1309 = vrot.lane.b32.xlu1 %v3421_v36, %s1967_s12  ;;  %v554_v1 = vadd.f32 %v551_v45, %v540_v52  ;;  %v666_v48 = vadd.f32 %v663_v9, %v658_v58  ;;  %v657_v11 = vmul.f32 %v654_v22, %v652_v31  ;;  %v3593_v19 = vsel %vm113_vm1, %v1241_v14, %v1242_v43  ;;  %v4336_v45 = vld [vmem:[#allocation46_spill] sm:$0xff] }
 0x193   :  { %v659_v4 = vadd.f32 %v656_v38, %v553_v51  ;;  %v3599_v16 = vsel %vm113_vm1, %v1242_v43, %v1243_v42  ;;  %v1431_v15 = vmax.f32 %v1428_v25, 0.0  ;;  %v1430_v49 = vmax.f32 %v1427_v20, 0.0  ;;  %v4338_v25 = vld [vmem:[#allocation44_spill] sm:$0xff] }
 0x194   :  { %v670_v44 = vpop.permute.xlu1 %669  ;;  %1319 = vrot.lane.b32.xlu0 %v3593_v19, %s1966_s11  ;;  %v665_v52 = vmul.f32 %v4332_v30, %v4334_v57  ;;  %v660_v22 = vadd.f32 %v657_v11, %v554_v1  ;;  %v1429_v23 = vmax.f32 %v1426_v62, 0.0  ;;  %v691_v9 = vmul.f32 %v690_v50, %v4335_v56  ;;  %v4341_v11 = vld [vmem:[#allocation97_spill] sm:$0xff] }
 0x195   :  { %v677_v6 = vmul.f32 %v676_v12, %v670_v44  ;;  %v667_v32 = vadd.f32 %v664_v61, %v659_v4  ;;  %v712_v10 = vstv %s3573_s15  ;;  %v672_v34 = vpop.permute.xlu0 %671  ;;  %v699_v13 = vmul.f32 %v4337_v0, %v4336_v45  ;;  %v4339_v4 = vld [vmem:[#allocation93_spill] sm:$0xff]  ;;  %s1872_s15 = sld [smem:[#allocation7 + $0x33]] }
 0x196   :  { %1321 = vrot.lane.b32.xlu1 %v3599_v16, %s1966_s11  ;;  %v668_v43 = vadd.f32 %v665_v52, %v660_v22  ;;  %v678_v51 = vmul.f32 %v676_v12, %v672_v34  ;;  %v3613_v30 = vsel %vm113_vm1, %v1243_v42, %v1241_v14  ;;  %v700_v20 = vmul.f32 %v4337_v0, %v4338_v25  ;;  %v4342_v22 = vld [vmem:[#allocation41_spill] sm:$0xff]  ;;  %v4345_v25 = vld [vmem:[#allocation70_spill] sm:$0xff] }
 0x197   :  { %v680_v63 = vadd.f32 %v677_v6, %v666_v48  ;;  %v3621_v27 = vsel %vm2123_vm15, %v1431_v15, 0.0  ;;  %v3625_v61 = vsel %vm2458_vm3, %v1430_v49, 0.0  ;;  %v692_v42 = vmul.f32 %v690_v50, %v4339_v4  ;;  %v4343_v45 = vld [vmem:[#allocation101_spill] sm:$0xff] }
 0x198   :  { %v674_v38 = vpop.permute.xlu1 %673  ;;  %1323 = vrot.lane.b32.xlu0 %v3613_v30, %s1966_s11  ;;  %v681_v14 = vadd.f32 %v678_v51, %v667_v32  ;;  %v726_v31 = vstv %s3584_s16  ;;  %v3633_v1 = vsel %vm2108_vm11, %v1429_v23, 0.0  ;;  %v713_v44 = vmul.f32 %v712_v10, %v4341_v11  ;;  %s1873_s16 = sld [smem:[#allocation7 + $0x34]] }
 0x199   :  { %v694_v58 = vadd.f32 %v691_v9, %v680_v63  ;;  %v679_v62 = vmul.f32 %v676_v12, %v674_v38  ;;  %v4340_v12 = vld [vmem:[#allocation95_spill] sm:$0xff]  ;;  %v720_v57 = vpop.permute.xlu0 %719  ;;  %v701_v32 = vmul.f32 %v4337_v0, %v4342_v22  ;;  %v1437_v56 = vrot.slane %v3621_v27, 7  ;;  %v4344_v38 = vld [vmem:[#allocation45_spill] sm:$0xff] }
 0x19a   :  { %1341 = vrot.lane.b32.xlu1 %v3593_v19, %s1967_s12  ;;  %v693_v48 = vmul.f32 %v690_v50, %v4340_v12  ;;  %v695_v49 = vadd.f32 %v692_v42, %v681_v14  ;;  %v1436_v9 = vrot.slane %v3625_v61, 7  ;;  %v727_v34 = vmul.f32 %v726_v31, %v720_v57  ;;  %v4348_v22 = vld [vmem:[#allocation53_spill] sm:$0xff] }
 0x19b   :  { %v682_v6 = vadd.f32 %v679_v62, %v668_v43  ;;  %v702_v15 = vadd.f32 %v699_v13, %v694_v58  ;;  %v1435_v50 = vrot.slane %v3633_v1, 7  ;;  %v714_v13 = vmul.f32 %v712_v10, %v4343_v45  ;;  %v4346_v62 = vld [vmem:[#allocation103_spill] sm:$0xff] }
 0x19c   :  { %v722_v52 = vpop.permute.xlu1 %721  ;;  %1343 = vrot.lane.b32.xlu0 %v3599_v16, %s1967_s12  ;;  %v703_v43 = vadd.f32 %v700_v20, %v695_v49  ;;  %v748_v0 = vstv %s3605_s17  ;;  %v735_v58 = vmul.f32 %v4345_v25, %v4344_v38  ;;  %v715_v4 = vmul.f32 %v712_v10, %v4346_v62  ;;  %s1874_s17 = sld [smem:[#allocation7 + $0x35]] }
 0x19d   :  { %v696_v63 = vadd.f32 %v693_v48, %v682_v6  ;;  %v716_v23 = vadd.f32 %v713_v44, %v702_v15  ;;  %v728_v51 = vmul.f32 %v726_v31, %v722_v52  ;;  %v724_v14 = vpop.permute.xlu0 %723  ;;  %v1582_v48 = vadd.f32 %v3565_v24, %v3553_v3  ;;  %v4347_v3 = vld [vmem:[#allocation59_spill] sm:$0xff] }
 0x19e   :  { %1345 = vrot.lane.b32.xlu1 %v3613_v30, %s1967_s12  ;;  %v717_v11 = vadd.f32 %v714_v13, %v703_v43  ;;  %v3659_v20 = vsel %vm106_vm0, %v1437_v56, %v1435_v50  ;;  %v3663_v6 = vsel %vm106_vm0, %v1435_v50, %v1436_v9  ;;  %v729_v57 = vmul.f32 %v726_v31, %v724_v14  ;;  %v4349_v31 = vld [vmem:[#allocation54_spill] sm:$0xff] }
 0x19f   :  { %v730_v42 = vadd.f32 %v727_v34, %v716_v23  ;;  %v704_v12 = vadd.f32 %v701_v32, %v696_v63  ;;  %v1594_v24 = vmul.f32 %v4347_v3, %v2165_v39  ;;  %v1596_v52 = vmul.f32 %v4347_v3, %v2207_v54  ;;  %v4350_v39 = vld [vmem:[#allocation82_spill] sm:$0xff] }
 0x1a0   :  { %v742_v44 = vpop.permute.xlu1 %741  ;;  %1447 = vrot.lane.b32.xlu0 %v3659_v20, %s1966_s11  ;;  %v736_v32 = vmul.f32 %v4345_v25, %v4348_v22  ;;  %v731_v63 = vadd.f32 %v728_v51, %v717_v11  ;;  %v737_v23 = vmul.f32 %v4345_v25, %v4349_v31  ;;  %v1591_v13 = vadd.f32 %v4350_v39, %v3586_v18  ;;  %v4351_v54 = vld [vmem:[#allocation62_spill] sm:$0xff] }
 0x1a1   :  { %v738_v15 = vadd.f32 %v735_v58, %v730_v42  ;;  %v718_v10 = vadd.f32 %v715_v4, %v704_v12  ;;  %v749_v49 = vmul.f32 %v748_v0, %v742_v44  ;;  %v744_v45 = vpop.permute.xlu0 %743  ;;  %v1604_v43 = vmul.f32 %v4351_v54, %v2313_v46  ;;  %v4352_v42 = vld [vmem:[#allocation81_spill] sm:$0xff] }
 0x1a2   :  { %1449 = vrot.lane.b32.xlu1 %v3663_v6, %s1966_s11  ;;  %v739_v51 = vadd.f32 %v736_v32, %v731_v63  ;;  %v750_v38 = vmul.f32 %v748_v0, %v744_v45  ;;  %v3687_v58 = vsel %vm106_vm0, %v1436_v9, %v1437_v56  ;;  %v854_v18 = vstv %s3644_s18  ;;  %s1885_s18 = sld [smem:[#allocation7 + $0x36]] }
 0x1a3   :  { %v732_v34 = vadd.f32 %v729_v57, %v718_v10  ;;  %v752_v50 = vadd.f32 %v749_v49, %v738_v15  ;;  %v1589_v14 = vadd.f32 %v4352_v42, %v3561_v59  ;;  %v1595_v46 = vmul.f32 %v4347_v3, %v2205_v53  ;;  %v4353_v49 = vld [vmem:[#allocation85_spill] sm:$0xff] }
 0x1a4   :  { %v746_v62 = vpop.permute.xlu1 %745  ;;  %1451 = vrot.lane.b32.xlu0 %v3687_v58, %s1966_s11  ;;  %v753_v12 = vadd.f32 %v750_v38, %v739_v51  ;;  %v1602_v56 = vmul.f32 %v4351_v54, %v4271_v29  ;;  %v862_v9 = vstv %s3652_s19  ;;  %v1599_v15 = vadd.f32 %v1596_v52, %v1591_v13  ;;  %v4354_v52 = vld [vmem:[#allocation14_spill] sm:$0xff]  ;;  %s1886_s19 = sld [smem:[#allocation7 + $0x37]] }
 0x1a5   :  { %v740_v25 = vadd.f32 %v737_v23, %v732_v34  ;;  %v751_v4 = vmul.f32 %v748_v0, %v746_v62  ;;  %v848_v44 = vpop.permute.xlu0 %847  ;;  %v1603_v0 = vmul.f32 %v4351_v54, %v4272_v2  ;;  %v1609_v57 = vstv %s3665_s20  ;;  %v4356_v54 = vld [vmem:[#allocation18_spill] sm:$0xff]  ;;  %s1887_s20 = sld [smem:[#allocation7 + $0x38]] }
 0x1a6   :  { %1469 = vrot.lane.b32.xlu1 %v3659_v20, %s1967_s12  ;;  %v855_v10 = vmul.f32 %v854_v18, %v848_v44  ;;  %v1590_v53 = vadd.f32 %v4353_v49, %v1582_v48  ;;  %v1597_v29 = vadd.f32 %v1594_v24, %v1589_v14  ;;  %v1607_v22 = vadd.f32 %v1604_v43, %v1599_v15  ;;  %v4355_v48 = vld [vmem:[#allocation25_spill] sm:$0xff] }
 0x1a7   :  { %v754_v11 = vadd.f32 %v751_v4, %v740_v25  ;;  %v1612_v32 = vmul.f32 %v1609_v57, %v4318_v33  ;;  %v863_v63 = vmul.f32 %v862_v9, %v4354_v52  ;;  %v876_v2 = vstv %s3677_s21  ;;  %s1888_s21 = sld [smem:[#allocation7 + $0x39]] }
 0x1a8   :  { %v850_v59 = vpop.permute.xlu1 %849  ;;  %1471 = vrot.lane.b32.xlu0 %v3663_v6, %s1967_s12  ;;  %v858_v31 = vadd.f32 %v855_v10, %v752_v50  ;;  %v1598_v23 = vadd.f32 %v1595_v46, %v1590_v53  ;;  %v864_v34 = vmul.f32 %v862_v9, %v4355_v48  ;;  %v1605_v13 = vadd.f32 %v1602_v56, %v1597_v29 }
 0x1a9   :  { %v856_v3 = vmul.f32 %v854_v18, %v850_v59  ;;  %v852_v39 = vpop.permute.xlu0 %851  ;;  %v1610_v51 = vmul.f32 %v1609_v57, %v4356_v54  ;;  %v1617_v33 = vstv %s3689_s22  ;;  %v1611_v43 = vmul.f32 %v1609_v57, %v4320_v17  ;;  %s1889_s22 = sld [smem:[#allocation7 + $0x3a]] }
 0x1aa   :  { %1473 = vrot.lane.b32.xlu1 %v3687_v58, %s1967_s12  ;;  %v857_v24 = vmul.f32 %v854_v18, %v852_v39  ;;  %v1606_v50 = vadd.f32 %v1603_v0, %v1598_v23  ;;  %v866_v62 = vadd.f32 %v863_v63, %v858_v31  ;;  %v1615_v4 = vadd.f32 %v1612_v32, %v1607_v22 }
 0x1ab   :  { %v859_v45 = vadd.f32 %v856_v3, %v753_v12  ;;  %v1620_v42 = vmul.f32 %v1617_v33, %v4280_v7  ;;  %v1619_v46 = vmul.f32 %v1617_v33, %v4282_v60  ;;  %v4357_v12 = vld [vmem:[#allocation16_spill] sm:$0xff]  ;;  %v1613_v15 = vadd.f32 %v1610_v51, %v1605_v13 }
 0x1ac   :  { %v870_v38 = vpop.permute.xlu1 %869  ;;  %1483 = vrot.lane.b32.xlu0 %v3633_v1, %s1966_s11  ;;  %v860_v14 = vadd.f32 %v857_v24, %v754_v11  ;;  %v865_v17 = vmul.f32 %v862_v9, %v4357_v12  ;;  %v1618_v0 = vmul.f32 %v1617_v33, %v4279_v40  ;;  %v1614_v7 = vadd.f32 %v1611_v43, %v1606_v50  ;;  %v4358_v24 = vld [vmem:[#allocation23_spill] sm:$0xff] }
 0x1ad   :  { %v877_v25 = vmul.f32 %v876_v2, %v870_v38  ;;  %v867_v18 = vadd.f32 %v864_v34, %v859_v45  ;;  %v872_v44 = vpop.permute.xlu0 %871  ;;  %v890_v49 = vstv %s3709_s23  ;;  %v1623_v53 = vadd.f32 %v1620_v42, %v1615_v4  ;;  %s1890_s23 = sld [smem:[#allocation7 + $0x3b]] }
 0x1ae   :  { %1485 = vrot.lane.b32.xlu1 %v3625_v61, %s1966_s11  ;;  %v878_v10 = vmul.f32 %v876_v2, %v872_v44  ;;  %v868_v11 = vadd.f32 %v865_v17, %v860_v14  ;;  %v1622_v9 = vadd.f32 %v1619_v46, %v1614_v7  ;;  %v1621_v29 = vadd.f32 %v1618_v0, %v1613_v15  ;;  %v4360_v0 = vld [vmem:[#allocation24_spill] sm:$0xff] }
 0x1af   :  { %v880_v56 = vadd.f32 %v877_v25, %v866_v62  ;;  %v1442_v52 = vrot.slane %v3625_v61, 1  ;;  %v898_v63 = vstv %s3718_s24  ;;  %v1625_v31 = vstv %s3721_s25  ;;  %v4359_v25 = vld [vmem:[#allocation15_spill] sm:$0xff]  ;;  %s1891_s24 = sld [smem:[#allocation7 + $0x3c]]  ;;  %s1892_s25 = sld [smem:[#allocation7 + $0x3d]] }
 0x1b0   :  { %v874_v59 = vpop.permute.xlu1 %873  ;;  %1487 = vrot.lane.b32.xlu0 %v3621_v27, %s1966_s11  ;;  %v881_v60 = vadd.f32 %v878_v10, %v867_v18  ;;  %v1443_v23 = vrot.slane %v3621_v27, 1  ;;  %v1628_v48 = vadd.f32 %v1625_v31, %v1623_v53  ;;  %v1441_v45 = vrot.slane %v3633_v1, 1 }
 0x1b1   :  { %v879_v57 = vmul.f32 %v876_v2, %v874_v59  ;;  %v884_v40 = vpop.permute.xlu0 %883  ;;  %v912_v39 = vstv %s3729_s26  ;;  %v1627_v13 = vadd.f32 %v1625_v31, %v1622_v9  ;;  %v899_v38 = vmul.f32 %v898_v63, %v4358_v24  ;;  %s1893_s26 = sld [smem:[#allocation7 + $0x3e]] }
 0x1b2   :  { %1505 = vrot.lane.b32.xlu1 %v3633_v1, %s1967_s12  ;;  %v891_v22 = vmul.f32 %v890_v49, %v884_v40  ;;  %v1626_v33 = vadd.f32 %v1625_v31, %v1621_v29  ;;  %v3756_v43 = vsel %vm113_vm1, %v1441_v45, %v1442_v52  ;;  %v900_v4 = vmul.f32 %v898_v63, %v4359_v25 }
 0x1b3   :  { %v882_v3 = vadd.f32 %v879_v57, %v868_v11  ;;  %v3763_v18 = vsel %vm113_vm1, %v1442_v52, %v1443_v23  ;;  %v1631_v46 = vmax.f32 %v1628_v48, 0.0  ;;  %v901_v10 = vmul.f32 %v898_v63, %v4360_v0 }
 0x1b4   :  { %v886_v32 = vpop.permute.xlu1 %885  ;;  %1507 = vrot.lane.b32.xlu0 %v3625_v61, %s1967_s12  ;;  %v894_v34 = vadd.f32 %v891_v22, %v880_v56  ;;  %v1630_v56 = vmax.f32 %v1627_v13, 0.0  ;;  %v1629_v59 = vmax.f32 %v1626_v33, 0.0  ;;  %v3772_v11 = vsel %vm113_vm1, %v1443_v23, %v1441_v45 }
 0x1b5   :  { %v892_v2 = vmul.f32 %v890_v49, %v886_v32  ;;  %v888_v51 = vpop.permute.xlu0 %887  ;;  %v3779_v9 = vsel %vm2123_vm15, %v1631_v46, 0.0  ;;  %v934_v52 = vstv %s3752_s1  ;;  %v948_v48 = vstv %s3767_s0  ;;  %s1905_s1 = sld [smem:[#allocation7 + $0x40]]  ;;  %s1906_s0 = sld [smem:[#allocation7 + $0x41]] }
 0x1b6   :  { %1509 = vrot.lane.b32.xlu1 %v3621_v27, %s1967_s12  ;;  %v893_v50 = vmul.f32 %v890_v49, %v888_v51  ;;  %v902_v42 = vadd.f32 %v899_v38, %v894_v34  ;;  %4361 = vst [vmem:[#allocation63_spill] sm:$0xff] %v3779_v9  ;;  %v3785_v40 = vsel %vm2458_vm3, %v1630_v56, 0.0  ;;  %v3789_v32 = vsel %vm2108_vm11, %v1629_v59, 0.0  ;;  %v4364_v34 = vld [vmem:[#allocation76_spill] sm:$0xff] }
 0x1b7   :  { %v895_v54 = vadd.f32 %v892_v2, %v881_v60  ;;  %v926_v60 = vstv %s3745_s2  ;;  %4362 = vst [vmem:[#allocation38_spill] sm:$0xff] %v3785_v40  ;;  %4363 = vst [vmem:[#allocation39_spill] sm:$0xff] %v3789_v32  ;;  %v1637_v31 = vrot.slane %v3779_v9, 7  ;;  %v1636_v8 = vrot.slane %v3785_v40, 7  ;;  %s1904_s2 = sld [smem:[#allocation7 + $0x3f]] }
 0x1b8   :  { %v906_v62 = vpop.permute.xlu1 %905  ;;  %1519 = vrot.lane.b32.xlu0 %v3756_v43, %s1966_s11  ;;  %v896_v12 = vadd.f32 %v893_v50, %v882_v3  ;;  %v1635_v28 = vrot.slane %v3789_v32, 7  ;;  %v935_v45 = vmul.f32 %v934_v52, %v4364_v34  ;;  %v1054_v59 = vstv %s1847_s27  ;;  %s1907_s27 = sld [smem:[#allocation7 + $0x42]] }
 0x1b9   :  { %v913_v14 = vmul.f32 %v912_v39, %v906_v62  ;;  %v903_v17 = vadd.f32 %v900_v4, %v895_v54  ;;  %v908_v15 = vpop.permute.xlu0 %907  ;;  %v4365_v54 = vld [vmem:[#allocation79_spill] sm:$0xff] }
 0x1ba   :  { %1521 = vrot.lane.b32.xlu1 %v3763_v18, %s1966_s11  ;;  %v914_v7 = vmul.f32 %v912_v39, %v908_v15  ;;  %v904_v49 = vadd.f32 %v901_v10, %v896_v12  ;;  %v936_v51 = vmul.f32 %v934_v52, %v4365_v54  ;;  %v3804_v38 = vsel %vm106_vm0, %v1637_v31, %v1635_v28  ;;  %v4371_v54 = vld [vmem:[#allocation102_spill] sm:$0xff] }
 0x1bb   :  { %v916_v44 = vadd.f32 %v913_v14, %v902_v42  ;;  %4366 = vst [vmem:[#allocation43_spill] sm:$0xff] %v3804_v38  ;;  %v3810_v25 = vsel %vm106_vm0, %v1635_v28, %v1636_v8  ;;  %v4367_v14 = vld [vmem:[#allocation86_spill] sm:$0xff] }
 0x1bc   :  { %v910_v57 = vpop.permute.xlu1 %909  ;;  %1523 = vrot.lane.b32.xlu0 %v3772_v11, %s1966_s11  ;;  %v917_v3 = vadd.f32 %v914_v7, %v903_v17  ;;  %v937_v46 = vmul.f32 %v934_v52, %v4367_v14  ;;  %v1076_v52 = vstv %s1849_s4  ;;  %s1909_s4 = sld [smem:[#allocation7 + $0x44]] }
 0x1bd   :  { %v915_v53 = vmul.f32 %v912_v39, %v910_v57  ;;  %v920_v22 = vpop.permute.xlu0 %919 }
 0x1be   :  { %1541 = vrot.lane.b32.xlu1 %v3756_v43, %s1967_s12  ;;  %v927_v63 = vmul.f32 %v926_v60, %v920_v22 }
 0x1bf   :  { %v918_v29 = vadd.f32 %v915_v53, %v904_v49  ;;  %v1062_v53 = vstv %s1848_s28  ;;  %s1908_s28 = sld [smem:[#allocation7 + $0x43]] }
 0x1c0   :  { %v922_v5 = vpop.permute.xlu1 %921  ;;  %1543 = vrot.lane.b32.xlu0 %v3763_v18, %s1967_s12  ;;  %v930_v23 = vadd.f32 %v927_v63, %v916_v44  ;;  %v3817_v44 = vsel %vm106_vm0, %v1636_v8, %v1637_v31  ;;  %v4369_v63 = vld [vmem:[#allocation96_spill] sm:$0xff]  ;;  %v4370_v8 = vld [vmem:[#allocation98_spill] sm:$0xff] }
 0x1c1   :  { %v928_v2 = vmul.f32 %v926_v60, %v922_v5  ;;  %v924_v13 = vpop.permute.xlu0 %923  ;;  %4368 = vst [vmem:[#allocation64_spill] sm:$0xff] %v3817_v44  ;;  %v1063_v5 = vmul.f32 %v1062_v53, %v4369_v63 }
 0x1c2   :  { %1545 = vrot.lane.b32.xlu1 %v3772_v11, %s1967_s12  ;;  %v929_v24 = vmul.f32 %v926_v60, %v924_v13  ;;  %v938_v50 = vadd.f32 %v935_v45, %v930_v23  ;;  %v1064_v23 = vmul.f32 %v1062_v53, %v4370_v8 }
 0x1c3   :  { %v931_v39 = vadd.f32 %v928_v2, %v917_v3 }
 0x1c4   :  { %v942_v33 = vpop.permute.xlu1 %941  ;;  %1647 = vrot.lane.b32.xlu0 %v3804_v38, %s1966_s11  ;;  %v932_v4 = vadd.f32 %v929_v24, %v918_v29 }
 0x1c5   :  { %v949_v62 = vmul.f32 %v948_v48, %v942_v33  ;;  %v939_v42 = vadd.f32 %v936_v51, %v931_v39  ;;  %v944_v17 = vpop.permute.xlu0 %943  ;;  %v1065_v51 = vmul.f32 %v1062_v53, %v4371_v54 }
 0x1c6   :  { %1649 = vrot.lane.b32.xlu1 %v3810_v25, %s1966_s11  ;;  %v950_v56 = vmul.f32 %v948_v48, %v944_v17  ;;  %v940_v0 = vadd.f32 %v937_v46, %v932_v4 }
 0x1c7   :  { %v952_v12 = vadd.f32 %v949_v62, %v938_v50 }
 0x1c8   :  { %v946_v15 = vpop.permute.xlu1 %945  ;;  %1651 = vrot.lane.b32.xlu0 %v3817_v44, %s1966_s11  ;;  %v953_v7 = vadd.f32 %v950_v56, %v939_v42  ;;  %v1642_v56 = vrot.slane %v3785_v40, 1 }
 0x1c9   :  { %v951_v10 = vmul.f32 %v948_v48, %v946_v15  ;;  %v1048_v49 = vpop.permute.xlu0 %1047  ;;  %v1643_v15 = vrot.slane %v3779_v9, 1 }
 0x1ca   :  { %1669 = vrot.lane.b32.xlu1 %v3804_v38, %s1967_s12  ;;  %v1055_v60 = vmul.f32 %v1054_v59, %v1048_v49 }
 0x1cb   :  { %v954_v57 = vadd.f32 %v951_v10, %v940_v0  ;;  %v1641_v0 = vrot.slane %v3789_v32, 1 }
 0x1cc   :  { %v1050_v3 = vpop.permute.xlu1 %1049  ;;  %1671 = vrot.lane.b32.xlu0 %v3810_v25, %s1967_s12  ;;  %v1058_v22 = vadd.f32 %v1055_v60, %v952_v12 }
 0x1cd   :  { %v1056_v29 = vmul.f32 %v1054_v59, %v1050_v3  ;;  %v3865_v53 = vsel %vm113_vm1, %v1643_v15, %v1641_v0 }
 0x1ce   :  { %1673 = vrot.lane.b32.xlu1 %v3817_v44, %s1967_s12  ;;  %v1052_v2 = vpop.permute.xlu0 %1051  ;;  %v1066_v34 = vadd.f32 %v1063_v5, %v1058_v22  ;;  %4374 = vst [vmem:[#allocation75_spill] sm:$0xff] %v3865_v53 }
 0x1cf   :  { %v1059_v31 = vadd.f32 %v1056_v29, %v953_v7  ;;  %v1057_v28 = vmul.f32 %v1054_v59, %v1052_v2  ;;  %v3851_v59 = vsel %vm113_vm1, %v1641_v0, %v1642_v56 }
 0x1d0   :  { %v1070_v48 = vpop.permute.xlu1 %1069  ;;  %1683 = vrot.lane.b32.xlu0 %v3789_v32, %s1966_s11  ;;  %4372 = vst [vmem:[#allocation42_spill] sm:$0xff] %v3851_v59 }
 0x1d1   :  { %v1077_v45 = vmul.f32 %v1076_v52, %v1070_v48  ;;  %v1060_v39 = vadd.f32 %v1057_v28, %v954_v57  ;;  %v1067_v13 = vadd.f32 %v1064_v23, %v1059_v31  ;;  %v3859_v57 = vsel %vm113_vm1, %v1642_v56, %v1643_v15  ;;  %v4375_v56 = vld [vmem:[#allocation29_spill] sm:$0xff] }
 0x1d2   :  { %1685 = vrot.lane.b32.xlu1 %v3785_v40, %s1966_s11  ;;  %v1072_v33 = vpop.permute.xlu0 %1071  ;;  %4373 = vst [vmem:[#allocation50_spill] sm:$0xff] %v3859_v57  ;;  %v1098_v23 = vstv %s1851_s30  ;;  %v1112_v28 = vstv %s1852_s6  ;;  %s1911_s30 = sld [smem:[#allocation7 + $0x46]]  ;;  %s1912_s6 = sld [smem:[#allocation7 + $0x47]] }
 0x1d3   :  { %v3834_v24 = vadd.f32 %v1077_v45, %v1066_v34  ;;  %v1078_v50 = vmul.f32 %v1076_v52, %v1072_v33  ;;  %v1068_v4 = vadd.f32 %v1065_v51, %v1060_v39  ;;  %v1100_v34 = vmul.f32 %v1098_v23, %v3184_v41 }
 0x1d4   :  { %v1074_v62 = vpop.permute.xlu1 %1073  ;;  %1687 = vrot.lane.b32.xlu0 %v3779_v9, %s1966_s11 }
 0x1d5   :  { %v1079_v42 = vmul.f32 %v1076_v52, %v1074_v62  ;;  %v1081_v14 = vadd.f32 %v1078_v50, %v1067_v13  ;;  %v1090_v52 = vstv %s1850_s29  ;;  %s1910_s29 = sld [smem:[#allocation7 + $0x45]] }
 0x1d6   :  { %1705 = vrot.lane.b32.xlu1 %v3789_v32, %s1967_s12  ;;  %v1084_v12 = vpop.permute.xlu0 %1083 }
 0x1d7   :  { %v3840_v46 = vadd.f32 %v1079_v42, %v1068_v4  ;;  %v1134_v4 = vstv %s1854_s7 }
 0x1d8   :  { %v1086_v17 = vpop.permute.xlu1 %1085  ;;  %1707 = vrot.lane.b32.xlu0 %v3785_v40, %s1967_s12  ;;  %v1136_v41 = vmul.f32 %v1134_v4, %v4375_v56 }
 0x1d9   :  { %v1092_v63 = vmul.f32 %v1090_v52, %v1086_v17 }
 0x1da   :  { %1709 = vrot.lane.b32.xlu1 %v3779_v9, %s1967_s12  ;;  %v1088_v10 = vpop.permute.xlu0 %1087  ;;  %v4376_v9 = vld [vmem:[#allocation92_spill] sm:$0xff] }
 0x1db   :  { %v1095_v2 = vadd.f32 %v1092_v63, %v1081_v14  ;;  %v1093_v56 = vmul.f32 %v1090_v52, %v1088_v10  ;;  %v1099_v32 = vmul.f32 %v1098_v23, %v4376_v9 }
 0x1dc   :  { %v3853_v7 = vpop.permute.xlu1 %1105  ;;  %1719 = vrot.lane.b32.xlu0 %v3851_v59, %s1966_s11 }
 0x1dd   :  { %v1103_v45 = vadd.f32 %v1100_v34, %v1095_v2  ;;  %v1091_v2 = vmul.f32 %v1090_v52, %v1084_v12  ;;  %v1254_v34 = vstv %s1866_s3  ;;  %v3904_v12 = vstv %s1868_s9 }
 0x1de   :  { %1721 = vrot.lane.b32.xlu1 %v3859_v57, %s1966_s11  ;;  %v1108_v49 = vpop.permute.xlu0 %1107 }
 0x1df   :  { %v1114_v39 = vmul.f32 %v1112_v28, %v1108_v49 }
 0x1e0   :  { %v3867_v60 = vpop.permute.xlu1 %1109  ;;  %1723 = vrot.lane.b32.xlu0 %v3865_v53, %s1966_s11  ;;  %s1853_s11 = sld [smem:[#allocation7 + $0x2a]] }
 0x1e1   :  { %v1117_v50 = vadd.f32 %v1114_v39, %v1103_v45 }
 0x1e2   :  { %1741 = vrot.lane.b32.xlu1 %v3851_v59, %s1967_s12  ;;  %v1120_v3 = vpop.permute.xlu0 %1119 }
 0x1e4   :  { %v1122_v29 = vpop.permute.xlu1 %1121  ;;  %1743 = vrot.lane.b32.xlu0 %v3859_v57, %s1967_s12 }
 0x1e6   :  { %1745 = vrot.lane.b32.xlu1 %v3865_v53, %s1967_s12  ;;  %v3877_v26 = vpop.permute.xlu0 %1123  ;;  %s1855_s12 = sld [smem:[#allocation7 + $0x2c]]  ;;  %v1126_v54 = vstv %s1853_s11 }
 0x1e7   :  { %v1128_v33 = vmul.f32 %v1126_v54, %v1122_v29 }
 0x1e8   :  { %v3879_v22 = vpop.permute.xlu1 %1141 }
 0x1e9   :  { %v1131_v14 = vadd.f32 %v1128_v33, %v1117_v50  ;;  %v3899_v33 = vstv %s1867_s8  ;;  %v1094_v50 = vadd.f32 %v1091_v2, %v3834_v24 }
 0x1ea   :  { %v1144_v5 = vpop.permute.xlu0 %1143 }
 0x1eb   :  { %v1139_v49 = vadd.f32 %v1136_v41, %v1131_v14  ;;  %v1264_v14 = vmul.f32 %v3899_v33, %v3479_v37  ;;  %v1096_v41 = vadd.f32 %v1093_v56, %v3840_v46  ;;  %v1129_v46 = vmul.f32 %v1126_v54, %v3877_v26 }
 0x1ec   :  { %v3881_v31 = vpop.permute.xlu1 %1145  ;;  %v1148_v17 = vstv %s1855_s12 }
 0x1ed   :  { %v1150_v63 = vmul.f32 %v1148_v17, %v1144_v5  ;;  %v1113_v5 = vmul.f32 %v1112_v28, %v3853_v7  ;;  %v4377_v7 = vld [vmem:[#allocation89_spill] sm:$0xff]  ;;  %v1149_v56 = vmul.f32 %v1148_v17, %v3879_v22 }
 0x1ee   :  { %v3883_v8 = vpop.permute.xlu0 %1247  ;;  %v1101_v2 = vmul.f32 %v1098_v23, %v4377_v7 }
 0x1ef   :  { %v1153_v39 = vadd.f32 %v1150_v63, %v1139_v49  ;;  %v1102_v49 = vadd.f32 %v1099_v32, %v1094_v50  ;;  %v1127_v63 = vmul.f32 %v1126_v54, %v1120_v3 }
 0x1f0   :  { %v1250_v48 = vpop.permute.xlu1 %1249  ;;  %v1104_v37 = vadd.f32 %v1101_v2, %v1096_v41  ;;  %v1312_v41 = vstv %s1871_s14 }
 0x1f1   :  { %v1256_v29 = vmul.f32 %v1254_v34, %v1250_v48  ;;  %v1116_v9 = vadd.f32 %v1113_v5, %v1102_v49  ;;  %v4379_v49 = vld [vmem:[#allocation21_spill] sm:$0xff] }
 0x1f2   :  { %v3886_v13 = vpop.permute.xlu0 %1251 }
 0x1f3   :  { %v1259_v57 = vadd.f32 %v1256_v29, %v1153_v39  ;;  %v1115_v29 = vmul.f32 %v1112_v28, %v3867_v60  ;;  %v1290_v39 = vstv %s1869_s10  ;;  %v1130_v38 = vadd.f32 %v1127_v63, %v1116_v9 }
 0x1f4   :  { %v3888_v51 = vpop.permute.xlu1 %1269  ;;  %v1298_v60 = vstv %s1870_s13  ;;  %v1137_v63 = vmul.f32 %v1134_v4, %v4379_v49 }
 0x1f5   :  { %v1267_v24 = vadd.f32 %v1264_v14, %v1259_v57  ;;  %v4378_v57 = vld [vmem:[#allocation28_spill] sm:$0xff]  ;;  %v1118_v50 = vadd.f32 %v1115_v29, %v1104_v37  ;;  %v1255_v14 = vmul.f32 %v1254_v34, %v3883_v8  ;;  %v1300_v26 = vmul.f32 %v1298_v60, %v3436_v35 }
 0x1f6   :  { %v1272_v62 = vpop.permute.xlu0 %1271  ;;  %v1326_v29 = vstv %s1872_s15  ;;  %v1263_v35 = vmul.f32 %v3899_v33, %v3473_v55 }
 0x1f7   :  { %v1278_v10 = vmul.f32 %v3904_v12, %v1272_v62  ;;  %v1135_v62 = vmul.f32 %v1134_v4, %v4378_v57  ;;  %v1132_v28 = vadd.f32 %v1129_v46, %v1118_v50  ;;  %v1277_v4 = vmul.f32 %v3904_v12, %v3888_v51 }
 0x1f8   :  { %v3890_v42 = vpop.permute.xlu1 %1273 }
 0x1f9   :  { %v1281_v32 = vadd.f32 %v1278_v10, %v1267_v24  ;;  %v1151_v10 = vmul.f32 %v1148_v17, %v3881_v31  ;;  %v1140_v7 = vadd.f32 %v1137_v63, %v1132_v28  ;;  %v1279_v55 = vmul.f32 %v3904_v12, %v3890_v42 }
 0x1fa   :  { %v3893_v15 = vpop.permute.xlu0 %1283 }
 0x1fb   :  { %v1154_v46 = vadd.f32 %v1151_v10, %v1140_v7 }
 0x1fc   :  { %v1286_v0 = vpop.permute.xlu1 %1285 }
 0x1fd   :  { %v1292_v44 = vmul.f32 %v1290_v39, %v1286_v0  ;;  %v1138_v0 = vadd.f32 %v1135_v62, %v1130_v38  ;;  %v1257_v38 = vmul.f32 %v1254_v34, %v3886_v13  ;;  %v1291_v62 = vmul.f32 %v1290_v39, %v3893_v15 }
 0x1fe   :  { %v3895_v53 = vpop.permute.xlu0 %1287 }
 0x1ff   :  { %v1295_v23 = vadd.f32 %v1292_v44, %v1281_v32  ;;  %v1152_v24 = vadd.f32 %v1149_v56, %v1138_v0  ;;  %v1334_v32 = vstv %s1873_s16  ;;  %v1260_v57 = vadd.f32 %v1257_v38, %v1154_v46 }
 0x200   :  { %v3897_v45 = vpop.permute.xlu1 %1305  ;;  %v1348_v56 = vstv %s1874_s17  ;;  %v1476_v46 = vstv %s1887_s20 }
 0x201   :  { %v1303_v9 = vadd.f32 %v1300_v26, %v1295_v23  ;;  %v1258_v2 = vadd.f32 %v1255_v14, %v1152_v24  ;;  %v1336_v23 = vmul.f32 %v1334_v32, %v3599_v16  ;;  %v1293_v14 = vmul.f32 %v1290_v39, %v3895_v53 }
 0x202   :  { %v1308_v59 = vpop.permute.xlu0 %1307  ;;  %v1454_v24 = vstv %s1885_s18  ;;  %v1462_v53 = vstv %s1886_s19 }
 0x203   :  { %v1314_v44 = vmul.f32 %v1312_v41, %v1308_v59  ;;  %v1266_v59 = vadd.f32 %v1263_v35, %v1258_v2 }
 0x204   :  { %v3906_v48 = vpop.permute.xlu1 %1309 }
 0x205   :  { %v1317_v17 = vadd.f32 %v1314_v44, %v1303_v9  ;;  %v1280_v34 = vadd.f32 %v1277_v4, %v1266_v59  ;;  %v1315_v2 = vmul.f32 %v1312_v41, %v3906_v48  ;;  %v1464_v4 = vmul.f32 %v1462_v53, %v3663_v6 }
 0x206   :  { %v3912_v52 = vpop.permute.xlu0 %1319 }
 0x207   :  { %v1294_v0 = vadd.f32 %v1291_v62, %v1280_v34  ;;  %v1327_v16 = vmul.f32 %v1326_v29, %v3912_v52  ;;  %v1335_v52 = vmul.f32 %v1334_v32, %v3593_v19 }
 0x208   :  { %v1322_v40 = vpop.permute.xlu1 %1321 }
 0x209   :  { %v1328_v8 = vmul.f32 %v1326_v29, %v1322_v40  ;;  %v1265_v40 = vmul.f32 %v3899_v33, %v3496_v47  ;;  %v1299_v47 = vmul.f32 %v1298_v60, %v3450_v21  ;;  %v1313_v33 = vmul.f32 %v1312_v41, %v3897_v45 }
 0x20a   :  { %v3917_v3 = vpop.permute.xlu0 %1323 }
 0x20b   :  { %v1331_v50 = vadd.f32 %v1328_v8, %v1317_v17  ;;  %v1268_v28 = vadd.f32 %v1265_v40, %v1260_v57  ;;  %v1302_v9 = vadd.f32 %v1299_v47, %v1294_v0  ;;  %v1329_v35 = vmul.f32 %v1326_v29, %v3917_v3 }
 0x20c   :  { %v3921_v5 = vpop.permute.xlu1 %1341  ;;  %v1337_v29 = vmul.f32 %v1334_v32, %v3613_v30  ;;  %v1463_v0 = vmul.f32 %v1462_v53, %v3659_v20 }
 0x20d   :  { %v1339_v15 = vadd.f32 %v1336_v23, %v1331_v50  ;;  %v1282_v63 = vadd.f32 %v1279_v55, %v1268_v28  ;;  %v1316_v39 = vadd.f32 %v1313_v33, %v1302_v9  ;;  %v1349_v57 = vmul.f32 %v1348_v56, %v3921_v5 }
 0x20e   :  { %v1344_v54 = vpop.permute.xlu0 %1343  ;;  %v1490_v50 = vstv %s1888_s21  ;;  %v1526_v9 = vstv %s1891_s24 }
 0x20f   :  { %v1350_v26 = vmul.f32 %v1348_v56, %v1344_v54  ;;  %v1296_v12 = vadd.f32 %v1293_v14, %v1282_v63  ;;  %v1301_v54 = vmul.f32 %v1298_v60, %v3421_v36  ;;  %v1330_v45 = vadd.f32 %v1327_v16, %v1316_v39 }
 0x210   :  { %v3927_v22 = vpop.permute.xlu1 %1345  ;;  %v1512_v63 = vstv %s1890_s23 }
 0x211   :  { %v1353_v44 = vadd.f32 %v1350_v26, %v1339_v15  ;;  %v1304_v8 = vadd.f32 %v1301_v54, %v1296_v12  ;;  %v1338_v59 = vadd.f32 %v1335_v52, %v1330_v45  ;;  %v1351_v34 = vmul.f32 %v1348_v56, %v3927_v22 }
 0x212   :  { %v1448_v37 = vpop.permute.xlu0 %1447 }
 0x213   :  { %v1318_v17 = vadd.f32 %v1315_v2, %v1304_v8  ;;  %v1455_v62 = vmul.f32 %v1454_v24, %v1448_v37  ;;  %v1352_v6 = vadd.f32 %v1349_v57, %v1338_v59 }
 0x214   :  { %v1450_v31 = vpop.permute.xlu1 %1449 }
 0x215   :  { %v1456_v42 = vmul.f32 %v1454_v24, %v1450_v31  ;;  %v1332_v41 = vadd.f32 %v1329_v35, %v1318_v17  ;;  %v1458_v23 = vadd.f32 %v1455_v62, %v1352_v6  ;;  %v1654_v62 = vstv %s1904_s2 }
 0x216   :  { %v1452_v13 = vpop.permute.xlu0 %1451 }
 0x217   :  { %v1459_v21 = vadd.f32 %v1456_v42, %v1353_v44  ;;  %v1340_v5 = vadd.f32 %v1337_v29, %v1332_v41  ;;  %v1457_v28 = vmul.f32 %v1454_v24, %v1452_v13  ;;  %v1466_v22 = vadd.f32 %v1463_v0, %v1458_v23 }
 0x218   :  { %v1470_v51 = vpop.permute.xlu1 %1469  ;;  %v1465_v13 = vmul.f32 %v1462_v53, %v3687_v58 }
 0x219   :  { %v1467_v60 = vadd.f32 %v1464_v4, %v1459_v21  ;;  %v1354_v37 = vadd.f32 %v1351_v34, %v1340_v5  ;;  %v1477_v26 = vmul.f32 %v1476_v46, %v1470_v51 }
 0x21a   :  { %v1472_v49 = vpop.permute.xlu0 %1471 }
 0x21b   :  { %v1478_v48 = vmul.f32 %v1476_v46, %v1472_v49  ;;  %v1498_v49 = vstv %s1889_s22  ;;  %v1460_v32 = vadd.f32 %v1457_v28, %v1354_v37  ;;  %v1480_v20 = vadd.f32 %v1477_v26, %v1466_v22 }
 0x21c   :  { %v1474_v10 = vpop.permute.xlu1 %1473  ;;  %v1500_v30 = vmul.f32 %v1498_v49, %v3625_v61  ;;  %v1676_v37 = vstv %s1906_s0  ;;  %v1690_v22 = vstv %s1907_s27 }
 0x21d   :  { %v1481_v55 = vadd.f32 %v1478_v48, %v1467_v60  ;;  %v1479_v24 = vmul.f32 %v1476_v46, %v1474_v10  ;;  %v1468_v51 = vadd.f32 %v1465_v13, %v1460_v32  ;;  %v1548_v46 = vstv %s1893_s26 }
 0x21e   :  { %v1484_v7 = vpop.permute.xlu0 %1483 }
 0x21f   :  { %v1491_v56 = vmul.f32 %v1490_v50, %v1484_v7  ;;  %v1482_v21 = vadd.f32 %v1479_v24, %v1468_v51  ;;  %v1499_v7 = vmul.f32 %v1498_v49, %v3633_v1  ;;  %v4381_v51 = vld [vmem:[#allocation64_spill] sm:$0xff] }
 0x220   :  { %v1486_v38 = vpop.permute.xlu1 %1485 }
 0x221   :  { %v1492_v40 = vmul.f32 %v1490_v50, %v1486_v38  ;;  %v1494_v39 = vadd.f32 %v1491_v56, %v1480_v20  ;;  %v1534_v38 = vstv %s1892_s25 }
 0x222   :  { %v1488_v31 = vpop.permute.xlu0 %1487  ;;  %v1536_v4 = vmul.f32 %v1534_v38, %v3763_v18  ;;  %v1537_v0 = vmul.f32 %v1534_v38, %v3772_v11 }
 0x223   :  { %v1495_v14 = vadd.f32 %v1492_v40, %v1481_v55  ;;  %v1493_v54 = vmul.f32 %v1490_v50, %v1488_v31  ;;  %v1502_v53 = vadd.f32 %v1499_v7, %v1494_v39  ;;  %v1501_v31 = vmul.f32 %v1498_v49, %v3621_v27 }
 0x224   :  { %v1506_v36 = vpop.permute.xlu1 %1505  ;;  %v1662_v55 = vstv %s1905_s1  ;;  %v1712_v7 = vstv %s1909_s4 }
 0x225   :  { %v1503_v33 = vadd.f32 %v1500_v30, %v1495_v14  ;;  %v1513_v8 = vmul.f32 %v1512_v63, %v1506_v36  ;;  %v1496_v58 = vadd.f32 %v1493_v54, %v1482_v21  ;;  %v1664_v49 = vmul.f32 %v1662_v55, %v3810_v25 }
 0x226   :  { %v1508_v3 = vpop.permute.xlu0 %1507  ;;  %v1665_v39 = vmul.f32 %v1662_v55, %v4381_v51  ;;  %v1698_v21 = vstv %s1908_s28 }
 0x227   :  { %v1514_v42 = vmul.f32 %v1512_v63, %v1508_v3  ;;  %v1516_v17 = vadd.f32 %v1513_v8, %v1502_v53  ;;  %v1504_v1 = vadd.f32 %v1501_v31, %v1496_v58  ;;  %v1535_v3 = vmul.f32 %v1534_v38, %v3756_v43  ;;  %v4382_v58 = vld [vmem:[#allocation38_spill] sm:$0xff] }
 0x228   :  { %v1510_v19 = vpop.permute.xlu1 %1509  ;;  %v1700_v53 = vmul.f32 %v1698_v21, %v4382_v58 }
 0x229   :  { %v1517_v2 = vadd.f32 %v1514_v42, %v1503_v33  ;;  %v1515_v57 = vmul.f32 %v1512_v63, %v1510_v19  ;;  %v4380_v33 = vld [vmem:[#allocation43_spill] sm:$0xff] }
 0x22a   :  { %v1520_v15 = vpop.permute.xlu0 %1519  ;;  %v1663_v42 = vmul.f32 %v1662_v55, %v4380_v33 }
 0x22b   :  { %v1527_v10 = vmul.f32 %v1526_v9, %v1520_v15  ;;  %v1518_v29 = vadd.f32 %v1515_v57, %v1504_v1 }
 0x22c   :  { %v1522_v47 = vpop.permute.xlu1 %1521 }
 0x22d   :  { %v1528_v44 = vmul.f32 %v1526_v9, %v1522_v47  ;;  %v1530_v36 = vadd.f32 %v1527_v10, %v1516_v17 }
 0x22e   :  { %v1524_v12 = vpop.permute.xlu0 %1523 }
 0x22f   :  { %v1531_v35 = vadd.f32 %v1528_v44, %v1517_v2  ;;  %v1529_v59 = vmul.f32 %v1526_v9, %v1524_v12  ;;  %v1538_v19 = vadd.f32 %v1535_v3, %v1530_v36  ;;  %v1734_v36 = vstv %s1911_s30 }
 0x230   :  { %v1542_v16 = vpop.permute.xlu1 %1541 }
 0x231   :  { %v1539_v48 = vadd.f32 %v1536_v4, %v1531_v35  ;;  %v1549_v18 = vmul.f32 %v1548_v46, %v1542_v16  ;;  %v1532_v27 = vadd.f32 %v1529_v59, %v1518_v29  ;;  %v4383_v4 = vld [vmem:[#allocation39_spill] sm:$0xff] }
 0x232   :  { %v1544_v61 = vpop.permute.xlu0 %1543 }
 0x233   :  { %v1550_v41 = vmul.f32 %v1548_v46, %v1544_v61  ;;  %v1552_v14 = vadd.f32 %v1549_v18, %v1538_v19  ;;  %v1540_v43 = vadd.f32 %v1537_v0, %v1532_v27  ;;  %v1748_v19 = vstv %s1912_s6 }
 0x234   :  { %v1546_v45 = vpop.permute.xlu1 %1545 }
 0x235   :  { %v1553_v34 = vadd.f32 %v1550_v41, %v1539_v48  ;;  %v1551_v15 = vmul.f32 %v1548_v46, %v1546_v45  ;;  %v1726_v48 = vstv %s1910_s29 }
 0x236   :  { %v1648_v52 = vpop.permute.xlu0 %1647 }
 0x237   :  { %v1655_v5 = vmul.f32 %v1654_v62, %v1648_v52  ;;  %v1554_v12 = vadd.f32 %v1551_v15, %v1540_v43  ;;  %v1699_v52 = vmul.f32 %v1698_v21, %v4383_v4 }
 0x238   :  { %v1650_v60 = vpop.permute.xlu1 %1649 }
 0x239   :  { %v1656_v50 = vmul.f32 %v1654_v62, %v1650_v60  ;;  %v1658_v63 = vadd.f32 %v1655_v5, %v1552_v14  ;;  %v4385_v5 = vld [vmem:[#allocation42_spill] sm:$0xff] }
 0x23a   :  { %v1652_v40 = vpop.permute.xlu0 %1651  ;;  %v4386_v14 = vld [vmem:[#allocation50_spill] sm:$0xff] }
 0x23b   :  { %v1659_v23 = vadd.f32 %v1656_v50, %v1553_v34  ;;  %v1657_v47 = vmul.f32 %v1654_v62, %v1652_v40  ;;  %v1666_v9 = vadd.f32 %v1663_v42, %v1658_v63  ;;  %v4384_v50 = vld [vmem:[#allocation63_spill] sm:$0xff]  ;;  %v1736_v15 = vmul.f32 %v1734_v36, %v4386_v14 }
 0x23c   :  { %v1670_v6 = vpop.permute.xlu1 %1669  ;;  %v1701_v40 = vmul.f32 %v1698_v21, %v4384_v50 }
 0x23d   :  { %v1667_v30 = vadd.f32 %v1664_v49, %v1659_v23  ;;  %v1677_v13 = vmul.f32 %v1676_v37, %v1670_v6  ;;  %v1660_v24 = vadd.f32 %v1657_v47, %v1554_v12  ;;  %v1735_v23 = vmul.f32 %v1734_v36, %v4385_v5 }
 0x23e   :  { %v1672_v28 = vpop.permute.xlu0 %1671 }
 0x23f   :  { %v1678_v32 = vmul.f32 %v1676_v37, %v1672_v28  ;;  %v1680_v54 = vadd.f32 %v1677_v13, %v1666_v9  ;;  %v1668_v8 = vadd.f32 %v1665_v39, %v1660_v24 }
 0x240   :  { %v1674_v26 = vpop.permute.xlu1 %1673 }
 0x241   :  { %v1681_v25 = vadd.f32 %v1678_v32, %v1667_v30  ;;  %v1679_v2 = vmul.f32 %v1676_v37, %v1674_v26  ;;  %v4387_v32 = vld [vmem:[#allocation75_spill] sm:$0xff] }
 0x242   :  { %v1684_v56 = vpop.permute.xlu0 %1683 }
 0x243   :  { %v1691_v16 = vmul.f32 %v1690_v22, %v1684_v56  ;;  %v1682_v46 = vadd.f32 %v1679_v2, %v1668_v8 }
 0x244   :  { %v1686_v11 = vpop.permute.xlu1 %1685 }
 0x245   :  { %v1692_v20 = vmul.f32 %v1690_v22, %v1686_v11  ;;  %v1694_v45 = vadd.f32 %v1691_v16, %v1680_v54 }
 0x246   :  { %v1688_v44 = vpop.permute.xlu0 %1687 }
 0x247   :  { %v1695_v38 = vadd.f32 %v1692_v20, %v1681_v25  ;;  %v1693_v35 = vmul.f32 %v1690_v22, %v1688_v44  ;;  %v1702_v1 = vadd.f32 %v1699_v52, %v1694_v45  ;;  %v1737_v22 = vmul.f32 %v1734_v36, %v4387_v32 }
 0x248   :  { %v1706_v61 = vpop.permute.xlu1 %1705 }
 0x249   :  { %v1713_v17 = vmul.f32 %v1712_v7, %v1706_v61  ;;  %v1703_v57 = vadd.f32 %v1700_v53, %v1695_v38  ;;  %v1696_v41 = vadd.f32 %v1693_v35, %v1682_v46 }
 0x24a   :  { %v1708_v10 = vpop.permute.xlu0 %1707 }
 0x24b   :  { %v1714_v60 = vmul.f32 %v1712_v7, %v1708_v10  ;;  %v1716_v62 = vadd.f32 %v1713_v17, %v1702_v1  ;;  %v1704_v55 = vadd.f32 %v1701_v40, %v1696_v41 }
 0x24c   :  { %v1710_v31 = vpop.permute.xlu1 %1709 }
 0x24d   :  { %v1715_v3 = vmul.f32 %v1712_v7, %v1710_v31  ;;  %v1717_v6 = vadd.f32 %v1714_v60, %v1703_v57 }
 0x24e   :  { %v1720_v59 = vpop.permute.xlu0 %1719 }
 0x24f   :  { %v1727_v29 = vmul.f32 %v1726_v48, %v1720_v59  ;;  %v1718_v37 = vadd.f32 %v1715_v3, %v1704_v55 }
 0x250   :  { %v1722_v18 = vpop.permute.xlu1 %1721 }
 0x251   :  { %v1728_v34 = vmul.f32 %v1726_v48, %v1722_v18  ;;  %v1730_v27 = vadd.f32 %v1727_v29, %v1716_v62 }
 0x252   :  { %v1724_v0 = vpop.permute.xlu0 %1723 }
 0x253   :  { %v1731_v28 = vadd.f32 %v1728_v34, %v1717_v6  ;;  %v1729_v26 = vmul.f32 %v1726_v48, %v1724_v0  ;;  %v1738_v43 = vadd.f32 %v1735_v23, %v1730_v27 }
 0x254   :  { %v1742_v49 = vpop.permute.xlu1 %1741 }
 0x255   :  { %v1749_v63 = vmul.f32 %v1748_v19, %v1742_v49  ;;  %v1732_v47 = vadd.f32 %v1729_v26, %v1718_v37  ;;  %v1739_v30 = vadd.f32 %v1736_v15, %v1731_v28 }
 0x256   :  { %v1744_v33 = vpop.permute.xlu0 %1743 }
 0x257   :  { %v1752_v56 = vadd.f32 %v1749_v63, %v1738_v43  ;;  %v1750_v42 = vmul.f32 %v1748_v19, %v1744_v33  ;;  %v1740_v13 = vadd.f32 %v1737_v22, %v1732_v47 }
 0x258   :  { %v1746_v12 = vpop.permute.xlu1 %1745 }
 0x259   :  { %1755 = vst [vmem:[%s3983_s5] sm:$0xff] %v1752_v56  ;;  %v1751_v11 = vmul.f32 %v1748_v19, %v1746_v12  ;;  %v1753_v20 = vadd.f32 %v1750_v42, %v1739_v30 }
 0x25b   :  { %v1754_v24 = vadd.f32 %v1751_v11, %v1740_v13  ;;  %1756 = vst [vmem:[%s3983_s5 + $0x8] sm:$0xff] %v1753_v20 }
 0x25d   :  { %1757 = vst [vmem:[%s3983_s5 + $0x10] sm:$0xff] %v1754_v24 }
 0x25e   :  { %1762 = vsyncpa [#allocation4], 1 }
 0x25f   :  { %1763 = vsyncpa [#allocation6], 1 }

</bundles_post_ra>
